<compile_context>
chip_gen: v7x
topology: tpu7x:2x2x1
jax: 0.10.0
libtpu: 0.0.40
codegen_flags: <defaults>
</compile_context>

<pallas_src>
import jax
import jax.numpy as jnp
from jax import lax
from jax.experimental import pallas as pl
from jax.experimental.pallas import tpu as pltpu

LN_EPS = 1e-5                      # PyTorch nn.LayerNorm default
VMEM_LIMIT = 48 * 1024 * 1024      # safe on v7x (64 MiB physical); ample headroom on v5e/v6e


# --------------------------------------------------------------------------- in-kernel helpers
def _ln_relu_per_sample(y, g, b):
    """Per-sample LayerNorm over all (H, W, C) features of y:(BT,H,W,C) f32, affine, then ReLU."""
    n = y.shape[1] * y.shape[2] * y.shape[3]
    inv_n = 1.0 / n
    s = jnp.sum(y, axis=3, keepdims=True)
    s = jnp.sum(s, axis=2, keepdims=True)
    s = jnp.sum(s, axis=1, keepdims=True)
    mean = s * inv_n
    yc = y - mean
    s2 = jnp.sum(yc * yc, axis=3, keepdims=True)
    s2 = jnp.sum(s2, axis=2, keepdims=True)
    s2 = jnp.sum(s2, axis=1, keepdims=True)
    var = s2 * inv_n
    y = yc * lax.rsqrt(var + LN_EPS)
    return jnp.maximum(y * g + b, 0.0)


def _make_fused_kernel(bt, dims):
    """Whole-network kernel for a batch tile of `bt` samples (all static shapes via closure)."""
    oh1, ow1, c1, oh2, ow2, c2, oh3, ow3, c3 = dims

    def kernel(xs_ref,
               w1_ref, b1_ref, g1_ref, bb1_ref,
               w2_ref, b2_ref, g2_ref, bb2_ref,
               w3_ref, b3_ref, g3_ref, bb3_ref,
               f1w_ref, f1b_ref, tg_ref, tb_ref,
               f2w_ref, f2b_ref, qw_ref, qb_ref,
               o_ref):
        # ---- conv1 (8x8, s4, VALID) on the space-to-depth(4) input: 2x2 unit-stride taps ------
        x = xs_ref[...]                                             # (bt, HB, WB, 16*Cin) bf16
        acc = None
        for dh in range(2):
            for dw in range(2):
                tap = x[:, dh:dh + oh1, dw:dw + ow1, :]
                tap = tap.reshape(bt * oh1 * ow1, tap.shape[-1])
                r = jnp.dot(tap, w1_ref[dh, dw], preferred_element_type=jnp.float32)
                acc = r if acc is None else acc + r
        y1 = acc.reshape(bt, oh1, ow1, c1) + b1_ref[...]
        y1 = _ln_relu_per_sample(y1, g1_ref[...], bb1_ref[...]).astype(jnp.bfloat16)

        # ---- conv2 (4x4, s2): stride-2 taps via the (H, W) -> (H/2, 2, W/2, 2) split ----------
        hh, ww = oh1 // 2, ow1 // 2
        y1r = y1.reshape(bt, hh, 2, ww, 2, c1)                      # lane dim (c1) preserved
        acc = None
        for ki in range(4):
            ka, kr = ki // 2, ki % 2
            for kj in range(4):
                kb, ks = kj // 2, kj % 2
                tap = y1r[:, ka:ka + oh2, kr, kb:kb + ow2, ks, :]   # (bt, oh2, ow2, c1)
                tap = tap.reshape(bt * oh2 * ow2, c1)
                r = jnp.dot(tap, w2_ref[ki, kj], preferred_element_type=jnp.float32)
                acc = r if acc is None else acc + r
        y2 = acc.reshape(bt, oh2, ow2, c2) + b2_ref[...]
        y2 = _ln_relu_per_sample(y2, g2_ref[...], bb2_ref[...]).astype(jnp.bfloat16)

        # ---- conv3 (3x3, s1): unit-stride taps --------------------------------------------------
        acc = None
        for ki in range(3):
            for kj in range(3):
                tap = y2[:, ki:ki + oh3, kj:kj + ow3, :]
                tap = tap.reshape(bt * oh3 * ow3, c2)
                r = jnp.dot(tap, w3_ref[ki, kj], preferred_element_type=jnp.float32)
                acc = r if acc is None else acc + r
        y3 = acc.reshape(bt, oh3, ow3, c3) + b3_ref[...]
        y3 = _ln_relu_per_sample(y3, g3_ref[...], bb3_ref[...]).astype(jnp.bfloat16)

        # ---- trunk fc1 (flatten folded into per-position matmuls: no lane reshape) -------------
        h = None
        for i in range(oh3):
            for j in range(ow3):
                r = jnp.dot(y3[:, i, j, :], f1w_ref[i, j], preferred_element_type=jnp.float32)
                h = r if h is None else h + r
        h = h + f1b_ref[...]                                        # (bt, 512) f32
        m = jnp.mean(h, axis=-1, keepdims=True)                     # trunk LayerNorm
        hc = h - m
        v = jnp.mean(hc * hc, axis=-1, keepdims=True)
        h = hc * lax.rsqrt(v + LN_EPS)
        h = jnp.maximum(h * tg_ref[...] + tb_ref[...], 0.0).astype(jnp.bfloat16)   # trunk ReLU

        h = jnp.dot(h, f2w_ref[...], preferred_element_type=jnp.float32) + f2b_ref[...]  # fc2
        h = jnp.maximum(h, 0.0).astype(jnp.bfloat16)                # q_func ReLU
        q = jnp.dot(h, qw_ref[...], preferred_element_type=jnp.float32) + qb_ref[...]    # q head
        o_ref[0] = q

    return kernel


# -------------------------------------------------------------------------------- XLA-side glue
def _out_size(s, k, stride):
    return (s - k) // stride + 1


def _space_to_depth(x, s):
    """x: (B, H, W, C) -> (B, H/s, W/s, s*s*C); same byte count, makes conv1 taps unit-stride."""
    b, h, w, c = x.shape
    x = x.reshape(b, h // s, s, w // s, s, c)
    x = x.transpose(0, 1, 3, 2, 4, 5)
    return x.reshape(b, h // s, w // s, s * s * c)


def _pick_batch_tile(b):
    """>=2 parallel grid steps whenever B >= 2 (v7x has two TensorCores); tile capped at 16 so
    per-step VMEM stays small on every generation (v7x has only 64 MiB physical VMEM)."""
    for cand in (16, 8, 4, 2, 1):
        if b // cand >= 2:
            return cand
    return 1


# ------------------------------------------------------------------------ params / preparation
def init_params(key, obs_shape=(4, 44, 44), cnn_channels=(32, 64, 64),
                trunk_hidden=512, trunk_out=512, action_dim=6):
    c_in, hh, ww = obs_shape
    c1, c2, c3 = cnn_channels
    h1, w1 = _out_size(hh, 8, 4), _out_size(ww, 8, 4)
    h2, w2 = _out_size(h1, 4, 2), _out_size(w1, 4, 2)
    h3, w3 = _out_size(h2, 3, 1), _out_size(w2, 3, 1)
    flat = h3 * w3 * c3

    keys = jax.random.split(key, 6)

    def gauss(k, shape, fan_in):
        return (jnp.sqrt(2.0 / fan_in) * jax.random.normal(k, shape)).astype(jnp.float32)

    return {
        "conv1_w": gauss(keys[0], (8, 8, c_in, c1), 8 * 8 * c_in),
        "conv1_b": jnp.zeros((c1,), jnp.float32),
        "ln1_g": jnp.ones((h1 * w1 * c1,), jnp.float32),
        "ln1_b": jnp.zeros((h1 * w1 * c1,), jnp.float32),
        "conv2_w": gauss(keys[1], (4, 4, c1, c2), 4 * 4 * c1),
        "conv2_b": jnp.zeros((c2,), jnp.float32),
        "ln2_g": jnp.ones((h2 * w2 * c2,), jnp.float32),
        "ln2_b": jnp.zeros((h2 * w2 * c2,), jnp.float32),
        "conv3_w": gauss(keys[2], (3, 3, c2, c3), 3 * 3 * c2),
        "conv3_b": jnp.zeros((c3,), jnp.float32),
        "ln3_g": jnp.ones((h3 * w3 * c3,), jnp.float32),
        "ln3_b": jnp.zeros((h3 * w3 * c3,), jnp.float32),
        "fc1_w": gauss(keys[3], (flat, trunk_hidden), flat),
        "fc1_b": jnp.zeros((trunk_hidden,), jnp.float32),
        "trunk_ln_g": jnp.ones((trunk_hidden,), jnp.float32),
        "trunk_ln_b": jnp.zeros((trunk_hidden,), jnp.float32),
        "fc2_w": gauss(keys[4], (trunk_hidden, trunk_out), trunk_hidden),
        "fc2_b": jnp.zeros((trunk_out,), jnp.float32),
        "q_w": (0.01 * jax.random.normal(keys[5], (trunk_out, action_dim))).astype(jnp.float32),
        "q_b": jnp.zeros((action_dim,), jnp.float32),
    }


def prepare_params(params, obs_shape):
    """One-time weight prep OUTSIDE the per-step jitted forward: folds /255. into conv1, reorders
    conv1 for the space-to-depth(4) input, casts matmul weights to bf16, reshapes fc1 per conv3
    output position, and reshapes LN params onto NHWC grids."""
    c_in, hh, ww = obs_shape
    h1, w1 = _out_size(hh, 8, 4), _out_size(ww, 8, 4)
    h2, w2 = _out_size(h1, 4, 2), _out_size(w1, 4, 2)
    h3, w3 = _out_size(h2, 3, 1), _out_size(w2, 3, 1)
    c1 = params["conv1_w"].shape[-1]
    c2 = params["conv2_w"].shape[-1]
    c3 = params["conv3_w"].shape[-1]
    th = params["fc1_w"].shape[1]
    to = params["fc2_w"].shape[1]
    a = params["q_w"].shape[1]

    # conv1 (8,8,Cin,c1) -> (2,2,16*Cin,c1) matching s2d channel order (hi*4 + wi)*Cin + c.
    w1s = (params["conv1_w"] * (1.0 / 255.0)).reshape(2, 4, 2, 4, c_in, c1)
    w1s = w1s.transpose(0, 2, 1, 3, 4, 5).reshape(2, 2, 16 * c_in, c1)

    return {
        "w1": w1s.astype(jnp.bfloat16),
        "b1": params["conv1_b"].reshape(1, 1, 1, c1),
        "g1": params["ln1_g"].reshape(1, h1, w1, c1),
        "bb1": params["ln1_b"].reshape(1, h1, w1, c1),
        "w2": params["conv2_w"].astype(jnp.bfloat16),
        "b2": params["conv2_b"].reshape(1, 1, 1, c2),
        "g2": params["ln2_g"].reshape(1, h2, w2, c2),
        "bb2": params["ln2_b"].reshape(1, h2, w2, c2),
        "w3": params["conv3_w"].astype(jnp.bfloat16),
        "b3": params["conv3_b"].reshape(1, 1, 1, c3),
        "g3": params["ln3_g"].reshape(1, h3, w3, c3),
        "bb3": params["ln3_b"].reshape(1, h3, w3, c3),
        "f1w": params["fc1_w"].reshape(h3, w3, c3, th).astype(jnp.bfloat16),
        "f1b": params["fc1_b"].reshape(1, th),
        "tg": params["trunk_ln_g"].reshape(1, th),
        "tb": params["trunk_ln_b"].reshape(1, th),
        "f2w": params["fc2_w"].astype(jnp.bfloat16),
        "f2b": params["fc2_b"].reshape(1, to),
        "qw": params["q_w"].astype(jnp.bfloat16),
        "qb": params["q_b"].reshape(1, a),
    }


# ------------------------------------------------------------------------------------ forward
def pqn_forward(prep, x_nchw):
    """PQNAgent.forward:  Q = q_func(trunk(flatten(AtariCNN(x / 255.)))).

    prep: prepare_params() output; x_nchw: (B, C, H, W) f32 obs in [0, 255] -> (B, A) f32 Q."""
    b = x_nchw.shape[0]
    hh, ww = x_nchw.shape[2], x_nchw.shape[3]
    _, h1, w1, c1 = prep["g1"].shape
    _, h2, w2, c2 = prep["g2"].shape
    _, h3, w3, c3 = prep["g3"].shape
    th = prep["f1b"].shape[1]
    to = prep["f2b"].shape[1]
    act_dim = prep["qw"].shape[1]
    assert hh % 4 == 0 and ww % 4 == 0, "AtariCNN fused path assumes H, W divisible by 4"
    assert h1 % 2 == 0 and w1 % 2 == 0

    # NCHW -> NHWC, space-to-depth(4); /255. is already folded into the bf16 conv1 weights.
    x = jnp.transpose(x_nchw, (0, 2, 3, 1))
    xs = _space_to_depth(x, 4).astype(jnp.bfloat16)                 # (B, H/4, W/4, 16*C)

    bt = _pick_batch_tile(b)
    g = -(-b // bt)                                                 # number of grid steps
    b_pad = g * bt
    if b_pad != b:
        xs = jnp.pad(xs, ((0, b_pad - b), (0, 0), (0, 0), (0, 0)))  # ragged batch -> padded tile
    hb, wb, cs = xs.shape[1], xs.shape[2], xs.shape[3]

    def full(shape):
        return pl.BlockSpec(shape, lambda i: (0,) * len(shape))     # VMEM-resident across grid

    kernel = _make_fused_kernel(bt, (h1, w1, c1, h2, w2, c2, h3, w3, c3))

    q = pl.pallas_call(
        kernel,
        grid=(g,),
        in_specs=[
            pl.BlockSpec((bt, hb, wb, cs), lambda i: (i, 0, 0, 0)),   # s2d image batch tile
            full((2, 2, cs, c1)), full((1, 1, 1, c1)),                # conv1 w, b
            full((1, h1, w1, c1)), full((1, h1, w1, c1)),             # ln1 gamma, beta
            full((4, 4, c1, c2)), full((1, 1, 1, c2)),                # conv2 w, b
            full((1, h2, w2, c2)), full((1, h2, w2, c2)),             # ln2 gamma, beta
            full((3, 3, c2, c3)), full((1, 1, 1, c3)),                # conv3 w, b
            full((1, h3, w3, c3)), full((1, h3, w3, c3)),             # ln3 gamma, beta
            full((h3, w3, c3, th)), full((1, th)),                    # fc1 w, b
            full((1, th)), full((1, th)),                             # trunk LN gamma, beta
            full((th, to)), full((1, to)),                            # fc2 w, b
            full((to, act_dim)), full((1, act_dim)),                  # q head w, b
        ],
        out_specs=pl.BlockSpec((1, bt, act_dim), lambda i: (i, 0, 0)),
        out_shape=jax.ShapeDtypeStruct((g, bt, act_dim), jnp.float32),
        compiler_params=pltpu.CompilerParams(
            dimension_semantics=("parallel",),
            vmem_limit_bytes=VMEM_LIMIT),
    )(xs,
      prep["w1"], prep["b1"], prep["g1"], prep["bb1"],
      prep["w2"], prep["b2"], prep["g2"], prep["bb2"],
      prep["w3"], prep["b3"], prep["g3"], prep["bb3"],
      prep["f1w"], prep["f1b"], prep["tg"], prep["tb"],
      prep["f2w"], prep["f2b"], prep["qw"], prep["qb"])

    return q.reshape(b_pad, act_dim)[:b]


def get_max_value(prep, x_nchw):
    return jnp.max(pqn_forward(prep, x_nchw), axis=1)


# ------------------------------------------------------------- pure-JAX f32 reference (checks)
def pqn_forward_reference(params, x_nchw):
    p = params
    x = jnp.transpose(x_nchw, (0, 2, 3, 1)).astype(jnp.float32) / 255.0

    def conv(x, w, b, stride):
        y = lax.conv_general_dilated(x, w, (stride, stride), "VALID",
                                     dimension_numbers=("NHWC", "HWIO", "NHWC"))
        return y + b

    def ln_all(y, g, b):
        bsz = y.shape[0]
        yf = y.reshape(bsz, -1)
        m = yf.mean(-1, keepdims=True)
        v = ((yf - m) ** 2).mean(-1, keepdims=True)
        yf = (yf - m) * lax.rsqrt(v + LN_EPS) * g + b
        return jnp.maximum(yf, 0.0).reshape(y.shape)

    x = ln_all(conv(x, p["conv1_w"], p["conv1_b"], 4), p["ln1_g"], p["ln1_b"])
    x = ln_all(conv(x, p["conv2_w"], p["conv2_b"], 2), p["ln2_g"], p["ln2_b"])
    x = ln_all(conv(x, p["conv3_w"], p["conv3_b"], 1), p["ln3_g"], p["ln3_b"])
    f = x.reshape(x.shape[0], -1)
    h = f @ p["fc1_w"] + p["fc1_b"]
    m = h.mean(-1, keepdims=True)
    v = ((h - m) ** 2).mean(-1, keepdims=True)
    h = (h - m) * lax.rsqrt(v + LN_EPS) * p["trunk_ln_g"] + p["trunk_ln_b"]
    h = jnp.maximum(h, 0.0)
    h = jnp.maximum(h @ p["fc2_w"] + p["fc2_b"], 0.0)
    return h @ p["q_w"] + p["q_b"]


# ----------------------------------------------------------------------------------------- main
if __name__ == "__main__":
    B, C, H, W = 2, 4, 44, 44
    ACTION_DIM = 6

    key = jax.random.PRNGKey(0)
    pkey, xkey = jax.random.split(key)

    params = init_params(pkey, obs_shape=(C, H, W), cnn_channels=(32, 64, 64),
                         trunk_hidden=512, trunk_out=512, action_dim=ACTION_DIM)
    prep = prepare_params(params, obs_shape=(C, H, W))   # one-time bf16 cast / weight reorder
    x = jax.random.uniform(xkey, (B, C, H, W), jnp.float32, 0.0, 255.0)

    fwd = jax.jit(pqn_forward)
    vmax = jax.jit(get_max_value)

    q = jax.block_until_ready(fwd(prep, x))
    v = jax.block_until_ready(vmax(prep, x))
    q_ref = jax.block_until_ready(jax.jit(pqn_forward_reference)(params, x))

    assert q.shape == (B, ACTION_DIM) and q.dtype == jnp.float32
    assert v.shape == (B,)
    assert bool(jnp.all(jnp.isfinite(q)))
    max_err = float(jnp.max(jnp.abs(q - q_ref)))
    assert max_err < 5e-2, f"kernel vs f32 reference mismatch: max|dQ| = {max_err}"
    print("KERNEL_OK")
</pallas_src>

<mosaic_0001>
module attributes {stable_mosaic.version = 11 : i64} {
  func.func @kernel(%arg0: i32, %arg1: memref<1x11x11x64xbf16, #tpu.memory_space<vmem>>, %arg2: memref<2x2x64x32xbf16, #tpu.memory_space<vmem>>, %arg3: memref<1x1x1x32xf32, #tpu.memory_space<vmem>>, %arg4: memref<1x10x10x32xf32, #tpu.memory_space<vmem>>, %arg5: memref<1x10x10x32xf32, #tpu.memory_space<vmem>>, %arg6: memref<4x4x32x64xbf16, #tpu.memory_space<vmem>>, %arg7: memref<1x1x1x64xf32, #tpu.memory_space<vmem>>, %arg8: memref<1x4x4x64xf32, #tpu.memory_space<vmem>>, %arg9: memref<1x4x4x64xf32, #tpu.memory_space<vmem>>, %arg10: memref<3x3x64x64xbf16, #tpu.memory_space<vmem>>, %arg11: memref<1x1x1x64xf32, #tpu.memory_space<vmem>>, %arg12: memref<1x2x2x64xf32, #tpu.memory_space<vmem>>, %arg13: memref<1x2x2x64xf32, #tpu.memory_space<vmem>>, %arg14: memref<2x2x64x512xbf16, #tpu.memory_space<vmem>>, %arg15: memref<1x512xf32, #tpu.memory_space<vmem>>, %arg16: memref<1x512xf32, #tpu.memory_space<vmem>>, %arg17: memref<1x512xf32, #tpu.memory_space<vmem>>, %arg18: memref<512x512xbf16, #tpu.memory_space<vmem>>, %arg19: memref<1x512xf32, #tpu.memory_space<vmem>>, %arg20: memref<512x6xbf16, #tpu.memory_space<vmem>>, %arg21: memref<1x6xf32, #tpu.memory_space<vmem>>, %arg22: memref<1x1x6xf32, #tpu.memory_space<vmem>>) attributes {dimension_semantics = [#tpu.dimension_semantics<parallel>], iteration_bounds = array<i64: 2>, scalar_prefetch = 0 : i64, scratch_operands = 0 : i64, tpu.core_type = #tpu.core_type<tc>, window_params = [{transform_indices = @transform_0, window_bounds = array<i64: 1, 11, 11, 64>}, {pipeline_mode = #tpu.pipeline_mode<synchronous>, transform_indices = @transform_1, window_bounds = array<i64: 2, 2, 64, 32>}, {pipeline_mode = #tpu.pipeline_mode<synchronous>, transform_indices = @transform_2, window_bounds = array<i64: 1, 1, 1, 32>}, {pipeline_mode = #tpu.pipeline_mode<synchronous>, transform_indices = @transform_3, window_bounds = array<i64: 1, 10, 10, 32>}, {pipeline_mode = #tpu.pipeline_mode<synchronous>, transform_indices = @transform_4, window_bounds = array<i64: 1, 10, 10, 32>}, {pipeline_mode = #tpu.pipeline_mode<synchronous>, transform_indices = @transform_5, window_bounds = array<i64: 4, 4, 32, 64>}, {pipeline_mode = #tpu.pipeline_mode<synchronous>, transform_indices = @transform_6, window_bounds = array<i64: 1, 1, 1, 64>}, {pipeline_mode = #tpu.pipeline_mode<synchronous>, transform_indices = @transform_7, window_bounds = array<i64: 1, 4, 4, 64>}, {pipeline_mode = #tpu.pipeline_mode<synchronous>, transform_indices = @transform_8, window_bounds = array<i64: 1, 4, 4, 64>}, {pipeline_mode = #tpu.pipeline_mode<synchronous>, transform_indices = @transform_9, window_bounds = array<i64: 3, 3, 64, 64>}, {pipeline_mode = #tpu.pipeline_mode<synchronous>, transform_indices = @transform_10, window_bounds = array<i64: 1, 1, 1, 64>}, {pipeline_mode = #tpu.pipeline_mode<synchronous>, transform_indices = @transform_11, window_bounds = array<i64: 1, 2, 2, 64>}, {pipeline_mode = #tpu.pipeline_mode<synchronous>, transform_indices = @transform_12, window_bounds = array<i64: 1, 2, 2, 64>}, {pipeline_mode = #tpu.pipeline_mode<synchronous>, transform_indices = @transform_13, window_bounds = array<i64: 2, 2, 64, 512>}, {pipeline_mode = #tpu.pipeline_mode<synchronous>, transform_indices = @transform_14, window_bounds = array<i64: 1, 512>}, {pipeline_mode = #tpu.pipeline_mode<synchronous>, transform_indices = @transform_15, window_bounds = array<i64: 1, 512>}, {pipeline_mode = #tpu.pipeline_mode<synchronous>, transform_indices = @transform_16, window_bounds = array<i64: 1, 512>}, {pipeline_mode = #tpu.pipeline_mode<synchronous>, transform_indices = @transform_17, window_bounds = array<i64: 512, 512>}, {pipeline_mode = #tpu.pipeline_mode<synchronous>, transform_indices = @transform_18, window_bounds = array<i64: 1, 512>}, {pipeline_mode = #tpu.pipeline_mode<synchronous>, transform_indices = @transform_19, window_bounds = array<i64: 512, 6>}, {pipeline_mode = #tpu.pipeline_mode<synchronous>, transform_indices = @transform_20, window_bounds = array<i64: 1, 6>}, {transform_indices = @transform_21, window_bounds = array<i64: 1, 1, 6>}]} {
    %c0 = arith.constant 0 : index
    %c0_0 = arith.constant 0 : index
    %c0_1 = arith.constant 0 : index
    %c0_2 = arith.constant 0 : index
    %0 = vector.load %arg1[%c0, %c0_0, %c0_1, %c0_2] : memref<1x11x11x64xbf16, #tpu.memory_space<vmem>>, vector<1x11x11x64xbf16>
    %1 = vector.extract_strided_slice %0 {offsets = [0, 0, 0, 0], sizes = [1, 10, 10, 64], strides = [1, 1, 1, 1]} : vector<1x11x11x64xbf16> to vector<1x10x10x64xbf16>
    %2 = vector.shape_cast %1 : vector<1x10x10x64xbf16> to vector<100x64xbf16>
    %c0_3 = arith.constant 0 : index
    %c0_4 = arith.constant 0 : index
    %c0_5 = arith.constant 0 : index
    %c0_6 = arith.constant 0 : index
    %3 = vector.load %arg2[%c0_3, %c0_4, %c0_5, %c0_6] : memref<2x2x64x32xbf16, #tpu.memory_space<vmem>>, vector<1x1x64x32xbf16>
    %4 = vector.shape_cast %3 : vector<1x1x64x32xbf16> to vector<64x32xbf16>
    %cst = arith.constant dense<0.000000e+00> : vector<100x32xf32>
    %5 = tpu.matmul %2, %4, %cst {dimension_numbers = #tpu.dot_dimension_numbers<[1], [0], [0], [1], [0, 0, 1, 1], [], []>} : vector<100x64xbf16>, vector<64x32xbf16>, vector<100x32xf32> -> vector<100x32xf32>
    %6 = vector.extract_strided_slice %0 {offsets = [0, 0, 1, 0], sizes = [1, 10, 10, 64], strides = [1, 1, 1, 1]} : vector<1x11x11x64xbf16> to vector<1x10x10x64xbf16>
    %7 = vector.shape_cast %6 : vector<1x10x10x64xbf16> to vector<100x64xbf16>
    %c0_7 = arith.constant 0 : index
    %c1 = arith.constant 1 : index
    %c0_8 = arith.constant 0 : index
    %c0_9 = arith.constant 0 : index
    %8 = vector.load %arg2[%c0_7, %c1, %c0_8, %c0_9] : memref<2x2x64x32xbf16, #tpu.memory_space<vmem>>, vector<1x1x64x32xbf16>
    %9 = vector.shape_cast %8 : vector<1x1x64x32xbf16> to vector<64x32xbf16>
    %cst_10 = arith.constant dense<0.000000e+00> : vector<100x32xf32>
    %10 = tpu.matmul %7, %9, %cst_10 {dimension_numbers = #tpu.dot_dimension_numbers<[1], [0], [0], [1], [0, 0, 1, 1], [], []>} : vector<100x64xbf16>, vector<64x32xbf16>, vector<100x32xf32> -> vector<100x32xf32>
    %11 = arith.addf %5, %10 : vector<100x32xf32>
    %12 = vector.extract_strided_slice %0 {offsets = [0, 1, 0, 0], sizes = [1, 10, 10, 64], strides = [1, 1, 1, 1]} : vector<1x11x11x64xbf16> to vector<1x10x10x64xbf16>
    %13 = vector.shape_cast %12 : vector<1x10x10x64xbf16> to vector<100x64xbf16>
    %c1_11 = arith.constant 1 : index
    %c0_12 = arith.constant 0 : index
    %c0_13 = arith.constant 0 : index
    %c0_14 = arith.constant 0 : index
    %14 = vector.load %arg2[%c1_11, %c0_12, %c0_13, %c0_14] : memref<2x2x64x32xbf16, #tpu.memory_space<vmem>>, vector<1x1x64x32xbf16>
    %15 = vector.shape_cast %14 : vector<1x1x64x32xbf16> to vector<64x32xbf16>
    %cst_15 = arith.constant dense<0.000000e+00> : vector<100x32xf32>
    %16 = tpu.matmul %13, %15, %cst_15 {dimension_numbers = #tpu.dot_dimension_numbers<[1], [0], [0], [1], [0, 0, 1, 1], [], []>} : vector<100x64xbf16>, vector<64x32xbf16>, vector<100x32xf32> -> vector<100x32xf32>
    %17 = arith.addf %11, %16 : vector<100x32xf32>
    %18 = vector.extract_strided_slice %0 {offsets = [0, 1, 1, 0], sizes = [1, 10, 10, 64], strides = [1, 1, 1, 1]} : vector<1x11x11x64xbf16> to vector<1x10x10x64xbf16>
    %19 = vector.shape_cast %18 : vector<1x10x10x64xbf16> to vector<100x64xbf16>
    %c1_16 = arith.constant 1 : index
    %c1_17 = arith.constant 1 : index
    %c0_18 = arith.constant 0 : index
    %c0_19 = arith.constant 0 : index
    %20 = vector.load %arg2[%c1_16, %c1_17, %c0_18, %c0_19] : memref<2x2x64x32xbf16, #tpu.memory_space<vmem>>, vector<1x1x64x32xbf16>
    %21 = vector.shape_cast %20 : vector<1x1x64x32xbf16> to vector<64x32xbf16>
    %cst_20 = arith.constant dense<0.000000e+00> : vector<100x32xf32>
    %22 = tpu.matmul %19, %21, %cst_20 {dimension_numbers = #tpu.dot_dimension_numbers<[1], [0], [0], [1], [0, 0, 1, 1], [], []>} : vector<100x64xbf16>, vector<64x32xbf16>, vector<100x32xf32> -> vector<100x32xf32>
    %23 = arith.addf %17, %22 : vector<100x32xf32>
    %24 = vector.shape_cast %23 : vector<100x32xf32> to vector<1x10x10x32xf32>
    %c0_21 = arith.constant 0 : index
    %c0_22 = arith.constant 0 : index
    %c0_23 = arith.constant 0 : index
    %c0_24 = arith.constant 0 : index
    %25 = vector.load %arg3[%c0_21, %c0_22, %c0_23, %c0_24] : memref<1x1x1x32xf32, #tpu.memory_space<vmem>>, vector<1x1x1x32xf32>
    %26 = vector.broadcast %25 : vector<1x1x1x32xf32> to vector<1x10x10x32xf32>
    %27 = arith.addf %24, %26 : vector<1x10x10x32xf32>
    %c0_25 = arith.constant 0 : index
    %c0_26 = arith.constant 0 : index
    %c0_27 = arith.constant 0 : index
    %c0_28 = arith.constant 0 : index
    %28 = vector.load %arg4[%c0_25, %c0_26, %c0_27, %c0_28] : memref<1x10x10x32xf32, #tpu.memory_space<vmem>>, vector<1x10x10x32xf32>
    %c0_29 = arith.constant 0 : index
    %c0_30 = arith.constant 0 : index
    %c0_31 = arith.constant 0 : index
    %c0_32 = arith.constant 0 : index
    %29 = vector.load %arg5[%c0_29, %c0_30, %c0_31, %c0_32] : memref<1x10x10x32xf32, #tpu.memory_space<vmem>>, vector<1x10x10x32xf32>
    %cst_33 = arith.constant dense<0.000000e+00> : vector<1x10x10xf32>
    %30 = vector.multi_reduction <add>, %27, %cst_33 [3] : vector<1x10x10x32xf32> to vector<1x10x10xf32>
    %31 = vector.shape_cast %30 : vector<1x10x10xf32> to vector<1x10x10x1xf32>
    %cst_34 = arith.constant dense<0.000000e+00> : vector<1x10x1xf32>
    %32 = vector.multi_reduction <add>, %31, %cst_34 [2] : vector<1x10x10x1xf32> to vector<1x10x1xf32>
    %33 = vector.shape_cast %32 : vector<1x10x1xf32> to vector<1x10x1x1xf32>
    %cst_35 = arith.constant dense<0.000000e+00> : vector<1x1x1xf32>
    %34 = vector.multi_reduction <add>, %33, %cst_35 [1] : vector<1x10x1x1xf32> to vector<1x1x1xf32>
    %35 = vector.shape_cast %34 : vector<1x1x1xf32> to vector<1x1x1x1xf32>
    %cst_36 = arith.constant 3.125000e-04 : f32
    %36 = vector.broadcast %cst_36 : f32 to vector<1x1x1x1xf32>
    %37 = arith.mulf %35, %36 : vector<1x1x1x1xf32>
    %38 = vector.broadcast %37 : vector<1x1x1x1xf32> to vector<1x10x10x32xf32>
    %39 = arith.subf %27, %38 : vector<1x10x10x32xf32>
    %40 = arith.mulf %39, %39 : vector<1x10x10x32xf32>
    %cst_37 = arith.constant dense<0.000000e+00> : vector<1x10x10xf32>
    %41 = vector.multi_reduction <add>, %40, %cst_37 [3] : vector<1x10x10x32xf32> to vector<1x10x10xf32>
    %42 = vector.shape_cast %41 : vector<1x10x10xf32> to vector<1x10x10x1xf32>
    %cst_38 = arith.constant dense<0.000000e+00> : vector<1x10x1xf32>
    %43 = vector.multi_reduction <add>, %42, %cst_38 [2] : vector<1x10x10x1xf32> to vector<1x10x1xf32>
    %44 = vector.shape_cast %43 : vector<1x10x1xf32> to vector<1x10x1x1xf32>
    %cst_39 = arith.constant dense<0.000000e+00> : vector<1x1x1xf32>
    %45 = vector.multi_reduction <add>, %44, %cst_39 [1] : vector<1x10x1x1xf32> to vector<1x1x1xf32>
    %46 = vector.shape_cast %45 : vector<1x1x1xf32> to vector<1x1x1x1xf32>
    %cst_40 = arith.constant 3.125000e-04 : f32
    %47 = vector.broadcast %cst_40 : f32 to vector<1x1x1x1xf32>
    %48 = arith.mulf %46, %47 : vector<1x1x1x1xf32>
    %cst_41 = arith.constant 9.99999974E-6 : f32
    %49 = vector.broadcast %cst_41 : f32 to vector<1x1x1x1xf32>
    %50 = arith.addf %48, %49 : vector<1x1x1x1xf32>
    %51 = math.rsqrt %50 : vector<1x1x1x1xf32>
    %52 = vector.broadcast %51 : vector<1x1x1x1xf32> to vector<1x10x10x32xf32>
    %53 = arith.mulf %39, %52 : vector<1x10x10x32xf32>
    %54 = arith.mulf %53, %28 : vector<1x10x10x32xf32>
    %55 = arith.addf %54, %29 : vector<1x10x10x32xf32>
    %cst_42 = arith.constant 0.000000e+00 : f32
    %56 = vector.broadcast %cst_42 : f32 to vector<1x10x10x32xf32>
    %57 = arith.maximumf %55, %56 : vector<1x10x10x32xf32>
    %58 = arith.truncf %57 : vector<1x10x10x32xf32> to vector<1x10x10x32xbf16>
    %59 = vector.shape_cast %58 : vector<1x10x10x32xbf16> to vector<1x5x2x5x2x32xbf16>
    %60 = vector.extract_strided_slice %59 {offsets = [0, 0, 0, 0, 0, 0], sizes = [1, 4, 1, 4, 1, 32], strides = [1, 1, 1, 1, 1, 1]} : vector<1x5x2x5x2x32xbf16> to vector<1x4x1x4x1x32xbf16>
    %61 = vector.shape_cast %60 : vector<1x4x1x4x1x32xbf16> to vector<1x4x4x32xbf16>
    %62 = vector.shape_cast %61 : vector<1x4x4x32xbf16> to vector<16x32xbf16>
    %c0_43 = arith.constant 0 : index
    %c0_44 = arith.constant 0 : index
    %c0_45 = arith.constant 0 : index
    %c0_46 = arith.constant 0 : index
    %63 = vector.load %arg6[%c0_43, %c0_44, %c0_45, %c0_46] : memref<4x4x32x64xbf16, #tpu.memory_space<vmem>>, vector<1x1x32x64xbf16>
    %64 = vector.shape_cast %63 : vector<1x1x32x64xbf16> to vector<32x64xbf16>
    %cst_47 = arith.constant dense<0.000000e+00> : vector<16x64xf32>
    %65 = tpu.matmul %62, %64, %cst_47 {dimension_numbers = #tpu.dot_dimension_numbers<[1], [0], [0], [1], [0, 0, 1, 1], [], []>} : vector<16x32xbf16>, vector<32x64xbf16>, vector<16x64xf32> -> vector<16x64xf32>
    %66 = vector.extract_strided_slice %59 {offsets = [0, 0, 0, 0, 1, 0], sizes = [1, 4, 1, 4, 1, 32], strides = [1, 1, 1, 1, 1, 1]} : vector<1x5x2x5x2x32xbf16> to vector<1x4x1x4x1x32xbf16>
    %67 = vector.shape_cast %66 : vector<1x4x1x4x1x32xbf16> to vector<1x4x4x32xbf16>
    %68 = vector.shape_cast %67 : vector<1x4x4x32xbf16> to vector<16x32xbf16>
    %c0_48 = arith.constant 0 : index
    %c1_49 = arith.constant 1 : index
    %c0_50 = arith.constant 0 : index
    %c0_51 = arith.constant 0 : index
    %69 = vector.load %arg6[%c0_48, %c1_49, %c0_50, %c0_51] : memref<4x4x32x64xbf16, #tpu.memory_space<vmem>>, vector<1x1x32x64xbf16>
    %70 = vector.shape_cast %69 : vector<1x1x32x64xbf16> to vector<32x64xbf16>
    %cst_52 = arith.constant dense<0.000000e+00> : vector<16x64xf32>
    %71 = tpu.matmul %68, %70, %cst_52 {dimension_numbers = #tpu.dot_dimension_numbers<[1], [0], [0], [1], [0, 0, 1, 1], [], []>} : vector<16x32xbf16>, vector<32x64xbf16>, vector<16x64xf32> -> vector<16x64xf32>
    %72 = arith.addf %65, %71 : vector<16x64xf32>
    %73 = vector.extract_strided_slice %59 {offsets = [0, 0, 0, 1, 0, 0], sizes = [1, 4, 1, 4, 1, 32], strides = [1, 1, 1, 1, 1, 1]} : vector<1x5x2x5x2x32xbf16> to vector<1x4x1x4x1x32xbf16>
    %74 = vector.shape_cast %73 : vector<1x4x1x4x1x32xbf16> to vector<1x4x4x32xbf16>
    %75 = vector.shape_cast %74 : vector<1x4x4x32xbf16> to vector<16x32xbf16>
    %c0_53 = arith.constant 0 : index
    %c2 = arith.constant 2 : index
    %c0_54 = arith.constant 0 : index
    %c0_55 = arith.constant 0 : index
    %76 = vector.load %arg6[%c0_53, %c2, %c0_54, %c0_55] : memref<4x4x32x64xbf16, #tpu.memory_space<vmem>>, vector<1x1x32x64xbf16>
    %77 = vector.shape_cast %76 : vector<1x1x32x64xbf16> to vector<32x64xbf16>
    %cst_56 = arith.constant dense<0.000000e+00> : vector<16x64xf32>
    %78 = tpu.matmul %75, %77, %cst_56 {dimension_numbers = #tpu.dot_dimension_numbers<[1], [0], [0], [1], [0, 0, 1, 1], [], []>} : vector<16x32xbf16>, vector<32x64xbf16>, vector<16x64xf32> -> vector<16x64xf32>
    %79 = arith.addf %72, %78 : vector<16x64xf32>
    %80 = vector.extract_strided_slice %59 {offsets = [0, 0, 0, 1, 1, 0], sizes = [1, 4, 1, 4, 1, 32], strides = [1, 1, 1, 1, 1, 1]} : vector<1x5x2x5x2x32xbf16> to vector<1x4x1x4x1x32xbf16>
    %81 = vector.shape_cast %80 : vector<1x4x1x4x1x32xbf16> to vector<1x4x4x32xbf16>
    %82 = vector.shape_cast %81 : vector<1x4x4x32xbf16> to vector<16x32xbf16>
    %c0_57 = arith.constant 0 : index
    %c3 = arith.constant 3 : index
    %c0_58 = arith.constant 0 : index
    %c0_59 = arith.constant 0 : index
    %83 = vector.load %arg6[%c0_57, %c3, %c0_58, %c0_59] : memref<4x4x32x64xbf16, #tpu.memory_space<vmem>>, vector<1x1x32x64xbf16>
    %84 = vector.shape_cast %83 : vector<1x1x32x64xbf16> to vector<32x64xbf16>
    %cst_60 = arith.constant dense<0.000000e+00> : vector<16x64xf32>
    %85 = tpu.matmul %82, %84, %cst_60 {dimension_numbers = #tpu.dot_dimension_numbers<[1], [0], [0], [1], [0, 0, 1, 1], [], []>} : vector<16x32xbf16>, vector<32x64xbf16>, vector<16x64xf32> -> vector<16x64xf32>
    %86 = arith.addf %79, %85 : vector<16x64xf32>
    %87 = vector.extract_strided_slice %59 {offsets = [0, 0, 1, 0, 0, 0], sizes = [1, 4, 1, 4, 1, 32], strides = [1, 1, 1, 1, 1, 1]} : vector<1x5x2x5x2x32xbf16> to vector<1x4x1x4x1x32xbf16>
    %88 = vector.shape_cast %87 : vector<1x4x1x4x1x32xbf16> to vector<1x4x4x32xbf16>
    %89 = vector.shape_cast %88 : vector<1x4x4x32xbf16> to vector<16x32xbf16>
    %c1_61 = arith.constant 1 : index
    %c0_62 = arith.constant 0 : index
    %c0_63 = arith.constant 0 : index
    %c0_64 = arith.constant 0 : index
    %90 = vector.load %arg6[%c1_61, %c0_62, %c0_63, %c0_64] : memref<4x4x32x64xbf16, #tpu.memory_space<vmem>>, vector<1x1x32x64xbf16>
    %91 = vector.shape_cast %90 : vector<1x1x32x64xbf16> to vector<32x64xbf16>
    %cst_65 = arith.constant dense<0.000000e+00> : vector<16x64xf32>
    %92 = tpu.matmul %89, %91, %cst_65 {dimension_numbers = #tpu.dot_dimension_numbers<[1], [0], [0], [1], [0, 0, 1, 1], [], []>} : vector<16x32xbf16>, vector<32x64xbf16>, vector<16x64xf32> -> vector<16x64xf32>
    %93 = arith.addf %86, %92 : vector<16x64xf32>
    %94 = vector.extract_strided_slice %59 {offsets = [0, 0, 1, 0, 1, 0], sizes = [1, 4, 1, 4, 1, 32], strides = [1, 1, 1, 1, 1, 1]} : vector<1x5x2x5x2x32xbf16> to vector<1x4x1x4x1x32xbf16>
    %95 = vector.shape_cast %94 : vector<1x4x1x4x1x32xbf16> to vector<1x4x4x32xbf16>
    %96 = vector.shape_cast %95 : vector<1x4x4x32xbf16> to vector<16x32xbf16>
    %c1_66 = arith.constant 1 : index
    %c1_67 = arith.constant 1 : index
    %c0_68 = arith.constant 0 : index
    %c0_69 = arith.constant 0 : index
    %97 = vector.load %arg6[%c1_66, %c1_67, %c0_68, %c0_69] : memref<4x4x32x64xbf16, #tpu.memory_space<vmem>>, vector<1x1x32x64xbf16>
    %98 = vector.shape_cast %97 : vector<1x1x32x64xbf16> to vector<32x64xbf16>
    %cst_70 = arith.constant dense<0.000000e+00> : vector<16x64xf32>
    %99 = tpu.matmul %96, %98, %cst_70 {dimension_numbers = #tpu.dot_dimension_numbers<[1], [0], [0], [1], [0, 0, 1, 1], [], []>} : vector<16x32xbf16>, vector<32x64xbf16>, vector<16x64xf32> -> vector<16x64xf32>
    %100 = arith.addf %93, %99 : vector<16x64xf32>
    %101 = vector.extract_strided_slice %59 {offsets = [0, 0, 1, 1, 0, 0], sizes = [1, 4, 1, 4, 1, 32], strides = [1, 1, 1, 1, 1, 1]} : vector<1x5x2x5x2x32xbf16> to vector<1x4x1x4x1x32xbf16>
    %102 = vector.shape_cast %101 : vector<1x4x1x4x1x32xbf16> to vector<1x4x4x32xbf16>
    %103 = vector.shape_cast %102 : vector<1x4x4x32xbf16> to vector<16x32xbf16>
    %c1_71 = arith.constant 1 : index
    %c2_72 = arith.constant 2 : index
    %c0_73 = arith.constant 0 : index
    %c0_74 = arith.constant 0 : index
    %104 = vector.load %arg6[%c1_71, %c2_72, %c0_73, %c0_74] : memref<4x4x32x64xbf16, #tpu.memory_space<vmem>>, vector<1x1x32x64xbf16>
    %105 = vector.shape_cast %104 : vector<1x1x32x64xbf16> to vector<32x64xbf16>
    %cst_75 = arith.constant dense<0.000000e+00> : vector<16x64xf32>
    %106 = tpu.matmul %103, %105, %cst_75 {dimension_numbers = #tpu.dot_dimension_numbers<[1], [0], [0], [1], [0, 0, 1, 1], [], []>} : vector<16x32xbf16>, vector<32x64xbf16>, vector<16x64xf32> -> vector<16x64xf32>
    %107 = arith.addf %100, %106 : vector<16x64xf32>
    %108 = vector.extract_strided_slice %59 {offsets = [0, 0, 1, 1, 1, 0], sizes = [1, 4, 1, 4, 1, 32], strides = [1, 1, 1, 1, 1, 1]} : vector<1x5x2x5x2x32xbf16> to vector<1x4x1x4x1x32xbf16>
    %109 = vector.shape_cast %108 : vector<1x4x1x4x1x32xbf16> to vector<1x4x4x32xbf16>
    %110 = vector.shape_cast %109 : vector<1x4x4x32xbf16> to vector<16x32xbf16>
    %c1_76 = arith.constant 1 : index
    %c3_77 = arith.constant 3 : index
    %c0_78 = arith.constant 0 : index
    %c0_79 = arith.constant 0 : index
    %111 = vector.load %arg6[%c1_76, %c3_77, %c0_78, %c0_79] : memref<4x4x32x64xbf16, #tpu.memory_space<vmem>>, vector<1x1x32x64xbf16>
    %112 = vector.shape_cast %111 : vector<1x1x32x64xbf16> to vector<32x64xbf16>
    %cst_80 = arith.constant dense<0.000000e+00> : vector<16x64xf32>
    %113 = tpu.matmul %110, %112, %cst_80 {dimension_numbers = #tpu.dot_dimension_numbers<[1], [0], [0], [1], [0, 0, 1, 1], [], []>} : vector<16x32xbf16>, vector<32x64xbf16>, vector<16x64xf32> -> vector<16x64xf32>
    %114 = arith.addf %107, %113 : vector<16x64xf32>
    %115 = vector.extract_strided_slice %59 {offsets = [0, 1, 0, 0, 0, 0], sizes = [1, 4, 1, 4, 1, 32], strides = [1, 1, 1, 1, 1, 1]} : vector<1x5x2x5x2x32xbf16> to vector<1x4x1x4x1x32xbf16>
    %116 = vector.shape_cast %115 : vector<1x4x1x4x1x32xbf16> to vector<1x4x4x32xbf16>
    %117 = vector.shape_cast %116 : vector<1x4x4x32xbf16> to vector<16x32xbf16>
    %c2_81 = arith.constant 2 : index
    %c0_82 = arith.constant 0 : index
    %c0_83 = arith.constant 0 : index
    %c0_84 = arith.constant 0 : index
    %118 = vector.load %arg6[%c2_81, %c0_82, %c0_83, %c0_84] : memref<4x4x32x64xbf16, #tpu.memory_space<vmem>>, vector<1x1x32x64xbf16>
    %119 = vector.shape_cast %118 : vector<1x1x32x64xbf16> to vector<32x64xbf16>
    %cst_85 = arith.constant dense<0.000000e+00> : vector<16x64xf32>
    %120 = tpu.matmul %117, %119, %cst_85 {dimension_numbers = #tpu.dot_dimension_numbers<[1], [0], [0], [1], [0, 0, 1, 1], [], []>} : vector<16x32xbf16>, vector<32x64xbf16>, vector<16x64xf32> -> vector<16x64xf32>
    %121 = arith.addf %114, %120 : vector<16x64xf32>
    %122 = vector.extract_strided_slice %59 {offsets = [0, 1, 0, 0, 1, 0], sizes = [1, 4, 1, 4, 1, 32], strides = [1, 1, 1, 1, 1, 1]} : vector<1x5x2x5x2x32xbf16> to vector<1x4x1x4x1x32xbf16>
    %123 = vector.shape_cast %122 : vector<1x4x1x4x1x32xbf16> to vector<1x4x4x32xbf16>
    %124 = vector.shape_cast %123 : vector<1x4x4x32xbf16> to vector<16x32xbf16>
    %c2_86 = arith.constant 2 : index
    %c1_87 = arith.constant 1 : index
    %c0_88 = arith.constant 0 : index
    %c0_89 = arith.constant 0 : index
    %125 = vector.load %arg6[%c2_86, %c1_87, %c0_88, %c0_89] : memref<4x4x32x64xbf16, #tpu.memory_space<vmem>>, vector<1x1x32x64xbf16>
    %126 = vector.shape_cast %125 : vector<1x1x32x64xbf16> to vector<32x64xbf16>
    %cst_90 = arith.constant dense<0.000000e+00> : vector<16x64xf32>
    %127 = tpu.matmul %124, %126, %cst_90 {dimension_numbers = #tpu.dot_dimension_numbers<[1], [0], [0], [1], [0, 0, 1, 1], [], []>} : vector<16x32xbf16>, vector<32x64xbf16>, vector<16x64xf32> -> vector<16x64xf32>
    %128 = arith.addf %121, %127 : vector<16x64xf32>
    %129 = vector.extract_strided_slice %59 {offsets = [0, 1, 0, 1, 0, 0], sizes = [1, 4, 1, 4, 1, 32], strides = [1, 1, 1, 1, 1, 1]} : vector<1x5x2x5x2x32xbf16> to vector<1x4x1x4x1x32xbf16>
    %130 = vector.shape_cast %129 : vector<1x4x1x4x1x32xbf16> to vector<1x4x4x32xbf16>
    %131 = vector.shape_cast %130 : vector<1x4x4x32xbf16> to vector<16x32xbf16>
    %c2_91 = arith.constant 2 : index
    %c2_92 = arith.constant 2 : index
    %c0_93 = arith.constant 0 : index
    %c0_94 = arith.constant 0 : index
    %132 = vector.load %arg6[%c2_91, %c2_92, %c0_93, %c0_94] : memref<4x4x32x64xbf16, #tpu.memory_space<vmem>>, vector<1x1x32x64xbf16>
    %133 = vector.shape_cast %132 : vector<1x1x32x64xbf16> to vector<32x64xbf16>
    %cst_95 = arith.constant dense<0.000000e+00> : vector<16x64xf32>
    %134 = tpu.matmul %131, %133, %cst_95 {dimension_numbers = #tpu.dot_dimension_numbers<[1], [0], [0], [1], [0, 0, 1, 1], [], []>} : vector<16x32xbf16>, vector<32x64xbf16>, vector<16x64xf32> -> vector<16x64xf32>
    %135 = arith.addf %128, %134 : vector<16x64xf32>
    %136 = vector.extract_strided_slice %59 {offsets = [0, 1, 0, 1, 1, 0], sizes = [1, 4, 1, 4, 1, 32], strides = [1, 1, 1, 1, 1, 1]} : vector<1x5x2x5x2x32xbf16> to vector<1x4x1x4x1x32xbf16>
    %137 = vector.shape_cast %136 : vector<1x4x1x4x1x32xbf16> to vector<1x4x4x32xbf16>
    %138 = vector.shape_cast %137 : vector<1x4x4x32xbf16> to vector<16x32xbf16>
    %c2_96 = arith.constant 2 : index
    %c3_97 = arith.constant 3 : index
    %c0_98 = arith.constant 0 : index
    %c0_99 = arith.constant 0 : index
    %139 = vector.load %arg6[%c2_96, %c3_97, %c0_98, %c0_99] : memref<4x4x32x64xbf16, #tpu.memory_space<vmem>>, vector<1x1x32x64xbf16>
    %140 = vector.shape_cast %139 : vector<1x1x32x64xbf16> to vector<32x64xbf16>
    %cst_100 = arith.constant dense<0.000000e+00> : vector<16x64xf32>
    %141 = tpu.matmul %138, %140, %cst_100 {dimension_numbers = #tpu.dot_dimension_numbers<[1], [0], [0], [1], [0, 0, 1, 1], [], []>} : vector<16x32xbf16>, vector<32x64xbf16>, vector<16x64xf32> -> vector<16x64xf32>
    %142 = arith.addf %135, %141 : vector<16x64xf32>
    %143 = vector.extract_strided_slice %59 {offsets = [0, 1, 1, 0, 0, 0], sizes = [1, 4, 1, 4, 1, 32], strides = [1, 1, 1, 1, 1, 1]} : vector<1x5x2x5x2x32xbf16> to vector<1x4x1x4x1x32xbf16>
    %144 = vector.shape_cast %143 : vector<1x4x1x4x1x32xbf16> to vector<1x4x4x32xbf16>
    %145 = vector.shape_cast %144 : vector<1x4x4x32xbf16> to vector<16x32xbf16>
    %c3_101 = arith.constant 3 : index
    %c0_102 = arith.constant 0 : index
    %c0_103 = arith.constant 0 : index
    %c0_104 = arith.constant 0 : index
    %146 = vector.load %arg6[%c3_101, %c0_102, %c0_103, %c0_104] : memref<4x4x32x64xbf16, #tpu.memory_space<vmem>>, vector<1x1x32x64xbf16>
    %147 = vector.shape_cast %146 : vector<1x1x32x64xbf16> to vector<32x64xbf16>
    %cst_105 = arith.constant dense<0.000000e+00> : vector<16x64xf32>
    %148 = tpu.matmul %145, %147, %cst_105 {dimension_numbers = #tpu.dot_dimension_numbers<[1], [0], [0], [1], [0, 0, 1, 1], [], []>} : vector<16x32xbf16>, vector<32x64xbf16>, vector<16x64xf32> -> vector<16x64xf32>
    %149 = arith.addf %142, %148 : vector<16x64xf32>
    %150 = vector.extract_strided_slice %59 {offsets = [0, 1, 1, 0, 1, 0], sizes = [1, 4, 1, 4, 1, 32], strides = [1, 1, 1, 1, 1, 1]} : vector<1x5x2x5x2x32xbf16> to vector<1x4x1x4x1x32xbf16>
    %151 = vector.shape_cast %150 : vector<1x4x1x4x1x32xbf16> to vector<1x4x4x32xbf16>
    %152 = vector.shape_cast %151 : vector<1x4x4x32xbf16> to vector<16x32xbf16>
    %c3_106 = arith.constant 3 : index
    %c1_107 = arith.constant 1 : index
    %c0_108 = arith.constant 0 : index
    %c0_109 = arith.constant 0 : index
    %153 = vector.load %arg6[%c3_106, %c1_107, %c0_108, %c0_109] : memref<4x4x32x64xbf16, #tpu.memory_space<vmem>>, vector<1x1x32x64xbf16>
    %154 = vector.shape_cast %153 : vector<1x1x32x64xbf16> to vector<32x64xbf16>
    %cst_110 = arith.constant dense<0.000000e+00> : vector<16x64xf32>
    %155 = tpu.matmul %152, %154, %cst_110 {dimension_numbers = #tpu.dot_dimension_numbers<[1], [0], [0], [1], [0, 0, 1, 1], [], []>} : vector<16x32xbf16>, vector<32x64xbf16>, vector<16x64xf32> -> vector<16x64xf32>
    %156 = arith.addf %149, %155 : vector<16x64xf32>
    %157 = vector.extract_strided_slice %59 {offsets = [0, 1, 1, 1, 0, 0], sizes = [1, 4, 1, 4, 1, 32], strides = [1, 1, 1, 1, 1, 1]} : vector<1x5x2x5x2x32xbf16> to vector<1x4x1x4x1x32xbf16>
    %158 = vector.shape_cast %157 : vector<1x4x1x4x1x32xbf16> to vector<1x4x4x32xbf16>
    %159 = vector.shape_cast %158 : vector<1x4x4x32xbf16> to vector<16x32xbf16>
    %c3_111 = arith.constant 3 : index
    %c2_112 = arith.constant 2 : index
    %c0_113 = arith.constant 0 : index
    %c0_114 = arith.constant 0 : index
    %160 = vector.load %arg6[%c3_111, %c2_112, %c0_113, %c0_114] : memref<4x4x32x64xbf16, #tpu.memory_space<vmem>>, vector<1x1x32x64xbf16>
    %161 = vector.shape_cast %160 : vector<1x1x32x64xbf16> to vector<32x64xbf16>
    %cst_115 = arith.constant dense<0.000000e+00> : vector<16x64xf32>
    %162 = tpu.matmul %159, %161, %cst_115 {dimension_numbers = #tpu.dot_dimension_numbers<[1], [0], [0], [1], [0, 0, 1, 1], [], []>} : vector<16x32xbf16>, vector<32x64xbf16>, vector<16x64xf32> -> vector<16x64xf32>
    %163 = arith.addf %156, %162 : vector<16x64xf32>
    %164 = vector.extract_strided_slice %59 {offsets = [0, 1, 1, 1, 1, 0], sizes = [1, 4, 1, 4, 1, 32], strides = [1, 1, 1, 1, 1, 1]} : vector<1x5x2x5x2x32xbf16> to vector<1x4x1x4x1x32xbf16>
    %165 = vector.shape_cast %164 : vector<1x4x1x4x1x32xbf16> to vector<1x4x4x32xbf16>
    %166 = vector.shape_cast %165 : vector<1x4x4x32xbf16> to vector<16x32xbf16>
    %c3_116 = arith.constant 3 : index
    %c3_117 = arith.constant 3 : index
    %c0_118 = arith.constant 0 : index
    %c0_119 = arith.constant 0 : index
    %167 = vector.load %arg6[%c3_116, %c3_117, %c0_118, %c0_119] : memref<4x4x32x64xbf16, #tpu.memory_space<vmem>>, vector<1x1x32x64xbf16>
    %168 = vector.shape_cast %167 : vector<1x1x32x64xbf16> to vector<32x64xbf16>
    %cst_120 = arith.constant dense<0.000000e+00> : vector<16x64xf32>
    %169 = tpu.matmul %166, %168, %cst_120 {dimension_numbers = #tpu.dot_dimension_numbers<[1], [0], [0], [1], [0, 0, 1, 1], [], []>} : vector<16x32xbf16>, vector<32x64xbf16>, vector<16x64xf32> -> vector<16x64xf32>
    %170 = arith.addf %163, %169 : vector<16x64xf32>
    %171 = vector.shape_cast %170 : vector<16x64xf32> to vector<1x4x4x64xf32>
    %c0_121 = arith.constant 0 : index
    %c0_122 = arith.constant 0 : index
    %c0_123 = arith.constant 0 : index
    %c0_124 = arith.constant 0 : index
    %172 = vector.load %arg7[%c0_121, %c0_122, %c0_123, %c0_124] : memref<1x1x1x64xf32, #tpu.memory_space<vmem>>, vector<1x1x1x64xf32>
    %173 = vector.broadcast %172 : vector<1x1x1x64xf32> to vector<1x4x4x64xf32>
    %174 = arith.addf %171, %173 : vector<1x4x4x64xf32>
    %c0_125 = arith.constant 0 : index
    %c0_126 = arith.constant 0 : index
    %c0_127 = arith.constant 0 : index
    %c0_128 = arith.constant 0 : index
    %175 = vector.load %arg8[%c0_125, %c0_126, %c0_127, %c0_128] : memref<1x4x4x64xf32, #tpu.memory_space<vmem>>, vector<1x4x4x64xf32>
    %c0_129 = arith.constant 0 : index
    %c0_130 = arith.constant 0 : index
    %c0_131 = arith.constant 0 : index
    %c0_132 = arith.constant 0 : index
    %176 = vector.load %arg9[%c0_129, %c0_130, %c0_131, %c0_132] : memref<1x4x4x64xf32, #tpu.memory_space<vmem>>, vector<1x4x4x64xf32>
    %cst_133 = arith.constant dense<0.000000e+00> : vector<1x4x4xf32>
    %177 = vector.multi_reduction <add>, %174, %cst_133 [3] : vector<1x4x4x64xf32> to vector<1x4x4xf32>
    %178 = vector.shape_cast %177 : vector<1x4x4xf32> to vector<1x4x4x1xf32>
    %cst_134 = arith.constant dense<0.000000e+00> : vector<1x4x1xf32>
    %179 = vector.multi_reduction <add>, %178, %cst_134 [2] : vector<1x4x4x1xf32> to vector<1x4x1xf32>
    %180 = vector.shape_cast %179 : vector<1x4x1xf32> to vector<1x4x1x1xf32>
    %cst_135 = arith.constant dense<0.000000e+00> : vector<1x1x1xf32>
    %181 = vector.multi_reduction <add>, %180, %cst_135 [1] : vector<1x4x1x1xf32> to vector<1x1x1xf32>
    %182 = vector.shape_cast %181 : vector<1x1x1xf32> to vector<1x1x1x1xf32>
    %cst_136 = arith.constant 9.765625E-4 : f32
    %183 = vector.broadcast %cst_136 : f32 to vector<1x1x1x1xf32>
    %184 = arith.mulf %182, %183 : vector<1x1x1x1xf32>
    %185 = vector.broadcast %184 : vector<1x1x1x1xf32> to vector<1x4x4x64xf32>
    %186 = arith.subf %174, %185 : vector<1x4x4x64xf32>
    %187 = arith.mulf %186, %186 : vector<1x4x4x64xf32>
    %cst_137 = arith.constant dense<0.000000e+00> : vector<1x4x4xf32>
    %188 = vector.multi_reduction <add>, %187, %cst_137 [3] : vector<1x4x4x64xf32> to vector<1x4x4xf32>
    %189 = vector.shape_cast %188 : vector<1x4x4xf32> to vector<1x4x4x1xf32>
    %cst_138 = arith.constant dense<0.000000e+00> : vector<1x4x1xf32>
    %190 = vector.multi_reduction <add>, %189, %cst_138 [2] : vector<1x4x4x1xf32> to vector<1x4x1xf32>
    %191 = vector.shape_cast %190 : vector<1x4x1xf32> to vector<1x4x1x1xf32>
    %cst_139 = arith.constant dense<0.000000e+00> : vector<1x1x1xf32>
    %192 = vector.multi_reduction <add>, %191, %cst_139 [1] : vector<1x4x1x1xf32> to vector<1x1x1xf32>
    %193 = vector.shape_cast %192 : vector<1x1x1xf32> to vector<1x1x1x1xf32>
    %cst_140 = arith.constant 9.765625E-4 : f32
    %194 = vector.broadcast %cst_140 : f32 to vector<1x1x1x1xf32>
    %195 = arith.mulf %193, %194 : vector<1x1x1x1xf32>
    %cst_141 = arith.constant 9.99999974E-6 : f32
    %196 = vector.broadcast %cst_141 : f32 to vector<1x1x1x1xf32>
    %197 = arith.addf %195, %196 : vector<1x1x1x1xf32>
    %198 = math.rsqrt %197 : vector<1x1x1x1xf32>
    %199 = vector.broadcast %198 : vector<1x1x1x1xf32> to vector<1x4x4x64xf32>
    %200 = arith.mulf %186, %199 : vector<1x4x4x64xf32>
    %201 = arith.mulf %200, %175 : vector<1x4x4x64xf32>
    %202 = arith.addf %201, %176 : vector<1x4x4x64xf32>
    %cst_142 = arith.constant 0.000000e+00 : f32
    %203 = vector.broadcast %cst_142 : f32 to vector<1x4x4x64xf32>
    %204 = arith.maximumf %202, %203 : vector<1x4x4x64xf32>
    %205 = arith.truncf %204 : vector<1x4x4x64xf32> to vector<1x4x4x64xbf16>
    %206 = vector.extract_strided_slice %205 {offsets = [0, 0, 0, 0], sizes = [1, 2, 2, 64], strides = [1, 1, 1, 1]} : vector<1x4x4x64xbf16> to vector<1x2x2x64xbf16>
    %207 = vector.shape_cast %206 : vector<1x2x2x64xbf16> to vector<4x64xbf16>
    %c0_143 = arith.constant 0 : index
    %c0_144 = arith.constant 0 : index
    %c0_145 = arith.constant 0 : index
    %c0_146 = arith.constant 0 : index
    %208 = vector.load %arg10[%c0_143, %c0_144, %c0_145, %c0_146] : memref<3x3x64x64xbf16, #tpu.memory_space<vmem>>, vector<1x1x64x64xbf16>
    %209 = vector.shape_cast %208 : vector<1x1x64x64xbf16> to vector<64x64xbf16>
    %cst_147 = arith.constant dense<0.000000e+00> : vector<4x64xf32>
    %210 = tpu.matmul %207, %209, %cst_147 {dimension_numbers = #tpu.dot_dimension_numbers<[1], [0], [0], [1], [0, 0, 1, 1], [], []>} : vector<4x64xbf16>, vector<64x64xbf16>, vector<4x64xf32> -> vector<4x64xf32>
    %211 = vector.extract_strided_slice %205 {offsets = [0, 0, 1, 0], sizes = [1, 2, 2, 64], strides = [1, 1, 1, 1]} : vector<1x4x4x64xbf16> to vector<1x2x2x64xbf16>
    %212 = vector.shape_cast %211 : vector<1x2x2x64xbf16> to vector<4x64xbf16>
    %c0_148 = arith.constant 0 : index
    %c1_149 = arith.constant 1 : index
    %c0_150 = arith.constant 0 : index
    %c0_151 = arith.constant 0 : index
    %213 = vector.load %arg10[%c0_148, %c1_149, %c0_150, %c0_151] : memref<3x3x64x64xbf16, #tpu.memory_space<vmem>>, vector<1x1x64x64xbf16>
    %214 = vector.shape_cast %213 : vector<1x1x64x64xbf16> to vector<64x64xbf16>
    %cst_152 = arith.constant dense<0.000000e+00> : vector<4x64xf32>
    %215 = tpu.matmul %212, %214, %cst_152 {dimension_numbers = #tpu.dot_dimension_numbers<[1], [0], [0], [1], [0, 0, 1, 1], [], []>} : vector<4x64xbf16>, vector<64x64xbf16>, vector<4x64xf32> -> vector<4x64xf32>
    %216 = arith.addf %210, %215 : vector<4x64xf32>
    %217 = vector.extract_strided_slice %205 {offsets = [0, 0, 2, 0], sizes = [1, 2, 2, 64], strides = [1, 1, 1, 1]} : vector<1x4x4x64xbf16> to vector<1x2x2x64xbf16>
    %218 = vector.shape_cast %217 : vector<1x2x2x64xbf16> to vector<4x64xbf16>
    %c0_153 = arith.constant 0 : index
    %c2_154 = arith.constant 2 : index
    %c0_155 = arith.constant 0 : index
    %c0_156 = arith.constant 0 : index
    %219 = vector.load %arg10[%c0_153, %c2_154, %c0_155, %c0_156] : memref<3x3x64x64xbf16, #tpu.memory_space<vmem>>, vector<1x1x64x64xbf16>
    %220 = vector.shape_cast %219 : vector<1x1x64x64xbf16> to vector<64x64xbf16>
    %cst_157 = arith.constant dense<0.000000e+00> : vector<4x64xf32>
    %221 = tpu.matmul %218, %220, %cst_157 {dimension_numbers = #tpu.dot_dimension_numbers<[1], [0], [0], [1], [0, 0, 1, 1], [], []>} : vector<4x64xbf16>, vector<64x64xbf16>, vector<4x64xf32> -> vector<4x64xf32>
    %222 = arith.addf %216, %221 : vector<4x64xf32>
    %223 = vector.extract_strided_slice %205 {offsets = [0, 1, 0, 0], sizes = [1, 2, 2, 64], strides = [1, 1, 1, 1]} : vector<1x4x4x64xbf16> to vector<1x2x2x64xbf16>
    %224 = vector.shape_cast %223 : vector<1x2x2x64xbf16> to vector<4x64xbf16>
    %c1_158 = arith.constant 1 : index
    %c0_159 = arith.constant 0 : index
    %c0_160 = arith.constant 0 : index
    %c0_161 = arith.constant 0 : index
    %225 = vector.load %arg10[%c1_158, %c0_159, %c0_160, %c0_161] : memref<3x3x64x64xbf16, #tpu.memory_space<vmem>>, vector<1x1x64x64xbf16>
    %226 = vector.shape_cast %225 : vector<1x1x64x64xbf16> to vector<64x64xbf16>
    %cst_162 = arith.constant dense<0.000000e+00> : vector<4x64xf32>
    %227 = tpu.matmul %224, %226, %cst_162 {dimension_numbers = #tpu.dot_dimension_numbers<[1], [0], [0], [1], [0, 0, 1, 1], [], []>} : vector<4x64xbf16>, vector<64x64xbf16>, vector<4x64xf32> -> vector<4x64xf32>
    %228 = arith.addf %222, %227 : vector<4x64xf32>
    %229 = vector.extract_strided_slice %205 {offsets = [0, 1, 1, 0], sizes = [1, 2, 2, 64], strides = [1, 1, 1, 1]} : vector<1x4x4x64xbf16> to vector<1x2x2x64xbf16>
    %230 = vector.shape_cast %229 : vector<1x2x2x64xbf16> to vector<4x64xbf16>
    %c1_163 = arith.constant 1 : index
    %c1_164 = arith.constant 1 : index
    %c0_165 = arith.constant 0 : index
    %c0_166 = arith.constant 0 : index
    %231 = vector.load %arg10[%c1_163, %c1_164, %c0_165, %c0_166] : memref<3x3x64x64xbf16, #tpu.memory_space<vmem>>, vector<1x1x64x64xbf16>
    %232 = vector.shape_cast %231 : vector<1x1x64x64xbf16> to vector<64x64xbf16>
    %cst_167 = arith.constant dense<0.000000e+00> : vector<4x64xf32>
    %233 = tpu.matmul %230, %232, %cst_167 {dimension_numbers = #tpu.dot_dimension_numbers<[1], [0], [0], [1], [0, 0, 1, 1], [], []>} : vector<4x64xbf16>, vector<64x64xbf16>, vector<4x64xf32> -> vector<4x64xf32>
    %234 = arith.addf %228, %233 : vector<4x64xf32>
    %235 = vector.extract_strided_slice %205 {offsets = [0, 1, 2, 0], sizes = [1, 2, 2, 64], strides = [1, 1, 1, 1]} : vector<1x4x4x64xbf16> to vector<1x2x2x64xbf16>
    %236 = vector.shape_cast %235 : vector<1x2x2x64xbf16> to vector<4x64xbf16>
    %c1_168 = arith.constant 1 : index
    %c2_169 = arith.constant 2 : index
    %c0_170 = arith.constant 0 : index
    %c0_171 = arith.constant 0 : index
    %237 = vector.load %arg10[%c1_168, %c2_169, %c0_170, %c0_171] : memref<3x3x64x64xbf16, #tpu.memory_space<vmem>>, vector<1x1x64x64xbf16>
    %238 = vector.shape_cast %237 : vector<1x1x64x64xbf16> to vector<64x64xbf16>
    %cst_172 = arith.constant dense<0.000000e+00> : vector<4x64xf32>
    %239 = tpu.matmul %236, %238, %cst_172 {dimension_numbers = #tpu.dot_dimension_numbers<[1], [0], [0], [1], [0, 0, 1, 1], [], []>} : vector<4x64xbf16>, vector<64x64xbf16>, vector<4x64xf32> -> vector<4x64xf32>
    %240 = arith.addf %234, %239 : vector<4x64xf32>
    %241 = vector.extract_strided_slice %205 {offsets = [0, 2, 0, 0], sizes = [1, 2, 2, 64], strides = [1, 1, 1, 1]} : vector<1x4x4x64xbf16> to vector<1x2x2x64xbf16>
    %242 = vector.shape_cast %241 : vector<1x2x2x64xbf16> to vector<4x64xbf16>
    %c2_173 = arith.constant 2 : index
    %c0_174 = arith.constant 0 : index
    %c0_175 = arith.constant 0 : index
    %c0_176 = arith.constant 0 : index
    %243 = vector.load %arg10[%c2_173, %c0_174, %c0_175, %c0_176] : memref<3x3x64x64xbf16, #tpu.memory_space<vmem>>, vector<1x1x64x64xbf16>
    %244 = vector.shape_cast %243 : vector<1x1x64x64xbf16> to vector<64x64xbf16>
    %cst_177 = arith.constant dense<0.000000e+00> : vector<4x64xf32>
    %245 = tpu.matmul %242, %244, %cst_177 {dimension_numbers = #tpu.dot_dimension_numbers<[1], [0], [0], [1], [0, 0, 1, 1], [], []>} : vector<4x64xbf16>, vector<64x64xbf16>, vector<4x64xf32> -> vector<4x64xf32>
    %246 = arith.addf %240, %245 : vector<4x64xf32>
    %247 = vector.extract_strided_slice %205 {offsets = [0, 2, 1, 0], sizes = [1, 2, 2, 64], strides = [1, 1, 1, 1]} : vector<1x4x4x64xbf16> to vector<1x2x2x64xbf16>
    %248 = vector.shape_cast %247 : vector<1x2x2x64xbf16> to vector<4x64xbf16>
    %c2_178 = arith.constant 2 : index
    %c1_179 = arith.constant 1 : index
    %c0_180 = arith.constant 0 : index
    %c0_181 = arith.constant 0 : index
    %249 = vector.load %arg10[%c2_178, %c1_179, %c0_180, %c0_181] : memref<3x3x64x64xbf16, #tpu.memory_space<vmem>>, vector<1x1x64x64xbf16>
    %250 = vector.shape_cast %249 : vector<1x1x64x64xbf16> to vector<64x64xbf16>
    %cst_182 = arith.constant dense<0.000000e+00> : vector<4x64xf32>
    %251 = tpu.matmul %248, %250, %cst_182 {dimension_numbers = #tpu.dot_dimension_numbers<[1], [0], [0], [1], [0, 0, 1, 1], [], []>} : vector<4x64xbf16>, vector<64x64xbf16>, vector<4x64xf32> -> vector<4x64xf32>
    %252 = arith.addf %246, %251 : vector<4x64xf32>
    %253 = vector.extract_strided_slice %205 {offsets = [0, 2, 2, 0], sizes = [1, 2, 2, 64], strides = [1, 1, 1, 1]} : vector<1x4x4x64xbf16> to vector<1x2x2x64xbf16>
    %254 = vector.shape_cast %253 : vector<1x2x2x64xbf16> to vector<4x64xbf16>
    %c2_183 = arith.constant 2 : index
    %c2_184 = arith.constant 2 : index
    %c0_185 = arith.constant 0 : index
    %c0_186 = arith.constant 0 : index
    %255 = vector.load %arg10[%c2_183, %c2_184, %c0_185, %c0_186] : memref<3x3x64x64xbf16, #tpu.memory_space<vmem>>, vector<1x1x64x64xbf16>
    %256 = vector.shape_cast %255 : vector<1x1x64x64xbf16> to vector<64x64xbf16>
    %cst_187 = arith.constant dense<0.000000e+00> : vector<4x64xf32>
    %257 = tpu.matmul %254, %256, %cst_187 {dimension_numbers = #tpu.dot_dimension_numbers<[1], [0], [0], [1], [0, 0, 1, 1], [], []>} : vector<4x64xbf16>, vector<64x64xbf16>, vector<4x64xf32> -> vector<4x64xf32>
    %258 = arith.addf %252, %257 : vector<4x64xf32>
    %259 = vector.shape_cast %258 : vector<4x64xf32> to vector<1x2x2x64xf32>
    %c0_188 = arith.constant 0 : index
    %c0_189 = arith.constant 0 : index
    %c0_190 = arith.constant 0 : index
    %c0_191 = arith.constant 0 : index
    %260 = vector.load %arg11[%c0_188, %c0_189, %c0_190, %c0_191] : memref<1x1x1x64xf32, #tpu.memory_space<vmem>>, vector<1x1x1x64xf32>
    %261 = vector.broadcast %260 : vector<1x1x1x64xf32> to vector<1x2x2x64xf32>
    %262 = arith.addf %259, %261 : vector<1x2x2x64xf32>
    %c0_192 = arith.constant 0 : index
    %c0_193 = arith.constant 0 : index
    %c0_194 = arith.constant 0 : index
    %c0_195 = arith.constant 0 : index
    %263 = vector.load %arg12[%c0_192, %c0_193, %c0_194, %c0_195] : memref<1x2x2x64xf32, #tpu.memory_space<vmem>>, vector<1x2x2x64xf32>
    %c0_196 = arith.constant 0 : index
    %c0_197 = arith.constant 0 : index
    %c0_198 = arith.constant 0 : index
    %c0_199 = arith.constant 0 : index
    %264 = vector.load %arg13[%c0_196, %c0_197, %c0_198, %c0_199] : memref<1x2x2x64xf32, #tpu.memory_space<vmem>>, vector<1x2x2x64xf32>
    %cst_200 = arith.constant dense<0.000000e+00> : vector<1x2x2xf32>
    %265 = vector.multi_reduction <add>, %262, %cst_200 [3] : vector<1x2x2x64xf32> to vector<1x2x2xf32>
    %266 = vector.shape_cast %265 : vector<1x2x2xf32> to vector<1x2x2x1xf32>
    %cst_201 = arith.constant dense<0.000000e+00> : vector<1x2x1xf32>
    %267 = vector.multi_reduction <add>, %266, %cst_201 [2] : vector<1x2x2x1xf32> to vector<1x2x1xf32>
    %268 = vector.shape_cast %267 : vector<1x2x1xf32> to vector<1x2x1x1xf32>
    %cst_202 = arith.constant dense<0.000000e+00> : vector<1x1x1xf32>
    %269 = vector.multi_reduction <add>, %268, %cst_202 [1] : vector<1x2x1x1xf32> to vector<1x1x1xf32>
    %270 = vector.shape_cast %269 : vector<1x1x1xf32> to vector<1x1x1x1xf32>
    %cst_203 = arith.constant 3.906250e-03 : f32
    %271 = vector.broadcast %cst_203 : f32 to vector<1x1x1x1xf32>
    %272 = arith.mulf %270, %271 : vector<1x1x1x1xf32>
    %273 = vector.broadcast %272 : vector<1x1x1x1xf32> to vector<1x2x2x64xf32>
    %274 = arith.subf %262, %273 : vector<1x2x2x64xf32>
    %275 = arith.mulf %274, %274 : vector<1x2x2x64xf32>
    %cst_204 = arith.constant dense<0.000000e+00> : vector<1x2x2xf32>
    %276 = vector.multi_reduction <add>, %275, %cst_204 [3] : vector<1x2x2x64xf32> to vector<1x2x2xf32>
    %277 = vector.shape_cast %276 : vector<1x2x2xf32> to vector<1x2x2x1xf32>
    %cst_205 = arith.constant dense<0.000000e+00> : vector<1x2x1xf32>
    %278 = vector.multi_reduction <add>, %277, %cst_205 [2] : vector<1x2x2x1xf32> to vector<1x2x1xf32>
    %279 = vector.shape_cast %278 : vector<1x2x1xf32> to vector<1x2x1x1xf32>
    %cst_206 = arith.constant dense<0.000000e+00> : vector<1x1x1xf32>
    %280 = vector.multi_reduction <add>, %279, %cst_206 [1] : vector<1x2x1x1xf32> to vector<1x1x1xf32>
    %281 = vector.shape_cast %280 : vector<1x1x1xf32> to vector<1x1x1x1xf32>
    %cst_207 = arith.constant 3.906250e-03 : f32
    %282 = vector.broadcast %cst_207 : f32 to vector<1x1x1x1xf32>
    %283 = arith.mulf %281, %282 : vector<1x1x1x1xf32>
    %cst_208 = arith.constant 9.99999974E-6 : f32
    %284 = vector.broadcast %cst_208 : f32 to vector<1x1x1x1xf32>
    %285 = arith.addf %283, %284 : vector<1x1x1x1xf32>
    %286 = math.rsqrt %285 : vector<1x1x1x1xf32>
    %287 = vector.broadcast %286 : vector<1x1x1x1xf32> to vector<1x2x2x64xf32>
    %288 = arith.mulf %274, %287 : vector<1x2x2x64xf32>
    %289 = arith.mulf %288, %263 : vector<1x2x2x64xf32>
    %290 = arith.addf %289, %264 : vector<1x2x2x64xf32>
    %cst_209 = arith.constant 0.000000e+00 : f32
    %291 = vector.broadcast %cst_209 : f32 to vector<1x2x2x64xf32>
    %292 = arith.maximumf %290, %291 : vector<1x2x2x64xf32>
    %293 = arith.truncf %292 : vector<1x2x2x64xf32> to vector<1x2x2x64xbf16>
    %294 = vector.extract_strided_slice %293 {offsets = [0, 0, 0, 0], sizes = [1, 1, 1, 64], strides = [1, 1, 1, 1]} : vector<1x2x2x64xbf16> to vector<1x1x1x64xbf16>
    %295 = vector.shape_cast %294 : vector<1x1x1x64xbf16> to vector<1x64xbf16>
    %c0_210 = arith.constant 0 : index
    %c0_211 = arith.constant 0 : index
    %c0_212 = arith.constant 0 : index
    %c0_213 = arith.constant 0 : index
    %296 = vector.load %arg14[%c0_210, %c0_211, %c0_212, %c0_213] : memref<2x2x64x512xbf16, #tpu.memory_space<vmem>>, vector<1x1x64x512xbf16>
    %297 = vector.shape_cast %296 : vector<1x1x64x512xbf16> to vector<64x512xbf16>
    %cst_214 = arith.constant dense<0.000000e+00> : vector<1x512xf32>
    %298 = tpu.matmul %295, %297, %cst_214 {dimension_numbers = #tpu.dot_dimension_numbers<[1], [0], [0], [1], [0, 0, 1, 1], [], []>} : vector<1x64xbf16>, vector<64x512xbf16>, vector<1x512xf32> -> vector<1x512xf32>
    %299 = vector.extract_strided_slice %293 {offsets = [0, 0, 1, 0], sizes = [1, 1, 1, 64], strides = [1, 1, 1, 1]} : vector<1x2x2x64xbf16> to vector<1x1x1x64xbf16>
    %300 = vector.shape_cast %299 : vector<1x1x1x64xbf16> to vector<1x64xbf16>
    %c0_215 = arith.constant 0 : index
    %c1_216 = arith.constant 1 : index
    %c0_217 = arith.constant 0 : index
    %c0_218 = arith.constant 0 : index
    %301 = vector.load %arg14[%c0_215, %c1_216, %c0_217, %c0_218] : memref<2x2x64x512xbf16, #tpu.memory_space<vmem>>, vector<1x1x64x512xbf16>
    %302 = vector.shape_cast %301 : vector<1x1x64x512xbf16> to vector<64x512xbf16>
    %cst_219 = arith.constant dense<0.000000e+00> : vector<1x512xf32>
    %303 = tpu.matmul %300, %302, %cst_219 {dimension_numbers = #tpu.dot_dimension_numbers<[1], [0], [0], [1], [0, 0, 1, 1], [], []>} : vector<1x64xbf16>, vector<64x512xbf16>, vector<1x512xf32> -> vector<1x512xf32>
    %304 = arith.addf %298, %303 : vector<1x512xf32>
    %305 = vector.extract_strided_slice %293 {offsets = [0, 1, 0, 0], sizes = [1, 1, 1, 64], strides = [1, 1, 1, 1]} : vector<1x2x2x64xbf16> to vector<1x1x1x64xbf16>
    %306 = vector.shape_cast %305 : vector<1x1x1x64xbf16> to vector<1x64xbf16>
    %c1_220 = arith.constant 1 : index
    %c0_221 = arith.constant 0 : index
    %c0_222 = arith.constant 0 : index
    %c0_223 = arith.constant 0 : index
    %307 = vector.load %arg14[%c1_220, %c0_221, %c0_222, %c0_223] : memref<2x2x64x512xbf16, #tpu.memory_space<vmem>>, vector<1x1x64x512xbf16>
    %308 = vector.shape_cast %307 : vector<1x1x64x512xbf16> to vector<64x512xbf16>
    %cst_224 = arith.constant dense<0.000000e+00> : vector<1x512xf32>
    %309 = tpu.matmul %306, %308, %cst_224 {dimension_numbers = #tpu.dot_dimension_numbers<[1], [0], [0], [1], [0, 0, 1, 1], [], []>} : vector<1x64xbf16>, vector<64x512xbf16>, vector<1x512xf32> -> vector<1x512xf32>
    %310 = arith.addf %304, %309 : vector<1x512xf32>
    %311 = vector.extract_strided_slice %293 {offsets = [0, 1, 1, 0], sizes = [1, 1, 1, 64], strides = [1, 1, 1, 1]} : vector<1x2x2x64xbf16> to vector<1x1x1x64xbf16>
    %312 = vector.shape_cast %311 : vector<1x1x1x64xbf16> to vector<1x64xbf16>
    %c1_225 = arith.constant 1 : index
    %c1_226 = arith.constant 1 : index
    %c0_227 = arith.constant 0 : index
    %c0_228 = arith.constant 0 : index
    %313 = vector.load %arg14[%c1_225, %c1_226, %c0_227, %c0_228] : memref<2x2x64x512xbf16, #tpu.memory_space<vmem>>, vector<1x1x64x512xbf16>
    %314 = vector.shape_cast %313 : vector<1x1x64x512xbf16> to vector<64x512xbf16>
    %cst_229 = arith.constant dense<0.000000e+00> : vector<1x512xf32>
    %315 = tpu.matmul %312, %314, %cst_229 {dimension_numbers = #tpu.dot_dimension_numbers<[1], [0], [0], [1], [0, 0, 1, 1], [], []>} : vector<1x64xbf16>, vector<64x512xbf16>, vector<1x512xf32> -> vector<1x512xf32>
    %316 = arith.addf %310, %315 : vector<1x512xf32>
    %c0_230 = arith.constant 0 : index
    %c0_231 = arith.constant 0 : index
    %317 = vector.load %arg15[%c0_230, %c0_231] : memref<1x512xf32, #tpu.memory_space<vmem>>, vector<1x512xf32>
    %318 = arith.addf %316, %317 : vector<1x512xf32>
    %cst_232 = arith.constant dense<0.000000e+00> : vector<1xf32>
    %319 = vector.multi_reduction <add>, %318, %cst_232 [1] : vector<1x512xf32> to vector<1xf32>
    %320 = vector.shape_cast %319 : vector<1xf32> to vector<1x1xf32>
    %cst_233 = arith.constant 5.120000e+02 : f32
    %321 = vector.broadcast %cst_233 : f32 to vector<1x1xf32>
    %322 = arith.divf %320, %321 : vector<1x1xf32>
    %323 = vector.broadcast %322 : vector<1x1xf32> to vector<1x512xf32>
    %324 = arith.subf %318, %323 : vector<1x512xf32>
    %325 = arith.mulf %324, %324 : vector<1x512xf32>
    %cst_234 = arith.constant dense<0.000000e+00> : vector<1xf32>
    %326 = vector.multi_reduction <add>, %325, %cst_234 [1] : vector<1x512xf32> to vector<1xf32>
    %327 = vector.shape_cast %326 : vector<1xf32> to vector<1x1xf32>
    %cst_235 = arith.constant 5.120000e+02 : f32
    %328 = vector.broadcast %cst_235 : f32 to vector<1x1xf32>
    %329 = arith.divf %327, %328 : vector<1x1xf32>
    %cst_236 = arith.constant 9.99999974E-6 : f32
    %330 = vector.broadcast %cst_236 : f32 to vector<1x1xf32>
    %331 = arith.addf %329, %330 : vector<1x1xf32>
    %332 = math.rsqrt %331 : vector<1x1xf32>
    %333 = vector.broadcast %332 : vector<1x1xf32> to vector<1x512xf32>
    %334 = arith.mulf %324, %333 : vector<1x512xf32>
    %c0_237 = arith.constant 0 : index
    %c0_238 = arith.constant 0 : index
    %335 = vector.load %arg16[%c0_237, %c0_238] : memref<1x512xf32, #tpu.memory_space<vmem>>, vector<1x512xf32>
    %336 = arith.mulf %334, %335 : vector<1x512xf32>
    %c0_239 = arith.constant 0 : index
    %c0_240 = arith.constant 0 : index
    %337 = vector.load %arg17[%c0_239, %c0_240] : memref<1x512xf32, #tpu.memory_space<vmem>>, vector<1x512xf32>
    %338 = arith.addf %336, %337 : vector<1x512xf32>
    %cst_241 = arith.constant 0.000000e+00 : f32
    %339 = vector.broadcast %cst_241 : f32 to vector<1x512xf32>
    %340 = arith.maximumf %338, %339 : vector<1x512xf32>
    %341 = arith.truncf %340 : vector<1x512xf32> to vector<1x512xbf16>
    %c0_242 = arith.constant 0 : index
    %c0_243 = arith.constant 0 : index
    %342 = vector.load %arg18[%c0_242, %c0_243] : memref<512x512xbf16, #tpu.memory_space<vmem>>, vector<512x512xbf16>
    %cst_244 = arith.constant dense<0.000000e+00> : vector<1x512xf32>
    %343 = tpu.matmul %341, %342, %cst_244 {dimension_numbers = #tpu.dot_dimension_numbers<[1], [0], [0], [1], [0, 0, 1, 1], [], []>} : vector<1x512xbf16>, vector<512x512xbf16>, vector<1x512xf32> -> vector<1x512xf32>
    %c0_245 = arith.constant 0 : index
    %c0_246 = arith.constant 0 : index
    %344 = vector.load %arg19[%c0_245, %c0_246] : memref<1x512xf32, #tpu.memory_space<vmem>>, vector<1x512xf32>
    %345 = arith.addf %343, %344 : vector<1x512xf32>
    %cst_247 = arith.constant 0.000000e+00 : f32
    %346 = vector.broadcast %cst_247 : f32 to vector<1x512xf32>
    %347 = arith.maximumf %345, %346 : vector<1x512xf32>
    %348 = arith.truncf %347 : vector<1x512xf32> to vector<1x512xbf16>
    %c0_248 = arith.constant 0 : index
    %c0_249 = arith.constant 0 : index
    %349 = vector.load %arg20[%c0_248, %c0_249] : memref<512x6xbf16, #tpu.memory_space<vmem>>, vector<512x6xbf16>
    %cst_250 = arith.constant dense<0.000000e+00> : vector<1x6xf32>
    %350 = tpu.matmul %348, %349, %cst_250 {dimension_numbers = #tpu.dot_dimension_numbers<[1], [0], [0], [1], [0, 0, 1, 1], [], []>} : vector<1x512xbf16>, vector<512x6xbf16>, vector<1x6xf32> -> vector<1x6xf32>
    %c0_251 = arith.constant 0 : index
    %c0_252 = arith.constant 0 : index
    %351 = vector.load %arg21[%c0_251, %c0_252] : memref<1x6xf32, #tpu.memory_space<vmem>>, vector<1x6xf32>
    %352 = arith.addf %350, %351 : vector<1x6xf32>
    %c0_253 = arith.constant 0 : index
    %c0_254 = arith.constant 0 : index
    %c0_255 = arith.constant 0 : index
    %353 = vector.load %arg22[%c0_253, %c0_254, %c0_255] : memref<1x1x6xf32, #tpu.memory_space<vmem>>, vector<1x1x6xf32>
    %354 = vector.shape_cast %353 : vector<1x1x6xf32> to vector<1x6xf32>
    %355 = vector.shape_cast %352 : vector<1x6xf32> to vector<1x1x6xf32>
    tpu.vector_store %arg22[%c0_253, %c0_254, %c0_255], %355 {strides = array<i32>} : memref<1x1x6xf32, #tpu.memory_space<vmem>>, vector<1x1x6xf32>,
    return
  }
  func.func @transform_0(%arg0: i32) -> (i32, i32, i32, i32) {
    %c0_i32 = arith.constant 0 : i32
    %c0_i32_0 = arith.constant 0 : i32
    %c0_i32_1 = arith.constant 0 : i32
    %c0_i32_2 = arith.constant 0 : i32
    return %arg0, %c0_i32, %c0_i32_0, %c0_i32_1 : i32, i32, i32, i32
  }
  func.func @transform_1(%arg0: i32) -> (i32, i32, i32, i32) {
    %c0_i32 = arith.constant 0 : i32
    %c0_i32_0 = arith.constant 0 : i32
    %c0_i32_1 = arith.constant 0 : i32
    %c0_i32_2 = arith.constant 0 : i32
    %c0_i32_3 = arith.constant 0 : i32
    return %c0_i32, %c0_i32_0, %c0_i32_1, %c0_i32_2 : i32, i32, i32, i32
  }
  func.func @transform_2(%arg0: i32) -> (i32, i32, i32, i32) {
    %c0_i32 = arith.constant 0 : i32
    %c0_i32_0 = arith.constant 0 : i32
    %c0_i32_1 = arith.constant 0 : i32
    %c0_i32_2 = arith.constant 0 : i32
    %c0_i32_3 = arith.constant 0 : i32
    return %c0_i32, %c0_i32_0, %c0_i32_1, %c0_i32_2 : i32, i32, i32, i32
  }
  func.func @transform_3(%arg0: i32) -> (i32, i32, i32, i32) {
    %c0_i32 = arith.constant 0 : i32
    %c0_i32_0 = arith.constant 0 : i32
    %c0_i32_1 = arith.constant 0 : i32
    %c0_i32_2 = arith.constant 0 : i32
    %c0_i32_3 = arith.constant 0 : i32
    return %c0_i32, %c0_i32_0, %c0_i32_1, %c0_i32_2 : i32, i32, i32, i32
  }
  func.func @transform_4(%arg0: i32) -> (i32, i32, i32, i32) {
    %c0_i32 = arith.constant 0 : i32
    %c0_i32_0 = arith.constant 0 : i32
    %c0_i32_1 = arith.constant 0 : i32
    %c0_i32_2 = arith.constant 0 : i32
    %c0_i32_3 = arith.constant 0 : i32
    return %c0_i32, %c0_i32_0, %c0_i32_1, %c0_i32_2 : i32, i32, i32, i32
  }
  func.func @transform_5(%arg0: i32) -> (i32, i32, i32, i32) {
    %c0_i32 = arith.constant 0 : i32
    %c0_i32_0 = arith.constant 0 : i32
    %c0_i32_1 = arith.constant 0 : i32
    %c0_i32_2 = arith.constant 0 : i32
    %c0_i32_3 = arith.constant 0 : i32
    return %c0_i32, %c0_i32_0, %c0_i32_1, %c0_i32_2 : i32, i32, i32, i32
  }
  func.func @transform_6(%arg0: i32) -> (i32, i32, i32, i32) {
    %c0_i32 = arith.constant 0 : i32
    %c0_i32_0 = arith.constant 0 : i32
    %c0_i32_1 = arith.constant 0 : i32
    %c0_i32_2 = arith.constant 0 : i32
    %c0_i32_3 = arith.constant 0 : i32
    return %c0_i32, %c0_i32_0, %c0_i32_1, %c0_i32_2 : i32, i32, i32, i32
  }
  func.func @transform_7(%arg0: i32) -> (i32, i32, i32, i32) {
    %c0_i32 = arith.constant 0 : i32
    %c0_i32_0 = arith.constant 0 : i32
    %c0_i32_1 = arith.constant 0 : i32
    %c0_i32_2 = arith.constant 0 : i32
    %c0_i32_3 = arith.constant 0 : i32
    return %c0_i32, %c0_i32_0, %c0_i32_1, %c0_i32_2 : i32, i32, i32, i32
  }
  func.func @transform_8(%arg0: i32) -> (i32, i32, i32, i32) {
    %c0_i32 = arith.constant 0 : i32
    %c0_i32_0 = arith.constant 0 : i32
    %c0_i32_1 = arith.constant 0 : i32
    %c0_i32_2 = arith.constant 0 : i32
    %c0_i32_3 = arith.constant 0 : i32
    return %c0_i32, %c0_i32_0, %c0_i32_1, %c0_i32_2 : i32, i32, i32, i32
  }
  func.func @transform_9(%arg0: i32) -> (i32, i32, i32, i32) {
    %c0_i32 = arith.constant 0 : i32
    %c0_i32_0 = arith.constant 0 : i32
    %c0_i32_1 = arith.constant 0 : i32
    %c0_i32_2 = arith.constant 0 : i32
    %c0_i32_3 = arith.constant 0 : i32
    return %c0_i32, %c0_i32_0, %c0_i32_1, %c0_i32_2 : i32, i32, i32, i32
  }
  func.func @transform_10(%arg0: i32) -> (i32, i32, i32, i32) {
    %c0_i32 = arith.constant 0 : i32
    %c0_i32_0 = arith.constant 0 : i32
    %c0_i32_1 = arith.constant 0 : i32
    %c0_i32_2 = arith.constant 0 : i32
    %c0_i32_3 = arith.constant 0 : i32
    return %c0_i32, %c0_i32_0, %c0_i32_1, %c0_i32_2 : i32, i32, i32, i32
  }
  func.func @transform_11(%arg0: i32) -> (i32, i32, i32, i32) {
    %c0_i32 = arith.constant 0 : i32
    %c0_i32_0 = arith.constant 0 : i32
    %c0_i32_1 = arith.constant 0 : i32
    %c0_i32_2 = arith.constant 0 : i32
    %c0_i32_3 = arith.constant 0 : i32
    return %c0_i32, %c0_i32_0, %c0_i32_1, %c0_i32_2 : i32, i32, i32, i32
  }
  func.func @transform_12(%arg0: i32) -> (i32, i32, i32, i32) {
    %c0_i32 = arith.constant 0 : i32
    %c0_i32_0 = arith.constant 0 : i32
    %c0_i32_1 = arith.constant 0 : i32
    %c0_i32_2 = arith.constant 0 : i32
    %c0_i32_3 = arith.constant 0 : i32
    return %c0_i32, %c0_i32_0, %c0_i32_1, %c0_i32_2 : i32, i32, i32, i32
  }
  func.func @transform_13(%arg0: i32) -> (i32, i32, i32, i32) {
    %c0_i32 = arith.constant 0 : i32
    %c0_i32_0 = arith.constant 0 : i32
    %c0_i32_1 = arith.constant 0 : i32
    %c0_i32_2 = arith.constant 0 : i32
    %c0_i32_3 = arith.constant 0 : i32
    return %c0_i32, %c0_i32_0, %c0_i32_1, %c0_i32_2 : i32, i32, i32, i32
  }
  func.func @transform_14(%arg0: i32) -> (i32, i32) {
    %c0_i32 = arith.constant 0 : i32
    %c0_i32_0 = arith.constant 0 : i32
    %c0_i32_1 = arith.constant 0 : i32
    return %c0_i32, %c0_i32_0 : i32, i32
  }
  func.func @transform_15(%arg0: i32) -> (i32, i32) {
    %c0_i32 = arith.constant 0 : i32
    %c0_i32_0 = arith.constant 0 : i32
    %c0_i32_1 = arith.constant 0 : i32
    return %c0_i32, %c0_i32_0 : i32, i32
  }
  func.func @transform_16(%arg0: i32) -> (i32, i32) {
    %c0_i32 = arith.constant 0 : i32
    %c0_i32_0 = arith.constant 0 : i32
    %c0_i32_1 = arith.constant 0 : i32
    return %c0_i32, %c0_i32_0 : i32, i32
  }
  func.func @transform_17(%arg0: i32) -> (i32, i32) {
    %c0_i32 = arith.constant 0 : i32
    %c0_i32_0 = arith.constant 0 : i32
    %c0_i32_1 = arith.constant 0 : i32
    return %c0_i32, %c0_i32_0 : i32, i32
  }
  func.func @transform_18(%arg0: i32) -> (i32, i32) {
    %c0_i32 = arith.constant 0 : i32
    %c0_i32_0 = arith.constant 0 : i32
    %c0_i32_1 = arith.constant 0 : i32
    return %c0_i32, %c0_i32_0 : i32, i32
  }
  func.func @transform_19(%arg0: i32) -> (i32, i32) {
    %c0_i32 = arith.constant 0 : i32
    %c0_i32_0 = arith.constant 0 : i32
    %c0_i32_1 = arith.constant 0 : i32
    return %c0_i32, %c0_i32_0 : i32, i32
  }
  func.func @transform_20(%arg0: i32) -> (i32, i32) {
    %c0_i32 = arith.constant 0 : i32
    %c0_i32_0 = arith.constant 0 : i32
    %c0_i32_1 = arith.constant 0 : i32
    return %c0_i32, %c0_i32_0 : i32, i32
  }
  func.func @transform_21(%arg0: i32) -> (i32, i32, i32) {
    %c0_i32 = arith.constant 0 : i32
    %c0_i32_0 = arith.constant 0 : i32
    %c0_i32_1 = arith.constant 0 : i32
    return %arg0, %c0_i32, %c0_i32_0 : i32, i32, i32
  }
}

</mosaic_0001>

<bundles_post_ra>
// kernel: pqn_forward.1
= control target key start
LH: loop header
LB: loop body
LE: loop exit
PB: predicated region body
PF: predicated region fallthrough
CT: control target
= control target key end

     0   :  { %s19243_s0 = inlined_call_operand.vmem [shape: bf16[2,11,11,64], index: 0, kind: input, shape index: {}]   ;;  %s19244_s1 = inlined_call_operand.vmem [shape: bf16[2,2,64,32], index: 1, kind: input, shape index: {}]   ;;  %s19245_s2 = inlined_call_operand.vmem [shape: f32[1,1,1,32], index: 2, kind: input, shape index: {}]   ;;  %s19246_s3 = inlined_call_operand.vmem [shape: f32[1,10,10,32], index: 3, kind: input, shape index: {}]   ;;  %s19247_s4 = inlined_call_operand.vmem [shape: f32[1,10,10,32], index: 4, kind: input, shape index: {}]   ;;  %s19248_s5 = inlined_call_operand.vmem [shape: bf16[4,4,32,64], index: 5, kind: input, shape index: {}]   ;;  %s19249_s6 = inlined_call_operand.vmem [shape: f32[1,1,1,64], index: 6, kind: input, shape index: {}]   ;;  %s19250_s7 = inlined_call_operand.vmem [shape: f32[1,4,4,64], index: 7, kind: input, shape index: {}]   ;;  %s19251_s8 = inlined_call_operand.vmem [shape: f32[1,4,4,64], index: 8, kind: input, shape index: {}]   ;;  %s19252_s9 = inlined_call_operand.vmem [shape: bf16[3,3,64,64], index: 9, kind: input, shape index: {}]   ;;  %s19253_s10 = inlined_call_operand.vmem [shape: f32[1,1,1,64], index: 10, kind: input, shape index: {}]   ;;  %s19254_s11 = inlined_call_operand.vmem [shape: f32[1,2,2,64], index: 11, kind: input, shape index: {}]   ;;  %s19255_s12 = inlined_call_operand.vmem [shape: f32[1,2,2,64], index: 12, kind: input, shape index: {}]   ;;  %s19256_s13 = inlined_call_operand.vmem [shape: bf16[2,2,64,512], index: 13, kind: input, shape index: {}]   ;;  %s19257_s14 = inlined_call_operand.vmem [shape: f32[1,512], index: 14, kind: input, shape index: {}]   ;;  %s19258_s15 = inlined_call_operand.vmem [shape: f32[1,512], index: 15, kind: input, shape index: {}]   ;;  %s19259_s16 = inlined_call_operand.vmem [shape: f32[1,512], index: 16, kind: input, shape index: {}]   ;;  %s19260_s17 = inlined_call_operand.vmem [shape: bf16[512,512], index: 17, kind: input, shape index: {}]   ;;  %s19261_s18 = inlined_call_operand.vmem [shape: f32[1,512], index: 18, kind: input, shape index: {}]   ;;  %s19262_s19 = inlined_call_operand.vmem [shape: bf16[512,6], index: 19, kind: input, shape index: {}]   ;;  %s19263_s20 = inlined_call_operand.vmem [shape: f32[1,6], index: 20, kind: input, shape index: {}]   ;;  %s19264_s21 = inlined_call_operand.hbm [shape: f32[2,1,6], index: 21, kind: output, shape index: {}]  }
   0x1   :  { %19466 = sst [smem:[#allocation71_spill]] %s19243_s0 }
   0x2   :  { %19467 = sst [smem:[#allocation72_spill]] %s19244_s1 }
   0x3   :  { %19468 = sst [smem:[#allocation73_spill]] %s19245_s2 }
   0x4   :  { %19469 = sst [smem:[#allocation74_spill]] %s19246_s3 }
   0x5   :  { %19470 = sst [smem:[#allocation75_spill]] %s19247_s4 }
   0x6   :  { %19471 = sst [smem:[#allocation76_spill]] %s19248_s5 }
   0x7   :  { %19472 = sst [smem:[#allocation77_spill]] %s19249_s6 }
   0x8   :  { %19473 = sst [smem:[#allocation78_spill]] %s19250_s7 }
   0x9   :  { %19474 = sst [smem:[#allocation79_spill]] %s19251_s8 }
   0xa   :  { %26 = vsyncpa [#allocation3], 0 }
   0xb   :  { %28 = vsyncpa [#allocation3 + $0x1], 0  ;;  %s14161_s2 = smov 0   ;;  %s14163_s25 = smov 0  }
   0xc   :  { %s14165_s26 = smov 0   ;;  %s14167_s27 = smov 0  }
   0xd LB: > { %19475 = sst [smem:[#allocation5_spill]] %s14031_s2  ;;  %s14182_s3 = sadd.s32 4294967295, %s14043_s27   ;;  %s14043_s27 = sphi %s14167_s27, %s19858_s27   ;;  %s14039_s26 = sphi %s14165_s26, %s19860_s26   ;;  %s14035_s25 = sphi %s14163_s25, %s19862_s25   ;;  %s14031_s2 = sphi %s14161_s2, %s19861_s2  }
   0xe   : > { %19476 = sst [smem:[#allocation6_spill]] %s14039_s26  ;;  %s12055_s28 = sadd.s32 4294967294, %s14043_s27  }
   0xf   : > { %s14186_s29 = sadd.s32 1, %s14043_s27   ;;  %s487_s0 = sadd.s32 1, %s14039_s26 }
  0x10   : > { %19477 = sst [smem:[#allocation7_spill]] %s14186_s29  ;;  %s484_s4 = ssub.s32 %s14043_s27, %s14186_s29 }
  0x11   : > { %p497_p0 = scmp.ne.s32.totalorder %s14039_s26, %s14035_s25  ;;  %p485_p1 = scmp.eq.s32.totalorder %s484_s4, 0 }
  0x12   : > { %p498_p2 = scmp.eq.s32.totalorder %s14182_s3, 1  ;;  %p503_p3 = scmp.ne.s32.totalorder %s14035_s25, %s14031_s2 }
  0x13   : > { %p504_p4 = scmp.eq.s32.totalorder %s12055_s28, 1  ;;  %p12058_p7 = scmp.ge.s32.totalorder %s14043_s27, 1 }
  0x14   : > { %s14197_s30 = scalar_select %p485_p1, %s14039_s26, %s487_s0  }
  0x15   : > { %p14199_p5 = por %p498_p2, %p497_p0  ;;  %p14203_p6 = por %p504_p4, %p503_p3 }
  0x16   : > { %19478 = sst [smem:[#allocation8_spill]] %s14197_s30  ;;  %p590_p8 = scmp.lt.s32.totalorder %s14043_s27, 3 }
  0x17   : > { %s19480_s22 = scalar_select %p14203_p6, 1, 0 }
  0x18   : > { %p591_p9 = pnand %p12058_p7, %p590_p8 }
  0x19   : > { %19481 = sst [smem:[#allocation9_spill]] %s19480_s22 }
  0x1a   : > { %594 = sbr.rel (%p591_p9) target bundleno = 3677 (0xe5d), region = 104 }
  0x21   : > { %s19482_s24 = sld [smem:[#allocation72_spill]]  ;;  %v708_v1 = vlaneseq  ;;  %v19274_v2 = vmov 0.0   ;;  %vm14046_vm0 = vmmov 0   ;;  %p649_p10 = scmp.lt.s32.totalorder %s14182_s3, 1  ;;  %vm1165_vm1 = vsmask.f32 256 }
  0x22   : > { %12936 = vmatprep.subr.bf16.mxu0 %v19274_v2  ;;  %13080 = vmatprep.subr.bf16.mxu1 %v19274_v2  ;;  %v14047_v5 = vmov 1966171168   ;;  %vm1166_vm2 = vsmask.f32 1284  ;;  %vm1168_vm3 = vsmask.f32 2312 }
  0x23   : > { %12944 = vmatprep.mubr.msk.bf16.mxu0 %vm14046_vm0, %v19274_v2  ;;  %13084 = vmatprep.mubr.msk.bf16.mxu1 %vm14046_vm0, %v19274_v2  ;;  %s650_s4 = scalar_select %p649_p10, %s14182_s3, 1  ;;  %v14224_v4 = vshrl.u32 %v708_v1, 7  ;;  %v706_v6 = vunpack.c.l.s4 %v14047_v5  ;;  %vm1170_vm4 = vsmask.f32 3340  ;;  %vm1167_vm5 = vmor %vm1165_vm1, %vm1166_vm2  ;;  %vm1172_vm6 = vsmask.f32 4368 }
  0x24   : > { %vm1169_vm7 = vmor %vm1167_vm5, %vm1168_vm3  ;;  %vm1174_vm8 = vsmask.f32 5396  ;;  %s19484_s22 = sld [smem:[#allocation71_spill]]  ;;  %vm1176_vm10 = vsmask.f32 6424  ;;  %v19486_v23 = vmov 0 }
  0x25   : > { %19483 = vst [vmem:[#allocation10_spill] sm:$0xff] %v14224_v4  ;;  %s13504_s28 = smul.u32 88, %s650_s4  ;;  %v707_v8 = vunpack.c.0.s8 %v706_v6  ;;  %vm1171_vm9 = vmor %vm1169_vm7, %vm1170_vm4  ;;  %vm1178_vm13 = vsmask.f32 7452  ;;  %vm1932_vm1 = vcmask 523264   ;;  %vm4207_vm2 = vcmask 254976  }
  0x26   : > { %vm1173_vm11 = vmor %vm1171_vm9, %vm1172_vm6  ;;  %vm4203_vm3 = vcmask 261120   ;;  %vm4265_vm4 = vcmask 1041408   ;;  %s19649_s29 = sld [smem:[#allocation74_spill]]  ;;  %s19650_s4 = sld [smem:[#allocation75_spill]]  ;;  %vm6708_vm5 = vcmask 1041409   ;;  %vm6711_vm6 = vcmask 1042434  }
  0x27   : > { %v13549_v0 = vld [vmem:[%s19482_s24 + $0x20] sm:$0xff]   ;;  %v13550_v3 = vld [vmem:[%s19482_s24 + $0x28] sm:$0xff]   ;;  %v13551_v7 = vld [vmem:[%s19482_s24 + $0x30] sm:$0xff]   ;;  %v14240_v11 = vsub.s32 %v707_v8, %v14224_v4  ;;  %s19659_s1 = sld [smem:[#allocation76_spill]]  ;;  %vm6714_vm7 = vcmask 1043459   ;;  %vm6720_vm9 = vcmask 1045509  }
  0x28   : > { %12937 = vmatpush3.bf16.msra.mxu0 %v13549_v0  ;;  %v13552_v9 = vld [vmem:[%s19482_s24 + $0x38] sm:$0xff]   ;;  %vm1175_vm12 = vmor %vm1173_vm11, %vm1174_vm8  ;;  %vm6717_vm8 = vcmask 1044484   ;;  %vm6726_vm11 = vcmask 1047559   ;;  %s19850_s6 = sld [smem:[#allocation77_spill]]  ;;  %s19851_s7 = sld [smem:[#allocation78_spill]] }
  0x29   : > { %12938 = vmatprep.subr.bf16.mxu0 %v19274_v2  ;;  %19485 = vst [vmem:[#allocation11_spill] sm:$0xff] %v14240_v11  ;;  %vm1177_vm14 = vmor %vm1175_vm12, %vm1176_vm10  ;;  %vm6723_vm10 = vcmask 1046534   ;;  %vm8667_vm12 = vcmask 519168   ;;  %s19852_s8 = sld [smem:[#allocation79_spill]] }
  0x2a   : > { %s14236_s2 = scalar_lea.vmem %s19484_s22, %s13504_s28  ;;  %vm14260_vm15 = vmor %vm1177_vm14, %vm1178_vm13  ;;  %s19588_s28 = sld [smem:[#allocation73_spill]]  ;;  %vm8680_vm13 = vcmask 1043456   ;;  %vm10590_vm14 = vcmask 1040384  }
  0x2b   : > { %v12060_v10 = vld.sshfl [vmem:[%s14236_s2] sm:$0x33 pattern:$0x75316420]  ;;  %v19487_v23 = vsel %vm14260_vm15, 4294967295, %v19486_v23 }
  0x2c   : > { %12939 = vmatpush3.bf16.msra.mxu0 %v13550_v3  ;;  %v12061_v12 = vld.sshfl [vmem:[%s14236_s2 + $0x4] sm:$0x11 pattern:$0x75316420]  ;;  %v704_v13 = vcombine.high %v12060_v10, %v12060_v10  ;;  %v14246_v15 = vrot.slane %v12060_v10, %v14240_v11  ;;  %19488 = vst [vmem:[#allocation12_spill] sm:$0xff] %v19487_v23 }
  0x2d   : > { %12940 = vmatprep.subr.bf16.mxu0 %v19274_v2  ;;  %v12062_v14 = vld.sshfl [vmem:[%s14236_s2 + $0x8] sm:$0x33 pattern:$0x75316420]  ;;  %v14249_v16 = vrot.slane %v12061_v12, %v14240_v11  ;;  %v1085_v17 = vcombine.high %v12061_v12, %v12061_v12 }
  0x2e   : > { %v14252_v18 = vrot.slane %v704_v13, %v14240_v11  ;;  %v742_v19 = vcombine.high %v12062_v14, %v12062_v14  ;;  %v14255_v20 = vrot.slane %v12062_v14, %v14240_v11  ;;  %v719_v21 = vcombine.high %v14246_v15, %v14246_v15  ;;  %v12064_v46 = vld.sshfl [vmem:[%s14236_s2 + $0x10] sm:$0x33 pattern:$0x75316420] }
  0x2f   : > { %v1092_v22 = vrot.slane %v1085_v17, %v14240_v11  ;;  %v1181_v24 = vshrl.u32 %v14246_v15, 16  ;;  %v1210_v25 = vshll.u32 %v14249_v16, 16  ;;  %v1213_v33 = vshrl.u32 %v14249_v16, 16 }
  0x30   : > { %12941 = vmatpush3.bf16.msra.mxu0 %v13551_v7  ;;  %v720_v26 = vcombine.high %v14252_v18, %v14252_v18  ;;  %v14269_v27 = vrot.slane %v742_v19, %v14240_v11  ;;  %v14273_v28 = vcombine.high %v14255_v20, %v14255_v20  ;;  %v1186_v29 = vshll.u32 %v14252_v18, 16  ;;  %v12063_v55 = vld.sshfl [vmem:[%s14236_s2 + $0xc] sm:$0x11 pattern:$0x75316420] }
  0x31   : > { %12942 = vmatprep.subr.bf16.mxu0 %v19274_v2  ;;  %v1189_v30 = vshrl.u32 %v14252_v18, 16  ;;  %v1194_v31 = vshll.u32 %v719_v21, 16  ;;  %v1197_v32 = vshrl.u32 %v719_v21, 16  ;;  %v1218_v39 = vshll.u32 %v1092_v22, 16 }
  0x32   : > { %v14281_v34 = vcombine.high %v14269_v27, %v14269_v27  ;;  %v1188_v35 = vsel %vm14260_vm15, %v1181_v24, %v1186_v29  ;;  %v1202_v36 = vshll.u32 %v720_v26, 16  ;;  %v1205_v37 = vshrl.u32 %v720_v26, 16  ;;  %v12066_v58 = vld.sshfl [vmem:[%s14236_s2 + $0x18] sm:$0x33 pattern:$0x75316420] }
  0x33   : > { %v1196_v38 = vsel %vm14260_vm15, %v1189_v30, %v1194_v31  ;;  %v1222_v40 = vshrl.u32 %v14255_v20, 16  ;;  %v1227_v41 = vshll.u32 %v14269_v27, 16  ;;  %v1230_v44 = vshrl.u32 %v14269_v27, 16 }
  0x34   : > { %12943 = vmatpush3.bf16.msra.mxu0 %v13552_v9  ;;  %v1204_v42 = vsel %vm14260_vm15, %v1197_v32, %v1202_v36  ;;  %v1212_v43 = vsel %vm14260_vm15, %v1205_v37, %v1210_v25  ;;  %v1235_v45 = vshll.u32 %v14273_v28, 16  ;;  %v1220_v47 = vsel %vm14260_vm15, %v1213_v33, %v1218_v39  ;;  %v12065_v0 = vld.sshfl [vmem:[%s14236_s2 + $0x14] sm:$0x11 pattern:$0x75316420]  ;;  %v13553_v32 = vld [vmem:[%s19482_s24] sm:$0xff]  }
  0x35   : > { %12972 = vmatprep.subr.bf16.mxu0 %v19274_v2  ;;  %v14300_v48 = vsel %vm14260_vm15, %v1222_v40, %v1227_v41  ;;  %v1238_v49 = vshrl.u32 %v14273_v28, 16  ;;  %v1243_v50 = vshll.u32 %v14281_v34, 16  ;;  %v1599_v52 = vcombine.low %v1188_v35, %v1196_v38 }
  0x36   : > { %v14306_v51 = vsel %vm14260_vm15, %v1230_v44, %v1235_v45  ;;  %v1600_v53 = vcombine.low %v1204_v42, %v1212_v43  ;;  %v1601_v54 = vcombine.low %v1220_v47, %v14300_v48  ;;  %v780_v59 = vcombine.high %v12064_v46, %v12064_v46 }
  0x37   : > { %v14312_v56 = vsel %vm14260_vm15, %v1238_v49, %v1243_v50  ;;  %v1609_v61 = vrot.slane %v1599_v52, %v14240_v11  ;;  %v14324_v1 = vrot.slane %v12063_v55, %v14240_v11  ;;  %v14327_v3 = vrot.slane %v12064_v46, %v14240_v11  ;;  %v13554_v50 = vld [vmem:[%s19482_s24 + $0x8] sm:$0xff]  }
  0x38   : > { %v1602_v60 = vcombine.low %v14306_v51, %v14312_v56  ;;  %v1616_v62 = vrot.slane %v1600_v53, %v14240_v11  ;;  %v1623_v63 = vrot.slane %v1601_v54, %v14240_v11  ;;  %v14330_v5 = vrot.slane %v780_v59, %v14240_v11 }
  0x39   : > { %v14333_v6 = vrot.slane %v12065_v0, %v14240_v11  ;;  %v818_v9 = vcombine.high %v12066_v58, %v12066_v58  ;;  %v14337_v10 = vrot.slane %v12066_v58, %v14240_v11  ;;  %v14341_v12 = vcombine.high %v14327_v3, %v14327_v3 }
  0x3a   : > { %v1630_v7 = vrot.slane %v1602_v60, %v14240_v11  ;;  %v1631_v8 = vcombine.low %v1609_v61, %v1616_v62  ;;  %v14345_v13 = vcombine.high %v14330_v5, %v14330_v5  ;;  %v1093_v14 = vcombine.high %v12063_v55, %v12063_v55  ;;  %v12068_v61 = vld.sshfl [vmem:[%s14236_s2 + $0x20] sm:$0x33 pattern:$0x75316420] }
  0x3b   : > { %19489 = vst [vmem:[#allocation13_spill] sm:$0xff] %v14341_v12  ;;  %v1101_v17 = vcombine.high %v12065_v0, %v12065_v0  ;;  %v14349_v22 = vrot.slane %v818_v9, %v14240_v11  ;;  %v1246_v24 = vshrl.u32 %v14281_v34, 16  ;;  %v1251_v29 = vshll.u32 %v14324_v1, 16 }
  0x3c   : > { %19490 = vst [vmem:[#allocation14_spill] sm:$0xff] %v14345_v13  ;;  %v1632_v19 = vcombine.low %v1623_v63, %v1630_v7  ;;  %v1639_v21 = vrot.slane %v1631_v8, %v14240_v11  ;;  %v1100_v25 = vrot.slane %v1093_v14, %v14240_v11  ;;  %v1254_v30 = vshrl.u32 %v14324_v1, 16  ;;  %v12067_v9 = vld.sshfl [vmem:[%s14236_s2 + $0x1c] sm:$0x11 pattern:$0x75316420] }
  0x3d   : > { %v1108_v26 = vrot.slane %v1101_v17, %v14240_v11  ;;  %v1263_v33 = vshrl.u32 %v14327_v3, 16  ;;  %v1268_v35 = vshll.u32 %v14330_v5, 16  ;;  %v1271_v36 = vshrl.u32 %v14330_v5, 16 }
  0x3e   : > { %v1646_v31 = vrot.slane %v1632_v19, %v14240_v11  ;;  %v14365_v37 = vsel %vm14260_vm15, %v1246_v24, %v1251_v29  ;;  %v1259_v38 = vshll.u32 %v1100_v25, 16  ;;  %v1276_v39 = vshll.u32 %v14341_v12, 16  ;;  %v14422_v14 = vld.sshfl [vmem:[%s14236_s2 + $0x24] sm:$0x11 pattern:$0x75316420] }
  0x3f   : > { %v1279_v40 = vshrl.u32 %v14341_v12, 16  ;;  %v14371_v42 = vsel %vm14260_vm15, %v1263_v33, %v1268_v35  ;;  %v1284_v43 = vshll.u32 %v14345_v13, 16  ;;  %v1287_v44 = vshrl.u32 %v14345_v13, 16  ;;  %v13555_v25 = vld [vmem:[%s19482_s24 + $0x10] sm:$0xff]  }
  0x40   : > { %v1647_v41 = vcombine.low %v1639_v21, %v1646_v31  ;;  %19491 = vst [vmem:[#allocation15_spill] sm:$0xff] %v14371_v42  ;;  %v14377_v45 = vsel %vm14260_vm15, %v1254_v30, %v1259_v38  ;;  %v14381_v46 = vsel %vm14260_vm15, %v1271_v36, %v1276_v39  ;;  %v1292_v47 = vshll.u32 %v14333_v6, 16 }
  0x41   : > { %19492 = vst [vmem:[#allocation16_spill] sm:$0xff] %v14377_v45  ;;  %19493 = vst [vmem:[#allocation17_spill] sm:$0xff] %v14381_v46  ;;  %v1295_v49 = vshrl.u32 %v14333_v6, 16  ;;  %v14391_v52 = vsel %vm14260_vm15, %v1279_v40, %v1284_v43  ;;  %v1300_v53 = vshll.u32 %v1108_v26, 16  ;;  %v1304_v54 = vshrl.u32 %v14337_v10, 16 }
  0x42   : > { %12945 = vmatmul.mubr.msk.bf16.vlgmr.msra.gmra.mrb[0].mxu0 %vm1932_vm1, %v1647_v41  ;;  %19494 = vst [vmem:[#allocation18_spill] sm:$0xff] %v14391_v52  ;;  %v1309_v55 = vshll.u32 %v14349_v22, 16  ;;  %v14399_v58 = vsel %vm14260_vm15, %v1287_v44, %v1292_v47  ;;  %v1648_v59 = vcombine.low %v14365_v37, %v14377_v45  ;;  %v1649_v60 = vcombine.low %v14371_v42, %v14381_v46  ;;  %v12077_v46 = vld.sshfl [vmem:[%s14236_s2 + $0x44] sm:$0x11 pattern:$0x75316420] }
  0x43   : > { %12973 = vmatpush3.bf16.msra.mxu0 %v13553_v32  ;;  %12948 = vmatprep.mubr.msk.bf16.mxu0 %vm14046_vm0, %v19274_v2  ;;  %19495 = vst [vmem:[#allocation19_spill] sm:$0xff] %v14399_v58  ;;  %v1312_v62 = vshrl.u32 %v14349_v22, 16  ;;  %v14409_v63 = vsel %vm14260_vm15, %v1295_v49, %v1300_v53  ;;  %v1650_v7 = vcombine.low %v14391_v52, %v14399_v58  ;;  %v13556_v53 = vld [vmem:[%s19482_s24 + $0x18] sm:$0xff]  }
  0x44   : > { %19496 = vst [vmem:[#allocation20_spill] sm:$0xff] %v14409_v63  ;;  %v14413_v0 = vsel %vm14260_vm15, %v1304_v54, %v1309_v55  ;;  %12974 = vmatprep.subr.bf16.mxu0 %v19274_v2  ;;  %v1658_v19 = vrot.slane %v1648_v59, %v14240_v11  ;;  %v1665_v21 = vrot.slane %v1649_v60, %v14240_v11  ;;  %v12079_v42 = vld.sshfl [vmem:[%s14236_s2 + $0x4c] sm:$0x11 pattern:$0x75316420] }
  0x45   : > { %19497 = vst [vmem:[#allocation21_spill] sm:$0xff] %v14413_v0  ;;  %v1651_v17 = vcombine.low %v14409_v63, %v14413_v0  ;;  %v1672_v26 = vrot.slane %v1650_v7, %v14240_v11  ;;  %v14438_v30 = vcombine.high %v14337_v10, %v14337_v10  ;;  %v14443_v33 = vcombine.high %v14349_v22, %v14349_v22 }
  0x46   : > { %v1680_v32 = vcombine.low %v1658_v19, %v1665_v21  ;;  %v14446_v35 = vrot.slane %v12067_v9, %v14240_v11  ;;  %v856_v36 = vcombine.high %v12068_v61, %v12068_v61  ;;  %v14449_v38 = vrot.slane %v12068_v61, %v14240_v11  ;;  %v12070_v19 = vld.sshfl [vmem:[%s14236_s2 + $0x28] sm:$0x33 pattern:$0x75316420] }
  0x47   : > { %v1679_v31 = vrot.slane %v1651_v17, %v14240_v11  ;;  %12975 = vmatpush3.bf16.msra.mxu0 %v13554_v50  ;;  %v14455_v41 = vrot.slane %v14422_v14, %v14240_v11  ;;  %v1109_v43 = vcombine.high %v12067_v9, %v12067_v9  ;;  %v1317_v49 = vshll.u32 %v14438_v30, 16 }
  0x48   : > { %12976 = vmatprep.subr.bf16.mxu0 %v19274_v2  ;;  %v1688_v40 = vrot.slane %v1680_v32, %v14240_v11  ;;  %v14458_v44 = vrot.slane %v856_v36, %v14240_v11  ;;  %v14462_v47 = vcombine.high %v14449_v38, %v14449_v38  ;;  %v1320_v50 = vshrl.u32 %v14438_v30, 16 }
  0x49   : > { %v1681_v39 = vcombine.low %v1672_v26, %v1679_v31  ;;  %v1116_v55 = vrot.slane %v1109_v43, %v14240_v11  ;;  %v1325_v59 = vshll.u32 %v14443_v33, 16  ;;  %v1328_v60 = vshrl.u32 %v14443_v33, 16 }
  0x4a   : > { %19498 = vst [vmem:[#allocation22_spill] sm:$0xff] %v14462_v47  ;;  %v14475_v61 = vcombine.high %v14458_v44, %v14458_v44  ;;  %v14479_v7 = vsel %vm14260_vm15, %v1312_v62, %v1317_v49  ;;  %v1333_v9 = vshll.u32 %v14446_v35, 16  ;;  %v1336_v17 = vshrl.u32 %v14446_v35, 16 }
  0x4b   : > { %v1695_v54 = vrot.slane %v1681_v39, %v14240_v11  ;;  %12977 = vmatpush3.bf16.msra.mxu0 %v13555_v25  ;;  %19500 = vst [vmem:[#allocation24_spill] sm:$0xff] %v14479_v7  ;;  %v14487_v25 = vsel %vm14260_vm15, %v1320_v50, %v1325_v59  ;;  %v1341_v26 = vshll.u32 %v1116_v55, 16  ;;  %v1345_v31 = vshrl.u32 %v14449_v38, 16 }
  0x4c   : > { %19499 = vst [vmem:[#allocation23_spill] sm:$0xff] %v14475_v61  ;;  %12978 = vmatprep.subr.bf16.mxu0 %v19274_v2  ;;  %19501 = vst [vmem:[#allocation25_spill] sm:$0xff] %v14487_v25  ;;  %v14492_v62 = vsel %vm14260_vm15, %v1328_v60, %v1333_v9  ;;  %v1350_v32 = vshll.u32 %v14458_v44, 16  ;;  %v1353_v36 = vshrl.u32 %v14458_v44, 16  ;;  %v1358_v39 = vshll.u32 %v14462_v47, 16 }
  0x4d   : > { %v1696_v21 = vcombine.low %v1688_v40, %v1695_v54  ;;  %19502 = vst [vmem:[#allocation26_spill] sm:$0xff] %v14492_v62  ;;  %v14500_v40 = vsel %vm14260_vm15, %v1336_v17, %v1341_v26  ;;  %v1361_v43 = vshrl.u32 %v14462_v47, 16  ;;  %v1366_v49 = vshll.u32 %v14475_v61, 16 }
  0x4e   : > { %19503 = vst [vmem:[#allocation27_spill] sm:$0xff] %v14500_v40  ;;  %v1369_v50 = vshrl.u32 %v14475_v61, 16  ;;  %v12071_v54 = vld.sshfl [vmem:[%s14236_s2 + $0x2c] sm:$0x11 pattern:$0x75316420]  ;;  %v14511_v59 = vsel %vm14260_vm15, %v1345_v31, %v1350_v32  ;;  %v14515_v60 = vsel %vm14260_vm15, %v1353_v36, %v1358_v39  ;;  %v1697_v17 = vcombine.low %v14479_v7, %v14487_v25 }
  0x4f   : > { %12949 = vmatmul.mubr.msk.bf16.gmra.mrb[4].mxu0 %vm1932_vm1, %v1696_v21  ;;  %v12072_v55 = vld.sshfl [vmem:[%s14236_s2 + $0x30] sm:$0x33 pattern:$0x75316420]  ;;  %19504 = vst [vmem:[#allocation28_spill] sm:$0xff] %v14511_v59  ;;  %19505 = vst [vmem:[#allocation29_spill] sm:$0xff] %v14515_v60  ;;  %v14522_v21 = vsel %vm14260_vm15, %v1361_v43, %v1366_v49  ;;  %v1698_v26 = vcombine.low %v14492_v62, %v14500_v40  ;;  %v1699_v31 = vcombine.low %v14511_v59, %v14515_v60 }
  0x50   : > { %12952 = vmatprep.mubr.msk.bf16.mxu0 %vm14046_vm0, %v19274_v2  ;;  %v1374_v9 = vshll.u32 %v14455_v41, 16  ;;  %12979 = vmatpush3.bf16.msra.mxu0 %v13556_v53  ;;  %19506 = vst [vmem:[#allocation30_spill] sm:$0xff] %v14522_v21  ;;  %v894_v32 = vcombine.high %v12070_v19, %v12070_v19  ;;  %v1707_v39 = vrot.slane %v1697_v17, %v14240_v11  ;;  %v12074_v59 = vld.sshfl [vmem:[%s14236_s2 + $0x38] sm:$0x33 pattern:$0x75316420] }
  0x51   : > { %13008 = vmatprep.subr.bf16.mxu0 %v19274_v2  ;;  %v14535_v53 = vrot.slane %v12070_v19, %v14240_v11  ;;  %v14538_v43 = vrot.slane %v12071_v54, %v14240_v11  ;;  %v1714_v29 = vrot.slane %v1698_v26, %v14240_v11  ;;  %v1721_v24 = vrot.slane %v1699_v31, %v14240_v11  ;;  %v12075_v7 = vld.sshfl [vmem:[%s14236_s2 + $0x3c] sm:$0x11 pattern:$0x75316420] }
  0x52   : > { %v14531_v36 = vsel %vm14260_vm15, %v1369_v50, %v1374_v9  ;;  %v14545_v8 = vrot.slane %v894_v32, %v14240_v11  ;;  %v932_v9 = vcombine.high %v12072_v55, %v12072_v55  ;;  %v14552_v19 = vrot.slane %v12072_v55, %v14240_v11  ;;  %v12076_v47 = vld.sshfl [vmem:[%s14236_s2 + $0x40] sm:$0x33 pattern:$0x75316420] }
  0x53   : > { %19507 = vst [vmem:[#allocation31_spill] sm:$0xff] %v14531_v36  ;;  %v1700_v49 = vcombine.low %v14522_v21, %v14531_v36  ;;  %v14549_v50 = vcombine.high %v14535_v53, %v14535_v53  ;;  %v1117_v17 = vcombine.high %v14422_v14, %v14422_v14  ;;  %v1729_v2 = vcombine.low %v1707_v39, %v1714_v29 }
  0x54   : > { %v14559_v26 = vcombine.high %v14545_v8, %v14545_v8  ;;  %v1125_v31 = vcombine.high %v12071_v54, %v12071_v54  ;;  %v14562_v32 = vrot.slane %v932_v9, %v14240_v11  ;;  %v14566_v4 = vcombine.high %v14552_v19, %v14552_v19 }
  0x55   : > { %v1728_v57 = vrot.slane %v1700_v49, %v14240_v11  ;;  %v1124_v55 = vrot.slane %v1117_v17, %v14240_v11  ;;  %v1377_v36 = vshrl.u32 %v14455_v41, 16  ;;  %v1737_v29 = vrot.slane %v1729_v2, %v14240_v11 }
  0x56   : > { %v1132_v39 = vrot.slane %v1125_v31, %v14240_v11  ;;  %v1386_v49 = vshrl.u32 %v14535_v53, 16  ;;  %v1391_v9 = vshll.u32 %v14545_v8, 16  ;;  %v1394_v60 = vshrl.u32 %v14545_v8, 16 }
  0x57   : > { %v1730_v14 = vcombine.low %v1721_v24, %v1728_v57  ;;  %v1382_v54 = vshll.u32 %v1124_v55, 16  ;;  %v1399_v21 = vshll.u32 %v14549_v50, 16  ;;  %v1402_v40 = vshrl.u32 %v14549_v50, 16 }
  0x58   : > { %v1407_v57 = vshll.u32 %v14559_v26, 16  ;;  %v1410_v2 = vshrl.u32 %v14559_v26, 16  ;;  %v14586_v31 = vsel %vm14260_vm15, %v1386_v49, %v1391_v9  ;;  %v1418_v0 = vshrl.u32 %v14538_v43, 16 }
  0x59   : > { %v1744_v17 = vrot.slane %v1730_v14, %v14240_v11  ;;  %v14582_v24 = vsel %vm14260_vm15, %v1377_v36, %v1382_v54  ;;  %19509 = vst [vmem:[#allocation33_spill] sm:$0xff] %v14586_v31  ;;  %v14590_v55 = vsel %vm14260_vm15, %v1394_v60, %v1399_v21  ;;  %v1415_v14 = vshll.u32 %v14538_v43, 16  ;;  %v12073_v54 = vld.sshfl [vmem:[%s14236_s2 + $0x34] sm:$0x11 pattern:$0x75316420] }
  0x5a   : > { %19508 = vst [vmem:[#allocation32_spill] sm:$0xff] %v14582_v24  ;;  %19510 = vst [vmem:[#allocation34_spill] sm:$0xff] %v14590_v55  ;;  %v14596_v62 = vsel %vm14260_vm15, %v1402_v40, %v1407_v57  ;;  %v1423_v36 = vshll.u32 %v1132_v39, 16  ;;  %v1427_v9 = vshrl.u32 %v14552_v19, 16  ;;  %v1432_v60 = vshll.u32 %v14562_v32, 16 }
  0x5b   : > { %v1745_v25 = vcombine.low %v1737_v29, %v1744_v17  ;;  %19511 = vst [vmem:[#allocation35_spill] sm:$0xff] %v14596_v62  ;;  %v14602_v49 = vsel %vm14260_vm15, %v1410_v2, %v1415_v14  ;;  %v1435_v21 = vshrl.u32 %v14562_v32, 16  ;;  %v1440_v29 = vshll.u32 %v14566_v4, 16 }
  0x5c   : > { %19512 = vst [vmem:[#allocation36_spill] sm:$0xff] %v14602_v49  ;;  %v14611_v40 = vsel %vm14260_vm15, %v1418_v0, %v1423_v36  ;;  %v1746_v39 = vcombine.low %v14582_v24, %v14586_v31  ;;  %v1747_v17 = vcombine.low %v14590_v55, %v14596_v62  ;;  %v19514_v57 = vmov 0.0  }
  0x5d   : > { %12953 = vmatmul.mubr.msk.bf16.gmra.mrb[8].mxu0 %vm1932_vm1, %v1745_v25  ;;  %19513 = vst [vmem:[#allocation37_spill] sm:$0xff] %v14611_v40  ;;  %v14622_v2 = vsel %vm14260_vm15, %v1427_v9, %v1432_v60  ;;  %v1748_v25 = vcombine.low %v14602_v49, %v14611_v40  ;;  %v14628_v0 = vcombine.high %v14562_v32, %v14562_v32 }
  0x5e   : > { %12956 = vmatprep.mubr.msk.bf16.mxu0 %vm14046_vm0, %v19514_v57  ;;  %19515 = vst [vmem:[#allocation38_spill] sm:$0xff] %v14622_v2  ;;  %v14631_v14 = vrot.slane %v12073_v54, %v14240_v11  ;;  %v14635_v36 = vsel %vm14260_vm15, %v1435_v21, %v1440_v29  ;;  %v1756_v62 = vrot.slane %v1746_v39, %v14240_v11 }
  0x5f   : > { %19516 = vst [vmem:[#allocation39_spill] sm:$0xff] %v14628_v0  ;;  %19517 = vst [vmem:[#allocation40_spill] sm:$0xff] %v14635_v36  ;;  %v1763_v31 = vrot.slane %v1747_v17, %v14240_v11  ;;  %v970_v9 = vcombine.high %v12074_v59, %v12074_v59  ;;  %v1749_v60 = vcombine.low %v14622_v2, %v14635_v36 }
  0x60   : > { %v1770_v40 = vrot.slane %v1748_v25, %v14240_v11  ;;  %v14643_v49 = vrot.slane %v12074_v59, %v14240_v11  ;;  %v14646_v55 = vrot.slane %v12075_v7, %v14240_v11  ;;  %v1133_v29 = vcombine.high %v12073_v54, %v12073_v54 }
  0x61   : > { %v1778_v24 = vcombine.low %v1756_v62, %v1763_v31  ;;  %v14649_v21 = vrot.slane %v970_v9, %v14240_v11  ;;  %v1141_v39 = vcombine.high %v12075_v7, %v12075_v7  ;;  %v1777_v17 = vrot.slane %v1749_v60, %v14240_v11 }
  0x62   : > { %v14654_v36 = vcombine.high %v14643_v49, %v14643_v49  ;;  %v1443_v25 = vshrl.u32 %v14566_v4, 16  ;;  %v1448_v59 = vshll.u32 %v14628_v0, 16  ;;  %v1140_v31 = vrot.slane %v1133_v29, %v14240_v11 }
  0x63   : > { %v1786_v2 = vrot.slane %v1778_v24, %v14240_v11  ;;  %v14661_v62 = vcombine.high %v14649_v21, %v14649_v21  ;;  %v1148_v7 = vrot.slane %v1141_v39, %v14240_v11  ;;  %v1779_v54 = vcombine.low %v1770_v40, %v1777_v17 }
  0x64   : > { %v14667_v9 = vsel %vm14260_vm15, %v1443_v25, %v1448_v59  ;;  %v1451_v60 = vshrl.u32 %v14628_v0, 16  ;;  %v1456_v58 = vshll.u32 %v14631_v14, 16  ;;  %v1459_v63 = vshrl.u32 %v14631_v14, 16 }
  0x65   : > { %19518 = vst [vmem:[#allocation41_spill] sm:$0xff] %v14667_v9  ;;  %v1464_v24 = vshll.u32 %v1140_v31, 16  ;;  %v1468_v61 = vshrl.u32 %v14643_v49, 16  ;;  %v1473_v29 = vshll.u32 %v14649_v21, 16  ;;  %v1793_v40 = vrot.slane %v1779_v54, %v14240_v11 }
  0x66   : > { %v14678_v39 = vsel %vm14260_vm15, %v1451_v60, %v1456_v58  ;;  %v1476_v17 = vshrl.u32 %v14649_v21, 16  ;;  %v1481_v25 = vshll.u32 %v14654_v36, 16  ;;  %v1484_v13 = vshrl.u32 %v14654_v36, 16 }
  0x67   : > { %19519 = vst [vmem:[#allocation42_spill] sm:$0xff] %v14678_v39  ;;  %v14684_v59 = vsel %vm14260_vm15, %v1459_v63, %v1464_v24  ;;  %v14688_v31 = vsel %vm14260_vm15, %v1468_v61, %v1473_v29  ;;  %v1489_v54 = vshll.u32 %v14661_v62, 16  ;;  %v1794_v12 = vcombine.low %v1786_v2, %v1793_v40  ;;  %v12078_v63 = vld.sshfl [vmem:[%s14236_s2 + $0x48] sm:$0x33 pattern:$0x75316420] }
  0x68   : > { %19520 = vst [vmem:[#allocation43_spill] sm:$0xff] %v14684_v59  ;;  %19521 = vst [vmem:[#allocation44_spill] sm:$0xff] %v14688_v31  ;;  %v14694_v58 = vsel %vm14260_vm15, %v1476_v17, %v1481_v25  ;;  %v1492_v60 = vshrl.u32 %v14661_v62, 16  ;;  %v1497_v52 = vshll.u32 %v14646_v55, 16  ;;  %v1500_v61 = vshrl.u32 %v14646_v55, 16 }
  0x69   : > { %19522 = vst [vmem:[#allocation45_spill] sm:$0xff] %v14694_v58  ;;  %v14702_v24 = vsel %vm14260_vm15, %v1484_v13, %v1489_v54  ;;  %v1505_v29 = vshll.u32 %v1148_v7, 16  ;;  %v1795_v2 = vcombine.low %v14667_v9, %v14678_v39  ;;  %12957 = vmatmul.mubr.msk.bf16.gmra.mrb[12].mxu0 %vm1932_vm1, %v1794_v12  ;;  %v1796_v17 = vcombine.low %v14684_v59, %v14688_v31 }
  0x6a   : > { %19523 = vst [vmem:[#allocation46_spill] sm:$0xff] %v14702_v24  ;;  %v14710_v40 = vsel %vm14260_vm15, %v1492_v60, %v1497_v52  ;;  %v1797_v25 = vcombine.low %v14694_v58, %v14702_v24  ;;  %v1008_v13 = vcombine.high %v12076_v47, %v12076_v47  ;;  %12960 = vmatprep.mubr.msk.bf16.mxu0 %vm14046_vm0, %v19514_v57 }
  0x6b   : > { %19524 = vst [vmem:[#allocation47_spill] sm:$0xff] %v14710_v40  ;;  %v14720_v7 = vsel %vm14260_vm15, %v1500_v61, %v1505_v29  ;;  %v1805_v12 = vrot.slane %v1795_v2, %v14240_v11  ;;  %v14724_v54 = vrot.slane %v12076_v47, %v14240_v11  ;;  %v14727_v52 = vrot.slane %v12077_v46, %v14240_v11 }
  0x6c   : > { %19525 = vst [vmem:[#allocation48_spill] sm:$0xff] %v14720_v7  ;;  %v1798_v60 = vcombine.low %v14710_v40, %v14720_v7  ;;  %v1812_v31 = vrot.slane %v1796_v17, %v14240_v11  ;;  %v1819_v58 = vrot.slane %v1797_v25, %v14240_v11  ;;  %v14734_v39 = vrot.slane %v1008_v13, %v14240_v11 }
  0x6d   : > { %19526 = vst [vmem:[#allocation49_spill] sm:$0xff] %v14724_v54  ;;  %v14738_v61 = vcombine.high %v14724_v54, %v14724_v54  ;;  %v1046_v29 = vcombine.high %v12078_v63, %v12078_v63  ;;  %v14741_v47 = vrot.slane %v12078_v63, %v14240_v11  ;;  %v1149_v2 = vcombine.high %v12077_v46, %v12077_v46 }
  0x6e   : > { %19527 = vst [vmem:[#allocation50_spill] sm:$0xff] %v14734_v39  ;;  %v1826_v59 = vrot.slane %v1798_v60, %v14240_v11  ;;  %v1827_v9 = vcombine.low %v1805_v12, %v1812_v31  ;;  %v14746_v17 = vcombine.high %v14734_v39, %v14734_v39  ;;  %v1509_v25 = vshrl.u32 %v14724_v54, 16 }
  0x6f   : > { %19528 = vst [vmem:[#allocation51_spill] sm:$0xff] %v14738_v61  ;;  %v14750_v13 = vrot.slane %v1046_v29, %v14240_v11  ;;  %v14754_v7 = vcombine.high %v14741_v47, %v14741_v47  ;;  %v1156_v63 = vrot.slane %v1149_v2, %v14240_v11  ;;  %v1514_v46 = vshll.u32 %v14734_v39, 16 }
  0x70   : > { %19529 = vst [vmem:[#allocation52_spill] sm:$0xff] %v14746_v17  ;;  %v1828_v60 = vcombine.low %v1819_v58, %v1826_v59  ;;  %v1835_v31 = vrot.slane %v1827_v9, %v14240_v11  ;;  %v1517_v12 = vshrl.u32 %v14734_v39, 16  ;;  %v1522_v24 = vshll.u32 %v14738_v61, 16 }
  0x71   : > { %v14763_v29 = vcombine.high %v14750_v13, %v14750_v13  ;;  %v14767_v40 = vsel %vm14260_vm15, %v1509_v25, %v1514_v46  ;;  %v1525_v54 = vshrl.u32 %v14738_v61, 16  ;;  %v1530_v2 = vshll.u32 %v14746_v17, 16 }
  0x72   : > { %19530 = vst [vmem:[#allocation53_spill] sm:$0xff] %v14767_v40  ;;  %v1842_v59 = vrot.slane %v1828_v60, %v14240_v11  ;;  %v14774_v9 = vsel %vm14260_vm15, %v1517_v12, %v1522_v24  ;;  %v1533_v58 = vshrl.u32 %v14746_v17, 16  ;;  %v1538_v39 = vshll.u32 %v14727_v52, 16 }
  0x73   : > { %19531 = vst [vmem:[#allocation54_spill] sm:$0xff] %v14774_v9  ;;  %v14781_v45 = vsel %vm14260_vm15, %v1525_v54, %v1530_v2  ;;  %v1541_v25 = vshrl.u32 %v14727_v52, 16  ;;  %v1546_v46 = vshll.u32 %v1156_v63, 16  ;;  %v1550_v61 = vshrl.u32 %v14741_v47, 16 }
  0x74   : > { %19532 = vst [vmem:[#allocation55_spill] sm:$0xff] %v14781_v45  ;;  %v1843_v0 = vcombine.low %v1835_v31, %v1842_v59  ;;  %v14787_v60 = vsel %vm14260_vm15, %v1533_v58, %v1538_v39  ;;  %v1555_v24 = vshll.u32 %v14750_v13, 16  ;;  %v1558_v12 = vshrl.u32 %v14750_v13, 16 }
  0x75   : > { %19533 = vst [vmem:[#allocation56_spill] sm:$0xff] %v14787_v60  ;;  %v14793_v17 = vsel %vm14260_vm15, %v1541_v25, %v1546_v46  ;;  %v1563_v54 = vshll.u32 %v14754_v7, 16  ;;  %v1566_v2 = vshrl.u32 %v14754_v7, 16  ;;  %v1571_v63 = vshll.u32 %v14763_v29, 16 }
  0x76   : > { %19534 = vst [vmem:[#allocation57_spill] sm:$0xff] %v14793_v17  ;;  %12961 = vmatmul.mubr.msk.bf16.gmra.mrb[16].mxu0 %vm1932_vm1, %v1843_v0  ;;  %v14801_v39 = vsel %vm14260_vm15, %v1550_v61, %v1555_v24  ;;  %v1844_v31 = vcombine.low %v14767_v40, %v14774_v9  ;;  %v1845_v59 = vcombine.low %v14781_v45, %v14787_v60  ;;  %v1574_v45 = vshrl.u32 %v14763_v29, 16 }
  0x77   : > { %19535 = vst [vmem:[#allocation58_spill] sm:$0xff] %v14801_v39  ;;  %v14808_v58 = vrot.slane %v12079_v42, %v14240_v11  ;;  %12964 = vmatprep.mubr.msk.bf16.mxu0 %vm14046_vm0, %v19514_v57  ;;  %v14814_v25 = vsel %vm14260_vm15, %v1558_v12, %v1563_v54  ;;  %v14818_v0 = vsel %vm14260_vm15, %v1566_v2, %v1571_v63 }
  0x78   : > { %19536 = vst [vmem:[#allocation59_spill] sm:$0xff] %v14814_v25  ;;  %v1846_v61 = vcombine.low %v14793_v17, %v14801_v39  ;;  %v1157_v46 = vcombine.high %v12079_v42, %v12079_v42  ;;  %v1847_v24 = vcombine.low %v14814_v25, %v14818_v0  ;;  %v1854_v60 = vrot.slane %v1844_v31, %v14240_v11 }
  0x79   : > { %v1861_v9 = vrot.slane %v1845_v59, %v14240_v11  ;;  %v1579_v2 = vshll.u32 %v14808_v58, 16  ;;  %v1582_v63 = vshrl.u32 %v14808_v58, 16 }
  0x7a   : > { %v1868_v12 = vrot.slane %v1846_v61, %v14240_v11  ;;  %v1164_v54 = vrot.slane %v1157_v46, %v14240_v11  ;;  %v1875_v39 = vrot.slane %v1847_v24, %v14240_v11  ;;  %v2042_v61 = vcombine.low %v14246_v15, %v14252_v18 }
  0x7b   : > { %v1876_v42 = vcombine.low %v1854_v60, %v1861_v9  ;;  %v14834_v25 = vsel %vm14260_vm15, %v1574_v45, %v1579_v2  ;;  %v12149_v46 = vcombine.high %v14246_v15, %v14252_v18  ;;  %v2044_v45 = vcombine.low %v14249_v16, %v14255_v20 }
  0x7c   : > { %v1587_v31 = vshll.u32 %v1164_v54, 16  ;;  %v1877_v17 = vcombine.low %v1868_v12, %v1875_v39  ;;  %v3292_v9 = vcombine.low %v14818_v0, %v14834_v25  ;;  %v2045_v60 = vcombine.low %v14269_v27, %v14273_v28 }
  0x7d   : > { %v1884_v59 = vrot.slane %v1876_v42, %v14240_v11  ;;  %v2052_v15 = vrot.slane %v2042_v61, %v14240_v11  ;;  %v2059_v18 = vrot.slane %v12149_v46, %v14240_v11  ;;  %v2066_v54 = vrot.slane %v2044_v45, %v14240_v11 }
  0x7e   : > { %v14843_v40 = vsel %vm14260_vm15, %v1582_v63, %v1587_v31  ;;  %v1891_v39 = vrot.slane %v1877_v17, %v14240_v11  ;;  %v2073_v2 = vrot.slane %v2045_v60, %v14240_v11  ;;  %v2091_v28 = vcombine.low %v14281_v34, %v14324_v1 }
  0x7f   : > { %v1893_v24 = vcombine.low %v14834_v25, %v14843_v40  ;;  %v2092_v17 = vcombine.low %v14327_v3, %v14330_v5  ;;  %v2140_v63 = vcombine.low %v14349_v22, %v14438_v30  ;;  %v2074_v42 = vcombine.low %v2052_v15, %v2059_v18 }
  0x80   : > { %v1892_v12 = vcombine.low %v1884_v59, %v1891_v39  ;;  %v2141_v31 = vcombine.low %v14443_v33, %v14446_v35  ;;  %v2075_v59 = vcombine.low %v2066_v54, %v2073_v2  ;;  %v12150_v61 = vcombine.high %v14327_v3, %v14330_v5 }
  0x81   : > { %v1900_v16 = vrot.slane %v1893_v24, %v14240_v11  ;;  %v14873_v46 = vrot.slane %v2140_v63, %v14240_v11  ;;  %v2189_v34 = vcombine.low %v14455_v41, %v14535_v53  ;;  %v2094_v60 = vcombine.low %v14333_v6, %v14337_v10 }
  0x82   : > { %12965 = vmatmul.mubr.msk.bf16.gmra.mrb[20].mxu0 %vm1932_vm1, %v1892_v12  ;;  %v2101_v30 = vrot.slane %v2091_v28, %v14240_v11  ;;  %v2157_v39 = vrot.slane %v2141_v31, %v14240_v11  ;;  %v2108_v33 = vrot.slane %v2092_v17, %v14240_v11  ;;  %v2190_v24 = vcombine.low %v14545_v8, %v14549_v50 }
  0x83   : > { %12968 = vmatprep.mubr.msk.bf16.mxu0 %vm14046_vm0, %v19514_v57  ;;  %v1907_v45 = vrot.slane %v1900_v16, %v14240_v11  ;;  %v2191_v12 = vcombine.low %v14559_v26, %v14538_v43  ;;  %v2192_v15 = vcombine.low %v14552_v19, %v14562_v32  ;;  %v2082_v18 = vrot.slane %v2074_v42, %v14240_v11 }
  0x84   : > { %v2172_v54 = vcombine.low %v14873_v46, %v2157_v39  ;;  %v2199_v2 = vrot.slane %v2189_v34, %v14240_v11  ;;  %v12152_v16 = vcombine.high %v14552_v19, %v14562_v32  ;;  %v2089_v28 = vrot.slane %v2075_v59, %v14240_v11 }
  0x85   : > { %v2206_v17 = vrot.slane %v2190_v24, %v14240_v11  ;;  %v2213_v50 = vrot.slane %v2191_v12, %v14240_v11  ;;  %v2220_v26 = vrot.slane %v2192_v15, %v14240_v11  ;;  %v2115_v63 = vrot.slane %v12150_v61, %v14240_v11  ;;  %v13557_v12 = vld [vmem:[%s19482_s24 + $0x40] sm:$0xff]  }
  0x86   : > { %v2122_v42 = vrot.slane %v2094_v60, %v14240_v11  ;;  %v2239_v31 = vcombine.low %v14631_v14, %v14643_v49  ;;  %v2240_v46 = vcombine.low %v14649_v21, %v14654_v36  ;;  %v2241_v39 = vcombine.low %v14661_v62, %v14646_v55 }
  0x87   : > { %v2221_v59 = vcombine.low %v2199_v2, %v2206_v17  ;;  %v2222_v34 = vcombine.low %v2213_v50, %v2220_v26  ;;  %v2123_v24 = vcombine.low %v2101_v30, %v2108_v33  ;;  %v2142_v36 = vcombine.low %v14449_v38, %v14458_v44 }
  0x88   : > { %v2255_v61 = vrot.slane %v2239_v31, %v14240_v11  ;;  %v2262_v60 = vrot.slane %v2240_v46, %v14240_v11  ;;  %v2269_v62 = vrot.slane %v2241_v39, %v14240_v11  ;;  %v2090_v30 = vcombine.low %v2082_v18, %v2089_v28  ;;  %v13558_v46 = vld [vmem:[%s19482_s24 + $0x48] sm:$0xff]   ;;  %v13559_v39 = vld [vmem:[%s19482_s24 + $0x50] sm:$0xff]  }
  0x89   : > { %v14918_v15 = vrot.slane %v2221_v59, %v14240_v11  ;;  %v14921_v2 = vrot.slane %v2222_v34, %v14240_v11  ;;  %v2124_v33 = vcombine.low %v2115_v63, %v2122_v42  ;;  %v2131_v18 = vrot.slane %v2123_v24, %v14240_v11  ;;  %v12165_v24 = vld.sshfl [vmem:[%s14236_s2 + $0x50] sm:$0x33 pattern:$0x75316420] }
  0x8a   : > { %12969 = vmatmul.mubr.msk.bf16.gmra.mrb[24].mxu0 %vm1932_vm1, %v1907_v45  ;;  %v2248_v45 = vrot.slane %v12152_v16, %v14240_v11  ;;  %v12151_v16 = vcombine.high %v14449_v38, %v14458_v44  ;;  %v2271_v26 = vcombine.low %v2262_v60, %v2269_v62  ;;  %v2164_v63 = vrot.slane %v2142_v36, %v14240_v11  ;;  %v13560_v60 = vld [vmem:[%s19482_s24 + $0x58] sm:$0xff]  }
  0x8b   : > { %12980 = vmatprep.mubr.msk.bf16.mxu0 %vm14046_vm0, %v19514_v57  ;;  %v2237_v50 = vcombine.low %v14918_v15, %v14921_v2  ;;  %v2138_v28 = vrot.slane %v2124_v33, %v14240_v11  ;;  %v2680_v62 = vcombine.low %v14538_v43, %v14552_v19  ;;  %v2681_v43 = vcombine.low %v14562_v32, %v14566_v4  ;;  %v19540_v19 = vld [vmem:[#allocation16_spill] sm:$0xff] }
  0x8c   : > { %v2270_v17 = vcombine.low %v2248_v45, %v2255_v61  ;;  %v14935_v59 = vrot.slane %v2271_v26, %v14240_v11  ;;  %v2171_v42 = vrot.slane %v12151_v16, %v14240_v11  ;;  %v2493_v16 = vcombine.high %v12165_v24, %v12165_v24 }
  0x8d   : > { %v2139_v45 = vcombine.low %v2131_v18, %v2138_v28  ;;  %v14971_v26 = vrot.slane %v12165_v24, %v14240_v11 }
  0x8e   : > { %v14929_v31 = vrot.slane %v2270_v17, %v14240_v11  ;;  %v2173_v61 = vcombine.low %v2164_v63, %v2171_v42  ;;  %v19538_v17 = vcombine.low %v14312_v56, %v14365_v37  ;;  %v2683_v56 = vcombine.low %v14643_v49, %v14649_v21  ;;  %v19543_v42 = vld [vmem:[#allocation17_spill] sm:$0xff] }
  0x8f   : > { %v2690_v37 = vrot.slane %v2680_v62, %v14240_v11  ;;  %v12178_v63 = vcombine.high %v14643_v49, %v14649_v21  ;;  %v19546_v62 = vld [vmem:[#allocation49_spill] sm:$0xff]  ;;  %v19547_v49 = vld [vmem:[#allocation51_spill] sm:$0xff]  ;;  %v19548_v21 = vld [vmem:[#allocation50_spill] sm:$0xff] }
  0x90   : > { %v2286_v34 = vcombine.low %v14929_v31, %v14935_v59  ;;  %v2187_v36 = vrot.slane %v2173_v61, %v14240_v11  ;;  %v14994_v61 = vrot.slane %v2493_v16, %v14240_v11  ;;  %v15007_v16 = vcombine.high %v14971_v26, %v14971_v26  ;;  %v19554_v31 = vld [vmem:[#allocation55_spill] sm:$0xff]  ;;  %v19555_v59 = vld [vmem:[#allocation54_spill] sm:$0xff] }
  0x92   : > { %12981 = vmatmul.mubr.msk.bf16.vlgmr.msra.gmra.mrb[0].mxu0 %vm1932_vm1, %v2090_v30  ;;  %v19537_v30 = vcombine.low %v14300_v48, %v14306_v51  ;;  %v19539_v48 = vld [vmem:[#allocation39_spill] sm:$0xff] }
  0x93   : > { %13009 = vmatpush3.bf16.msra.mxu0 %v13557_v12  ;;  %12984 = vmatprep.mubr.msk.bf16.mxu0 %vm14046_vm0, %v19514_v57  ;;  %v2180_v12 = vrot.slane %v2172_v54, %v14240_v11  ;;  %v3063_v54 = vrot.slane %v19538_v17, %v14240_v11  ;;  %v2682_v51 = vcombine.low %v19539_v48, %v14631_v14 }
  0x94   : > { %13010 = vmatprep.subr.bf16.mxu0 %v19514_v57  ;;  %v3056_v33 = vrot.slane %v19537_v30, %v14240_v11  ;;  %v2697_v14 = vrot.slane %v2681_v43, %v14240_v11  ;;  %v2711_v30 = vrot.slane %v2683_v56, %v14240_v11  ;;  %v2730_v17 = vcombine.low %v14646_v55, %v19546_v62 }
  0x95   : > { %v2188_v24 = vcombine.low %v2180_v12, %v2187_v36  ;;  %v2731_v48 = vcombine.low %v19548_v21, %v19547_v49  ;;  %v19549_v12 = vld [vmem:[#allocation52_spill] sm:$0xff]  ;;  %v2739_v43 = vrot.slane %v12178_v63, %v14240_v11  ;;  %v12179_v63 = vcombine.high %v14741_v47, %v14750_v13 }
  0x96   : > { %v2732_v36 = vcombine.low %v19549_v12, %v14727_v52  ;;  %v2746_v55 = vrot.slane %v2730_v17, %v14240_v11 }
  0x97   : > { %13011 = vmatpush3.bf16.msra.mxu0 %v13558_v46  ;;  %v19541_v46 = vld [vmem:[#allocation15_spill] sm:$0xff]  ;;  %v2795_v17 = vrot.slane %v12179_v63, %v14240_v11 }
  0x98   : > { %13012 = vmatprep.subr.bf16.mxu0 %v19514_v57  ;;  %v19542_v18 = vcombine.low %v19540_v19, %v19541_v46  ;;  %v2712_v19 = vcombine.low %v2690_v37, %v2697_v14  ;;  %v2753_v46 = vrot.slane %v2731_v48, %v14240_v11  ;;  %v2760_v56 = vrot.slane %v2732_v36, %v14240_v11 }
  0x99   : > { %v2778_v37 = vcombine.low %v14741_v47, %v14750_v13  ;;  %v12153_v14 = vcombine.high %v19546_v62, %v19548_v21  ;;  %v2289_v36 = vcombine.low %v14727_v52, %v14741_v47  ;;  %v3002_v52 = vshll.u32 %v14994_v61, 16 }
  0x9a   : > { %12985 = vmatmul.mubr.msk.bf16.gmra.mrb[4].mxu0 %vm1932_vm1, %v2139_v45  ;;  %v3070_v28 = vrot.slane %v19542_v18, %v14240_v11  ;;  %v2704_v45 = vrot.slane %v2682_v51, %v14240_v11  ;;  %v15015_v18 = vrot.slane %v2712_v19, %v14240_v11 }
  0x9b   : > { %12988 = vmatprep.mubr.msk.bf16.mxu0 %vm14046_vm0, %v19514_v57  ;;  %13013 = vmatpush3.bf16.msra.mxu0 %v13559_v39  ;;  %v19544_v39 = vld [vmem:[#allocation18_spill] sm:$0xff] }
  0x9c   : > { %13014 = vmatprep.subr.bf16.mxu0 %v19514_v57  ;;  %v19545_v4 = vcombine.low %v19543_v42, %v19544_v39  ;;  %v2713_v51 = vcombine.low %v2704_v45, %v2711_v30  ;;  %v2761_v39 = vcombine.low %v2739_v43, %v2746_v55  ;;  %v2762_v45 = vcombine.low %v2753_v46, %v2760_v56 }
  0x9d   : > { %v2788_v30 = vrot.slane %v2778_v37, %v14240_v11  ;;  %v3078_v55 = vcombine.low %v3056_v33, %v3063_v54  ;;  %v2997_v56 = vshrl.u32 %v14971_v26, 16  ;;  %v2304_v54 = vrot.slane %v12153_v14, %v14240_v11  ;;  %v19551_v14 = vld [vmem:[#allocation46_spill] sm:$0xff] }
  0x9e   : > { %v3077_v32 = vrot.slane %v19545_v4, %v14240_v11  ;;  %v15025_v42 = vrot.slane %v2713_v51, %v14240_v11  ;;  %v2780_v4 = vcombine.low %v14808_v58, %v14971_v26  ;;  %v15038_v48 = vrot.slane %v2761_v39, %v14240_v11 }
  0x9f   : > { %13015 = vmatpush3.bf16.msra.mxu0 %v13560_v60  ;;  %v2287_v60 = vcombine.low %v19546_v62, %v19548_v21  ;;  %v2290_v62 = vcombine.low %v14750_v13, %v14754_v7  ;;  %v15047_v21 = vrot.slane %v2762_v45, %v14240_v11  ;;  %v2810_v43 = vcombine.low %v2788_v30, %v2795_v17 }
  0xa0   : > { %13044 = vmatprep.subr.bf16.mxu0 %v19514_v57  ;;  %v2728_v49 = vcombine.low %v15015_v18, %v15025_v42  ;;  %v2802_v19 = vrot.slane %v2780_v4, %v14240_v11  ;;  %v3079_v46 = vcombine.low %v3070_v28, %v3077_v32  ;;  %v15060_v7 = vrot.slane %v3078_v55, %v14240_v11 }
  0xa1   : > { %v2777_v37 = vcombine.low %v15038_v48, %v15047_v21  ;;  %v15053_v63 = vrot.slane %v2810_v43, %v14240_v11  ;;  %v2297_v33 = vrot.slane %v2287_v60, %v14240_v11  ;;  %v2311_v26 = vrot.slane %v2289_v36, %v14240_v11  ;;  %v19557_v43 = vld [vmem:[#allocation56_spill] sm:$0xff]  ;;  %v19565_v48 = vld [vmem:[#allocation19_spill] sm:$0xff] }
  0xa2   : > { %12989 = vmatmul.mubr.msk.bf16.gmra.mrb[8].mxu0 %vm1932_vm1, %v2188_v24  ;;  %v2781_v24 = vcombine.low %v14994_v61, %v15007_v16  ;;  %v15063_v13 = vrot.slane %v3079_v46, %v14240_v11  ;;  %v2318_v28 = vrot.slane %v2290_v62, %v14240_v11  ;;  %v3004_v15 = vsel %vm14260_vm15, %v2997_v56, %v3002_v52  ;;  %v19556_v62 = vld [vmem:[#allocation57_spill] sm:$0xff] }
  0xa3   : > { %12992 = vmatprep.mubr.msk.bf16.mxu0 %vm14046_vm0, %v19514_v57  ;;  %v2319_v2 = vcombine.low %v2297_v33, %v2304_v54  ;;  %v3293_v60 = vcombine.low %v14843_v40, %v3004_v15  ;;  %v2336_v4 = vcombine.low %v14763_v29, %v14808_v58  ;;  %v19552_v40 = vld [vmem:[#allocation53_spill] sm:$0xff]  ;;  %v2533_v29 = vcombine.low %v14255_v20, %v14269_v27 }
  0xa4   : > { %v2809_v12 = vrot.slane %v2781_v24, %v14240_v11  ;;  %v3094_v39 = vcombine.low %v15060_v7, %v15063_v13  ;;  %v19550_v24 = vld [vmem:[#allocation47_spill] sm:$0xff]  ;;  %v12175_v58 = vcombine.high %v14255_v20, %v14269_v27  ;;  %v3005_v52 = vshrl.u32 %v14994_v61, 16  ;;  %v19558_v54 = vld [vmem:[#allocation13_spill] sm:$0xff]  ;;  %v19585_v13 = vld [vmem:[#allocation42_spill] sm:$0xff] }
  0xa5   : > { %v3242_v45 = vcombine.low %v19551_v14, %v19550_v24  ;;  %v2327_v30 = vrot.slane %v2319_v2, %v14240_v11  ;;  %v2535_v33 = vcombine.low %v14324_v1, %v14327_v3  ;;  %v2536_v20 = vcombine.low %v14330_v5, %v19558_v54  ;;  %v19559_v14 = vld [vmem:[#allocation59_spill] sm:$0xff] }
  0xa6   : > { %v2811_v51 = vcombine.low %v2802_v19, %v2809_v12  ;;  %v15094_v19 = vcombine.high %v14994_v61, %v14994_v61  ;;  %v19553_v12 = vld [vmem:[#allocation48_spill] sm:$0xff]  ;;  %v3010_v2 = vshll.u32 %v15007_v16, 16  ;;  %v3308_v1 = vrot.slane %v3292_v9, %v14240_v11  ;;  %v19584_v7 = vld [vmem:[#allocation43_spill] sm:$0xff] }
  0xa7   : > { %v3243_v36 = vcombine.low %v19553_v12, %v19552_v40  ;;  %v3252_v46 = vrot.slane %v3242_v45, %v14240_v11  ;;  %v19560_v45 = vld [vmem:[#allocation58_spill] sm:$0xff]  ;;  %v2343_v3 = vrot.slane %v2336_v4, %v14240_v11  ;;  %v3315_v25 = vrot.slane %v3293_v60, %v14240_v11 }
  0xa8   : > { %v15057_v47 = vrot.slane %v2811_v51, %v14240_v11  ;;  %v3245_v51 = vcombine.low %v19557_v43, %v19556_v62  ;;  %v3018_v55 = vshll.u32 %v15094_v19, 16  ;;  %v3291_v61 = vcombine.low %v19560_v45, %v19559_v14  ;;  %v19561_v62 = vld [vmem:[#allocation14_spill] sm:$0xff] }
  0xa9   : > { %v3259_v56 = vrot.slane %v3243_v36, %v14240_v11  ;;  %v2543_v0 = vrot.slane %v2533_v29, %v14240_v11  ;;  %v2550_v9 = vrot.slane %v12175_v58, %v14240_v11  ;;  %v2557_v4 = vrot.slane %v2535_v33, %v14240_v11 }
  0xaa   : > { %12993 = vmatmul.mubr.msk.bf16.gmra.mrb[12].mxu0 %vm1932_vm1, %v2237_v50  ;;  %v2826_v32 = vcombine.low %v15053_v63, %v15057_v47  ;;  %v2320_v50 = vcombine.low %v2311_v26, %v2318_v28  ;;  %v3273_v26 = vrot.slane %v3245_v51, %v14240_v11  ;;  %v3301_v12 = vrot.slane %v3291_v61, %v14240_v11  ;;  %v19571_v63 = vld [vmem:[#allocation27_spill] sm:$0xff] }
  0xab   : > { %12996 = vmatprep.mubr.msk.bf16.mxu0 %vm14046_vm0, %v19514_v57  ;;  %v3274_v15 = vcombine.low %v3252_v46, %v3259_v56  ;;  %v2564_v36 = vrot.slane %v2536_v20, %v14240_v11  ;;  %v2350_v60 = vrot.slane %v2343_v3, %v14240_v11  ;;  %v2582_v29 = vcombine.low %v19561_v62, %v14333_v6  ;;  %v19567_v62 = vld [vmem:[#allocation21_spill] sm:$0xff] }
  0xac   : > { %v2334_v17 = vrot.slane %v2320_v50, %v14240_v11  ;;  %v3013_v50 = vshrl.u32 %v15007_v16, 16  ;;  %v2583_v58 = vcombine.low %v14337_v10, %v14349_v22  ;;  %v12176_v56 = vcombine.high %v14337_v10, %v14349_v22 }
  0xad   : > { %v15128_v5 = vrot.slane %v3274_v15, %v14240_v11  ;;  %v2566_v46 = vcombine.low %v2557_v4, %v2564_v36  ;;  %v2592_v6 = vrot.slane %v2582_v29, %v14240_v11  ;;  %v19563_v15 = vld [vmem:[#allocation23_spill] sm:$0xff]  ;;  %v12177_v61 = vcombine.high %v14535_v53, %v14545_v8  ;;  %v13564_v4 = vld [vmem:[%s19482_s24 + $0x78] sm:$0xff]  }
  0xae   : > { %v2335_v28 = vcombine.low %v2327_v30, %v2334_v17  ;;  %v3012_v30 = vsel %vm14260_vm15, %v3005_v52, %v3010_v2  ;;  %v3020_v16 = vsel %vm14260_vm15, %v3013_v50, %v3018_v55  ;;  %v2565_v55 = vcombine.low %v2543_v0, %v2550_v9 }
  0xaf   : > { %v3294_v40 = vcombine.low %v3012_v30, %v3020_v16  ;;  %v2585_v52 = vcombine.low %v14446_v35, %v14449_v38  ;;  %v2599_v54 = vrot.slane %v2583_v58, %v14240_v11  ;;  %v2606_v10 = vrot.slane %v12176_v56, %v14240_v11  ;;  %v13561_v35 = vld [vmem:[%s19482_s24 + $0x60] sm:$0xff]  }
  0xb0   : > { %v19562_v38 = vld [vmem:[#allocation22_spill] sm:$0xff]  ;;  %v2632_v2 = vcombine.low %v19563_v15, %v14455_v41  ;;  %v2633_v50 = vcombine.low %v14535_v53, %v14545_v8  ;;  %v13563_v8 = vld [vmem:[%s19482_s24 + $0x70] sm:$0xff]  }
  0xb1   : > { %v2613_v22 = vrot.slane %v2585_v52, %v14240_v11  ;;  %v2614_v14 = vcombine.low %v2592_v6, %v2599_v54  ;;  %v19568_v58 = vld [vmem:[#allocation26_spill] sm:$0xff] }
  0xb2   : > { %12997 = vmatmul.mubr.msk.bf16.gmra.mrb[16].mxu0 %vm1932_vm1, %v2286_v34  ;;  %v3244_v34 = vcombine.low %v19555_v59, %v19554_v31  ;;  %v3322_v59 = vrot.slane %v3294_v40, %v14240_v11  ;;  %v2655_v16 = vrot.slane %v2633_v50, %v14240_v11  ;;  %v2662_v40 = vrot.slane %v12177_v61, %v14240_v11  ;;  %v19572_v54 = vld [vmem:[#allocation30_spill] sm:$0xff] }
  0xb3   : > { %13000 = vmatprep.mubr.msk.bf16.mxu0 %vm14046_vm0, %v19514_v57  ;;  %v2615_v45 = vcombine.low %v2606_v10, %v2613_v22  ;;  %v2622_v41 = vrot.slane %v2614_v14, %v14240_v11  ;;  %v19574_v10 = vld [vmem:[#allocation32_spill] sm:$0xff]  ;;  %v19575_v22 = vld [vmem:[#allocation31_spill] sm:$0xff]  ;;  %v19576_v15 = vld [vmem:[#allocation34_spill] sm:$0xff] }
  0xb4   : > { %v3266_v27 = vrot.slane %v3244_v34, %v14240_v11  ;;  %v3323_v34 = vcombine.low %v3301_v12, %v3308_v1  ;;  %v3324_v43 = vcombine.low %v3315_v25, %v3322_v59  ;;  %v13562_v1 = vld [vmem:[%s19482_s24 + $0x68] sm:$0xff]   ;;  %v2664_v25 = vcombine.low %v2655_v16, %v2662_v40  ;;  %v12166_v59 = vld.sshfl [vmem:[%s14236_s2 + $0x54] sm:$0x11 pattern:$0x75316420]  ;;  %v19581_v40 = vld [vmem:[#allocation37_spill] sm:$0xff] }
  0xb5   : > { %v2629_v30 = vrot.slane %v2615_v45, %v14240_v11  ;;  %v19579_v14 = vld [vmem:[#allocation35_spill] sm:$0xff]  ;;  %v19580_v16 = vld [vmem:[#allocation38_spill] sm:$0xff] }
  0xb6   : > { %v3275_v24 = vcombine.low %v3266_v27, %v3273_v26  ;;  %v15155_v51 = vrot.slane %v3323_v34, %v14240_v11  ;;  %v15162_v33 = vrot.slane %v3324_v43, %v14240_v11  ;;  %v2573_v27 = vrot.slane %v2565_v55, %v14240_v11  ;;  %v19569_v43 = vld [vmem:[#allocation25_spill] sm:$0xff] }
  0xb7   : > { %v2580_v26 = vrot.slane %v2566_v46, %v14240_v11  ;;  %v2630_v53 = vcombine.low %v2622_v41, %v2629_v30  ;;  %v2678_v9 = vrot.slane %v2664_v25, %v14240_v11  ;;  %v15227_v34 = vrot.slane %v12166_v59, %v14240_v11  ;;  %v19570_v46 = vld [vmem:[#allocation28_spill] sm:$0xff] }
  0xb8   : > { %v15135_v17 = vrot.slane %v3275_v24, %v14240_v11  ;;  %v3339_v20 = vcombine.low %v15155_v51, %v15162_v33  ;;  %v3097_v55 = vcombine.low %v19569_v43, %v19568_v58  ;;  %v3098_v47 = vcombine.low %v19571_v63, %v19570_v46 }
  0xb9   : > { %v2581_v24 = vcombine.low %v2573_v27, %v2580_v26  ;;  %v2827_v18 = vcombine.low %v15094_v19, %v15227_v34  ;;  %v19573_v27 = vld [vmem:[#allocation29_spill] sm:$0xff] }
  0xba   : > { %13001 = vmatmul.mubr.msk.bf16.gmra.mrb[20].mxu0 %vm1932_vm1, %v2335_v28  ;;  %v3290_v31 = vcombine.low %v15128_v5, %v15135_v17  ;;  %v2631_v28 = vcombine.low %v14458_v44, %v19562_v38  ;;  %v2648_v44 = vrot.slane %v2632_v2, %v14240_v11  ;;  %v3119_v52 = vrot.slane %v3097_v55, %v14240_v11  ;;  %v19577_v2 = vld [vmem:[#allocation33_spill] sm:$0xff] }
  0xbb   : > { %13004 = vmatprep.mubr.msk.bf16.mxu0 %vm14046_vm0, %v19514_v57  ;;  %v2834_v42 = vrot.slane %v2827_v18, %v14240_v11  ;;  %v3126_v6 = vrot.slane %v3098_v47, %v14240_v11  ;;  %v3144_v26 = vcombine.low %v19573_v27, %v19572_v54  ;;  %v3146_v50 = vcombine.low %v19577_v2, %v19576_v15  ;;  %v19587_v18 = vld [vmem:[#allocation44_spill] sm:$0xff] }
  0xbc   : > { %v2641_v3 = vrot.slane %v2631_v28, %v14240_v11  ;;  %v2988_v47 = vcombine.high %v12166_v59, %v12166_v59  ;;  %v14048_v17 = vmov 1983009808  }
  0xbd   : > { %v3128_v28 = vcombine.low %v3119_v52, %v3126_v6  ;;  %v3154_v61 = vrot.slane %v3144_v26, %v14240_v11  ;;  %v3168_v41 = vrot.slane %v3146_v50, %v14240_v11  ;;  %v3026_v52 = vshll.u32 %v15227_v34, 16 }
  0xbe   : > { %v2663_v12 = vcombine.low %v2641_v3, %v2648_v44  ;;  %v3029_v6 = vshrl.u32 %v15227_v34, 16 }
  0xbf   : > { %v3142_v44 = vrot.slane %v3128_v28, %v14240_v11 }
  0xc0   : > { %v2671_v0 = vrot.slane %v2663_v12, %v14240_v11  ;;  %v19583_v12 = vld [vmem:[#allocation40_spill] sm:$0xff] }
  0xc2   : > { %13005 = vmatmul.mubr.msk.bf16.gmra.mrb[24].mxu0 %vm1932_vm1, %v2350_v60  ;;  %v2679_v36 = vcombine.low %v2671_v0, %v2678_v9  ;;  %v19566_v60 = vld [vmem:[#allocation24_spill] sm:$0xff] }
  0xc3   : > { %13016 = vmatprep.mubr.msk.bf16.mxu0 %vm14046_vm0, %v19514_v57  ;;  %v3096_v29 = vcombine.low %v19567_v62, %v19566_v60 }
  0xc5   : > { %v3112_v56 = vrot.slane %v3096_v29, %v14240_v11 }
  0xca   : > { %13017 = vmatmul.mubr.msk.bf16.vlgmr.msra.gmra.mrb[0].mxu0 %vm1932_vm1, %v2581_v24  ;;  %v19578_v24 = vld [vmem:[#allocation36_spill] sm:$0xff] }
  0xcb   : > { %13045 = vmatpush3.bf16.msra.mxu0 %v13561_v35  ;;  %13020 = vmatprep.mubr.msk.bf16.mxu0 %vm14046_vm0, %v19514_v57  ;;  %v3145_v35 = vcombine.low %v19575_v22, %v19574_v10  ;;  %v3147_v45 = vcombine.low %v19579_v14, %v19578_v24  ;;  %v12215_v10 = vld [vmem:[%s19588_s28] ss:$0 sm:$0xff]  ;;  %v19589_v22 = vld [vmem:[#allocation10_spill] sm:$0xff] }
  0xcc   : > { %13046 = vmatprep.subr.bf16.mxu0 %v19514_v57  ;;  %v3782_v33 = vcombine.high %v12215_v10, %v12215_v10 }
  0xcd   : > { %v3175_v30 = vrot.slane %v3147_v45, %v14240_v11 }
  0xcf   : > { %13047 = vmatpush3.bf16.msra.mxu0 %v13562_v1  ;;  %v3161_v1 = vrot.slane %v3145_v35, %v14240_v11 }
  0xd0   : > { %13048 = vmatprep.subr.bf16.mxu0 %v19514_v57 }
  0xd1   : > { %v3176_v9 = vcombine.low %v3154_v61, %v3161_v1 }
  0xd2   : > { %13021 = vmatmul.mubr.msk.bf16.gmra.mrb[4].mxu0 %vm1932_vm1, %v2630_v53  ;;  %v19582_v53 = vld [vmem:[#allocation41_spill] sm:$0xff] }
  0xd3   : > { %13024 = vmatprep.mubr.msk.bf16.mxu0 %vm14046_vm0, %v19514_v57  ;;  %13049 = vmatpush3.bf16.msra.mxu0 %v13563_v8  ;;  %v3193_v8 = vcombine.low %v19581_v40, %v19580_v16  ;;  %v3194_v25 = vcombine.low %v19583_v12, %v19582_v53 }
  0xd4   : > { %13050 = vmatprep.subr.bf16.mxu0 %v19514_v57 }
  0xd7   : > { %13051 = vmatpush3.bf16.msra.mxu0 %v13564_v4  ;;  %v3177_v4 = vcombine.low %v3168_v41, %v3175_v30 }
  0xda   : > { %13025 = vmatmul.mubr.msk.bf16.gmra.mrb[8].mxu0 %vm1932_vm1, %v2679_v36  ;;  %v19586_v36 = vld [vmem:[#allocation45_spill] sm:$0xff] }
  0xdb   : > { %13028 = vmatprep.mubr.msk.bf16.mxu0 %vm14046_vm0, %v19514_v57 }
  0xe2   : > { %13029 = vmatmul.mubr.msk.bf16.gmra.mrb[12].mxu0 %vm1932_vm1, %v2728_v49  ;;  %v19564_v49 = vld [vmem:[#allocation20_spill] sm:$0xff] }
  0xe3   : > { %13032 = vmatprep.mubr.msk.bf16.mxu0 %vm14046_vm0, %v19514_v57  ;;  %v3095_v21 = vcombine.low %v19565_v48, %v19564_v49  ;;  %v3203_v49 = vrot.slane %v3193_v8, %v14240_v11  ;;  %v3210_v48 = vrot.slane %v3194_v25, %v14240_v11 }
  0xe5   : > { %v3225_v58 = vcombine.low %v3203_v49, %v3210_v48 }
  0xe7   : > { %v3233_v55 = vrot.slane %v3225_v58, %v14240_v11 }
  0xea   : > { %13033 = vmatmul.mubr.msk.bf16.gmra.mrb[16].mxu0 %vm1932_vm1, %v2777_v37  ;;  %v2841_v37 = vrot.slane %v2834_v42, %v14240_v11  ;;  %v3196_v42 = vcombine.low %v19587_v18, %v19586_v36 }
  0xeb   : > { %13036 = vmatprep.mubr.msk.bf16.mxu0 %vm14046_vm0, %v19514_v57 }
  0xec   : > { %v3224_v62 = vrot.slane %v3196_v42, %v14240_v11 }
  0xf2   : > { %13037 = vmatmul.mubr.msk.bf16.gmra.mrb[20].mxu0 %vm1932_vm1, %v2826_v32  ;;  %v3105_v32 = vrot.slane %v3095_v21, %v14240_v11  ;;  %v3184_v21 = vrot.slane %v3176_v9, %v14240_v11 }
  0xf3   : > { %13040 = vmatprep.mubr.msk.bf16.mxu0 %vm14046_vm0, %v19514_v57 }
  0xf4   : > { %v3127_v38 = vcombine.low %v3105_v32, %v3112_v56  ;;  %v2995_v32 = vrot.slane %v2988_v47, %v14240_v11  ;;  %v3021_v56 = vshrl.u32 %v15094_v19, 16 }
  0xf6   : > { %v3135_v3 = vrot.slane %v3127_v38, %v14240_v11  ;;  %v3034_v54 = vshll.u32 %v2995_v32, 16  ;;  %v3028_v59 = vsel %vm14260_vm15, %v3021_v56, %v3026_v52 }
  0xf8   : > { %v3143_v0 = vcombine.low %v3135_v3, %v3142_v44  ;;  %v3036_v27 = vsel %vm14260_vm15, %v3029_v6, %v3034_v54 }
  0xf9   : > { %v3340_v19 = vcombine.low %v3028_v59, %v3036_v27 }
  0xfa   : > { %13041 = vmatmul.mubr.msk.bf16.gmra.mrb[24].mxu0 %vm1932_vm1, %v2841_v37  ;;  %v3191_v37 = vrot.slane %v3177_v4, %v14240_v11 }
  0xfb   : > { %13052 = vmatprep.mubr.msk.bf16.mxu0 %vm14046_vm0, %v19514_v57  ;;  %v3347_v34 = vrot.slane %v3340_v19, %v14240_v11 }
  0xfc   : > { %v3192_v29 = vcombine.low %v3184_v21, %v3191_v37 }
  0xfd   : > { %v3354_v5 = vrot.slane %v3347_v34, %v14240_v11 }
 0x102   : > { %13053 = vmatmul.mubr.msk.bf16.vlgmr.msra.gmra.mrb[0].mxu0 %vm1932_vm1, %v3094_v39  ;;  %v3195_v39 = vcombine.low %v19585_v13, %v19584_v7 }
 0x103   : > { %13056 = vmatprep.mubr.msk.bf16.mxu0 %vm14046_vm0, %v19514_v57 }
 0x104   : > { %v3217_v60 = vrot.slane %v3195_v39, %v14240_v11 }
 0x106   : > { %v3226_v43 = vcombine.low %v3217_v60, %v3224_v62 }
 0x108   : > { %v3240_v46 = vrot.slane %v3226_v43, %v14240_v11 }
 0x10a   : > { %13057 = vmatmul.mubr.msk.bf16.gmra.mrb[4].mxu0 %vm1932_vm1, %v3143_v0  ;;  %v3241_v63 = vcombine.low %v3233_v55, %v3240_v46 }
 0x10b   : > { %13060 = vmatprep.mubr.msk.bf16.mxu0 %vm14046_vm0, %v19514_v57 }
 0x112   : > { %13061 = vmatmul.mubr.msk.bf16.gmra.mrb[8].mxu0 %vm1932_vm1, %v3192_v29 }
 0x113   : > { %13064 = vmatprep.mubr.msk.bf16.mxu0 %vm14046_vm0, %v19514_v57 }
 0x11a   : > { %13065 = vmatmul.mubr.msk.bf16.gmra.mrb[12].mxu0 %vm1932_vm1, %v3241_v63 }
 0x11b   : > { %13068 = vmatprep.mubr.msk.bf16.mxu0 %vm14046_vm0, %v19514_v57 }
 0x122   : > { %13069 = vmatmul.mubr.msk.bf16.gmra.mrb[16].mxu0 %vm1932_vm1, %v3290_v31  ;;  %v3516_v31 = vunpack.c.l.s4 %v14048_v17 }
 0x123   : > { %13072 = vmatprep.mubr.msk.bf16.mxu0 %vm14046_vm0, %v19514_v57 }
 0x124   : > { %v3517_v26 = vunpack.c.0.s8 %v3516_v31 }
 0x126   : > { %v15328_v51 = vsub.s32 %v3517_v26, %v19589_v22 }
 0x128   : > { %19590 = vst [vmem:[#allocation39_spill] sm:$0xff] %v15328_v51  ;;  %v15334_v35 = vrot.slane %v3782_v33, %v15328_v51 }
 0x12a   : > { %13073 = vmatmul.mubr.msk.bf16.gmra.mrb[20].mxu0 %vm1932_vm1, %v3339_v20  ;;  %v15331_v20 = vrot.slane %v12215_v10, %v15328_v51  ;;  %v15344_v3 = vcombine.high %v15334_v35, %v15334_v35 }
 0x12b   : > { %13076 = vmatprep.mubr.msk.bf16.mxu0 %vm14046_vm0, %v19514_v57 }
 0x12c   : > { %v15339_v2 = vcombine.high %v15331_v20, %v15331_v20 }
 0x132   : > { %13077 = vmatmul.mubr.msk.bf16.gmra.mrb[24].mxu0 %vm1932_vm1, %v3354_v5 }
 0x1d5   : > { %v3434_v38 = vpop.f32.mrb[0].mxu0 }
 0x1d6   : > { %v3514_v28 = vcombine.high %v3434_v38, %v3434_v38  ;;  %v3521_v15 = vrot.slane %v3434_v38, %v15328_v51  ;;  %v13054_v50 = vpop.f32.mrb[1].mxu0 }
 0x1d7   : > { %v3437_v24 = vpop.f32.mrb[2].mxu0 }
 0x1d8   : > { %v3528_v14 = vrot.slane %v3514_v28, %v15328_v51  ;;  %v3529_v45 = vcombine.high %v3521_v15, %v3521_v15  ;;  %v3531_v61 = vcombine.high %v3437_v24, %v3437_v24  ;;  %v13055_v1 = vpop.f32.mrb[3].mxu0  ;;  %v3538_v44 = vrot.slane %v3437_v24, %v15328_v51 }
 0x1d9   : > { %v15352_v40 = vadd.f32 %v15331_v20, %v3521_v15 }
 0x1da   : > { %v3530_v41 = vcombine.high %v3528_v14, %v3528_v14  ;;  %v15348_v30 = vadd.f32 %v15339_v2, %v3529_v45  ;;  %v3545_v16 = vrot.slane %v3531_v61, %v15328_v51  ;;  %v3546_v8 = vcombine.high %v3538_v44, %v3538_v44 }
 0x1db   : > { %v15355_v53 = vadd.f32 %v15331_v20, %v3538_v44  ;;  %v15358_v12 = vadd.f32 %v15334_v35, %v3528_v14 }
 0x1dc   : > { %v3547_v25 = vcombine.high %v3545_v16, %v3545_v16  ;;  %v15361_v7 = vadd.f32 %v15339_v2, %v3545_v16  ;;  %v15364_v13 = vadd.f32 %v15344_v3, %v3530_v41  ;;  %v15367_v39 = vadd.f32 %v15331_v20, %v3546_v8 }
 0x1dd   : > { %v3442_v0 = vpop.f32.mrb[4].mxu0  ;;  %v3966_v9 = vrot.slane %v15355_v53, %v15328_v51  ;;  %v3943_v4 = vcombine.low %v15352_v40, %v15348_v30 }
 0x1de   : > { %v3548_v36 = vcombine.high %v3442_v0, %v3442_v0  ;;  %v3555_v18 = vrot.slane %v3442_v0, %v15328_v51  ;;  %v13058_v42 = vpop.f32.mrb[5].mxu0  ;;  %v3944_v49 = vcombine.low %v15358_v12, %v15364_v13  ;;  %v15377_v48 = vadd.f32 %v15334_v35, %v3547_v25 }
 0x1df   : > { %v4208_v21 = vsel %vm4207_vm2, %v3966_v9, 0.0  ;;  %v3445_v37 = vpop.f32.mrb[6].mxu0  ;;  %v3967_v60 = vcombine.low %v15367_v39, %v15361_v7  ;;  %v3951_v63 = vrot.slane %v3943_v4, %v15328_v51 }
 0x1e0   : > { %v3562_v62 = vrot.slane %v3548_v36, %v15328_v51  ;;  %v3563_v29 = vcombine.high %v3555_v18, %v3555_v18  ;;  %v15384_v58 = vadd.f32 %v15344_v3, %v3555_v18  ;;  %4209 = vadd.xlane.f32.xlu0 %v4208_v21  ;;  %v3565_v43 = vcombine.high %v3445_v37, %v3445_v37  ;;  %v13059_v55 = vpop.f32.mrb[7].mxu0 }
 0x1e1   : > { %v3572_v46 = vrot.slane %v3445_v37, %v15328_v51  ;;  %v3958_v47 = vrot.slane %v3944_v49, %v15328_v51  ;;  %v3975_v6 = vrot.slane %v3967_v60, %v15328_v51 }
 0x1e2   : > { %v3564_v32 = vcombine.high %v3562_v62, %v3562_v62  ;;  %v3968_v56 = vcombine.low %v15377_v48, %v15384_v58  ;;  %v3579_v52 = vrot.slane %v3565_v43, %v15328_v51  ;;  %v15394_v54 = vadd.f32 %v15331_v20, %v3562_v62 }
 0x1e3   : > { %v3580_v59 = vcombine.high %v3572_v46, %v3572_v46  ;;  %v3959_v27 = vcombine.low %v3951_v63, %v3958_v47  ;;  %v15397_v19 = vadd.f32 %v15331_v20, %v3563_v29  ;;  %v15407_v26 = vadd.f32 %v15334_v35, %v3572_v46 }
 0x1e4   : > { %v15400_v34 = vadd.f32 %v15339_v2, %v3564_v32  ;;  %v3581_v5 = vcombine.high %v3579_v52, %v3579_v52  ;;  %v3982_v17 = vrot.slane %v3968_v56, %v15328_v51  ;;  %v15404_v31 = vadd.f32 %v15331_v20, %v3579_v52 }
 0x1e5   : > { %19591 = vst [vmem:[#allocation16_spill] sm:$0xff] %v15397_v19  ;;  %v15410_v10 = vadd.f32 %v15344_v3, %v3580_v59  ;;  %v4204_v33 = vsel %vm4203_vm3, %v3959_v27, 0.0  ;;  %v3450_v38 = vpop.f32.mrb[8].mxu0  ;;  %v3990_v28 = vrot.slane %v15397_v19, %v15328_v51 }
 0x1e6   : > { %19592 = vst [vmem:[#allocation15_spill] sm:$0xff] %v15404_v31  ;;  %4205 = vadd.xlane.f32.xlu1 %v4204_v33  ;;  %v3582_v15 = vcombine.high %v3450_v38, %v3450_v38  ;;  %v3589_v50 = vrot.slane %v3450_v38, %v15328_v51  ;;  %v15417_v24 = vadd.f32 %v15331_v20, %v3581_v5  ;;  %v13062_v14 = vpop.f32.mrb[9].mxu0 }
 0x1e7   : > { %v3983_v45 = vcombine.low %v3975_v6, %v3982_v17  ;;  %v3992_v61 = vcombine.low %v15407_v26, %v15410_v10  ;;  %v4214_v1 = vsel %vm4207_vm2, %v3990_v28, 0.0  ;;  %v3453_v44 = vpop.f32.mrb[10].mxu0  ;;  %v4014_v41 = vrot.slane %v15404_v31, %v15328_v51 }
 0x1e8   : > { %v3991_v16 = vcombine.low %v15394_v54, %v15400_v34  ;;  %v3596_v8 = vrot.slane %v3582_v15, %v15328_v51  ;;  %v3597_v25 = vcombine.high %v3589_v50, %v3589_v50  ;;  %v15428_v0 = vadd.f32 %v15339_v2, %v3589_v50  ;;  %4215 = vadd.xlane.f32.xlu0 %v4214_v1  ;;  %v13063_v4 = vpop.f32.mrb[11].mxu0 }
 0x1e9   : > { %v3599_v9 = vcombine.high %v3453_v44, %v3453_v44  ;;  %v3606_v36 = vrot.slane %v3453_v44, %v15328_v51  ;;  %v4211_v18 = vsel %vm4203_vm3, %v3983_v45, 0.0  ;;  %v4220_v43 = vsel %vm4207_vm2, %v4014_v41, 0.0 }
 0x1ea   : > { %v3999_v42 = vrot.slane %v3991_v16, %v15328_v51  ;;  %v3598_v49 = vcombine.high %v3596_v8, %v3596_v8  ;;  %v15434_v21 = vadd.f32 %v15334_v35, %v3597_v25  ;;  %v15437_v37 = vadd.f32 %v15344_v3, %v3596_v8  ;;  %4212 = vadd.xlane.f32.xlu1 %v4211_v18 }
 0x1eb   : > { %v4015_v60 = vcombine.low %v15417_v24, %v15428_v0  ;;  %v3613_v62 = vrot.slane %v3599_v9, %v15328_v51  ;;  %v3614_v29 = vcombine.high %v3606_v36, %v3606_v36  ;;  %v4006_v55 = vrot.slane %v3992_v61, %v15328_v51 }
 0x1ec   : > { %v15445_v46 = vadd.f32 %v15331_v20, %v3606_v36  ;;  %4221 = vadd.xlane.f32.xlu0 %v4220_v43  ;;  %v15448_v63 = vadd.f32 %v15331_v20, %v3598_v49  ;;  %v4016_v47 = vcombine.low %v15434_v21, %v15437_v37 }
 0x1ed   : > { %v3615_v32 = vcombine.high %v3613_v62, %v3613_v62  ;;  %v15453_v56 = vadd.f32 %v15339_v2, %v3614_v29  ;;  %v4007_v52 = vcombine.low %v3999_v42, %v4006_v55  ;;  %v3458_v6 = vpop.f32.mrb[12].mxu0  ;;  %v4023_v59 = vrot.slane %v4015_v60, %v15328_v51 }
 0x1ee   : > { %19593 = vst [vmem:[#allocation17_spill] sm:$0xff] %v15448_v63  ;;  %v3616_v27 = vcombine.high %v3458_v6, %v3458_v6  ;;  %v3623_v5 = vrot.slane %v3458_v6, %v15328_v51  ;;  %v13066_v17 = vpop.f32.mrb[13].mxu0  ;;  %v4038_v33 = vrot.slane %v15448_v63, %v15328_v51  ;;  %v4030_v38 = vrot.slane %v4016_v47, %v15328_v51 }
 0x1ef   : > { %v15461_v28 = vadd.f32 %v15334_v35, %v3613_v62  ;;  %v15464_v15 = vadd.f32 %v15344_v3, %v3615_v32  ;;  %v4039_v50 = vcombine.low %v15445_v46, %v15453_v56  ;;  %v4217_v14 = vsel %vm4203_vm3, %v4007_v52, 0.0  ;;  %v3461_v45 = vpop.f32.mrb[14].mxu0 }
 0x1f0   : > { %4218 = vadd.xlane.f32.xlu1 %v4217_v14  ;;  %v3630_v61 = vrot.slane %v3616_v27, %v15328_v51  ;;  %v3631_v1 = vcombine.high %v3623_v5, %v3623_v5  ;;  %v15471_v44 = vadd.f32 %v15331_v20, %v3623_v5  ;;  %v3633_v41 = vcombine.high %v3461_v45, %v3461_v45  ;;  %v13067_v16 = vpop.f32.mrb[15].mxu0 }
 0x1f1   : > { %v3640_v8 = vrot.slane %v3461_v45, %v15328_v51  ;;  %v4226_v25 = vsel %vm4207_vm2, %v4038_v33, 0.0  ;;  %v4031_v9 = vcombine.low %v4023_v59, %v4030_v38  ;;  %v4040_v4 = vcombine.low %v15461_v28, %v15464_v15 }
 0x1f2   : > { %v3632_v36 = vcombine.high %v3630_v61, %v3630_v61  ;;  %v15478_v18 = vadd.f32 %v15331_v20, %v3631_v1  ;;  %v15481_v42 = vadd.f32 %v15339_v2, %v3630_v61  ;;  %v3647_v49 = vrot.slane %v3633_v41, %v15328_v51  ;;  %4227 = vadd.xlane.f32.xlu0 %v4226_v25 }
 0x1f3   : > { %v3648_v60 = vcombine.high %v3640_v8, %v3640_v8  ;;  %v4223_v62 = vsel %vm4203_vm3, %v4031_v9, 0.0  ;;  %v4062_v29 = vrot.slane %v15471_v44, %v15328_v51  ;;  %v15491_v47 = vadd.f32 %v15344_v3, %v3640_v8 }
 0x1f4   : > { %v3649_v43 = vcombine.high %v3647_v49, %v3647_v49  ;;  %v15488_v55 = vadd.f32 %v15334_v35, %v3632_v36  ;;  %4224 = vadd.xlane.f32.xlu1 %v4223_v62  ;;  %v4047_v32 = vrot.slane %v4039_v50, %v15328_v51  ;;  %v4054_v59 = vrot.slane %v4040_v4, %v15328_v51 }
 0x1f5   : > { %v4232_v52 = vsel %vm4207_vm2, %v4062_v29, 0.0  ;;  %v3466_v6 = vpop.f32.mrb[16].mxu0  ;;  %v15497_v27 = vadd.f32 %v15331_v20, %v3648_v60  ;;  %v4063_v5 = vcombine.low %v15478_v18, %v15481_v42  ;;  %v15502_v17 = vadd.f32 %v15331_v20, %v3647_v49 }
 0x1f6   : > { %v4064_v33 = vcombine.low %v15488_v55, %v15491_v47  ;;  %4233 = vadd.xlane.f32.xlu0 %v4232_v52  ;;  %v3650_v38 = vcombine.high %v3466_v6, %v3466_v6  ;;  %v3657_v50 = vrot.slane %v3466_v6, %v15328_v51  ;;  %v13070_v14 = vpop.f32.mrb[17].mxu0  ;;  %v15508_v45 = vadd.f32 %v15339_v2, %v3649_v43 }
 0x1f7   : > { %19594 = vst [vmem:[#allocation18_spill] sm:$0xff] %v15497_v27  ;;  %v4055_v61 = vcombine.low %v4047_v32, %v4054_v59  ;;  %v3469_v1 = vpop.f32.mrb[18].mxu0  ;;  %v4086_v41 = vrot.slane %v15497_v27, %v15328_v51  ;;  %v4071_v16 = vrot.slane %v4063_v5, %v15328_v51 }
 0x1f8   : > { %v3664_v8 = vrot.slane %v3650_v38, %v15328_v51  ;;  %v3665_v25 = vcombine.high %v3657_v50, %v3657_v50  ;;  %v15515_v9 = vadd.f32 %v15334_v35, %v3657_v50  ;;  %v3667_v4 = vcombine.high %v3469_v1, %v3469_v1  ;;  %v13071_v36 = vpop.f32.mrb[19].mxu0 }
 0x1f9   : > { %v4229_v49 = vsel %vm4203_vm3, %v4055_v61, 0.0  ;;  %v3674_v60 = vrot.slane %v3469_v1, %v15328_v51  ;;  %v4238_v62 = vsel %vm4207_vm2, %v4086_v41, 0.0  ;;  %v4078_v29 = vrot.slane %v4064_v33, %v15328_v51 }
 0x1fa   : > { %v3666_v43 = vcombine.high %v3664_v8, %v3664_v8  ;;  %v15522_v32 = vadd.f32 %v15344_v3, %v3665_v25  ;;  %4230 = vadd.xlane.f32.xlu1 %v4229_v49  ;;  %v3681_v52 = vrot.slane %v3667_v4, %v15328_v51  ;;  %4239 = vadd.xlane.f32.xlu0 %v4238_v62 }
 0x1fb   : > { %v3682_v6 = vcombine.high %v3674_v60, %v3674_v60  ;;  %v15526_v59 = vadd.f32 %v15339_v2, %v3674_v60  ;;  %v4079_v5 = vcombine.low %v4071_v16, %v4078_v29  ;;  %v15529_v38 = vadd.f32 %v15331_v20, %v3664_v8 }
 0x1fc   : > { %v4088_v50 = vcombine.low %v15515_v9, %v15522_v32  ;;  %v3683_v33 = vcombine.high %v3681_v52, %v3681_v52  ;;  %v15534_v14 = vadd.f32 %v15331_v20, %v3666_v43  ;;  %v15537_v61 = vadd.f32 %v15344_v3, %v3681_v52 }
 0x1fd   : > { %19595 = vst [vmem:[#allocation49_spill] sm:$0xff] %v15526_v59  ;;  %19596 = vst [vmem:[#allocation51_spill] sm:$0xff] %v15529_v38  ;;  %v15540_v1 = vadd.f32 %v15334_v35, %v3682_v6  ;;  %v4235_v41 = vsel %vm4203_vm3, %v4079_v5, 0.0  ;;  %v3474_v25 = vpop.f32.mrb[20].mxu0  ;;  %v4110_v16 = vrot.slane %v15529_v38, %v15328_v51  ;;  %v4087_v8 = vcombine.low %v15502_v17, %v15508_v45 }
 0x1fe   : > { %19597 = vst [vmem:[#allocation50_spill] sm:$0xff] %v15537_v61  ;;  %v4111_v4 = vcombine.low %v15534_v14, %v15526_v59  ;;  %4236 = vadd.xlane.f32.xlu1 %v4235_v41  ;;  %v3684_v36 = vcombine.high %v3474_v25, %v3474_v25  ;;  %v3691_v49 = vrot.slane %v3474_v25, %v15328_v51  ;;  %v13074_v60 = vpop.f32.mrb[21].mxu0 }
 0x1ff   : > { %19598 = vst [vmem:[#allocation52_spill] sm:$0xff] %v15540_v1  ;;  %v4102_v62 = vrot.slane %v4088_v50, %v15328_v51  ;;  %v4244_v29 = vsel %vm4207_vm2, %v4110_v16, 0.0  ;;  %v3477_v43 = vpop.f32.mrb[22].mxu0  ;;  %v4095_v52 = vrot.slane %v4087_v8, %v15328_v51  ;;  %v15554_v6 = vadd.f32 %v15331_v20, %v3683_v33 }
 0x200   : > { %v4112_v5 = vcombine.low %v15540_v1, %v15537_v61  ;;  %v3698_v22 = vrot.slane %v3684_v36, %v15328_v51  ;;  %v3699_v41 = vcombine.high %v3691_v49, %v3691_v49  ;;  %v15560_v23 = vadd.f32 %v15331_v20, %v3691_v49  ;;  %4245 = vadd.xlane.f32.xlu0 %v4244_v29  ;;  %v13075_v50 = vpop.f32.mrb[23].mxu0 }
 0x201   : > { %19599 = vst [vmem:[#allocation47_spill] sm:$0xff] %v15554_v6  ;;  %v3701_v25 = vcombine.high %v3477_v43, %v3477_v43  ;;  %v3708_v16 = vrot.slane %v3477_v43, %v15328_v51  ;;  %v4103_v60 = vcombine.low %v4095_v52, %v4102_v62  ;;  %v4134_v8 = vrot.slane %v15554_v6, %v15328_v51 }
 0x202   : > { %19600 = vst [vmem:[#allocation46_spill] sm:$0xff] %v15560_v23  ;;  %v4119_v33 = vrot.slane %v4111_v4, %v15328_v51  ;;  %v3700_v11 = vcombine.high %v3698_v22, %v3698_v22  ;;  %v15567_v57 = vadd.f32 %v15339_v2, %v3699_v41  ;;  %v15570_v36 = vadd.f32 %v15334_v35, %v3698_v22 }
 0x203   : > { %v3715_v49 = vrot.slane %v3701_v25, %v15328_v51  ;;  %v3716_v29 = vcombine.high %v3708_v16, %v3708_v16  ;;  %v15574_v50 = vadd.f32 %v15331_v20, %v3708_v16  ;;  %v4241_v62 = vsel %vm4203_vm3, %v4103_v60, 0.0 }
 0x204   : > { %19601 = vst [vmem:[#allocation53_spill] sm:$0xff] %v15567_v57  ;;  %19602 = vst [vmem:[#allocation48_spill] sm:$0xff] %v15570_v36  ;;  %v4250_v43 = vsel %vm4207_vm2, %v4134_v8, 0.0  ;;  %v15579_v52 = vadd.f32 %v15344_v3, %v3700_v11  ;;  %v4135_v4 = vcombine.low %v15560_v23, %v15567_v57  ;;  %4242 = vadd.xlane.f32.xlu1 %v4241_v62 }
 0x205   : > { %19603 = vst [vmem:[#allocation55_spill] sm:$0xff] %v15574_v50  ;;  %v3717_v41 = vcombine.high %v3715_v49, %v3715_v49  ;;  %v15584_v22 = vadd.f32 %v15339_v2, %v3715_v49  ;;  %v15587_v25 = vadd.f32 %v15331_v20, %v3716_v29  ;;  %4251 = vadd.xlane.f32.xlu0 %v4250_v43  ;;  %v3482_v16 = vpop.f32.mrb[24].mxu0 }
 0x206   : > { %19604 = vst [vmem:[#allocation54_spill] sm:$0xff] %v15579_v52  ;;  %v4126_v60 = vrot.slane %v4112_v5, %v15328_v51  ;;  %v4158_v8 = vrot.slane %v15574_v50, %v15328_v51  ;;  %v3724_v11 = vrot.slane %v3482_v16, %v15328_v51  ;;  %v13078_v6 = vpop.f32.mrb[25].mxu0  ;;  %v4136_v38 = vcombine.low %v15570_v36, %v15579_v52 }
 0x207   : > { %19605 = vst [vmem:[#allocation57_spill] sm:$0xff] %v15584_v22  ;;  %19606 = vst [vmem:[#allocation56_spill] sm:$0xff] %v15587_v25  ;;  %v15596_v2 = vadd.f32 %v15334_v35, %v3717_v41  ;;  %v3485_v62 = vpop.f32.mrb[26].mxu0  ;;  %v4143_v43 = vrot.slane %v4135_v4, %v15328_v51  ;;  %v4159_v6 = vcombine.low %v15587_v25, %v15584_v22 }
 0x208   : > { %v4127_v49 = vcombine.low %v4119_v33, %v4126_v60  ;;  %v4256_v29 = vsel %vm4207_vm2, %v4158_v8, 0.0  ;;  %v3725_v27 = vcombine.high %v3724_v11, %v3724_v11  ;;  %v15601_v5 = vadd.f32 %v15344_v3, %v3724_v11  ;;  %v13079_v63 = vpop.f32.mrb[27].mxu0 }
 0x209   : > { %19607 = vst [vmem:[#allocation13_spill] sm:$0xff] %v15596_v2  ;;  %v4150_v16 = vrot.slane %v4136_v38, %v15328_v51  ;;  %4257 = vadd.xlane.f32.xlu0 %v4256_v29  ;;  %v4167_v38 = vrot.slane %v4159_v6, %v15328_v51 }
 0x20a   : > { %19608 = vst [vmem:[#allocation59_spill] sm:$0xff] %v15601_v5  ;;  %v4247_v31 = vsel %vm4203_vm3, %v4127_v49, 0.0  ;;  %v4160_v35 = vcombine.low %v15596_v2, %v15601_v5  ;;  %v15610_v4 = vadd.f32 %v15331_v20, %v3725_v27 }
 0x20b   : > { %4248 = vadd.xlane.f32.xlu1 %v4247_v31  ;;  %v4151_v33 = vcombine.low %v4143_v43, %v4150_v16 }
 0x20c   : > { %19609 = vst [vmem:[#allocation58_spill] sm:$0xff] %v15610_v4  ;;  %v4182_v63 = vrot.slane %v15610_v4, %v15328_v51  ;;  %v4174_v41 = vrot.slane %v4160_v35, %v15328_v51 }
 0x20d   : > { %v4253_v3 = vsel %vm4203_vm3, %v4151_v33, 0.0 }
 0x20e   : > { %v4262_v60 = vsel %vm4207_vm2, %v4182_v63, 0.0  ;;  %v4175_v8 = vcombine.low %v4167_v38, %v4174_v41 }
 0x20f   : > { %4254 = vadd.xlane.f32.xlu1 %v4253_v3  ;;  %4263 = vadd.xlane.f32.xlu0 %v4262_v60 }
 0x210   : > { %v4259_v31 = vsel %vm4203_vm3, %v4175_v8, 0.0 }
 0x213   : > { %4260 = vadd.xlane.f32.xlu1 %v4259_v31 }
 0x26d   : > { %v4210_v11 = vpop.xlane.xlu0 %4209 }
 0x26e   : > { %v4266_v3 = vsel %vm4265_vm4, %v4210_v11, 0.0 }
 0x273   : > { %v4206_v20 = vpop.xlane.xlu1 %4205 }
 0x274   : > { %v4267_v38 = vadd.f32 %v4266_v3, %v4206_v20 }
 0x275   : > { %v4216_v27 = vpop.xlane.xlu0 %4215 }
 0x276   : > { %v4274_v43 = vsel %vm4265_vm4, %v4216_v27, 0.0  ;;  %v4268_v51 = vrot.slane %v4267_v38, 4 }
 0x277   : > { %v4213_v49 = vpop.xlane.xlu1 %4212 }
 0x278   : > { %v4275_v35 = vadd.f32 %v4274_v43, %v4213_v49  ;;  %v4269_v49 = vadd.f32 %v4268_v51, %v4267_v38 }
 0x279   : > { %v4222_v29 = vpop.xlane.xlu0 %4221 }
 0x27a   : > { %v4282_v6 = vsel %vm4265_vm4, %v4222_v29, 0.0  ;;  %v4276_v8 = vrot.slane %v4275_v35, 4 }
 0x27c   : > { %v4277_v22 = vadd.f32 %v4276_v8, %v4275_v35 }
 0x27d   : > { %v4219_v62 = vpop.xlane.xlu1 %4218 }
 0x27e   : > { %v4283_v41 = vadd.f32 %v4282_v6, %v4219_v62  ;;  %v4278_v62 = vrot.slane %v4277_v22, 2 }
 0x27f   : > { %v4228_v16 = vpop.xlane.xlu0 %4227 }
 0x280   : > { %v4290_v63 = vsel %vm4265_vm4, %v4228_v16, 0.0  ;;  %v4284_v5 = vrot.slane %v4283_v41, 4  ;;  %v4279_v52 = vadd.f32 %v4278_v62, %v4277_v22 }
 0x281   : > { %v4225_v33 = vpop.xlane.xlu1 %4224 }
 0x282   : > { %v4291_v31 = vadd.f32 %v4290_v63, %v4225_v33  ;;  %v4285_v43 = vadd.f32 %v4284_v5, %v4283_v41  ;;  %v4270_v63 = vrot.slane %v4269_v49, 2 }
 0x283   : > { %v4234_v60 = vpop.xlane.xlu0 %4233 }
 0x284   : > { %v4298_v4 = vsel %vm4265_vm4, %v4234_v60, 0.0  ;;  %v4292_v29 = vrot.slane %v4291_v31, 4  ;;  %v4286_v60 = vrot.slane %v4285_v43, 2  ;;  %v4271_v38 = vadd.f32 %v4270_v63, %v4269_v49 }
 0x286   : > { %v4293_v6 = vadd.f32 %v4292_v29, %v4291_v31  ;;  %v4287_v41 = vadd.f32 %v4286_v60, %v4285_v43  ;;  %v4272_v57 = vrot.slane %v4271_v38, 1 }
 0x287   : > { %v4231_v2 = vpop.xlane.xlu1 %4230  ;;  %v4240_v19 = vpop.xlane.xlu0 %4239 }
 0x288   : > { %v4299_v27 = vadd.f32 %v4298_v4, %v4231_v2  ;;  %v4306_v11 = vsel %vm4265_vm4, %v4240_v19, 0.0  ;;  %v4294_v36 = vrot.slane %v4293_v6, 2  ;;  %v4288_v23 = vrot.slane %v4287_v41, 1 }
 0x289   : > { %v4273_v43 = vadd.f32 %v4272_v57, %v4271_v38 }
 0x28a   : > { %v4300_v25 = vrot.slane %v4299_v27, 4  ;;  %v4289_v63 = vadd.f32 %v4288_v23, %v4287_v41 }
 0x28b   : > { %v4237_v16 = vpop.xlane.xlu1 %4236 }
 0x28c   : > { %v4307_v20 = vadd.f32 %v4306_v11, %v4237_v16  ;;  %v4301_v50 = vadd.f32 %v4300_v25, %v4299_v27  ;;  %v4280_v11 = vrot.slane %v4279_v52, 1  ;;  %v4295_v16 = vadd.f32 %v4294_v36, %v4293_v6 }
 0x28d   : > { %v4246_v3 = vpop.xlane.xlu0 %4245 }
 0x28e   : > { %v4308_v33 = vrot.slane %v4307_v20, 4  ;;  %v4314_v2 = vsel %vm4265_vm4, %v4246_v3, 0.0  ;;  %v4302_v19 = vrot.slane %v4301_v50, 2 }
 0x290   : > { %v4309_v35 = vadd.f32 %v4308_v33, %v4307_v20  ;;  %v4303_v61 = vadd.f32 %v4302_v19, %v4301_v50  ;;  %v4281_v20 = vadd.f32 %v4280_v11, %v4279_v52  ;;  %v4296_v33 = vrot.slane %v4295_v16, 1 }
 0x291   : > { %v4243_v4 = vpop.xlane.xlu1 %4242 }
 0x292   : > { %v4315_v51 = vadd.f32 %v4314_v2, %v4243_v4  ;;  %v4252_v5 = vpop.xlane.xlu0 %4251  ;;  %v4310_v31 = vrot.slane %v4309_v35, 2  ;;  %v4304_v60 = vrot.slane %v4303_v61, 1  ;;  %v4346_v19 = vadd.f32 %v4281_v20, %v4273_v43 }
 0x293   : > { %v4322_v22 = vsel %vm4265_vm4, %v4252_v5, 0.0  ;;  %v4297_v5 = vadd.f32 %v4296_v33, %v4295_v16 }
 0x294   : > { %v4316_v8 = vrot.slane %v4315_v51, 4  ;;  %v4311_v2 = vadd.f32 %v4310_v31, %v4309_v35  ;;  %v4347_v11 = vadd.f32 %v4346_v19, %v4289_v63  ;;  %v4305_v35 = vadd.f32 %v4304_v60, %v4303_v61 }
 0x296   : > { %v4317_v29 = vadd.f32 %v4316_v8, %v4315_v51  ;;  %v4258_v3 = vpop.xlane.xlu0 %4257 }
 0x297   : > { %v4330_v36 = vsel %vm4265_vm4, %v4258_v3, 0.0  ;;  %v4348_v3 = vadd.f32 %v4347_v11, %v4297_v5  ;;  %v19617_v11 = vld [vmem:[#allocation49_spill] sm:$0xff] }
 0x298   : > { %v4249_v25 = vpop.xlane.xlu1 %4248  ;;  %v4318_v27 = vrot.slane %v4317_v29, 2 }
 0x299   : > { %v4323_v62 = vadd.f32 %v4322_v22, %v4249_v25  ;;  %v4312_v22 = vrot.slane %v4311_v2, 1 }
 0x29a   : > { %v4319_v4 = vadd.f32 %v4318_v27, %v4317_v29 }
 0x29b   : > { %v4324_v49 = vrot.slane %v4323_v62, 4  ;;  %v4313_v59 = vadd.f32 %v4312_v22, %v4311_v2 }
 0x29c   : > { %v4255_v6 = vpop.xlane.xlu1 %4254  ;;  %v4264_v50 = vpop.xlane.xlu0 %4263  ;;  %v4320_v57 = vrot.slane %v4319_v4, 1 }
 0x29d   : > { %v4325_v51 = vadd.f32 %v4324_v49, %v4323_v62  ;;  %v4331_v8 = vadd.f32 %v4330_v36, %v4255_v6  ;;  %v4338_v1 = vsel %vm4265_vm4, %v4264_v50, 0.0  ;;  %v4349_v49 = vadd.f32 %v4348_v3, %v4305_v35  ;;  %v19619_v35 = vld [vmem:[#allocation52_spill] sm:$0xff]  ;;  %v19628_v3 = vld [vmem:[#allocation54_spill] sm:$0xff] }
 0x29e   : > { %v4321_v20 = vadd.f32 %v4320_v57, %v4319_v4  ;;  %v19622_v57 = vld [vmem:[#allocation46_spill] sm:$0xff] }
 0x29f   : > { %v4326_v25 = vrot.slane %v4325_v51, 2  ;;  %v4332_v52 = vrot.slane %v4331_v8, 4  ;;  %v4350_v43 = vadd.f32 %v4349_v49, %v4313_v59  ;;  %v19632_v49 = vld [vmem:[#allocation56_spill] sm:$0xff] }
 0x2a0   : > { %v4261_v31 = vpop.xlane.xlu1 %4260 }
 0x2a1   : > { %v4327_v23 = vadd.f32 %v4326_v25, %v4325_v51  ;;  %v4333_v38 = vadd.f32 %v4332_v52, %v4331_v8  ;;  %v4339_v41 = vadd.f32 %v4338_v1, %v4261_v31  ;;  %v4351_v63 = vadd.f32 %v4350_v43, %v4321_v20  ;;  %v19620_v31 = vld [vmem:[#allocation50_spill] sm:$0xff]  ;;  %v19636_v43 = vld [vmem:[#allocation16_spill] sm:$0xff] }
 0x2a3   : > { %v4328_v29 = vrot.slane %v4327_v23, 1  ;;  %v4334_v27 = vrot.slane %v4333_v38, 2  ;;  %v4340_v62 = vrot.slane %v4339_v41, 4 }
 0x2a5   : > { %v4335_v16 = vadd.f32 %v4334_v27, %v4333_v38  ;;  %v4341_v33 = vadd.f32 %v4340_v62, %v4339_v41  ;;  %v4329_v36 = vadd.f32 %v4328_v29, %v4327_v23  ;;  %v19624_v23 = vld [vmem:[#allocation53_spill] sm:$0xff]  ;;  %v19626_v38 = vld [vmem:[#allocation48_spill] sm:$0xff]  ;;  %v19630_v27 = vld [vmem:[#allocation55_spill] sm:$0xff] }
 0x2a7   : > { %v4336_v6 = vrot.slane %v4335_v16, 1  ;;  %v4342_v50 = vrot.slane %v4341_v33, 2  ;;  %v4352_v19 = vadd.f32 %v4351_v63, %v4329_v36  ;;  %v19639_v63 = vld [vmem:[#allocation59_spill] sm:$0xff] }
 0x2a9   : > { %v4337_v61 = vadd.f32 %v4336_v6, %v4335_v16  ;;  %v4343_v60 = vadd.f32 %v4342_v50, %v4341_v33  ;;  %v19634_v16 = vld [vmem:[#allocation57_spill] sm:$0xff] }
 0x2aa   : > { %v19637_v6 = vld [vmem:[#allocation13_spill] sm:$0xff] }
 0x2ab   : > { %v4344_v51 = vrot.slane %v4343_v60, 1  ;;  %v4353_v8 = vadd.f32 %v4352_v19, %v4337_v61 }
 0x2ad   : > { %v4345_v1 = vadd.f32 %v4344_v51, %v4343_v60 }
 0x2af   : > { %v4354_v5 = vadd.f32 %v4353_v8, %v4345_v1 }
 0x2b1   : > { %v15629_v2 = vmul.f32 0.0003125, %v4354_v5 }
 0x2b3   : > { %v15633_v22 = vsub.f32 %v15352_v40, %v15629_v2  ;;  %v15637_v59 = vsub.f32 %v15348_v30, %v15629_v2  ;;  %v15641_v4 = vsub.f32 %v15358_v12, %v15629_v2  ;;  %v15645_v25 = vsub.f32 %v15364_v13, %v15629_v2 }
 0x2b4   : > { %v15649_v52 = vsub.f32 %v15355_v53, %v15629_v2  ;;  %v15653_v40 = vsub.f32 %v15367_v39, %v15629_v2  ;;  %v15657_v30 = vsub.f32 %v15361_v7, %v15629_v2  ;;  %v15661_v12 = vsub.f32 %v15377_v48, %v15629_v2 }
 0x2b5   : > { %v15665_v13 = vsub.f32 %v15384_v58, %v15629_v2  ;;  %v15669_v53 = vsub.f32 %v15394_v54, %v15629_v2  ;;  %v15673_v39 = vsub.f32 %v15400_v34, %v15629_v2  ;;  %v15677_v7 = vsub.f32 %v15407_v26, %v15629_v2 }
 0x2b6   : > { %v15681_v48 = vsub.f32 %v15410_v10, %v15629_v2  ;;  %v15685_v58 = vsub.f32 %v15417_v24, %v15629_v2  ;;  %v15689_v54 = vsub.f32 %v15428_v0, %v15629_v2  ;;  %v15693_v34 = vsub.f32 %v15434_v21, %v15629_v2 }
 0x2b7   : > { %19610 = vst [vmem:[#allocation14_spill] sm:$0xff] %v15669_v53  ;;  %19611 = vst [vmem:[#allocation22_spill] sm:$0xff] %v15673_v39  ;;  %v15697_v26 = vsub.f32 %v15437_v37, %v15629_v2  ;;  %v15701_v10 = vsub.f32 %v15445_v46, %v15629_v2  ;;  %v15705_v24 = vsub.f32 %v15453_v56, %v15629_v2 }
 0x2b8   : > { %19612 = vst [vmem:[#allocation23_spill] sm:$0xff] %v15677_v7  ;;  %19613 = vst [vmem:[#allocation20_spill] sm:$0xff] %v15689_v54  ;;  %v15709_v0 = vsub.f32 %v15461_v28, %v15629_v2  ;;  %v15713_v21 = vsub.f32 %v15464_v15, %v15629_v2  ;;  %v15717_v37 = vsub.f32 %v15471_v44, %v15629_v2 }
 0x2b9   : > { %19614 = vst [vmem:[#allocation19_spill] sm:$0xff] %v15701_v10  ;;  %v15721_v46 = vsub.f32 %v15478_v18, %v15629_v2  ;;  %v15725_v56 = vsub.f32 %v15481_v42, %v15629_v2  ;;  %v15729_v28 = vsub.f32 %v15488_v55, %v15629_v2  ;;  %v15733_v15 = vsub.f32 %v15491_v47, %v15629_v2 }
 0x2ba   : > { %v15737_v44 = vsub.f32 %v15502_v17, %v15629_v2  ;;  %v15741_v18 = vsub.f32 %v15508_v45, %v15629_v2  ;;  %v15745_v42 = vsub.f32 %v15515_v9, %v15629_v2  ;;  %v15749_v55 = vsub.f32 %v15522_v32, %v15629_v2 }
 0x2bb   : > { %19615 = vst [vmem:[#allocation24_spill] sm:$0xff] %v15733_v15  ;;  %v15753_v47 = vsub.f32 %v15534_v14, %v15629_v2  ;;  %v15757_v17 = vsub.f32 %v19617_v11, %v15629_v2  ;;  %v15761_v45 = vsub.f32 %v19619_v35, %v15629_v2  ;;  %v15765_v9 = vsub.f32 %v19620_v31, %v15629_v2 }
 0x2bc   : > { %19616 = vst [vmem:[#allocation21_spill] sm:$0xff] %v15745_v42  ;;  %v15769_v32 = vsub.f32 %v19622_v57, %v15629_v2  ;;  %v15773_v14 = vsub.f32 %v19624_v23, %v15629_v2  ;;  %v15777_v41 = vsub.f32 %v19626_v38, %v15629_v2  ;;  %v15781_v29 = vsub.f32 %v19628_v3, %v15629_v2  ;;  %v19641_v23 = vld [vmem:[#allocation39_spill] sm:$0xff] }
 0x2bd   : > { %19618 = vst [vmem:[#allocation26_spill] sm:$0xff] %v15757_v17  ;;  %19621 = vst [vmem:[#allocation25_spill] sm:$0xff] %v15765_v9  ;;  %v15785_v62 = vsub.f32 %v19630_v27, %v15629_v2  ;;  %v15789_v20 = vsub.f32 %v19632_v49, %v15629_v2  ;;  %v15793_v33 = vsub.f32 %v19634_v16, %v15629_v2 }
 0x2be   : > { %19623 = vst [vmem:[#allocation28_spill] sm:$0xff] %v15769_v32  ;;  %19625 = vst [vmem:[#allocation27_spill] sm:$0xff] %v15773_v14  ;;  %v15797_v36 = vsub.f32 %v19636_v43, %v15629_v2  ;;  %v15801_v50 = vsub.f32 %v19637_v6, %v15629_v2  ;;  %v15805_v61 = vsub.f32 %v19639_v63, %v15629_v2  ;;  %v19642_v43 = vld [vmem:[#allocation15_spill] sm:$0xff] }
 0x2bf   : > { %19627 = vst [vmem:[#allocation30_spill] sm:$0xff] %v15777_v41  ;;  %19629 = vst [vmem:[#allocation29_spill] sm:$0xff] %v15781_v29  ;;  %v15809_v60 = vmul.f32 %v15633_v22, %v15633_v22  ;;  %v4414_v19 = vmul.f32 %v15665_v13, %v15665_v13  ;;  %v4418_v8 = vmul.f32 %v15677_v7, %v15677_v7  ;;  %v19643_v7 = vld [vmem:[#allocation17_spill] sm:$0xff] }
 0x2c0   : > { %19631 = vst [vmem:[#allocation32_spill] sm:$0xff] %v15785_v62  ;;  %19633 = vst [vmem:[#allocation31_spill] sm:$0xff] %v15789_v20  ;;  %v4415_v51 = vmul.f32 %v15797_v36, %v15797_v36  ;;  %v4422_v1 = vmul.f32 %v15689_v54, %v15689_v54  ;;  %v4426_v5 = vmul.f32 %v15701_v10, %v15701_v10 }
 0x2c1   : > { %19635 = vst [vmem:[#allocation34_spill] sm:$0xff] %v15793_v33  ;;  %19638 = vst [vmem:[#allocation33_spill] sm:$0xff] %v15801_v50  ;;  %v15823_v11 = vmul.f32 %v15733_v15, %v15733_v15  ;;  %v15827_v35 = vmul.f32 %v15745_v42, %v15745_v42  ;;  %v15831_v31 = vmul.f32 %v15757_v17, %v15757_v17 }
 0x2c2   : > { %19640 = vst [vmem:[#allocation36_spill] sm:$0xff] %v15805_v61  ;;  %v4410_v57 = vmul.f32 %v15649_v52, %v15649_v52  ;;  %v4553_v38 = vrot.slane %v4415_v51, %v19641_v23  ;;  %v4411_v3 = vmul.f32 %v15653_v40, %v15653_v40  ;;  %v4412_v27 = vmul.f32 %v15657_v30, %v15657_v30 }
 0x2c3   : > { %v4413_v49 = vmul.f32 %v15661_v12, %v15661_v12  ;;  %v15845_v6 = vsub.f32 %v19642_v43, %v15629_v2  ;;  %v4416_v63 = vmul.f32 %v15669_v53, %v15669_v53  ;;  %v4417_v51 = vmul.f32 %v15673_v39, %v15673_v39 }
 0x2c4   : > { %v4529_v16 = vrot.slane %v4410_v57, %v19641_v23  ;;  %v4775_v17 = vsel %vm4207_vm2, %v4553_v38, 0.0  ;;  %v4530_v42 = vcombine.low %v4411_v3, %v4412_v27  ;;  %v4419_v10 = vmul.f32 %v15681_v48, %v15681_v48 }
 0x2c5   : > { %v4531_v15 = vcombine.low %v4413_v49, %v4414_v19  ;;  %4776 = vadd.xlane.f32.xlu1 %v4775_v17  ;;  %v4420_v43 = vmul.f32 %v15845_v6, %v15845_v6  ;;  %v4554_v54 = vcombine.low %v4416_v63, %v4417_v51  ;;  %v15859_v53 = vsub.f32 %v19643_v7, %v15629_v2 }
 0x2c6   : > { %v4769_v57 = vsel %vm4207_vm2, %v4529_v16, 0.0  ;;  %v4538_v39 = vrot.slane %v4530_v42, %v19641_v23  ;;  %v4555_v19 = vcombine.low %v4418_v8, %v4419_v10  ;;  %v4421_v3 = vmul.f32 %v15685_v58, %v15685_v58 }
 0x2c7   : > { %4770 = vadd.xlane.f32.xlu0 %v4769_v57  ;;  %v4545_v38 = vrot.slane %v4531_v15, %v19641_v23  ;;  %v4577_v17 = vrot.slane %v4420_v43, %v19641_v23  ;;  %v4562_v27 = vrot.slane %v4554_v54, %v19641_v23  ;;  %v4425_v49 = vmul.f32 %v15859_v53, %v15859_v53 }
 0x2c8   : > { %v4423_v7 = vmul.f32 %v15693_v34, %v15693_v34  ;;  %v4569_v63 = vrot.slane %v4555_v19, %v19641_v23  ;;  %v4424_v15 = vmul.f32 %v15697_v26, %v15697_v26  ;;  %v4578_v10 = vcombine.low %v4421_v3, %v4422_v1 }
 0x2c9   : > { %v4546_v16 = vcombine.low %v4538_v39, %v4545_v38  ;;  %v4781_v42 = vsel %vm4207_vm2, %v4577_v17, 0.0  ;;  %v4601_v8 = vrot.slane %v4425_v49, %v19641_v23  ;;  %v4430_v54 = vmul.f32 %v15717_v37, %v15717_v37 }
 0x2ca   : > { %v4427_v51 = vmul.f32 %v15705_v24, %v15705_v24  ;;  %v4570_v39 = vcombine.low %v4562_v27, %v4569_v63  ;;  %v4579_v43 = vcombine.low %v4423_v7, %v4424_v15  ;;  %v4586_v38 = vrot.slane %v4578_v10, %v19641_v23 }
 0x2cb   : > { %v4772_v57 = vsel %vm4203_vm3, %v4546_v16, 0.0  ;;  %4782 = vadd.xlane.f32.xlu0 %v4781_v42  ;;  %v15884_v1 = vmul.f32 %v15769_v32, %v15769_v32  ;;  %v4787_v19 = vsel %vm4207_vm2, %v4601_v8, 0.0  ;;  %v4428_v3 = vmul.f32 %v15709_v0, %v15709_v0  ;;  %v19644_v16 = vld [vmem:[#allocation18_spill] sm:$0xff] }
 0x2cc   : > { %4773 = vadd.xlane.f32.xlu1 %v4772_v57  ;;  %v4429_v17 = vmul.f32 %v15713_v21, %v15713_v21  ;;  %v4593_v49 = vrot.slane %v4579_v43, %v19641_v23  ;;  %v4625_v27 = vrot.slane %v4430_v54, %v19641_v23  ;;  %v4602_v7 = vcombine.low %v4426_v5, %v4427_v51 }
 0x2cd   : > { %v15895_v63 = vsub.f32 %v19644_v16, %v15629_v2  ;;  %v4778_v15 = vsel %vm4203_vm3, %v4570_v39, 0.0  ;;  %v4431_v42 = vmul.f32 %v15721_v46, %v15721_v46  ;;  %v4432_v8 = vmul.f32 %v15725_v56, %v15725_v56 }
 0x2ce   : > { %v4603_v10 = vcombine.low %v4428_v3, %v4429_v17  ;;  %v4594_v57 = vcombine.low %v4586_v38, %v4593_v49  ;;  %v4610_v43 = vrot.slane %v4602_v7, %v19641_v23  ;;  %v4433_v54 = vmul.f32 %v15729_v28, %v15729_v28 }
 0x2cf   : > { %4788 = vadd.xlane.f32.xlu0 %v4787_v19  ;;  %v4435_v5 = vmul.f32 %v15895_v63, %v15895_v63  ;;  %v4626_v39 = vcombine.low %v4431_v42, %v4432_v8  ;;  %v4407_v3 = vmul.f32 %v15637_v59, %v15637_v59  ;;  %v4408_v17 = vmul.f32 %v15641_v4, %v15641_v4 }
 0x2d0   : > { %4779 = vadd.xlane.f32.xlu1 %v4778_v15  ;;  %v4617_v51 = vrot.slane %v4603_v10, %v19641_v23  ;;  %v4793_v38 = vsel %vm4207_vm2, %v4625_v27, 0.0  ;;  %v4627_v49 = vcombine.low %v4433_v54, %v15823_v11  ;;  %v4409_v7 = vmul.f32 %v15645_v25, %v15645_v25 }
 0x2d1   : > { %v4649_v19 = vrot.slane %v4435_v5, %v19641_v23  ;;  %v4784_v16 = vsel %vm4203_vm3, %v4594_v57, 0.0  ;;  %v4506_v10 = vcombine.low %v15809_v60, %v4407_v3  ;;  %v4436_v42 = vmul.f32 %v15737_v44, %v15737_v44 }
 0x2d2   : > { %v4618_v15 = vcombine.low %v4610_v43, %v4617_v51  ;;  %v4634_v8 = vrot.slane %v4626_v39, %v19641_v23  ;;  %v4641_v27 = vrot.slane %v4627_v49, %v19641_v23  ;;  %v4507_v32 = vcombine.low %v4408_v17, %v4409_v7  ;;  %v19645_v43 = vld [vmem:[#allocation51_spill] sm:$0xff] }
 0x2d3   : > { %4794 = vadd.xlane.f32.xlu0 %v4793_v38  ;;  %v4437_v11 = vmul.f32 %v15741_v18, %v15741_v18  ;;  %v4799_v5 = vsel %vm4207_vm2, %v4649_v19, 0.0  ;;  %v4514_v57 = vrot.slane %v4506_v10, %v19641_v23  ;;  %v4439_v60 = vmul.f32 %v15749_v55, %v15749_v55 }
 0x2d4   : > { %4785 = vadd.xlane.f32.xlu1 %v4784_v16  ;;  %v15931_v54 = vsub.f32 %v19645_v43, %v15629_v2  ;;  %v4790_v51 = vsel %vm4203_vm3, %v4618_v15, 0.0  ;;  %v4521_v39 = vrot.slane %v4507_v32, %v19641_v23  ;;  %v4441_v17 = vmul.f32 %v15753_v47, %v15753_v47 }
 0x2d5   : > { %v4650_v3 = vcombine.low %v4436_v42, %v4437_v11  ;;  %v4651_v38 = vcombine.low %v15827_v35, %v4439_v60  ;;  %v4443_v49 = vmul.f32 %v15761_v45, %v15761_v45  ;;  %v4444_v7 = vmul.f32 %v15765_v9, %v15765_v9  ;;  %v19646_v60 = vld [vmem:[#allocation47_spill] sm:$0xff] }
 0x2d6   : > { %v4440_v19 = vmul.f32 %v15931_v54, %v15931_v54  ;;  %v4642_v16 = vcombine.low %v4634_v8, %v4641_v27  ;;  %v4522_v15 = vcombine.low %v4514_v57, %v4521_v39  ;;  %v4674_v10 = vcombine.low %v4441_v17, %v15831_v31 }
 0x2d7   : > { %4800 = vadd.xlane.f32.xlu0 %v4799_v5  ;;  %v4658_v32 = vrot.slane %v4650_v3, %v19641_v23  ;;  %v4454_v42 = vmul.f32 %v15805_v61, %v15805_v61  ;;  %v4665_v35 = vrot.slane %v4651_v38, %v19641_v23  ;;  %v4675_v11 = vcombine.low %v4443_v49, %v4444_v7 }
 0x2d8   : > { %4791 = vadd.xlane.f32.xlu1 %v4790_v51  ;;  %v15951_v43 = vsub.f32 %v19646_v60, %v15629_v2  ;;  %v4766_v9 = vsel %vm4203_vm3, %v4522_v15, 0.0  ;;  %v4673_v8 = vrot.slane %v4440_v19, %v19641_v23  ;;  %v4447_v27 = vmul.f32 %v15773_v14, %v15773_v14 }
 0x2d9   : > { %v4448_v31 = vmul.f32 %v15777_v41, %v15777_v41  ;;  %v4666_v5 = vcombine.low %v4658_v32, %v4665_v35  ;;  %v4682_v57 = vrot.slane %v4674_v10, %v19641_v23  ;;  %v4689_v51 = vrot.slane %v4675_v11, %v19641_v23  ;;  %v19647_v35 = vld [vmem:[#allocation58_spill] sm:$0xff] }
 0x2da   : > { %v4445_v39 = vmul.f32 %v15951_v43, %v15951_v43  ;;  %v4796_v3 = vsel %vm4203_vm3, %v4642_v16, 0.0  ;;  %v4449_v17 = vmul.f32 %v15781_v29, %v15781_v29  ;;  %v4698_v38 = vcombine.low %v15884_v1, %v4447_v27 }
 0x2db   : > { %4767 = vadd.xlane.f32.xlu0 %v4766_v9  ;;  %v4451_v19 = vmul.f32 %v15789_v20, %v15789_v20  ;;  %v4452_v49 = vmul.f32 %v15793_v33, %v15793_v33  ;;  %v4805_v7 = vsel %vm4207_vm2, %v4673_v8, 0.0  ;;  %v4450_v32 = vmul.f32 %v15785_v62, %v15785_v62 }
 0x2dc   : > { %4797 = vadd.xlane.f32.xlu1 %v4796_v3  ;;  %v4699_v15 = vcombine.low %v4448_v31, %v4449_v17  ;;  %v4453_v9 = vmul.f32 %v15801_v50, %v15801_v50  ;;  %v4802_v16 = vsel %vm4203_vm3, %v4666_v5, 0.0  ;;  %v4690_v10 = vcombine.low %v4682_v57, %v4689_v51 }
 0x2dd   : > { %v4697_v1 = vrot.slane %v4445_v39, %v19641_v23  ;;  %v15980_v11 = vsub.f32 %v19647_v35, %v15629_v2  ;;  %v4706_v60 = vrot.slane %v4698_v38, %v19641_v23  ;;  %v4722_v27 = vcombine.low %v4451_v19, %v4452_v49 }
 0x2de   : > { %v4713_v8 = vrot.slane %v4699_v15, %v19641_v23  ;;  %v4723_v31 = vcombine.low %v4453_v9, %v4454_v42  ;;  %v4721_v17 = vrot.slane %v4450_v32, %v19641_v23  ;;  %v4808_v57 = vsel %vm4203_vm3, %v4690_v10, 0.0 }
 0x2df   : > { %19648 = vst [vmem:[#allocation35_spill] sm:$0xff] %v15980_v11  ;;  %4806 = vadd.xlane.f32.xlu0 %v4805_v7  ;;  %v4811_v3 = vsel %vm4207_vm2, %v4697_v1, 0.0  ;;  %v4455_v5 = vmul.f32 %v15980_v11, %v15980_v11  ;;  %v4730_v51 = vrot.slane %v4722_v27, %v19641_v23 }
 0x2e0   : > { %4803 = vadd.xlane.f32.xlu1 %v4802_v16  ;;  %v4714_v2 = vcombine.low %v4706_v60, %v4713_v8  ;;  %v4737_v39 = vrot.slane %v4723_v31, %v19641_v23  ;;  %v4817_v38 = vsel %vm4207_vm2, %v4721_v17, 0.0 }
 0x2e1   : > { %v4745_v42 = vrot.slane %v4455_v5, %v19641_v23 }
 0x2e2   : > { %v4814_v19 = vsel %vm4203_vm3, %v4714_v2, 0.0  ;;  %v4738_v49 = vcombine.low %v4730_v51, %v4737_v39 }
 0x2e3   : > { %4812 = vadd.xlane.f32.xlu0 %v4811_v3  ;;  %v4823_v7 = vsel %vm4207_vm2, %v4745_v42, 0.0 }
 0x2e4   : > { %4809 = vadd.xlane.f32.xlu1 %v4808_v57  ;;  %v4820_v15 = vsel %vm4203_vm3, %v4738_v49, 0.0 }
 0x2e7   : > { %4818 = vadd.xlane.f32.xlu0 %v4817_v38 }
 0x2e8   : > { %4815 = vadd.xlane.f32.xlu1 %v4814_v19 }
 0x2eb   : > { %4824 = vadd.xlane.f32.xlu0 %v4823_v7 }
 0x2ec   : > { %4821 = vadd.xlane.f32.xlu1 %v4820_v15 }
 0x352   : > { %v4777_v32 = vpop.xlane.xlu1 %4776 }
 0x353   : > { %v4834_v1 = vsel %vm4265_vm4, %v4777_v32, 0.0 }
 0x354   : > { %v4771_v9 = vpop.xlane.xlu0 %4770 }
 0x355   : > { %v4826_v32 = vsel %vm4265_vm4, %v4771_v9, 0.0 }
 0x358   : > { %v4783_v16 = vpop.xlane.xlu0 %4782 }
 0x359   : > { %v4774_v10 = vpop.xlane.xlu1 %4773  ;;  %v4842_v27 = vsel %vm4265_vm4, %v4783_v16, 0.0 }
 0x35a   : > { %v4835_v35 = vadd.f32 %v4834_v1, %v4774_v10 }
 0x35c   : > { %v4789_v60 = vpop.xlane.xlu0 %4788  ;;  %v4836_v3 = vrot.slane %v4835_v35, 4 }
 0x35d   : > { %v4780_v8 = vpop.xlane.xlu1 %4779  ;;  %v4850_v5 = vsel %vm4265_vm4, %v4789_v60, 0.0 }
 0x35e   : > { %v4843_v31 = vadd.f32 %v4842_v27, %v4780_v8  ;;  %v4837_v39 = vadd.f32 %v4836_v3, %v4835_v35 }
 0x360   : > { %v4795_v17 = vpop.xlane.xlu0 %4794  ;;  %v4844_v51 = vrot.slane %v4843_v31, 4  ;;  %v4838_v10 = vrot.slane %v4837_v39, 2 }
 0x361   : > { %v4786_v57 = vpop.xlane.xlu1 %4785  ;;  %v4858_v19 = vsel %vm4265_vm4, %v4795_v17, 0.0 }
 0x362   : > { %v4851_v2 = vadd.f32 %v4850_v5, %v4786_v57  ;;  %v4845_v15 = vadd.f32 %v4844_v51, %v4843_v31  ;;  %v4839_v61 = vadd.f32 %v4838_v10, %v4837_v39 }
 0x364   : > { %v4801_v38 = vpop.xlane.xlu0 %4800  ;;  %v4852_v42 = vrot.slane %v4851_v2, 4  ;;  %v4846_v57 = vrot.slane %v4845_v15, 2 }
 0x365   : > { %v4792_v49 = vpop.xlane.xlu1 %4791  ;;  %v4866_v27 = vsel %vm4265_vm4, %v4801_v38, 0.0  ;;  %v4840_v38 = vrot.slane %v4839_v61, 1 }
 0x366   : > { %v4859_v7 = vadd.f32 %v4858_v19, %v4792_v49  ;;  %v4853_v8 = vadd.f32 %v4852_v42, %v4851_v2  ;;  %v4847_v20 = vadd.f32 %v4846_v57, %v4845_v15 }
 0x368   : > { %v4860_v16 = vrot.slane %v4859_v7, 4  ;;  %v4768_v1 = vpop.xlane.xlu0 %4767  ;;  %v4854_v33 = vrot.slane %v4853_v8, 2  ;;  %v4848_v15 = vrot.slane %v4847_v20, 1 }
 0x369   : > { %v4798_v60 = vpop.xlane.xlu1 %4797  ;;  %v4827_v11 = vadd.f32 %v4826_v32, %v4768_v1 }
 0x36a   : > { %v4867_v5 = vadd.f32 %v4866_v27, %v4798_v60  ;;  %v4861_v35 = vadd.f32 %v4860_v16, %v4859_v7  ;;  %v3853_v7 = vld [vmem:[%s19649_s29] sm:$0xff]  ;;  %v4855_v39 = vadd.f32 %v4854_v33, %v4853_v8  ;;  %v4849_v41 = vadd.f32 %v4848_v15, %v4847_v20 }
 0x36b   : > { %v4828_v3 = vrot.slane %v4827_v11, 4 }
 0x36c   : > { %v4868_v50 = vrot.slane %v4867_v5, 4  ;;  %v4807_v17 = vpop.xlane.xlu0 %4806  ;;  %v4862_v2 = vrot.slane %v4861_v35, 2  ;;  %v4856_v33 = vrot.slane %v4855_v39, 1 }
 0x36d   : > { %v4829_v19 = vadd.f32 %v4828_v3, %v4827_v11  ;;  %v4804_v31 = vpop.xlane.xlu1 %4803  ;;  %v4874_v9 = vsel %vm4265_vm4, %v4807_v17, 0.0  ;;  %v4988_v3 = vcombine.high %v3853_v7, %v3853_v7  ;;  %v4841_v17 = vadd.f32 %v4840_v38, %v4839_v61 }
 0x36e   : > { %v4869_v51 = vadd.f32 %v4868_v50, %v4867_v5  ;;  %v4875_v49 = vadd.f32 %v4874_v9, %v4804_v31  ;;  %v3873_v50 = vld [vmem:[%s19650_s4] sm:$0xff]  ;;  %v4863_v5 = vadd.f32 %v4862_v2, %v4861_v35 }
 0x36f   : > { %v4830_v42 = vrot.slane %v4829_v19, 2  ;;  %v16015_v61 = vrot.slane %v4988_v3, %v19641_v23  ;;  %v16018_v38 = vrot.slane %v3873_v50, %v19641_v23 }
 0x370   : > { %v4876_v62 = vrot.slane %v4875_v49, 4  ;;  %v4813_v32 = vpop.xlane.xlu0 %4812  ;;  %v4870_v10 = vrot.slane %v4869_v51, 2  ;;  %v4864_v35 = vrot.slane %v4863_v5, 1 }
 0x371   : > { %v4831_v16 = vadd.f32 %v4830_v42, %v4829_v19  ;;  %v4810_v1 = vpop.xlane.xlu1 %4809  ;;  %v4882_v11 = vsel %vm4265_vm4, %v4813_v32, 0.0  ;;  %19651 = vst [vmem:[#allocation38_spill] sm:$0xff] %v16018_v38 }
 0x372   : > { %v4877_v27 = vadd.f32 %v4876_v62, %v4875_v49  ;;  %v4883_v60 = vadd.f32 %v4882_v11, %v4810_v1  ;;  %v4871_v8 = vadd.f32 %v4870_v10, %v4869_v51  ;;  %v16012_v62 = vrot.slane %v3853_v7, %v19641_v23 }
 0x373   : > { %v4832_v57 = vrot.slane %v4831_v16, 1  ;;  %v5348_v49 = vcombine.high %v3873_v50, %v3873_v50  ;;  %v4857_v7 = vadd.f32 %v4856_v33, %v4855_v39  ;;  %v3875_v39 = vld [vmem:[%s19650_s4 + $0x10] sm:$0xff] }
 0x374   : > { %v4878_v31 = vrot.slane %v4877_v27, 2  ;;  %v4884_v9 = vrot.slane %v4883_v60, 4  ;;  %v4819_v29 = vpop.xlane.xlu0 %4818 }
 0x375   : > { %v4833_v19 = vadd.f32 %v4832_v57, %v4831_v16  ;;  %v4816_v42 = vpop.xlane.xlu1 %4815  ;;  %v4890_v32 = vsel %vm4265_vm4, %v4819_v29, 0.0  ;;  %v3855_v29 = vld [vmem:[%s19649_s29 + $0x10] sm:$0xff] }
 0x376   : > { %v4885_v1 = vadd.f32 %v4884_v9, %v4883_v60  ;;  %v4891_v11 = vadd.f32 %v4890_v32, %v4816_v42  ;;  %v4879_v14 = vadd.f32 %v4878_v31, %v4877_v27  ;;  %v4872_v60 = vrot.slane %v4871_v8, 1 }
 0x377   : > { %v4906_v2 = vadd.f32 %v4841_v17, %v4833_v19  ;;  %v16025_v27 = vrot.slane %v3855_v29, %v19641_v23  ;;  %v4865_v9 = vadd.f32 %v4864_v35, %v4863_v5  ;;  %v16030_v32 = vrot.slane %v5348_v49, %v19641_v23  ;;  %v3857_v5 = vld [vmem:[%s19649_s29 + $0x20] sm:$0xff] }
 0x378   : > { %v4886_v51 = vrot.slane %v4885_v1, 2  ;;  %v4892_v10 = vrot.slane %v4891_v11, 4  ;;  %v4825_v16 = vpop.xlane.xlu0 %4824  ;;  %v4880_v42 = vrot.slane %v4879_v14, 1  ;;  %v4873_v35 = vadd.f32 %v4872_v60, %v4871_v8  ;;  %v3859_v8 = vld [vmem:[%s19649_s29 + $0x30] sm:$0xff] }
 0x379   : > { %v4907_v57 = vadd.f32 %v4906_v2, %v4849_v41  ;;  %v4822_v20 = vpop.xlane.xlu1 %4821  ;;  %v4898_v15 = vsel %vm4265_vm4, %v4825_v16, 0.0  ;;  %19652 = vst [vmem:[#allocation37_spill] sm:$0xff] %v16025_v27  ;;  %19653 = vst [vmem:[#allocation41_spill] sm:$0xff] %v16030_v32  ;;  %v5012_v16 = vcombine.high %v3855_v29, %v3855_v29  ;;  %v3879_v60 = vld [vmem:[%s19650_s4 + $0x30] sm:$0xff]  ;;  %v5036_v29 = vcombine.high %v3857_v5, %v3857_v5 }
 0x37a   : > { %v4887_v3 = vadd.f32 %v4886_v51, %v4885_v1  ;;  %v4893_v17 = vadd.f32 %v4892_v10, %v4891_v11  ;;  %v4899_v50 = vadd.f32 %v4898_v15, %v4822_v20  ;;  %v16038_v11 = vrot.slane %v3875_v39, %v19641_v23  ;;  %v3877_v10 = vld [vmem:[%s19650_s4 + $0x20] sm:$0xff] }
 0x37b   : > { %v4908_v19 = vadd.f32 %v4907_v57, %v4857_v7  ;;  %v16049_v20 = vrot.slane %v3857_v5, %v19641_v23  ;;  %v5372_v15 = vcombine.high %v3875_v39, %v3875_v39  ;;  %v16058_v41 = vrot.slane %v3877_v10, %v19641_v23 }
 0x37c   : > { %v4894_v33 = vrot.slane %v4893_v17, 2  ;;  %v4900_v1 = vrot.slane %v4899_v50, 4  ;;  %19654 = vst [vmem:[#allocation40_spill] sm:$0xff] %v16038_v11  ;;  %v4888_v49 = vrot.slane %v4887_v3, 1  ;;  %v5396_v39 = vcombine.high %v3877_v10, %v3877_v10  ;;  %v3881_v10 = vld [vmem:[%s19650_s4 + $0x40] sm:$0xff] }
 0x37d   : > { %v4909_v2 = vadd.f32 %v4908_v19, %v4865_v9  ;;  %19655 = vst [vmem:[#allocation43_spill] sm:$0xff] %v16049_v20  ;;  %v4881_v19 = vadd.f32 %v4880_v42, %v4879_v14  ;;  %19656 = vst [vmem:[#allocation42_spill] sm:$0xff] %v16058_v41  ;;  %v5060_v38 = vcombine.high %v3859_v8, %v3859_v8  ;;  %v19709_v20 = vld [vmem:[#allocation35_spill] sm:$0xff] }
 0x37e   : > { %v4895_v7 = vadd.f32 %v4894_v33, %v4893_v17  ;;  %v4901_v57 = vadd.f32 %v4900_v1, %v4899_v50  ;;  %v3861_v1 = vld [vmem:[%s19649_s29 + $0x40] sm:$0xff]  ;;  %v4889_v31 = vadd.f32 %v4888_v49, %v4887_v3  ;;  %v5420_v27 = vcombine.high %v3879_v60, %v3879_v60  ;;  %v13585_v3 = vld [vmem:[%s19659_s1 + $0x10] sm:$0xff]  }
 0x37f   : > { %v4910_v9 = vadd.f32 %v4909_v2, %v4873_v35  ;;  %v16066_v42 = vrot.slane %v5012_v16, %v19641_v23  ;;  %v16071_v2 = vrot.slane %v5372_v15, %v19641_v23  ;;  %v16082_v16 = vrot.slane %v5036_v29, %v19641_v23  ;;  %13081 = vmatpush3.bf16.msra.mxu1 %v13585_v3  ;;  %v3883_v3 = vld [vmem:[%s19650_s4 + $0x50] sm:$0xff] }
 0x380   : > { %v4896_v17 = vrot.slane %v4895_v7, 1  ;;  %v4902_v50 = vrot.slane %v4901_v57, 2  ;;  %v16085_v15 = vrot.slane %v5396_v39, %v19641_v23  ;;  %v5444_v29 = vcombine.high %v3881_v10, %v3881_v10  ;;  %v3887_v39 = vld [vmem:[%s19650_s4 + $0x70] sm:$0xff] }
 0x381   : > { %v4911_v51 = vadd.f32 %v4910_v9, %v4881_v19  ;;  %19657 = vst [vmem:[#allocation45_spill] sm:$0xff] %v16066_v42  ;;  %19658 = vst [vmem:[#allocation44_spill] sm:$0xff] %v16071_v2  ;;  %v16088_v9 = vrot.slane %v3859_v8, %v19641_v23  ;;  %v16094_v19 = vrot.slane %v5060_v38, %v19641_v23  ;;  %v19666_v49 = vmov 0.0  }
 0x382   : > { %v4897_v35 = vadd.f32 %v4896_v17, %v4895_v7  ;;  %v4903_v14 = vadd.f32 %v4902_v50, %v4901_v57  ;;  %19660 = vst [vmem:[#allocation49_spill] sm:$0xff] %v16082_v16  ;;  %v5084_v7 = vcombine.high %v3861_v1, %v3861_v1  ;;  %19661 = vst [vmem:[#allocation52_spill] sm:$0xff] %v16085_v15  ;;  %13082 = vmatprep.subr.bf16.mxu1 %v19666_v49  ;;  %v19708_v16 = vld [vmem:[#allocation36_spill] sm:$0xff] }
 0x383   : > { %v4912_v33 = vadd.f32 %v4911_v51, %v4889_v31  ;;  %19662 = vst [vmem:[#allocation50_spill] sm:$0xff] %v16088_v9  ;;  %v16091_v31 = vrot.slane %v3879_v60, %v19641_v23  ;;  %19664 = vst [vmem:[#allocation53_spill] sm:$0xff] %v16094_v19  ;;  %v16097_v17 = vrot.slane %v5420_v27, %v19641_v23 }
 0x384   : > { %v4904_v57 = vrot.slane %v4903_v14, 1  ;;  %v16112_v27 = vrot.slane %v5084_v7, %v19641_v23  ;;  %v16148_v38 = vrot.slane %v3883_v3, %v19641_v23  ;;  %v5468_v5 = vcombine.high %v3883_v3, %v3883_v3 }
 0x385   : > { %19663 = vst [vmem:[#allocation46_spill] sm:$0xff] %v16091_v31  ;;  %v4913_v51 = vadd.f32 %v4912_v33, %v4897_v35  ;;  %19665 = vst [vmem:[#allocation48_spill] sm:$0xff] %v16097_v17  ;;  %v16109_v33 = vrot.slane %v3861_v1, %v19641_v23  ;;  %v16115_v35 = vrot.slane %v3881_v10, %v19641_v23  ;;  %v3885_v1 = vld [vmem:[%s19650_s4 + $0x60] sm:$0xff]  ;;  %v3871_v17 = vld [vmem:[%s19649_s29 + $0x90] sm:$0xff] }
 0x386   : > { %v4905_v50 = vadd.f32 %v4904_v57, %v4903_v14  ;;  %19668 = vst [vmem:[#allocation55_spill] sm:$0xff] %v16112_v27  ;;  %v3863_v14 = vld [vmem:[%s19649_s29 + $0x50] sm:$0xff]  ;;  %19672 = vst [vmem:[#allocation13_spill] sm:$0xff] %v16148_v38  ;;  %v16169_v15 = vrot.slane %v3885_v1, %v19641_v23  ;;  %v5492_v2 = vcombine.high %v3885_v1, %v3885_v1 }
 0x387   : > { %19667 = vst [vmem:[#allocation54_spill] sm:$0xff] %v16109_v33  ;;  %19669 = vst [vmem:[#allocation56_spill] sm:$0xff] %v16115_v35  ;;  %v16145_v10 = vrot.slane %v3863_v14, %v19641_v23  ;;  %v5108_v8 = vcombine.high %v3863_v14, %v3863_v14  ;;  %v3869_v14 = vld [vmem:[%s19649_s29 + $0x80] sm:$0xff]  ;;  %v5516_v11 = vcombine.high %v3887_v39, %v3887_v39  ;;  %v13586_v33 = vld [vmem:[%s19659_s1 + $0x18] sm:$0xff]  }
 0x388   : > { %v4914_v57 = vadd.f32 %v4913_v51, %v4905_v50  ;;  %v16136_v51 = vrot.slane %v5444_v29, %v19641_v23  ;;  %v3865_v50 = vld [vmem:[%s19649_s29 + $0x60] sm:$0xff]  ;;  %v3867_v29 = vld [vmem:[%s19649_s29 + $0x70] sm:$0xff]  ;;  %19674 = vst [vmem:[#allocation15_spill] sm:$0xff] %v16169_v15  ;;  %v16190_v27 = vrot.slane %v5468_v5, %v19641_v23  ;;  %v5180_v60 = vcombine.high %v3869_v14, %v3869_v14 }
 0x389   : > { %19671 = vst [vmem:[#allocation16_spill] sm:$0xff] %v16145_v10  ;;  %v16166_v31 = vrot.slane %v3865_v50, %v19641_v23  ;;  %v5132_v41 = vcombine.high %v3865_v50, %v3865_v50  ;;  %v5156_v35 = vcombine.high %v3867_v29, %v3867_v29  ;;  %v16187_v32 = vrot.slane %v5108_v8, %v19641_v23  ;;  %v19697_v15 = vld [vmem:[#allocation21_spill] sm:$0xff] }
 0x38a   : > { %19670 = vst [vmem:[#allocation57_spill] sm:$0xff] %v16136_v51  ;;  %v4915_v7 = vmul.f32 0.0003125, %v4914_v57  ;;  %v3889_v57 = vld [vmem:[%s19650_s4 + $0x80] sm:$0xff]  ;;  %19676 = vst [vmem:[#allocation18_spill] sm:$0xff] %v16190_v27  ;;  %v5204_v19 = vcombine.high %v3871_v17, %v3871_v17  ;;  %v16203_v5 = vrot.slane %v5492_v2, %v19641_v23  ;;  %13083 = vmatpush3.bf16.msra.mxu1 %v13586_v33 }
 0x38b   : > { %19673 = vst [vmem:[#allocation59_spill] sm:$0xff] %v16166_v31  ;;  %19675 = vst [vmem:[#allocation17_spill] sm:$0xff] %v16187_v32  ;;  %v5540_v51 = vcombine.high %v3889_v57, %v3889_v57  ;;  %v16200_v8 = vrot.slane %v5132_v41, %v19641_v23  ;;  %v16206_v38 = vrot.slane %v3867_v29, %v19641_v23  ;;  %13088 = vmatprep.subr.bf16.mxu1 %v19666_v49  ;;  %v19698_v27 = vld [vmem:[#allocation26_spill] sm:$0xff]  ;;  %v19707_v31 = vld [vmem:[#allocation33_spill] sm:$0xff] }
 0x38c   : > { %v4916_v3 = vadd.f32 1e-05, %v4915_v7  ;;  %v3891_v7 = vld [vmem:[%s19650_s4 + $0x90] sm:$0xff]  ;;  %19678 = vst [vmem:[#allocation47_spill] sm:$0xff] %v16203_v5  ;;  %v16209_v10 = vrot.slane %v5156_v35, %v19641_v23  ;;  %v16212_v9 = vrot.slane %v3887_v39, %v19641_v23  ;;  %v16215_v1 = vrot.slane %v5516_v11, %v19641_v23 }
 0x38d   : > { %19677 = vst [vmem:[#allocation51_spill] sm:$0xff] %v16200_v8  ;;  %19679 = vst [vmem:[#allocation58_spill] sm:$0xff] %v16206_v38  ;;  %v16219_v41 = vrot.slane %v3869_v14, %v19641_v23  ;;  %v16222_v2 = vrot.slane %v3889_v57, %v19641_v23  ;;  %v16225_v33 = vrot.slane %v3871_v17, %v19641_v23  ;;  %v19696_v5 = vld [vmem:[#allocation24_spill] sm:$0xff]  ;;  %v19706_v38 = vld [vmem:[#allocation34_spill] sm:$0xff] }
 0x38e   : > { %13973 = vrsqrt.f32 %v4916_v3  ;;  %v5564_v3 = vcombine.high %v3891_v7, %v3891_v7  ;;  %19680 = vst [vmem:[#allocation60_spill] sm:$0xff] %v16209_v10  ;;  %19681 = vst [vmem:[#allocation61_spill] sm:$0xff] %v16212_v9  ;;  %v16228_v35 = vrot.slane %v3891_v7, %v19641_v23  ;;  %v16231_v39 = vrot.slane %v5180_v60, %v19641_v23  ;;  %v19695_v9 = vld [vmem:[#allocation19_spill] sm:$0xff] }
 0x38f   : > { %19682 = vst [vmem:[#allocation62_spill] sm:$0xff] %v16215_v1  ;;  %19683 = vst [vmem:[#allocation63_spill] sm:$0xff] %v16219_v41  ;;  %v16234_v11 = vrot.slane %v5540_v51, %v19641_v23  ;;  %v16237_v29 = vrot.slane %v5204_v19, %v19641_v23  ;;  %v19694_v1 = vld [vmem:[#allocation20_spill] sm:$0xff]  ;;  %v19703_v41 = vld [vmem:[#allocation29_spill] sm:$0xff] }
 0x390   : > { %19684 = vst [vmem:[#allocation64_spill] sm:$0xff] %v16222_v2  ;;  %19685 = vst [vmem:[#allocation65_spill] sm:$0xff] %v16225_v33  ;;  %v16240_v14 = vrot.slane %v5564_v3, %v19641_v23  ;;  %v19693_v2 = vld [vmem:[#allocation23_spill] sm:$0xff] }
 0x391   : > { %19686 = vst [vmem:[#allocation66_spill] sm:$0xff] %v16228_v35  ;;  %19687 = vst [vmem:[#allocation67_spill] sm:$0xff] %v16231_v39  ;;  %v19701_v33 = vld [vmem:[#allocation27_spill] sm:$0xff]  ;;  %v19702_v39 = vld [vmem:[#allocation30_spill] sm:$0xff] }
 0x392   : > { %19688 = vst [vmem:[#allocation68_spill] sm:$0xff] %v16234_v11  ;;  %19689 = vst [vmem:[#allocation69_spill] sm:$0xff] %v16237_v29  ;;  %v19692_v11 = vld [vmem:[#allocation22_spill] sm:$0xff]  ;;  %v19699_v29 = vld [vmem:[#allocation25_spill] sm:$0xff] }
 0x393   : > { %19690 = vst [vmem:[#allocation70_spill] sm:$0xff] %v16240_v14  ;;  %v19691_v14 = vld [vmem:[#allocation14_spill] sm:$0xff]  ;;  %v19705_v10 = vld [vmem:[#allocation31_spill] sm:$0xff] }
 0x398   : > { %v13974_v57 = vpop.eup %13973 }
 0x399   : > { %v4918_v7 = vmul.f32 %v13974_v57, %v15633_v22  ;;  %v4919_v60 = vmul.f32 %v13974_v57, %v15637_v59  ;;  %v4920_v49 = vmul.f32 %v13974_v57, %v15641_v4  ;;  %v4921_v51 = vmul.f32 %v13974_v57, %v15645_v25 }
 0x39a   : > { %v4922_v23 = vmul.f32 %v13974_v57, %v15649_v52  ;;  %v4923_v19 = vmul.f32 %v13974_v57, %v15653_v40  ;;  %v4924_v3 = vmul.f32 %v13974_v57, %v15657_v30  ;;  %v4925_v35 = vmul.f32 %v13974_v57, %v15661_v12 }
 0x39b   : > { %v4926_v50 = vmul.f32 %v13974_v57, %v15665_v13  ;;  %v4927_v17 = vmul.f32 %v13974_v57, %v15797_v36  ;;  %v4928_v22 = vmul.f32 %v13974_v57, %v19691_v14  ;;  %v4929_v59 = vmul.f32 %v13974_v57, %v19692_v11 }
 0x39c   : > { %v4930_v4 = vmul.f32 %v13974_v57, %v19693_v2  ;;  %v4931_v25 = vmul.f32 %v13974_v57, %v15681_v48  ;;  %v4932_v52 = vmul.f32 %v13974_v57, %v15845_v6  ;;  %v4933_v40 = vmul.f32 %v13974_v57, %v15685_v58 }
 0x39d   : > { %v4934_v30 = vmul.f32 %v13974_v57, %v19694_v1  ;;  %v4935_v12 = vmul.f32 %v13974_v57, %v15693_v34  ;;  %v4936_v13 = vmul.f32 %v13974_v57, %v15697_v26  ;;  %v4937_v36 = vmul.f32 %v13974_v57, %v15859_v53 }
 0x39e   : > { %v4938_v14 = vmul.f32 %v13974_v57, %v19695_v9  ;;  %v4939_v11 = vmul.f32 %v13974_v57, %v15705_v24  ;;  %v4940_v2 = vmul.f32 %v13974_v57, %v15709_v0  ;;  %v4941_v48 = vmul.f32 %v13974_v57, %v15713_v21 }
 0x39f   : > { %v4942_v6 = vmul.f32 %v13974_v57, %v15717_v37  ;;  %v4943_v58 = vmul.f32 %v13974_v57, %v15721_v46  ;;  %v4944_v1 = vmul.f32 %v13974_v57, %v15725_v56  ;;  %v4945_v34 = vmul.f32 %v13974_v57, %v15729_v28 }
 0x3a0   : > { %v4946_v26 = vmul.f32 %v13974_v57, %v19696_v5  ;;  %v4947_v53 = vmul.f32 %v13974_v57, %v15895_v63  ;;  %v4948_v9 = vmul.f32 %v13974_v57, %v15737_v44  ;;  %v4949_v24 = vmul.f32 %v13974_v57, %v15741_v18  ;;  %v12216_v44 = vld.sshfl [vmem:[%s19649_s29 + $0x8] sm:$0x3 pattern:$0x76325410]  ;;  %v19700_v18 = vld [vmem:[#allocation28_spill] sm:$0xff] }
 0x3a1   : > { %v4950_v0 = vmul.f32 %v13974_v57, %v19697_v15  ;;  %v4951_v21 = vmul.f32 %v13974_v57, %v15749_v55  ;;  %v4952_v37 = vmul.f32 %v13974_v57, %v15931_v54  ;;  %v4953_v46 = vmul.f32 %v13974_v57, %v15753_v47 }
 0x3a2   : > { %v4954_v56 = vmul.f32 %v13974_v57, %v19698_v27  ;;  %v4955_v28 = vmul.f32 %v13974_v57, %v15761_v45  ;;  %v4956_v5 = vmul.f32 %v13974_v57, %v19699_v29  ;;  %v4957_v63 = vmul.f32 %v13974_v57, %v15951_v43  ;;  %v12217_v45 = vld.sshfl [vmem:[%s19649_s29 + $0x18] sm:$0x3 pattern:$0x76325410] }
 0x3a3   : > { %v4958_v15 = vmul.f32 %v13974_v57, %v19700_v18  ;;  %v4959_v55 = vmul.f32 %v13974_v57, %v19701_v33  ;;  %v4960_v54 = vmul.f32 %v13974_v57, %v19702_v39  ;;  %v4961_v47 = vmul.f32 %v13974_v57, %v19703_v41  ;;  %v19704_v27 = vld [vmem:[#allocation32_spill] sm:$0xff] }
 0x3a4   : > { %v4962_v29 = vmul.f32 %v13974_v57, %v19704_v27  ;;  %v4963_v43 = vmul.f32 %v13974_v57, %v19705_v10  ;;  %v4964_v8 = vmul.f32 %v13974_v57, %v19706_v38  ;;  %v4965_v32 = vmul.f32 %v13974_v57, %v19707_v31  ;;  %v12218_v27 = vld.sshfl [vmem:[%s19649_s29 + $0x28] sm:$0x3 pattern:$0x76325410] }
 0x3a5   : > { %v4966_v18 = vmul.f32 %v13974_v57, %v19708_v16  ;;  %v4967_v33 = vmul.f32 %v13974_v57, %v19709_v20  ;;  %v5278_v39 = vmul.f32 %v16012_v62, %v4918_v7  ;;  %v19710_v41 = vcombine.high %v16012_v62, %v16012_v62  ;;  %v19712_v20 = vld [vmem:[#allocation37_spill] sm:$0xff]  ;;  %v12219_v7 = vld.sshfl [vmem:[%s19649_s29 + $0x38] sm:$0x3 pattern:$0x76325410] }
 0x3a6   : > { %v5280_v10 = vmul.f32 %v16015_v61, %v4920_v49  ;;  %v19711_v38 = vcombine.high %v16015_v61, %v16015_v61  ;;  %v5282_v16 = vmul.f32 %v12216_v44, %v4922_v23  ;;  %v5283_v57 = vmul.f32 %v19712_v20, %v4923_v19  ;;  %v12220_v23 = vld.sshfl [vmem:[%s19649_s29 + $0x48] sm:$0x3 pattern:$0x76325410]  ;;  %v19716_v19 = vld [vmem:[#allocation43_spill] sm:$0xff] }
 0x3a7   : > { %v5279_v42 = vmul.f32 %v19710_v41, %v4919_v60  ;;  %v19713_v62 = vcombine.high %v19712_v20, %v19712_v20  ;;  %v19714_v41 = vld [vmem:[#allocation45_spill] sm:$0xff]  ;;  %v5288_v44 = vmul.f32 %v19716_v19, %v4928_v22  ;;  %v19717_v20 = vcombine.high %v19716_v19, %v19716_v19 }
 0x3a8   : > { %v5281_v31 = vmul.f32 %v19711_v38, %v4921_v51  ;;  %v5285_v49 = vmul.f32 %v19714_v41, %v4925_v35  ;;  %v19715_v61 = vcombine.high %v19714_v41, %v19714_v41  ;;  %v5287_v51 = vmul.f32 %v12217_v45, %v4927_v17  ;;  %v12221_v17 = vld.sshfl [vmem:[%s19649_s29 + $0x58] sm:$0x3 pattern:$0x76325410] }
 0x3a9   : > { %v5284_v60 = vmul.f32 %v19713_v62, %v4924_v3  ;;  %v5289_v3 = vmul.f32 %v19717_v20, %v4929_v59  ;;  %v19718_v62 = vld [vmem:[#allocation49_spill] sm:$0xff]  ;;  %v5292_v45 = vmul.f32 %v12218_v27, %v4932_v52  ;;  %v19724_v27 = vld [vmem:[#allocation54_spill] sm:$0xff] }
 0x3aa   : > { %v5286_v38 = vmul.f32 %v19715_v61, %v4926_v50  ;;  %v5290_v35 = vmul.f32 %v19718_v62, %v4930_v4  ;;  %v19719_v41 = vcombine.high %v19718_v62, %v19718_v62  ;;  %v19720_v61 = vld [vmem:[#allocation50_spill] sm:$0xff]  ;;  %v19722_v59 = vld [vmem:[#allocation53_spill] sm:$0xff]  ;;  %v5298_v52 = vmul.f32 %v19724_v27, %v4938_v14  ;;  %v12223_v14 = vld.sshfl [vmem:[%s19649_s29 + $0x78] sm:$0x3 pattern:$0x76325410] }
 0x3ab   : > { %v5293_v22 = vmul.f32 %v19720_v61, %v4933_v40  ;;  %v19721_v19 = vcombine.high %v19720_v61, %v19720_v61  ;;  %v5295_v4 = vmul.f32 %v19722_v59, %v4935_v12  ;;  %v19723_v62 = vcombine.high %v19722_v59, %v19722_v59 }
 0x3ac   : > { %v5291_v50 = vmul.f32 %v19719_v41, %v4931_v25  ;;  %v5297_v41 = vmul.f32 %v12219_v7, %v4937_v36  ;;  %v19725_v40 = vcombine.high %v19724_v27, %v19724_v27  ;;  %v19728_v7 = vld [vmem:[#allocation16_spill] sm:$0xff] }
 0x3ad   : > { %v5294_v20 = vmul.f32 %v19721_v19, %v4934_v30  ;;  %v5296_v25 = vmul.f32 %v19723_v62, %v4936_v13  ;;  %v12222_v19 = vld.sshfl [vmem:[%s19649_s29 + $0x68] sm:$0x3 pattern:$0x76325410]  ;;  %v19726_v30 = vld [vmem:[#allocation55_spill] sm:$0xff]  ;;  %v5302_v62 = vmul.f32 %v12220_v23, %v4942_v6  ;;  %v5303_v36 = vmul.f32 %v19728_v7, %v4943_v58 }
 0x3ae   : > { %v5299_v61 = vmul.f32 %v19725_v40, %v4939_v11  ;;  %v5300_v12 = vmul.f32 %v19726_v30, %v4940_v2  ;;  %v19727_v59 = vcombine.high %v19726_v30, %v19726_v30  ;;  %v19729_v11 = vcombine.high %v19728_v7, %v19728_v7  ;;  %v19730_v40 = vld [vmem:[#allocation17_spill] sm:$0xff]  ;;  %v12224_v6 = vld.sshfl [vmem:[%s19649_s29 + $0x88] sm:$0x3 pattern:$0x76325410]  ;;  %v19732_v58 = vld [vmem:[#allocation59_spill] sm:$0xff] }
 0x3af   : > { %v5305_v2 = vmul.f32 %v19730_v40, %v4945_v34  ;;  %v19731_v30 = vcombine.high %v19730_v40, %v19730_v40  ;;  %v5308_v23 = vmul.f32 %v19732_v58, %v4948_v9  ;;  %v19733_v7 = vcombine.high %v19732_v58, %v19732_v58 }
 0x3b0   : > { %v5301_v13 = vmul.f32 %v19727_v59, %v4941_v48  ;;  %v5304_v27 = vmul.f32 %v19729_v11, %v4944_v1  ;;  %v5307_v59 = vmul.f32 %v12221_v17, %v4947_v53  ;;  %v19734_v11 = vld [vmem:[#allocation51_spill] sm:$0xff]  ;;  %v12225_v53 = vld.sshfl [vmem:[%s19649_s29 + $0x98] sm:$0x3 pattern:$0x76325410]  ;;  %v5312_v17 = vmul.f32 %v12222_v19, %v4952_v37 }
 0x3b1   : > { %v5306_v48 = vmul.f32 %v19731_v30, %v4946_v26  ;;  %v5309_v1 = vmul.f32 %v19733_v7, %v4949_v24  ;;  %v5310_v34 = vmul.f32 %v19734_v11, %v4950_v0  ;;  %v19735_v40 = vcombine.high %v19734_v11, %v19734_v11  ;;  %v19736_v30 = vld [vmem:[#allocation58_spill] sm:$0xff]  ;;  %v19738_v24 = vld [vmem:[#allocation60_spill] sm:$0xff]  ;;  %v19740_v19 = vld [vmem:[#allocation63_spill] sm:$0xff] }
 0x3b2   : > { %v5313_v9 = vmul.f32 %v19736_v30, %v4953_v46  ;;  %v19737_v58 = vcombine.high %v19736_v30, %v19736_v30  ;;  %v5315_v0 = vmul.f32 %v19738_v24, %v4955_v28  ;;  %v19739_v11 = vcombine.high %v19738_v24, %v19738_v24 }
 0x3b3   : > { %v5311_v26 = vmul.f32 %v19735_v40, %v4951_v21  ;;  %v5317_v40 = vmul.f32 %v12223_v14, %v4957_v63  ;;  %v5318_v37 = vmul.f32 %v19740_v19, %v4958_v15  ;;  %v19741_v46 = vcombine.high %v19740_v19, %v19740_v19  ;;  %v19744_v14 = vld [vmem:[#allocation65_spill] sm:$0xff]  ;;  %v12227_v15 = vld.sshfl [vmem:[%s19650_s4 + $0x18] sm:$0x3 pattern:$0x76325410] }
 0x3b4   : > { %v5314_v7 = vmul.f32 %v19737_v58, %v4954_v56  ;;  %v5316_v21 = vmul.f32 %v19739_v11, %v4956_v5  ;;  %v12226_v56 = vld.sshfl [vmem:[%s19650_s4 + $0x8] sm:$0x3 pattern:$0x76325410]  ;;  %v19742_v58 = vld [vmem:[#allocation67_spill] sm:$0xff]  ;;  %v5322_v11 = vmul.f32 %v12224_v6, %v4962_v29  ;;  %v5323_v63 = vmul.f32 %v19744_v14, %v4963_v43 }
 0x3b5   : > { %v5319_v30 = vmul.f32 %v19741_v46, %v4959_v55  ;;  %v5320_v28 = vmul.f32 %v19742_v58, %v4960_v54  ;;  %v19743_v24 = vcombine.high %v19742_v58, %v19742_v58  ;;  %v19745_v55 = vcombine.high %v19744_v14, %v19744_v14  ;;  %v19746_v46 = vld [vmem:[#allocation69_spill] sm:$0xff]  ;;  %v12228_v29 = vld.sshfl [vmem:[%s19650_s4 + $0x28] sm:$0x3 pattern:$0x76325410] }
 0x3b6   : > { %v5325_v54 = vmul.f32 %v19746_v46, %v4965_v32  ;;  %v19747_v58 = vcombine.high %v19746_v46, %v19746_v46  ;;  %v19748_v43 = vld [vmem:[#allocation38_spill] sm:$0xff] }
 0x3b7   : > { %v5321_v5 = vmul.f32 %v19743_v24, %v4961_v47  ;;  %v5324_v19 = vmul.f32 %v19745_v55, %v4964_v8  ;;  %v5327_v47 = vmul.f32 %v12225_v53, %v4967_v33  ;;  %v16444_v6 = vadd.f32 %v19748_v43, %v5278_v39  ;;  %v19750_v55 = vld [vmem:[#allocation41_spill] sm:$0xff]  ;;  %v12229_v33 = vld.sshfl [vmem:[%s19650_s4 + $0x38] sm:$0x3 pattern:$0x76325410] }
 0x3b8   : > { %v5326_v24 = vmul.f32 %v19747_v58, %v4966_v18  ;;  %v19749_v14 = vcombine.high %v19748_v43, %v19748_v43  ;;  %v16452_v32 = vadd.f32 %v19750_v55, %v5280_v10  ;;  %v19751_v46 = vcombine.high %v19750_v55, %v19750_v55  ;;  %v19752_v39 = vld [vmem:[#allocation40_spill] sm:$0xff] }
 0x3b9   : > { %v16462_v53 = vadd.f32 %v12226_v56, %v5282_v16  ;;  %v16465_v58 = vadd.f32 %v19752_v39, %v5283_v57  ;;  %v19755_v10 = vld [vmem:[#allocation44_spill] sm:$0xff]  ;;  %v19757_v16 = vld [vmem:[#allocation42_spill] sm:$0xff] }
 0x3ba   : > { %v16449_v8 = vadd.f32 %v19749_v14, %v5279_v42  ;;  %v16457_v18 = vadd.f32 %v19751_v46, %v5281_v31  ;;  %v19754_v42 = vcombine.high %v19752_v39, %v19752_v39  ;;  %v16473_v14 = vadd.f32 %v19755_v10, %v5285_v49  ;;  %v19759_v49 = vld [vmem:[#allocation52_spill] sm:$0xff] }
 0x3bb   : > { %19753 = vst [vmem:[#allocation14_spill] sm:$0xff] %v16465_v58  ;;  %v19756_v31 = vcombine.high %v19755_v10, %v19755_v10  ;;  %v16480_v46 = vadd.f32 %v12227_v15, %v5287_v51  ;;  %v16483_v56 = vadd.f32 %v19757_v16, %v5288_v44  ;;  %v19758_v57 = vcombine.high %v19757_v16, %v19757_v16  ;;  %v19761_v44 = vld [vmem:[#allocation46_spill] sm:$0xff] }
 0x3bc   : > { %v16470_v43 = vadd.f32 %v19754_v42, %v5284_v60  ;;  %v12230_v60 = vld.sshfl [vmem:[%s19650_s4 + $0x48] sm:$0x3 pattern:$0x76325410]  ;;  %v16494_v39 = vadd.f32 %v19759_v49, %v5290_v35  ;;  %v16501_v15 = vadd.f32 %v12228_v29, %v5292_v45  ;;  %v16504_v42 = vadd.f32 %v19761_v44, %v5293_v22  ;;  %v19763_v35 = vld [vmem:[#allocation48_spill] sm:$0xff] }
 0x3bd   : > { %v16478_v55 = vadd.f32 %v19756_v31, %v5286_v38  ;;  %v16488_v58 = vadd.f32 %v19758_v57, %v5289_v3  ;;  %v19760_v38 = vcombine.high %v19759_v49, %v19759_v49  ;;  %v12231_v3 = vld.sshfl [vmem:[%s19650_s4 + $0x58] sm:$0x3 pattern:$0x76325410]  ;;  %v19762_v10 = vcombine.high %v19761_v44, %v19761_v44 }
 0x3be   : > { %v16515_v16 = vadd.f32 %v19763_v35, %v5295_v4  ;;  %v16522_v29 = vadd.f32 %v12229_v33, %v5297_v41  ;;  %v12232_v22 = vld.sshfl [vmem:[%s19650_s4 + $0x68] sm:$0x3 pattern:$0x76325410]  ;;  %v19765_v57 = vld [vmem:[#allocation56_spill] sm:$0xff]  ;;  %v19767_v4 = vld [vmem:[#allocation57_spill] sm:$0xff] }
 0x3bf   : > { %v16499_v51 = vadd.f32 %v19760_v38, %v5291_v50  ;;  %v16512_v31 = vadd.f32 %v19762_v10, %v5294_v20  ;;  %v19764_v50 = vcombine.high %v19763_v35, %v19763_v35  ;;  %v16528_v49 = vadd.f32 %v19765_v57, %v5298_v52  ;;  %v12233_v33 = vld.sshfl [vmem:[%s19650_s4 + $0x78] sm:$0x3 pattern:$0x76325410]  ;;  %v19769_v52 = vld [vmem:[#allocation13_spill] sm:$0xff] }
 0x3c0   : > { %v19766_v20 = vcombine.high %v19765_v57, %v19765_v57  ;;  %v16536_v44 = vadd.f32 %v19767_v4, %v5300_v12  ;;  %v16546_v10 = vadd.f32 %v12230_v60, %v5302_v62  ;;  %v16549_v35 = vadd.f32 %v19769_v52, %v5303_v36  ;;  %v19771_v12 = vld [vmem:[#allocation18_spill] sm:$0xff]  ;;  %v19773_v62 = vld [vmem:[#allocation15_spill] sm:$0xff] }
 0x3c1   : > { %v16520_v45 = vadd.f32 %v19764_v50, %v5296_v25  ;;  %v19768_v25 = vcombine.high %v19767_v4, %v19767_v4  ;;  %v16557_v57 = vadd.f32 %v19771_v12, %v5305_v2  ;;  %v16564_v4 = vadd.f32 %v12231_v3, %v5307_v59  ;;  %v19775_v2 = vld [vmem:[#allocation47_spill] sm:$0xff] }
 0x3c2   : > { %v16533_v38 = vadd.f32 %v19766_v20, %v5299_v61  ;;  %v19770_v61 = vcombine.high %v19769_v52, %v19769_v52  ;;  %v16567_v60 = vadd.f32 %v19773_v62, %v5308_v23  ;;  %v19774_v36 = vcombine.high %v19773_v62, %v19773_v62  ;;  %v19777_v23 = vld [vmem:[#allocation61_spill] sm:$0xff] }
 0x3c3   : > { %v16541_v41 = vadd.f32 %v19768_v25, %v5301_v13  ;;  %v19772_v13 = vcombine.high %v19771_v12, %v19771_v12  ;;  %v16578_v52 = vadd.f32 %v19775_v2, %v5310_v34  ;;  %v16585_v3 = vadd.f32 %v12232_v22, %v5312_v17  ;;  %v19779_v34 = vld [vmem:[#allocation62_spill] sm:$0xff] }
 0x3c4   : > { %v16554_v50 = vadd.f32 %v19770_v61, %v5304_v27  ;;  %v16572_v25 = vadd.f32 %v19774_v36, %v5309_v1  ;;  %v12234_v27 = vld.sshfl [vmem:[%s19650_s4 + $0x88] sm:$0x3 pattern:$0x76325410]  ;;  %v16588_v61 = vadd.f32 %v19777_v23, %v5313_v9  ;;  %v19778_v12 = vcombine.high %v19777_v23, %v19777_v23  ;;  %v19781_v9 = vld [vmem:[#allocation64_spill] sm:$0xff] }
 0x3c5   : > { %v16562_v20 = vadd.f32 %v19772_v13, %v5306_v48  ;;  %v19776_v48 = vcombine.high %v19775_v2, %v19775_v2  ;;  %v12235_v1 = vld.sshfl [vmem:[%s19650_s4 + $0x98] sm:$0x3 pattern:$0x76325410]  ;;  %v16599_v62 = vadd.f32 %v19779_v34, %v5315_v0  ;;  %v16606_v22 = vadd.f32 %v12233_v33, %v5317_v40  ;;  %v19785_v40 = vld [vmem:[#allocation66_spill] sm:$0xff] }
 0x3c6   : > { %v16596_v13 = vadd.f32 %v19778_v12, %v5314_v7  ;;  %v16609_v36 = vadd.f32 %v19781_v9, %v5318_v37  ;;  %v19782_v2 = vcombine.high %v19781_v9, %v19781_v9  ;;  %v19783_v7 = vld [vmem:[#allocation68_spill] sm:$0xff]  ;;  %v16627_v33 = vadd.f32 %v19785_v40, %v5323_v63 }
 0x3c7   : > { %v16583_v59 = vadd.f32 %v19776_v48, %v5311_v26  ;;  %v19780_v26 = vcombine.high %v19779_v34, %v19779_v34  ;;  %v16617_v23 = vadd.f32 %v19783_v7, %v5320_v28  ;;  %v19784_v0 = vcombine.high %v19783_v7, %v19783_v7  ;;  %v19789_v7 = vld [vmem:[#allocation14_spill] sm:$0xff] }
 0x3c8   : > { %v16614_v48 = vadd.f32 %v19782_v2, %v5319_v30  ;;  %v19786_v37 = vcombine.high %v19785_v40, %v19785_v40  ;;  %v19787_v30 = vld [vmem:[#allocation70_spill] sm:$0xff]  ;;  %v5689_v63 = vmax.f32 %v16449_v8, 0.0  ;;  %v5691_v2 = vmax.f32 %v16457_v18, 0.0 }
 0x3c9   : > { %v16604_v17 = vadd.f32 %v19780_v26, %v5316_v21  ;;  %v16622_v12 = vadd.f32 %v19784_v0, %v5321_v5  ;;  %v16624_v21 = vadd.f32 %v12234_v27, %v5322_v11  ;;  %v16635_v26 = vadd.f32 %v19787_v30, %v5325_v54 }
 0x3ca   : > { %v16632_v34 = vadd.f32 %v19786_v37, %v5324_v19  ;;  %v19788_v28 = vcombine.high %v19787_v30, %v19787_v30  ;;  %v16642_v5 = vadd.f32 %v12235_v1, %v5327_v47  ;;  %v5688_v11 = vmax.f32 %v16444_v6, 0.0  ;;  %v19790_v30 = vld [vmem:[#allocation39_spill] sm:$0xff] }
 0x3cb   : > { %v5690_v27 = vmax.f32 %v16452_v32, 0.0  ;;  %v5692_v19 = vmax.f32 %v16462_v53, 0.0  ;;  %v5693_v54 = vmax.f32 %v19789_v7, 0.0  ;;  %v5694_v0 = vmax.f32 %v16470_v43, 0.0 }
 0x3cc   : > { %v16640_v9 = vadd.f32 %v19788_v28, %v5326_v24  ;;  %v5695_v40 = vmax.f32 %v16473_v14, 0.0  ;;  %v5696_v24 = vmax.f32 %v16478_v55, 0.0  ;;  %v5697_v47 = vmax.f32 %v16480_v46, 0.0 }
 0x3cd   : > { %v5698_v6 = vmax.f32 %v16483_v56, 0.0  ;;  %v5699_v8 = vmax.f32 %v16488_v58, 0.0  ;;  %v5700_v32 = vmax.f32 %v16494_v39, 0.0  ;;  %v5701_v18 = vmax.f32 %v16499_v51, 0.0 }
 0x3ce   : > { %v5702_v53 = vmax.f32 %v16501_v15, 0.0  ;;  %v5703_v1 = vmax.f32 %v16504_v42, 0.0  ;;  %v5704_v43 = vmax.f32 %v16512_v31, 0.0  ;;  %v5705_v14 = vmax.f32 %v16515_v16, 0.0 }
 0x3cf   : > { %v5706_v55 = vmax.f32 %v16520_v45, 0.0  ;;  %v5707_v46 = vmax.f32 %v16522_v29, 0.0  ;;  %v5708_v56 = vmax.f32 %v16528_v49, 0.0  ;;  %v5709_v58 = vmax.f32 %v16533_v38, 0.0 }
 0x3d0   : > { %v5710_v39 = vmax.f32 %v16536_v44, 0.0  ;;  %v5711_v51 = vmax.f32 %v16541_v41, 0.0  ;;  %v5712_v15 = vmax.f32 %v16546_v10, 0.0  ;;  %v5713_v42 = vmax.f32 %v16549_v35, 0.0 }
 0x3d1   : > { %v5714_v31 = vmax.f32 %v16554_v50, 0.0  ;;  %v5715_v16 = vmax.f32 %v16557_v57, 0.0  ;;  %v5716_v45 = vmax.f32 %v16562_v20, 0.0  ;;  %v5717_v29 = vmax.f32 %v16564_v4, 0.0 }
 0x3d2   : > { %v5718_v49 = vmax.f32 %v16567_v60, 0.0  ;;  %v5719_v38 = vmax.f32 %v16572_v25, 0.0  ;;  %v5720_v44 = vmax.f32 %v16578_v52, 0.0  ;;  %v5721_v41 = vmax.f32 %v16583_v59, 0.0 }
 0x3d3   : > { %v5722_v10 = vmax.f32 %v16585_v3, 0.0  ;;  %v5723_v35 = vmax.f32 %v16588_v61, 0.0  ;;  %v5724_v50 = vmax.f32 %v16596_v13, 0.0  ;;  %v5725_v57 = vmax.f32 %v16599_v62, 0.0 }
 0x3d4   : > { %v5726_v20 = vmax.f32 %v16604_v17, 0.0  ;;  %v5727_v4 = vmax.f32 %v16606_v22, 0.0  ;;  %v5728_v60 = vmax.f32 %v16609_v36, 0.0  ;;  %v5729_v25 = vmax.f32 %v16614_v48, 0.0 }
 0x3d5   : > { %v5730_v52 = vmax.f32 %v16617_v23, 0.0  ;;  %v5731_v59 = vmax.f32 %v16622_v12, 0.0  ;;  %v5732_v3 = vmax.f32 %v16624_v21, 0.0  ;;  %v5733_v61 = vmax.f32 %v16627_v33, 0.0 }
 0x3d6   : > { %v5734_v13 = vmax.f32 %v16632_v34, 0.0  ;;  %v5735_v62 = vmax.f32 %v16635_v26, 0.0  ;;  %v5736_v17 = vmax.f32 %v16640_v9, 0.0  ;;  %v5737_v22 = vmax.f32 %v16642_v5, 0.0 }
 0x3d7   : > { %v5788_v37 = vcombine.low %v5688_v11, %v5689_v63  ;;  %v5789_v36 = vcombine.low %v5690_v27, %v5691_v2  ;;  %v16695_v48 = vrot.slane %v5692_v19, %v19790_v30  ;;  %v5812_v23 = vcombine.low %v5693_v54, %v5694_v0 }
 0x3d8   : > { %v5813_v28 = vcombine.low %v5695_v40, %v5696_v24  ;;  %v16698_v12 = vrot.slane %v5697_v47, %v19790_v30  ;;  %v5836_v21 = vcombine.low %v5698_v6, %v5699_v8  ;;  %v5837_v33 = vcombine.low %v5700_v32, %v5701_v18 }
 0x3d9   : > { %v5796_v34 = vrot.slane %v5788_v37, %v19790_v30  ;;  %v5803_v26 = vrot.slane %v5789_v36, %v19790_v30  ;;  %v5820_v9 = vrot.slane %v5812_v23, %v19790_v30  ;;  %v16704_v5 = vrot.slane %v5702_v53, %v19790_v30 }
 0x3da   : > { %v5827_v11 = vrot.slane %v5813_v28, %v19790_v30  ;;  %v5844_v63 = vrot.slane %v5836_v21, %v19790_v30  ;;  %v5851_v27 = vrot.slane %v5837_v33, %v19790_v30  ;;  %v5860_v2 = vcombine.low %v5703_v1, %v5704_v43 }
 0x3db   : > { %v5804_v19 = vcombine.low %v5796_v34, %v5803_v26  ;;  %v5861_v7 = vcombine.low %v5705_v14, %v5706_v55  ;;  %v16710_v54 = vrot.slane %v5707_v46, %v19790_v30  ;;  %v5884_v0 = vcombine.low %v5708_v56, %v5709_v58  ;;  %v19791_v26 = vld [vmem:[#allocation11_spill] sm:$0xff] }
 0x3dc   : > { %v5828_v40 = vcombine.low %v5820_v9, %v5827_v11  ;;  %v5852_v24 = vcombine.low %v5844_v63, %v5851_v27  ;;  %v5868_v47 = vrot.slane %v5860_v2, %v19790_v30  ;;  %v5885_v6 = vcombine.low %v5710_v39, %v5711_v51 }
 0x3dd   : > { %v5875_v8 = vrot.slane %v5861_v7, %v19790_v30  ;;  %v5892_v32 = vrot.slane %v5884_v0, %v19790_v30  ;;  %v16716_v18 = vrot.slane %v5712_v15, %v19790_v30  ;;  %v5908_v53 = vcombine.low %v5713_v42, %v5714_v31 }
 0x3de   : > { %v5899_v1 = vrot.slane %v5885_v6, %v19790_v30  ;;  %v5909_v43 = vcombine.low %v5715_v16, %v5716_v45  ;;  %v16720_v14 = vrot.slane %v5717_v29, %v19790_v30  ;;  %v5932_v55 = vcombine.low %v5718_v49, %v5719_v38 }
 0x3df   : > { %v16722_v46 = vcombine.low %v5868_v47, %v5875_v8  ;;  %v5916_v56 = vrot.slane %v5908_v53, %v19790_v30  ;;  %v5933_v58 = vcombine.low %v5720_v44, %v5721_v41  ;;  %v16726_v39 = vrot.slane %v5722_v10, %v19790_v30 }
 0x3e0   : > { %v16728_v51 = vcombine.low %v5892_v32, %v5899_v1  ;;  %v5923_v15 = vrot.slane %v5909_v43, %v19790_v30  ;;  %v5940_v42 = vrot.slane %v5932_v55, %v19790_v30  ;;  %v5956_v31 = vcombine.low %v5723_v35, %v5724_v50 }
 0x3e1   : > { %v5947_v16 = vrot.slane %v5933_v58, %v19790_v30  ;;  %v5957_v45 = vcombine.low %v5725_v57, %v5726_v20  ;;  %v16734_v29 = vrot.slane %v5727_v4, %v19790_v30  ;;  %v5980_v49 = vcombine.low %v5728_v60, %v5729_v25 }
 0x3e2   : > { %v16736_v38 = vcombine.low %v5916_v56, %v5923_v15  ;;  %v5964_v44 = vrot.slane %v5956_v31, %v19790_v30  ;;  %v5981_v41 = vcombine.low %v5730_v52, %v5731_v59  ;;  %v16740_v10 = vrot.slane %v5732_v3, %v19790_v30 }
 0x3e3   : > { %v16742_v37 = vcombine.low %v5940_v42, %v5947_v16  ;;  %v5971_v36 = vrot.slane %v5957_v45, %v19790_v30  ;;  %v5988_v35 = vrot.slane %v5980_v49, %v19790_v30  ;;  %v6004_v50 = vcombine.low %v5733_v61, %v5734_v13 }
 0x3e4   : > { %v5995_v57 = vrot.slane %v5981_v41, %v19790_v30  ;;  %v6005_v20 = vcombine.low %v5735_v62, %v5736_v17  ;;  %v16748_v4 = vrot.slane %v5737_v22, %v19790_v30  ;;  %v6048_v60 = vpack.c.bf16 %v16695_v48, %v5804_v19 }
 0x3e5   : > { %v16751_v25 = vcombine.low %v5964_v44, %v5971_v36  ;;  %v6012_v52 = vrot.slane %v6004_v50, %v19790_v30  ;;  %v6049_v59 = vpack.c.bf16 %v16698_v12, %v5828_v40  ;;  %v6050_v3 = vpack.c.bf16 %v16704_v5, %v5852_v24 }
 0x3e6   : > { %v16756_v23 = vcombine.low %v5988_v35, %v5995_v57  ;;  %v6019_v61 = vrot.slane %v6005_v20, %v19790_v30  ;;  %v6051_v13 = vpack.c.bf16 %v16710_v54, %v16722_v46  ;;  %v6052_v62 = vpack.c.bf16 %v16716_v18, %v16728_v51 }
 0x3e7   : > { %v6053_v17 = vpack.c.bf16 %v16720_v14, %v16736_v38  ;;  %v6054_v22 = vpack.c.bf16 %v16726_v39, %v16742_v37  ;;  %v6055_v28 = vpack.c.bf16 %v16734_v29, %v16751_v25  ;;  %v12236_v21 = vpack.c.bf16 %v16695_v48, %v16695_v48 }
 0x3e8   : > { %v16771_v33 = vcombine.low %v6012_v52, %v6019_v61  ;;  %v6056_v34 = vpack.c.bf16 %v16740_v10, %v16756_v23  ;;  %v6075_v9 = vrot.slane %v6048_v60, %v19791_v26  ;;  %v12237_v11 = vpack.c.bf16 %v16698_v12, %v16698_v12 }
 0x3e9   : > { %v16779_v63 = vrot.slane %v12236_v21, %v19791_v26  ;;  %v6114_v27 = vrot.slane %v6049_v59, %v19791_v26  ;;  %v12238_v2 = vpack.c.bf16 %v16704_v5, %v16704_v5  ;;  %v6153_v48 = vrot.slane %v6050_v3, %v19791_v26 }
 0x3ea   : > { %v6057_v19 = vpack.c.bf16 %v16748_v4, %v16771_v33  ;;  %v6083_v7 = vcombine.high %v6075_v9, %v6075_v9  ;;  %v16788_v0 = vrot.slane %v6075_v9, %v19791_v26  ;;  %v16791_v40 = vrot.slane %v12237_v11, %v19791_v26 }
 0x3eb   : > { %v6097_v12 = vrot.slane %v16779_v63, %v19791_v26  ;;  %v6122_v24 = vcombine.high %v6114_v27, %v6114_v27  ;;  %v16796_v47 = vrot.slane %v6114_v27, %v19791_v26  ;;  %v16799_v5 = vrot.slane %v12238_v2, %v19791_v26 }
 0x3ec   : > { %v16802_v6 = vrot.slane %v6083_v7, %v19791_v26  ;;  %v6136_v32 = vrot.slane %v16791_v40, %v19791_v26  ;;  %v6161_v53 = vcombine.high %v6153_v48, %v6153_v48  ;;  %v16814_v55 = vrot.slane %v6153_v48, %v19791_v26 }
 0x3ed   : > { %v16809_v1 = vrot.slane %v6122_v24, %v19791_v26  ;;  %v6144_v43 = vcombine.high %v16796_v47, %v16796_v47  ;;  %v6175_v46 = vrot.slane %v16799_v5, %v19791_v26  ;;  %v12239_v58 = vpack.c.bf16 %v16710_v54, %v16710_v54 }
 0x3ee   : > { %v16819_v56 = vrot.slane %v6161_v53, %v19791_v26  ;;  %v6192_v51 = vrot.slane %v6051_v13, %v19791_v26  ;;  %v12240_v15 = vpack.c.bf16 %v16716_v18, %v16716_v18  ;;  %v6183_v31 = vcombine.high %v16814_v55, %v16814_v55 }
 0x3ef   : > { %v6145_v42 = vcombine.high %v16809_v1, %v16809_v1  ;;  %v6231_v16 = vrot.slane %v6052_v62, %v19791_v26  ;;  %v12241_v45 = vpack.c.bf16 %v16720_v14, %v16720_v14  ;;  %v16836_v54 = vrot.slane %v12239_v58, %v19791_v26 }
 0x3f0   : > { %v6184_v49 = vcombine.high %v16819_v56, %v16819_v56  ;;  %v6200_v38 = vcombine.high %v6192_v51, %v6192_v51  ;;  %v16839_v18 = vrot.slane %v6192_v51, %v19791_v26  ;;  %v16842_v44 = vrot.slane %v12240_v15, %v19791_v26 }
 0x3f1   : > { %v6239_v41 = vcombine.high %v6231_v16, %v6231_v16  ;;  %v16845_v37 = vrot.slane %v6231_v16, %v19791_v26  ;;  %v6270_v36 = vrot.slane %v6053_v17, %v19791_v26  ;;  %v6214_v14 = vrot.slane %v16836_v54, %v19791_v26 }
 0x3f2   : > { %v16851_v35 = vrot.slane %v6200_v38, %v19791_v26  ;;  %v6222_v50 = vcombine.high %v16839_v18, %v16839_v18  ;;  %v16856_v57 = vrot.slane %v12241_v45, %v19791_v26  ;;  %v6253_v20 = vrot.slane %v16842_v44, %v19791_v26 }
 0x3f3   : > { %v16861_v60 = vrot.slane %v6239_v41, %v19791_v26  ;;  %v6261_v25 = vcombine.high %v16845_v37, %v16845_v37  ;;  %v6278_v52 = vcombine.high %v6270_v36, %v6270_v36  ;;  %v16868_v3 = vrot.slane %v6270_v36, %v19791_v26 }
 0x3f4   : > { %v6223_v59 = vcombine.high %v16851_v35, %v16851_v35  ;;  %v6292_v61 = vrot.slane %v16856_v57, %v19791_v26  ;;  %v12242_v13 = vpack.c.bf16 %v16726_v39, %v16726_v39  ;;  %v6309_v21 = vrot.slane %v6054_v22, %v19791_v26 }
 0x3f5   : > { %v6262_v62 = vcombine.high %v16861_v60, %v16861_v60  ;;  %v16877_v17 = vrot.slane %v6278_v52, %v19791_v26  ;;  %v12243_v9 = vpack.c.bf16 %v16734_v29, %v16734_v29  ;;  %v6300_v11 = vcombine.high %v16868_v3, %v16868_v3 }
 0x3f6   : > { %v16885_v27 = vrot.slane %v12242_v13, %v19791_v26  ;;  %v6348_v2 = vrot.slane %v6055_v28, %v19791_v26  ;;  %v12244_v39 = vpack.c.bf16 %v16740_v10, %v16740_v10  ;;  %v6317_v7 = vcombine.high %v6309_v21, %v6309_v21 }
 0x3f7   : > { %v6301_v48 = vcombine.high %v16877_v17, %v16877_v17  ;;  %v6324_v22 = vrot.slane %v6309_v21, %v19791_v26  ;;  %v16894_v24 = vrot.slane %v12243_v9, %v19791_v26  ;;  %v6387_v28 = vrot.slane %v6056_v34, %v19791_v26 }
 0x3f8   : > { %v6331_v29 = vrot.slane %v16885_v27, %v19791_v26  ;;  %v6356_v53 = vcombine.high %v6348_v2, %v6348_v2  ;;  %v16899_v58 = vrot.slane %v6348_v2, %v19791_v26  ;;  %v6338_v51 = vrot.slane %v6317_v7, %v19791_v26 }
 0x3f9   : > { %v6339_v15 = vcombine.high %v6324_v22, %v6324_v22  ;;  %v16909_v45 = vrot.slane %v12244_v39, %v19791_v26  ;;  %v6395_v36 = vcombine.high %v6387_v28, %v6387_v28  ;;  %v16917_v52 = vrot.slane %v6387_v28, %v19791_v26 }
 0x3fa   : > { %v16912_v38 = vrot.slane %v6356_v53, %v19791_v26  ;;  %v6378_v41 = vcombine.high %v16899_v58, %v16899_v58  ;;  %v6340_v10 = vcombine.high %v6338_v51, %v6338_v51  ;;  %v12245_v34 = vpack.c.bf16 %v16748_v4, %v16748_v4 }
 0x3fb   : > { %19792 = vst [vmem:[#allocation22_spill] sm:$0xff] %v16909_v45  ;;  %v6426_v13 = vrot.slane %v6057_v19, %v19791_v26  ;;  %v16930_v9 = vrot.slane %v6395_v36, %v19791_v26  ;;  %v6529_v19 = vrot.slane %v16814_v55, %v19791_v26  ;;  %v6543_v36 = vrot.slane %v16819_v56, %v19791_v26 }
 0x3fc   : > { %v6379_v21 = vcombine.high %v16912_v38, %v16912_v38  ;;  %v16937_v7 = vrot.slane %v12245_v34, %v19791_v26  ;;  %v6557_v23 = vrot.slane %v6183_v31, %v19791_v26  ;;  %v6571_v33 = vrot.slane %v6184_v49, %v19791_v26 }
 0x3fd   : > { %v6434_v53 = vcombine.high %v6426_v13, %v6426_v13  ;;  %v16940_v28 = vrot.slane %v6426_v13, %v19791_v26  ;;  %v6536_v55 = vrot.slane %v6529_v19, %v19791_v26  ;;  %v6550_v4 = vrot.slane %v6543_v36, %v19791_v26 }
 0x3fe   : > { %19793 = vst [vmem:[#allocation23_spill] sm:$0xff] %v16937_v7  ;;  %v6564_v31 = vrot.slane %v6557_v23, %v19791_v26  ;;  %v6585_v34 = vrot.slane %v16845_v37, %v19791_v26  ;;  %v6578_v39 = vrot.slane %v6571_v33, %v19791_v26  ;;  %v6599_v8 = vrot.slane %v16861_v60, %v19791_v26 }
 0x3ff   : > { %v16954_v13 = vrot.slane %v6434_v53, %v19791_v26  ;;  %v6613_v56 = vrot.slane %v6261_v25, %v19791_v26  ;;  %v6627_v19 = vrot.slane %v6262_v62, %v19791_v26  ;;  %v6641_v36 = vrot.slane %v6324_v22, %v19791_v26 }
 0x400   : > { %v6592_v49 = vrot.slane %v6585_v34, %v19791_v26  ;;  %v6655_v23 = vrot.slane %v6338_v51, %v19791_v26  ;;  %v6606_v37 = vrot.slane %v6599_v8, %v19791_v26  ;;  %v6669_v53 = vrot.slane %v6339_v15, %v19791_v26 }
 0x401   : > { %19794 = vst [vmem:[#allocation20_spill] sm:$0xff] %v16954_v13  ;;  %v6620_v2 = vrot.slane %v6613_v56, %v19791_v26  ;;  %v6683_v33 = vrot.slane %v6340_v10, %v19791_v26  ;;  %v6634_v60 = vrot.slane %v6627_v19, %v19791_v26  ;;  %v6648_v25 = vrot.slane %v6641_v36, %v19791_v26 }
 0x402   : > { %v6662_v34 = vrot.slane %v6655_v23, %v19791_v26  ;;  %v16984_v16 = vunpack.c.l.b16 %v6536_v55  ;;  %v6676_v62 = vrot.slane %v6669_v53, %v19791_v26  ;;  %v16988_v51 = vunpack.c.l.b16 %v6550_v4 }
 0x403   : > { %v6690_v22 = vrot.slane %v6683_v33, %v19791_v26  ;;  %v16990_v8 = vunpack.c.l.b16 %v6564_v31  ;;  %v16992_v56 = vunpack.c.l.b16 %v6578_v39  ;;  %v16994_v15 = vunpack.c.l.b16 %v6592_v49 }
 0x404   : > { %19795 = vst [vmem:[#allocation19_spill] sm:$0xff] %v16984_v16  ;;  %v16996_v10 = vunpack.c.l.b16 %v6606_v37  ;;  %v16998_v19 = vunpack.c.l.b16 %v6620_v2  ;;  %v17000_v36 = vunpack.c.l.b16 %v6634_v60  ;;  %v17002_v55 = vunpack.c.l.b16 %v6648_v25 }
 0x405   : > { %v17004_v23 = vunpack.c.l.b16 %v6662_v34  ;;  %v17006_v53 = vunpack.c.l.b16 %v6676_v62  ;;  %v17008_v4 = vunpack.c.l.b16 %v6690_v22  ;;  %v6895_v39 = vrot.slane %v6097_v12, %v19791_v26 }
 0x406   : > { %v17018_v2 = vrot.slane %v6175_v46, %v19791_v26  ;;  %v6923_v31 = vrot.slane %v6253_v20, %v19791_v26  ;;  %v17028_v49 = vrot.slane %v6331_v29, %v19791_v26  ;;  %v7129_v63 = vrot.slane %v16796_v47, %v19791_v26 }
 0x407   : > { %v7143_v12 = vrot.slane %v16809_v1, %v19791_v26  ;;  %v7157_v5 = vrot.slane %v6144_v43, %v19791_v26  ;;  %v7171_v46 = vrot.slane %v6145_v42, %v19791_v26  ;;  %v7185_v44 = vrot.slane %v16839_v18, %v19791_v26 }
 0x408   : > { %v7199_v20 = vrot.slane %v16851_v35, %v19791_v26  ;;  %v7213_v27 = vrot.slane %v6222_v50, %v19791_v26  ;;  %v7227_v47 = vrot.slane %v6223_v59, %v19791_v26  ;;  %v7241_v1 = vrot.slane %v16868_v3, %v19791_v26 }
 0x409   : > { %v7255_v43 = vrot.slane %v16877_v17, %v19791_v26  ;;  %v7269_v42 = vrot.slane %v6300_v11, %v19791_v26  ;;  %v7283_v18 = vrot.slane %v6301_v48, %v19791_v26  ;;  %v7297_v35 = vrot.slane %v16899_v58, %v19791_v26 }
 0x40a   : > { %v7311_v50 = vrot.slane %v16912_v38, %v19791_v26  ;;  %v7325_v59 = vrot.slane %v6378_v41, %v19791_v26  ;;  %v7339_v3 = vrot.slane %v6379_v21, %v19791_v26  ;;  %v7553_v17 = vrot.slane %v6136_v32, %v19791_v26 }
 0x40b   : > { %v17086_v11 = vrot.slane %v6214_v14, %v19791_v26  ;;  %v7581_v48 = vrot.slane %v6292_v61, %v19791_v26  ;;  %v19796_v29 = vrot.slane %v16894_v24, %v19791_v26  ;;  %v7787_v40 = vrot.slane %v16917_v52, %v19791_v26 }
 0x40c   : > { %v7801_v32 = vrot.slane %v16930_v9, %v19791_v26  ;;  %v19797_v54 = vcombine.high %v16917_v52, %v16917_v52  ;;  %v8220_v57 = vrot.slane %v16940_v28, %v19791_v26  ;;  %v19798_v24 = vcombine.high %v16940_v28, %v16940_v28 }
 0x40d   : > { %v17096_v58 = vrot.slane %v19796_v29, %v19791_v26  ;;  %v6902_v41 = vrot.slane %v6895_v39, %v19791_v26  ;;  %v6930_v52 = vrot.slane %v6923_v31, %v19791_v26  ;;  %v17125_v33 = vrot.slane %v7129_v63, %v19791_v26 }
 0x40e   : > { %v17106_v14 = vrot.slane %v19797_v54, %v19791_v26  ;;  %v17116_v38 = vrot.slane %v19798_v24, %v19791_v26  ;;  %v7150_v60 = vrot.slane %v7143_v12, %v19791_v26  ;;  %v7164_v25 = vrot.slane %v7157_v5, %v19791_v26 }
 0x40f   : > { %v7178_v28 = vrot.slane %v7171_v46, %v19791_v26  ;;  %v7192_v34 = vrot.slane %v7185_v44, %v19791_v26  ;;  %v7206_v62 = vrot.slane %v7199_v20, %v19791_v26  ;;  %v7220_v22 = vrot.slane %v7213_v27, %v19791_v26 }
 0x410   : > { %19799 = vst [vmem:[#allocation24_spill] sm:$0xff] %v17116_v38  ;;  %v7234_v39 = vrot.slane %v7227_v47, %v19791_v26  ;;  %v7248_v31 = vrot.slane %v7241_v1, %v19791_v26  ;;  %v7262_v29 = vrot.slane %v7255_v43, %v19791_v26  ;;  %v7276_v63 = vrot.slane %v7269_v42, %v19791_v26 }
 0x411   : > { %v7290_v12 = vrot.slane %v7283_v18, %v19791_v26  ;;  %v7304_v5 = vrot.slane %v7297_v35, %v19791_v26  ;;  %v7318_v46 = vrot.slane %v7311_v50, %v19791_v26  ;;  %v7332_v44 = vrot.slane %v7325_v59, %v19791_v26 }
 0x412   : > { %v7346_v20 = vrot.slane %v7339_v3, %v19791_v26  ;;  %v7560_v27 = vrot.slane %v7553_v17, %v19791_v26  ;;  %v7588_v1 = vrot.slane %v7581_v48, %v19791_v26  ;;  %v17149_v42 = vrot.slane %v7787_v40, %v19791_v26 }
 0x413   : > { %v17152_v18 = vrot.slane %v7801_v32, %v19791_v26  ;;  %v17155_v35 = vrot.slane %v8220_v57, %v19791_v26  ;;  %v17157_v50 = vunpack.c.l.b16 %v6902_v41  ;;  %v17159_v59 = vunpack.c.l.b16 %v6930_v52 }
 0x414   : > { %19800 = vst [vmem:[#allocation21_spill] sm:$0xff] %v17149_v42  ;;  %v19450_v3 = vunpack.c.l.b16 %v17125_v33  ;;  %v17162_v17 = vunpack.c.l.b16 %v7150_v60  ;;  %v17164_v48 = vunpack.c.l.b16 %v7164_v25  ;;  %v17166_v54 = vunpack.c.l.b16 %v7178_v28 }
 0x415   : > { %19801 = vst [vmem:[#allocation26_spill] sm:$0xff] %v17152_v18  ;;  %19802 = vst [vmem:[#allocation25_spill] sm:$0xff] %v17155_v35  ;;  %v17168_v40 = vunpack.c.l.b16 %v7192_v34  ;;  %v17170_v32 = vunpack.c.l.b16 %v7206_v62  ;;  %v17172_v24 = vunpack.c.l.b16 %v7220_v22  ;;  %v17174_v57 = vunpack.c.l.b16 %v7234_v39 }
 0x416   : > { %v17176_v41 = vunpack.c.l.b16 %v7248_v31  ;;  %v17178_v52 = vunpack.c.l.b16 %v7262_v29  ;;  %v17180_v61 = vunpack.c.l.b16 %v7276_v63  ;;  %v17182_v60 = vunpack.c.l.b16 %v7290_v12 }
 0x417   : > { %v17184_v25 = vunpack.c.l.b16 %v7304_v5  ;;  %v17186_v28 = vunpack.c.l.b16 %v7318_v46  ;;  %v17188_v34 = vunpack.c.l.b16 %v7332_v44  ;;  %v17190_v62 = vunpack.c.l.b16 %v7346_v20 }
 0x418   : > { %v17192_v22 = vunpack.c.l.b16 %v7560_v27  ;;  %v17194_v39 = vunpack.c.l.b16 %v7588_v1  ;;  %v17200_v63 = vrot.slane %v19450_v3, 1  ;;  %v6106_v12 = vcombine.high %v16802_v6, %v16802_v6 }
 0x419   : > { %19803 = vst [vmem:[#allocation28_spill] sm:$0xff] %v17184_v25  ;;  %v19804_v5 = vrot.slane %v16788_v0, %v19791_v26  ;;  %v19805_v44 = vrot.slane %v16802_v6, %v19791_v26  ;;  %v19806_v27 = vcombine.high %v16788_v0, %v16788_v0  ;;  %v6716_v29 = vrot.slane %v16984_v16, 5 }
 0x41a   : > { %v6515_v31 = vrot.slane %v6106_v12, %v19791_v26  ;;  %v6728_v12 = vrot.slane %v16994_v15, 1  ;;  %v6734_v6 = vrot.slane %v17002_v55, 5  ;;  %v6807_v45 = vrot.slane %v16988_v51, 3 }
 0x41b   : > { %v6480_v46 = vrot.slane %v19804_v5, %v19791_v26  ;;  %v6494_v20 = vrot.slane %v19805_v44, %v19791_v26  ;;  %v6501_v1 = vrot.slane %v19806_v27, %v19791_v26  ;;  %v6805_v5 = vrot.slane %v16984_v16, 4 }
 0x41c   : > { %v6522_v0 = vrot.slane %v6515_v31, %v19791_v26  ;;  %v19807_v31 = vrot.slane %v17000_v36, 6  ;;  %v19809_v16 = vrot.slane %v16988_v51, 4 }
 0x41d   : > { %v6691_v43 = vunpack.c.l.b16 %v6480_v46  ;;  %v17218_v47 = vunpack.c.l.b16 %v6494_v20  ;;  %v6508_v3 = vrot.slane %v6501_v1, %v19791_v26  ;;  %v6730_v46 = vrot.slane %v16998_v19, 7 }
 0x41e   : > { %v17230_v21 = vunpack.c.l.b16 %v6522_v0 }
 0x41f   : > { %v6707_v44 = vrot.slane %v6691_v43, 1  ;;  %v17225_v37 = vunpack.c.l.b16 %v6508_v3  ;;  %v6729_v3 = vsel %vm6708_vm5, %v16996_v10, %v6728_v12  ;;  %v6799_v7 = vrot.slane %v17218_v47, 7 }
 0x420   : > { %v6713_v20 = vrot.slane %v17230_v21, 6  ;;  %v6731_v0 = vsel %vm6711_vm6, %v6730_v46, %v6729_v3  ;;  %v6803_v12 = vrot.slane %v17230_v21, 5 }
 0x421   : > { %v6709_v1 = vsel %vm6708_vm5, %v17218_v47, %v6707_v44  ;;  %v6710_v27 = vrot.slane %v17225_v37, 7  ;;  %v6801_v44 = vrot.slane %v17225_v37, 6  ;;  %v6733_v38 = vsel %vm6714_vm7, %v19807_v31, %v6731_v0 }
 0x422   : > { %v6735_v13 = vsel %vm6717_vm8, %v6734_v6, %v6733_v38  ;;  %v6800_v3 = vsel %vm6708_vm5, %v6799_v7, %v6691_v43  ;;  %v6809_v0 = vrot.slane %v16990_v8, 2  ;;  %v19810_v38 = vrot.slane %v17006_v53, 3 }
 0x423   : > { %v6712_v35 = vsel %vm6711_vm6, %v6710_v27, %v6709_v1  ;;  %v19808_v1 = vrot.slane %v17004_v23, 4  ;;  %v6802_v31 = vsel %vm6711_vm6, %v6801_v44, %v6800_v3  ;;  %v19812_v6 = vrot.slane %v17008_v4, 2 }
 0x424   : > { %v6715_v30 = vsel %vm6714_vm7, %v6713_v20, %v6712_v35  ;;  %v6804_v43 = vsel %vm6714_vm7, %v6803_v12, %v6802_v31  ;;  %v13587_v12 = vld [vmem:[%s19659_s1] sm:$0xff]   ;;  %v6815_v31 = vrot.slane %v16998_v19, 6 }
 0x425   : > { %v6718_v42 = vsel %vm6717_vm8, %v6716_v29, %v6715_v30  ;;  %v6737_v18 = vsel %vm6720_vm9, %v19808_v1, %v6735_v13  ;;  %v6811_v30 = vrot.slane %v16992_v56, 1  ;;  %v19811_v29 = vrot.slane %v16990_v8, 3 }
 0x426   : > { %v6721_v35 = vsel %vm6720_vm9, %v19809_v16, %v6718_v42  ;;  %v6739_v7 = vsel %vm6723_vm10, %v19810_v38, %v6737_v18  ;;  %v6806_v3 = vsel %vm6717_vm8, %v6805_v5, %v6804_v43  ;;  %v6813_v16 = vrot.slane %v16996_v10, 7 }
 0x427   : > { %v6724_v13 = vsel %vm6723_vm10, %v19811_v29, %v6721_v35  ;;  %v6741_v44 = vsel %vm6726_vm11, %v19812_v6, %v6739_v7  ;;  %v19813_v42 = vrot.slane %v16992_v56, 2  ;;  %v6808_v1 = vsel %vm6720_vm9, %v6807_v45, %v6806_v3 }
 0x428   : > { %v6817_v35 = vrot.slane %v17000_v36, 5  ;;  %v6810_v7 = vsel %vm6723_vm10, %v6809_v0, %v6808_v1  ;;  %v6814_v5 = vsel %vm6708_vm5, %v6813_v16, %v16994_v15  ;;  %v6819_v43 = vrot.slane %v17002_v55, 4 }
 0x429   : > { %v6727_v18 = vsel %vm6726_vm11, %v19813_v42, %v6724_v13  ;;  %v6812_v29 = vsel %vm6726_vm11, %v6811_v30, %v6810_v7  ;;  %v6816_v13 = vsel %vm6711_vm6, %v6815_v31, %v6814_v5  ;;  %v6821_v6 = vrot.slane %v17004_v23, 3 }
 0x42a   : > { %v6742_v38 = vpack.c.b16 %v6741_v44, %v6727_v18  ;;  %v6823_v45 = vrot.slane %v17006_v53, 2  ;;  %v6818_v3 = vsel %vm6714_vm7, %v6817_v35, %v6816_v13  ;;  %v6825_v44 = vrot.slane %v17008_v4, 1  ;;  %v13588_v18 = vld [vmem:[%s19659_s1 + $0x8] sm:$0xff]  }
 0x42b   : > { %v19814_v0 = vrot.slane %v17018_v2, %v19791_v26  ;;  %v19815_v30 = vrot.slane %v17028_v49, %v19791_v26  ;;  %v19816_v1 = vmov 0.0   ;;  %v6820_v31 = vsel %vm6717_vm8, %v6819_v43, %v6818_v3 }
 0x42c   : > { %13085 = vmatmul.mubr.msk.bf16.vlgmr.msra.gmra.mrb[0].mxu1 %vm4203_vm3, %v6742_v38  ;;  %v6949_v2 = vsel %vm6708_vm5, %v6710_v27, %v17218_v47  ;;  %v6951_v35 = vrot.slane %v17157_v50, 5  ;;  %v6958_v49 = vsel %vm6708_vm5, %v6730_v46, %v16996_v10  ;;  %v19817_v5 = vrot.slane %v17000_v36, 6 }
 0x42d   : > { %v17300_v16 = vunpack.c.l.b16 %v19814_v0  ;;  %v17305_v42 = vunpack.c.l.b16 %v19815_v30  ;;  %13089 = vmatpush3.bf16.msra.mxu1 %v13587_v12  ;;  %13092 = vmatprep.mubr.msk.bf16.mxu1 %vm14046_vm0, %v19816_v1  ;;  %v6822_v12 = vsel %vm6720_vm9, %v6821_v6, %v6820_v31  ;;  %v6950_v38 = vsel %vm6711_vm6, %v6713_v20, %v6949_v2 }
 0x42e   : > { %13090 = vmatprep.subr.bf16.mxu1 %v19816_v1  ;;  %v6959_v43 = vsel %vm6711_vm6, %v19817_v5, %v6958_v49  ;;  %v6824_v13 = vsel %vm6723_vm10, %v6823_v45, %v6822_v12  ;;  %v6952_v27 = vsel %vm6714_vm7, %v6951_v35, %v6950_v38  ;;  %v6960_v3 = vrot.slane %v17159_v59, 5 }
 0x42f   : > { %v6956_v7 = vrot.slane %v17300_v16, 1  ;;  %v6965_v46 = vrot.slane %v17305_v42, 1  ;;  %v6826_v0 = vsel %vm6726_vm11, %v6825_v44, %v6824_v13  ;;  %v19818_v6 = vrot.slane %v16988_v51, 4 }
 0x430   : > { %v7031_v30 = vrot.slane %v17218_v47, 1  ;;  %v7033_v31 = vrot.slane %v17230_v21, 7  ;;  %v6827_v2 = vpack.c.b16 %v6826_v0, %v6812_v29  ;;  %v19819_v45 = vrot.slane %v16990_v8, 3 }
 0x431   : > { %v6953_v20 = vsel %vm6717_vm8, %v19818_v6, %v6952_v27  ;;  %13091 = vmatpush3.bf16.msra.mxu1 %v13588_v18  ;;  %v6961_v49 = vsel %vm6714_vm7, %v6960_v3, %v6959_v43  ;;  %v7035_v12 = vrot.slane %v17157_v50, 6  ;;  %v19820_v44 = vrot.slane %v16992_v56, 2 }
 0x432   : > { %v6954_v35 = vsel %vm6720_vm9, %v19819_v45, %v6953_v20  ;;  %13096 = vmatprep.subr.bf16.mxu1 %v19816_v1  ;;  %v19821_v47 = vrot.slane %v17004_v23, 4  ;;  %v7032_v29 = vsel %vm6708_vm5, %v17225_v37, %v7031_v30  ;;  %v7037_v18 = vrot.slane %v16988_v51, 5 }
 0x433   : > { %v6955_v38 = vsel %vm6723_vm10, %v19820_v44, %v6954_v35  ;;  %v19822_v50 = vrot.slane %v17006_v53, 3  ;;  %v7034_v13 = vsel %vm6711_vm6, %v7033_v31, %v7032_v29  ;;  %v7039_v27 = vrot.slane %v16990_v8, 4 }
 0x434   : > { %v6962_v21 = vsel %vm6717_vm8, %v19821_v47, %v6961_v49  ;;  %v17351_v5 = vsel %vm6726_vm11, %v6956_v7, %v6955_v38  ;;  %v19823_v3 = vrot.slane %v17008_v4, 2  ;;  %v7036_v6 = vsel %vm6714_vm7, %v7035_v12, %v7034_v13  ;;  %v13589_v7 = vld [vmem:[%s19659_s1 + $0x20] sm:$0xff]  }
 0x435   : > { %v6963_v43 = vsel %vm6720_vm9, %v19822_v50, %v6962_v21  ;;  %v7041_v37 = vrot.slane %v16992_v56, 3  ;;  %v7043_v20 = vrot.slane %v17300_v16, 2  ;;  %v7038_v31 = vsel %vm6717_vm8, %v7037_v18, %v7036_v6 }
 0x436   : > { %v6964_v0 = vsel %vm6723_vm10, %v19823_v3, %v6963_v43  ;;  %v7045_v45 = vrot.slane %v16996_v10, 1  ;;  %v7047_v35 = vrot.slane %v17000_v36, 7  ;;  %v7040_v12 = vsel %vm6720_vm9, %v7039_v27, %v7038_v31  ;;  %v13590_v27 = vld [vmem:[%s19659_s1 + $0x28] sm:$0xff]  }
 0x437   : > { %v17368_v30 = vsel %vm6726_vm11, %v6965_v46, %v6964_v0  ;;  %v7049_v44 = vrot.slane %v17159_v59, 6  ;;  %v7051_v38 = vrot.slane %v17004_v23, 5  ;;  %v7042_v47 = vsel %vm6723_vm10, %v7041_v37, %v7040_v12 }
 0x438   : > { %v6967_v49 = vpack.c.b16 %v17368_v30, %v17351_v5  ;;  %v7046_v46 = vsel %vm6708_vm5, %v16998_v19, %v7045_v45  ;;  %v7053_v21 = vrot.slane %v17006_v53, 4  ;;  %v7055_v29 = vrot.slane %v17008_v4, 3  ;;  %13093 = vmatmul.mubr.msk.bf16.vlgmr.msra.gmra.mrb[0].mxu1 %vm4203_vm3, %v6827_v2 }
 0x439   : > { %v17385_v18 = vsel %vm6726_vm11, %v7043_v20, %v7042_v47  ;;  %v7048_v50 = vsel %vm6711_vm6, %v7047_v35, %v7046_v46  ;;  %v7057_v43 = vrot.slane %v17305_v42, 2  ;;  %v7363_v13 = vrot.slane %v17162_v17, 7  ;;  %13097 = vmatpush3.bf16.msra.mxu1 %v13589_v7  ;;  %13100 = vmatprep.mubr.msk.bf16.mxu1 %vm14046_vm0, %v19816_v1 }
 0x43a   : > { %v7050_v3 = vsel %vm6714_vm7, %v7049_v44, %v7048_v50  ;;  %v7365_v2 = vrot.slane %v17164_v48, 6  ;;  %v7367_v0 = vrot.slane %v17166_v54, 5  ;;  %v7369_v6 = vrot.slane %v17168_v40, 4  ;;  %13098 = vmatprep.subr.bf16.mxu1 %v19816_v1 }
 0x43b   : > { %v7052_v37 = vsel %vm6717_vm8, %v7051_v38, %v7050_v3  ;;  %v19824_v20 = vunpack.c.l.b16 %v17125_v33  ;;  %v7371_v31 = vrot.slane %v17170_v32, 3  ;;  %v7373_v45 = vrot.slane %v17172_v24, 2 }
 0x43c   : > { %v7054_v35 = vsel %vm6720_vm9, %v7053_v21, %v7052_v37  ;;  %v7375_v44 = vrot.slane %v17174_v57, 1  ;;  %v7377_v47 = vrot.slane %v17178_v52, 7  ;;  %v7379_v33 = vrot.slane %v17180_v61, 6 }
 0x43d   : > { %v7364_v7 = vsel %vm6708_vm5, %v7363_v13, %v19824_v20  ;;  %v7056_v46 = vsel %vm6723_vm10, %v7055_v29, %v7054_v35  ;;  %v7381_v50 = vrot.slane %v17182_v60, 5  ;;  %13099 = vmatpush3.bf16.msra.mxu1 %v13590_v27  ;;  %v7385_v27 = vrot.slane %v17186_v28, 3 }
 0x43e   : > { %v7366_v12 = vsel %vm6711_vm6, %v7365_v2, %v7364_v7  ;;  %v17415_v13 = vsel %vm6726_vm11, %v7057_v43, %v7056_v46  ;;  %v7378_v3 = vsel %vm6708_vm5, %v7377_v47, %v17176_v41  ;;  %v7383_v2 = vrot.slane %v17184_v25, 4  ;;  %13104 = vmatprep.subr.bf16.mxu1 %v19816_v1 }
 0x43f   : > { %v7368_v38 = vsel %vm6714_vm7, %v7367_v0, %v7366_v12  ;;  %v7380_v37 = vsel %vm6711_vm6, %v7379_v33, %v7378_v3  ;;  %v7387_v20 = vrot.slane %v17188_v34, 2  ;;  %v7389_v7 = vrot.slane %v17190_v62, 1 }
 0x440   : > { %v7370_v21 = vsel %vm6717_vm8, %v7369_v6, %v7368_v38  ;;  %v7382_v6 = vsel %vm6714_vm7, %v7381_v50, %v7380_v37  ;;  %v7457_v47 = vrot.slane %v17164_v48, 7  ;;  %v7459_v38 = vrot.slane %v17166_v54, 6 }
 0x441   : > { %v7372_v0 = vsel %vm6720_vm9, %v7371_v31, %v7370_v21  ;;  %v7384_v12 = vsel %vm6717_vm8, %v7383_v2, %v7382_v6  ;;  %v7456_v31 = vsel %vm6708_vm5, %v17162_v17, %v17200_v63  ;;  %v7461_v33 = vrot.slane %v17168_v40, 5 }
 0x442   : > { %v7374_v43 = vsel %vm6723_vm10, %v7373_v45, %v7372_v0  ;;  %v13591_v45 = vld [vmem:[%s19659_s1 + $0x30] sm:$0xff]   ;;  %v7386_v46 = vsel %vm6720_vm9, %v7385_v27, %v7384_v12  ;;  %v7458_v21 = vsel %vm6711_vm6, %v7457_v47, %v7456_v31  ;;  %v7465_v63 = vrot.slane %v17172_v24, 3  ;;  %v13592_v12 = vld [vmem:[%s19659_s1 + $0x38] sm:$0xff]  }
 0x443   : > { %v17432_v35 = vsel %vm6726_vm11, %v7375_v44, %v7374_v43  ;;  %v7463_v44 = vrot.slane %v17170_v32, 4  ;;  %v7388_v50 = vsel %vm6723_vm10, %v7387_v20, %v7386_v46  ;;  %v7467_v3 = vrot.slane %v17174_v57, 2 }
 0x444   : > { %v17451_v2 = vsel %vm6726_vm11, %v7389_v7, %v7388_v50  ;;  %v7460_v0 = vsel %vm6714_vm7, %v7459_v38, %v7458_v21  ;;  %v7469_v37 = vrot.slane %v17176_v41, 1  ;;  %v7471_v27 = vrot.slane %v17180_v61, 7  ;;  %13101 = vmatmul.mubr.msk.bf16.vlgmr.msra.gmra.mrb[0].mxu1 %vm4203_vm3, %v6967_v49 }
 0x445   : > { %v7462_v6 = vsel %vm6717_vm8, %v7461_v33, %v7460_v0  ;;  %v7473_v20 = vrot.slane %v17182_v60, 6  ;;  %v7475_v7 = vrot.slane %v17184_v25, 5  ;;  %13105 = vmatpush3.bf16.msra.mxu1 %v13591_v45  ;;  %13108 = vmatprep.mubr.msk.bf16.mxu1 %vm14046_vm0, %v19816_v1  ;;  %v7477_v49 = vrot.slane %v17186_v28, 4 }
 0x446   : > { %v7464_v5 = vsel %vm6720_vm9, %v7463_v44, %v7462_v6  ;;  %v7470_v30 = vsel %vm6708_vm5, %v17178_v52, %v7469_v37  ;;  %v7479_v31 = vrot.slane %v17188_v34, 3  ;;  %13106 = vmatprep.subr.bf16.mxu1 %v19816_v1  ;;  %v7481_v33 = vrot.slane %v17190_v62, 2 }
 0x447   : > { %v7466_v45 = vsel %vm6723_vm10, %v7465_v63, %v7464_v5  ;;  %v7472_v46 = vsel %vm6711_vm6, %v7471_v27, %v7470_v30  ;;  %v19825_v50 = vrot.slane %v17086_v11, %v19791_v26  ;;  %v19826_v6 = vrot.slane %v17096_v58, %v19791_v26 }
 0x448   : > { %v17485_v0 = vsel %vm6726_vm11, %v7467_v3, %v7466_v45  ;;  %v7474_v37 = vsel %vm6714_vm7, %v7473_v20, %v7472_v46  ;;  %v7607_v5 = vsel %vm6708_vm5, %v7457_v47, %v17162_v17  ;;  %v7609_v11 = vrot.slane %v17192_v22, 5 }
 0x449   : > { %v17482_v21 = vunpack.c.l.b16 %v19825_v50  ;;  %v17491_v43 = vunpack.c.l.b16 %v19826_v6  ;;  %v7476_v30 = vsel %vm6717_vm8, %v7475_v7, %v7474_v37  ;;  %v7608_v29 = vsel %vm6711_vm6, %v7459_v38, %v7607_v5  ;;  %13107 = vmatpush3.bf16.msra.mxu1 %v13592_v12 }
 0x44a   : > { %v7478_v45 = vsel %vm6720_vm9, %v7477_v49, %v7476_v30  ;;  %v7616_v46 = vsel %vm6708_vm5, %v7471_v27, %v17178_v52  ;;  %v7618_v58 = vrot.slane %v17194_v39, 5  ;;  %13112 = vmatprep.subr.bf16.mxu1 %v19816_v1  ;;  %v7610_v38 = vsel %vm6714_vm7, %v7609_v11, %v7608_v29 }
 0x44b   : > { %v7614_v50 = vrot.slane %v17482_v21, 1  ;;  %v7623_v6 = vrot.slane %v17491_v43, 1  ;;  %v7480_v47 = vsel %vm6723_vm10, %v7479_v31, %v7478_v45  ;;  %v7617_v7 = vsel %vm6711_vm6, %v7473_v20, %v7616_v46 }
 0x44c   : > { %v7689_v37 = vrot.slane %v17162_v17, 1  ;;  %v17510_v12 = vsel %vm6726_vm11, %v7481_v33, %v7480_v47  ;;  %v7611_v5 = vsel %vm6717_vm8, %v7463_v44, %v7610_v38  ;;  %v7619_v27 = vsel %vm6714_vm7, %v7618_v58, %v7617_v7  ;;  %v13593_v17 = vld [vmem:[%s19659_s1 + $0x40] sm:$0xff]  }
 0x44d   : > { %v7691_v30 = vrot.slane %v17166_v54, 7  ;;  %v7483_v25 = vpack.c.b16 %v17510_v12, %v17485_v0  ;;  %v7612_v45 = vsel %vm6720_vm9, %v7465_v63, %v7611_v5  ;;  %v7620_v29 = vsel %vm6717_vm8, %v7477_v49, %v7619_v27 }
 0x44e   : > { %v7690_v20 = vsel %vm6708_vm5, %v17164_v48, %v7689_v37  ;;  %v7613_v44 = vsel %vm6723_vm10, %v7467_v3, %v7612_v45  ;;  %v7621_v11 = vsel %vm6720_vm9, %v7479_v31, %v7620_v29  ;;  %v7693_v46 = vrot.slane %v17192_v22, 6  ;;  %v13594_v37 = vld [vmem:[%s19659_s1 + $0x48] sm:$0xff]  }
 0x44f   : > { %v7692_v54 = vsel %vm6711_vm6, %v7691_v30, %v7690_v20  ;;  %v17529_v58 = vsel %vm6726_vm11, %v7614_v50, %v7613_v44  ;;  %v7622_v63 = vsel %vm6723_vm10, %v7481_v33, %v7621_v11  ;;  %v7695_v49 = vrot.slane %v17170_v32, 5 }
 0x450   : > { %v7697_v48 = vrot.slane %v17172_v24, 4  ;;  %v17535_v47 = vsel %vm6726_vm11, %v7623_v6, %v7622_v63  ;;  %v7694_v3 = vsel %vm6714_vm7, %v7693_v46, %v7692_v54  ;;  %v7699_v31 = vrot.slane %v17174_v57, 3 }
 0x451   : > { %v7701_v38 = vrot.slane %v17482_v21, 2  ;;  %v19827_v22 = vpack.c.b16 %v17415_v13, %v17385_v18  ;;  %v7696_v50 = vsel %vm6717_vm8, %v7695_v49, %v7694_v3  ;;  %v7703_v7 = vrot.slane %v17178_v52, 1  ;;  %v19829_v49 = vld [vmem:[#allocation26_spill] sm:$0xff] }
 0x452   : > { %v7705_v6 = vrot.slane %v17182_v60, 7  ;;  %v7698_v18 = vsel %vm6720_vm9, %v7697_v48, %v7696_v50  ;;  %v7707_v13 = vrot.slane %v17194_v39, 6  ;;  %v7709_v5 = vrot.slane %v17186_v28, 5 }
 0x453   : > { %13109 = vmatmul.mubr.msk.bf16.vlgmr.msra.gmra.mrb[0].mxu1 %vm4203_vm3, %v19827_v22  ;;  %v7711_v27 = vrot.slane %v17188_v34, 4  ;;  %v7700_v30 = vsel %vm6723_vm10, %v7699_v31, %v7698_v18  ;;  %v7704_v45 = vsel %vm6708_vm5, %v17180_v61, %v7703_v7  ;;  %v7713_v29 = vrot.slane %v17190_v62, 3  ;;  %v19830_v7 = vld [vmem:[#allocation19_spill] sm:$0xff] }
 0x454   : > { %13113 = vmatpush3.bf16.msra.mxu1 %v13593_v17  ;;  %13116 = vmatprep.mubr.msk.bf16.mxu1 %vm14046_vm0, %v19816_v1  ;;  %v7715_v20 = vrot.slane %v17491_v43, 2  ;;  %v17565_v17 = vsel %vm6726_vm11, %v7701_v38, %v7700_v30  ;;  %v7706_v44 = vsel %vm6711_vm6, %v7705_v6, %v7704_v45  ;;  %v7822_v11 = vrot.slane %v17106_v14, %v19791_v26 }
 0x455   : > { %13114 = vmatprep.subr.bf16.mxu1 %v19816_v1  ;;  %v19828_v54 = vcombine.high %v16930_v9, %v16930_v9  ;;  %v7708_v63 = vsel %vm6714_vm7, %v7707_v13, %v7706_v44  ;;  %v17576_v48 = vunpack.c.l.b16 %v19829_v49  ;;  %v7841_v3 = vrot.slane %v16988_v51, 7 }
 0x456   : > { %v7843_v31 = vrot.slane %v16990_v8, 6  ;;  %v7710_v38 = vsel %vm6717_vm8, %v7709_v5, %v7708_v63  ;;  %v17582_v14 = vunpack.c.l.b16 %v7822_v11  ;;  %v7845_v50 = vrot.slane %v16992_v56, 5 }
 0x457   : > { %v7829_v46 = vrot.slane %v19828_v54, %v19791_v26  ;;  %v7712_v9 = vsel %vm6720_vm9, %v7711_v27, %v7710_v38  ;;  %v7842_v6 = vsel %vm6708_vm5, %v7841_v3, %v19830_v7  ;;  %v7847_v18 = vrot.slane %v16994_v15, 4  ;;  %v19831_v38 = vld [vmem:[#allocation21_spill] sm:$0xff] }
 0x458   : > { %13115 = vmatpush3.bf16.msra.mxu1 %v13594_v37  ;;  %v7849_v13 = vrot.slane %v16996_v10, 3  ;;  %v7714_v37 = vsel %vm6723_vm10, %v7713_v29, %v7712_v9  ;;  %v7844_v30 = vsel %vm6711_vm6, %v7843_v31, %v7842_v6  ;;  %v7851_v45 = vrot.slane %v16998_v19, 2 }
 0x459   : > { %v7836_v22 = vrot.slane %v7829_v46, %v19791_v26  ;;  %13120 = vmatprep.subr.bf16.mxu1 %v19816_v1  ;;  %v17597_v44 = vsel %vm6726_vm11, %v7715_v20, %v7714_v37  ;;  %v7846_v27 = vsel %vm6714_vm7, %v7845_v50, %v7844_v30  ;;  %v7853_v11 = vrot.slane %v17000_v36, 1  ;;  %v13595_v46 = vld [vmem:[%s19659_s1 + $0x50] sm:$0xff]  }
 0x45a   : > { %v7855_v54 = vrot.slane %v17004_v23, 7  ;;  %v7848_v63 = vsel %vm6717_vm8, %v7847_v18, %v7846_v27  ;;  %v7857_v49 = vrot.slane %v17006_v53, 6  ;;  %v7859_v20 = vrot.slane %v17008_v4, 5 }
 0x45b   : > { %v17592_v5 = vunpack.c.l.b16 %v7836_v22  ;;  %v7850_v3 = vsel %vm6720_vm9, %v7849_v13, %v7848_v63  ;;  %v19832_v22 = vunpack.c.l.b16 %v19831_v38  ;;  %v7863_v9 = vrot.slane %v17576_v48, 3 }
 0x45c   : > { %v7856_v31 = vsel %vm6708_vm5, %v7855_v54, %v17002_v55  ;;  %v7852_v6 = vsel %vm6723_vm10, %v7851_v45, %v7850_v3  ;;  %v7865_v18 = vrot.slane %v17582_v14, 2  ;;  %v19833_v27 = vpack.c.b16 %v17451_v2, %v17432_v35 }
 0x45d   : > { %v7861_v50 = vrot.slane %v19832_v22, 4  ;;  %v7858_v37 = vsel %vm6711_vm6, %v7857_v49, %v7856_v31  ;;  %v7867_v30 = vrot.slane %v17592_v5, 1  ;;  %v17625_v13 = vsel %vm6726_vm11, %v7853_v11, %v7852_v6  ;;  %v13596_v49 = vld [vmem:[%s19659_s1 + $0x58] sm:$0xff]  }
 0x45e   : > { %v7860_v54 = vsel %vm6714_vm7, %v7859_v20, %v7858_v37  ;;  %v7933_v63 = vrot.slane %v19830_v7, 1  ;;  %v7935_v45 = vrot.slane %v16990_v8, 7  ;;  %v7937_v2 = vrot.slane %v16992_v56, 6 }
 0x45f   : > { %13117 = vmatmul.mubr.msk.bf16.vlgmr.msra.gmra.mrb[0].mxu1 %vm4203_vm3, %v19833_v27  ;;  %v7862_v35 = vsel %vm6717_vm8, %v7861_v50, %v7860_v54  ;;  %v7939_v11 = vrot.slane %v16994_v15, 5  ;;  %v7941_v20 = vrot.slane %v16996_v10, 4  ;;  %v7943_v3 = vrot.slane %v16998_v19, 3 }
 0x460   : > { %13121 = vmatpush3.bf16.msra.mxu1 %v13595_v46  ;;  %13124 = vmatprep.mubr.msk.bf16.mxu1 %vm14046_vm0, %v19816_v1  ;;  %v7864_v7 = vsel %vm6720_vm9, %v7863_v9, %v7862_v35  ;;  %v7934_v46 = vsel %vm6708_vm5, %v16988_v51, %v7933_v63  ;;  %v7945_v31 = vrot.slane %v17000_v36, 2  ;;  %v7947_v6 = vrot.slane %v17002_v55, 1 }
 0x461   : > { %13122 = vmatprep.subr.bf16.mxu1 %v19816_v1  ;;  %v7866_v22 = vsel %vm6723_vm10, %v7865_v18, %v7864_v7  ;;  %v7936_v50 = vsel %vm6711_vm6, %v7935_v45, %v7934_v46  ;;  %v7949_v15 = vrot.slane %v17006_v53, 7  ;;  %v7951_v27 = vrot.slane %v17008_v4, 6 }
 0x462   : > { %v17650_v37 = vsel %vm6726_vm11, %v7867_v30, %v7866_v22  ;;  %v7938_v9 = vsel %vm6714_vm7, %v7937_v2, %v7936_v50  ;;  %v19834_v54 = vunpack.c.l.b16 %v19831_v38  ;;  %v7948_v55 = vsel %vm6708_vm5, %v17004_v23, %v7947_v6 }
 0x463   : > { %v7940_v35 = vsel %vm6717_vm8, %v7939_v11, %v7938_v9  ;;  %v7955_v7 = vrot.slane %v17576_v48, 4  ;;  %v7950_v46 = vsel %vm6711_vm6, %v7949_v15, %v7948_v55  ;;  %v7957_v38 = vrot.slane %v17582_v14, 3  ;;  %v19835_v11 = vld [vmem:[#allocation22_spill] sm:$0xff] }
 0x464   : > { %v7953_v63 = vrot.slane %v19834_v54, 5  ;;  %13123 = vmatpush3.bf16.msra.mxu1 %v13596_v49  ;;  %v7942_v30 = vsel %vm6720_vm9, %v7941_v20, %v7940_v35  ;;  %v7959_v49 = vrot.slane %v17592_v5, 2  ;;  %v7952_v50 = vsel %vm6714_vm7, %v7951_v27, %v7950_v46 }
 0x465   : > { %13128 = vmatprep.subr.bf16.mxu1 %v19816_v1  ;;  %v7944_v22 = vsel %vm6723_vm10, %v7943_v3, %v7942_v30  ;;  %v19836_v6 = vrot.slane %v19835_v11, %v19791_v26  ;;  %v8040_v54 = vsel %vm6708_vm5, %v7935_v45, %v16988_v51  ;;  %v8042_v29 = vrot.slane %v17300_v16, 5  ;;  %v13597_v30 = vld [vmem:[%s19659_s1 + $0x60] sm:$0xff]  }
 0x466   : > { %v17676_v35 = vsel %vm6726_vm11, %v7945_v31, %v7944_v22  ;;  %v7954_v55 = vsel %vm6717_vm8, %v7953_v63, %v7952_v50  ;;  %v8041_v18 = vsel %vm6711_vm6, %v7937_v2, %v8040_v54  ;;  %v8049_v45 = vsel %vm6708_vm5, %v7949_v15, %v17004_v23 }
 0x467   : > { %v8031_v9 = vrot.slane %v19836_v6, %v19791_v26  ;;  %v7956_v46 = vsel %vm6720_vm9, %v7955_v7, %v7954_v55  ;;  %v8047_v6 = vrot.slane %v17159_v59, 1  ;;  %v8043_v63 = vsel %vm6714_vm7, %v8042_v29, %v8041_v18 }
 0x468   : > { %v7958_v22 = vsel %vm6723_vm10, %v7957_v38, %v7956_v46  ;;  %v8050_v2 = vsel %vm6711_vm6, %v7951_v27, %v8049_v45  ;;  %v8051_v50 = vrot.slane %v17305_v42, 5  ;;  %v8044_v55 = vsel %vm6717_vm8, %v7941_v20, %v8043_v63  ;;  %v13598_v20 = vld [vmem:[%s19659_s1 + $0x68] sm:$0xff]  }
 0x469   : > { %v8038_v11 = vrot.slane %v8031_v9, %v19791_v26  ;;  %v17694_v54 = vsel %vm6726_vm11, %v7959_v49, %v7958_v22  ;;  %v8122_v9 = vrot.slane %v16988_v51, 1  ;;  %v8045_v15 = vsel %vm6720_vm9, %v7943_v3, %v8044_v55 }
 0x46a   : > { %v7961_v29 = vpack.c.b16 %v17694_v54, %v17676_v35  ;;  %v8052_v27 = vsel %vm6714_vm7, %v8051_v50, %v8050_v2  ;;  %v8124_v18 = vrot.slane %v16992_v56, 7  ;;  %v8046_v51 = vsel %vm6723_vm10, %v7945_v31, %v8045_v15  ;;  %v19837_v15 = vld [vmem:[#allocation20_spill] sm:$0xff]  ;;  %v13609_v54 = vld [vmem:[%s19659_s1 + $0xc0] sm:$0xff]  }
 0x46b   : > { %v8039_v33 = vunpack.c.l.b16 %v8038_v11  ;;  %13125 = vmatmul.mubr.msk.bf16.vlgmr.msra.gmra.mrb[0].mxu1 %vm4203_vm3, %v7483_v25  ;;  %v8053_v25 = vsel %vm6717_vm8, %v7955_v7, %v8052_v27  ;;  %v8123_v12 = vsel %vm6708_vm5, %v16990_v8, %v8122_v9  ;;  %v17718_v56 = vsel %vm6726_vm11, %v8047_v6, %v8046_v51  ;;  %v13608_v35 = vld [vmem:[%s19659_s1 + $0xb8] sm:$0xff]  }
 0x46c   : > { %13129 = vmatpush3.bf16.msra.mxu1 %v13597_v30  ;;  %13132 = vmatprep.mubr.msk.bf16.mxu1 %vm14046_vm0, %v19816_v1  ;;  %v8054_v3 = vsel %vm6720_vm9, %v7957_v38, %v8053_v25  ;;  %v8125_v30 = vsel %vm6711_vm6, %v8124_v18, %v8123_v12  ;;  %v8126_v46 = vrot.slane %v17300_v16, 6  ;;  %v8128_v31 = vrot.slane %v16996_v10, 5  ;;  %v13599_v18 = vld [vmem:[%s19659_s1 + $0x70] sm:$0xff]  }
 0x46d   : > { %v8056_v0 = vrot.slane %v8039_v33, 1  ;;  %13130 = vmatprep.subr.bf16.mxu1 %v19816_v1  ;;  %v8055_v11 = vsel %vm6723_vm10, %v7959_v49, %v8054_v3  ;;  %v8130_v7 = vrot.slane %v16998_v19, 4  ;;  %v8132_v45 = vrot.slane %v17000_v36, 3 }
 0x46e   : > { %v8127_v6 = vsel %vm6714_vm7, %v8126_v46, %v8125_v30  ;;  %v8134_v22 = vrot.slane %v17159_v59, 2  ;;  %v8136_v38 = vrot.slane %v17004_v23, 1  ;;  %v8138_v10 = vrot.slane %v17008_v4, 7 }
 0x46f   : > { %v17728_v8 = vsel %vm6726_vm11, %v8056_v0, %v8055_v11  ;;  %v8129_v49 = vsel %vm6717_vm8, %v8128_v31, %v8127_v6  ;;  %v8140_v19 = vrot.slane %v17305_v42, 6  ;;  %v8142_v59 = vrot.slane %v17576_v48, 5  ;;  %v19839_v48 = vld [vmem:[#allocation24_spill] sm:$0xff] }
 0x470   : > { %13131 = vmatpush3.bf16.msra.mxu1 %v13598_v20  ;;  %v8058_v16 = vpack.c.b16 %v17728_v8, %v17718_v56  ;;  %v8131_v36 = vsel %vm6720_vm9, %v8130_v7, %v8129_v49  ;;  %v8137_v63 = vsel %vm6708_vm5, %v17006_v53, %v8136_v38  ;;  %v8144_v23 = vrot.slane %v17582_v14, 4  ;;  %v13611_v56 = vld [vmem:[%s19659_s1 + $0xd0] sm:$0xff]   ;;  %v13612_v8 = vld [vmem:[%s19659_s1 + $0xd8] sm:$0xff]  }
 0x471   : > { %13136 = vmatprep.subr.bf16.mxu1 %v19816_v1  ;;  %v8133_v2 = vsel %vm6723_vm10, %v8132_v45, %v8131_v36  ;;  %v8139_v50 = vsel %vm6711_vm6, %v8138_v10, %v8137_v63  ;;  %v8146_v55 = vrot.slane %v17592_v5, 3  ;;  %v8148_v4 = vrot.slane %v8039_v33, 2  ;;  %v13600_v10 = vld [vmem:[%s19659_s1 + $0x78] sm:$0xff]  }
 0x472   : > { %v17748_v42 = vsel %vm6726_vm11, %v8134_v22, %v8133_v2  ;;  %v8141_v9 = vsel %vm6714_vm7, %v8140_v19, %v8139_v50  ;;  %v19838_v53 = vrot.slane %v19837_v15, %v19791_v26  ;;  %v8255_v14 = vrot.slane %v19839_v48, %v19791_v26  ;;  %v19844_v48 = vld [vmem:[#allocation28_spill] sm:$0xff] }
 0x473   : > { %v8143_v5 = vsel %vm6717_vm8, %v8142_v59, %v8141_v9  ;;  %v19840_v33 = vcombine.high %v19837_v15, %v19837_v15  ;;  %v8274_v51 = vrot.slane %v17170_v32, 7  ;;  %v8276_v25 = vrot.slane %v17172_v24, 6 }
 0x474   : > { %v8241_v27 = vrot.slane %v19838_v53, %v19791_v26  ;;  %v8145_v0 = vsel %vm6720_vm9, %v8144_v23, %v8143_v5  ;;  %v17770_v3 = vunpack.c.l.b16 %v8255_v14  ;;  %v8278_v30 = vrot.slane %v17174_v57, 5 }
 0x475   : > { %v8262_v20 = vrot.slane %v19840_v33, %v19791_v26  ;;  %v8147_v46 = vsel %vm6723_vm10, %v8146_v55, %v8145_v0  ;;  %v8275_v31 = vsel %vm6708_vm5, %v8274_v51, %v17168_v40  ;;  %v8280_v7 = vrot.slane %v17176_v41, 4  ;;  %v19842_v55 = vld [vmem:[#allocation25_spill] sm:$0xff] }
 0x476   : > { %v17768_v12 = vunpack.c.l.b16 %v8241_v27  ;;  %v19841_v45 = vpack.c.b16 %v17535_v47, %v17529_v58  ;;  %v17783_v6 = vsel %vm6726_vm11, %v8148_v4, %v8147_v46  ;;  %v8277_v22 = vsel %vm6711_vm6, %v8276_v25, %v8275_v31 }
 0x477   : > { %v8269_v11 = vrot.slane %v8262_v20, %v19791_v26  ;;  %v8282_v38 = vrot.slane %v17178_v52, 3  ;;  %v8284_v49 = vrot.slane %v17180_v61, 2  ;;  %v8150_v58 = vpack.c.b16 %v17783_v6, %v17748_v42  ;;  %v13614_v42 = vld [vmem:[%s19659_s1 + $0xe8] sm:$0xff]   ;;  %v13615_v6 = vld [vmem:[%s19659_s1 + $0xf0] sm:$0xff]  }
 0x478   : > { %13133 = vmatmul.mubr.msk.bf16.vlgmr.msra.gmra.mrb[0].mxu1 %vm4203_vm3, %v19841_v45  ;;  %v8279_v19 = vsel %vm6714_vm7, %v8278_v30, %v8277_v22  ;;  %v8286_v36 = vrot.slane %v17182_v60, 1  ;;  %v8288_v59 = vrot.slane %v17186_v28, 7  ;;  %v8290_v23 = vrot.slane %v17188_v34, 6 }
 0x479   : > { %13137 = vmatpush3.bf16.msra.mxu1 %v13599_v18  ;;  %13140 = vmatprep.mubr.msk.bf16.mxu1 %vm14046_vm0, %v19816_v1  ;;  %v17795_v47 = vunpack.c.l.b16 %v8269_v11  ;;  %v8281_v63 = vsel %vm6717_vm8, %v8280_v7, %v8279_v19  ;;  %v8292_v2 = vrot.slane %v17190_v62, 5  ;;  %v19843_v4 = vunpack.c.l.b16 %v19842_v55 }
 0x47a   : > { %13138 = vmatprep.subr.bf16.mxu1 %v19816_v1  ;;  %v8283_v50 = vsel %vm6720_vm9, %v8282_v38, %v8281_v63  ;;  %v8296_v15 = vrot.slane %v17768_v12, 3  ;;  %v8298_v53 = vrot.slane %v17770_v3, 2  ;;  %v8289_v14 = vsel %vm6708_vm5, %v8288_v59, %v19844_v48 }
 0x47b   : > { %v8294_v9 = vrot.slane %v19843_v4, 4  ;;  %v8285_v27 = vsel %vm6723_vm10, %v8284_v49, %v8283_v50  ;;  %v8300_v18 = vrot.slane %v17795_v47, 1  ;;  %v8366_v5 = vrot.slane %v17168_v40, 1 }
 0x47c   : > { %v17815_v33 = vsel %vm6726_vm11, %v8286_v36, %v8285_v27  ;;  %v8291_v20 = vsel %vm6711_vm6, %v8290_v23, %v8289_v14  ;;  %v8368_v51 = vrot.slane %v17172_v24, 7  ;;  %v8370_v25 = vrot.slane %v17174_v57, 6 }
 0x47d   : > { %13139 = vmatpush3.bf16.msra.mxu1 %v13600_v10  ;;  %v8293_v0 = vsel %vm6714_vm7, %v8292_v2, %v8291_v20  ;;  %v8367_v30 = vsel %vm6708_vm5, %v17170_v32, %v8366_v5  ;;  %v8372_v46 = vrot.slane %v17176_v41, 5  ;;  %v8374_v40 = vrot.slane %v17178_v52, 4  ;;  %v13601_v41 = vld [vmem:[%s19659_s1 + $0x80] sm:$0xff]   ;;  %v19847_v20 = vld [vmem:[#allocation23_spill] sm:$0xff] }
 0x47e   : > { %13144 = vmatprep.subr.bf16.mxu1 %v19816_v1  ;;  %v8295_v11 = vsel %vm6717_vm8, %v8294_v9, %v8293_v0  ;;  %v8369_v31 = vsel %vm6711_vm6, %v8368_v51, %v8367_v30  ;;  %v8376_v7 = vrot.slane %v17180_v61, 3  ;;  %v8378_v45 = vrot.slane %v17182_v60, 2 }
 0x47f   : > { %v8297_v22 = vsel %vm6720_vm9, %v8296_v15, %v8295_v11  ;;  %v8371_v38 = vsel %vm6714_vm7, %v8370_v25, %v8369_v31  ;;  %v8380_v49 = vrot.slane %v19844_v48, 1  ;;  %v8382_v10 = vrot.slane %v17188_v34, 7 }
 0x480   : > { %v8299_v19 = vsel %vm6723_vm10, %v8298_v53, %v8297_v22  ;;  %v8373_v36 = vsel %vm6717_vm8, %v8372_v46, %v8371_v38  ;;  %v8384_v63 = vrot.slane %v17190_v62, 6  ;;  %v19845_v59 = vmov %v19843_v4  ;;  %v13602_v46 = vld [vmem:[%s19659_s1 + $0x88] sm:$0xff]  }
 0x481   : > { %v8386_v23 = vrot.slane %v19845_v59, 5  ;;  %v17843_v2 = vsel %vm6726_vm11, %v8300_v18, %v8299_v19  ;;  %v8375_v50 = vsel %vm6720_vm9, %v8374_v40, %v8373_v36  ;;  %v8381_v4 = vsel %vm6708_vm5, %v17186_v28, %v8380_v49 }
 0x482   : > { %v8388_v9 = vrot.slane %v17768_v12, 4  ;;  %v8302_v15 = vpack.c.b16 %v17843_v2, %v17815_v33  ;;  %v8377_v53 = vsel %vm6723_vm10, %v8376_v7, %v8375_v50  ;;  %v8383_v27 = vsel %vm6711_vm6, %v8382_v10, %v8381_v4  ;;  %v12354_v33 = vld [vmem:[%s19850_s6] ss:$0 sm:$0xff]  ;;  %s12752_s6 = sshll.u32 %s14182_s3, 4  ;;  %s14050_s3 = smov [#allocation2]  }
 0x483   : > { %v8390_v55 = vrot.slane %v17770_v3, 3  ;;  %v19846_v48 = vpack.c.b16 %v17597_v44, %v17565_v17  ;;  %v17859_v14 = vsel %vm6726_vm11, %v8378_v45, %v8377_v53  ;;  %v8385_v18 = vsel %vm6714_vm7, %v8384_v63, %v8383_v27  ;;  %s13985_s28 = sshll.u32 %s14050_s3, 4  ;;  %s13986_s28 = int_to_ptr.vmem [resolvable:$false] %s13985_s28 }
 0x484   : > { %v8392_v5 = vrot.slane %v17795_v47, 2  ;;  %v19848_v0 = vrot.slane %v19847_v20, %v19791_v26  ;;  %v8387_v17 = vsel %vm6717_vm8, %v8386_v23, %v8385_v18  ;;  %v8473_v44 = vsel %vm6708_vm5, %v8368_v51, %v17170_v32  ;;  %s13987_s0 = scalar_lea.vmem %s13986_s28, 32 }
 0x485   : > { %13141 = vmatmul.mubr.msk.bf16.vlgmr.msra.gmra.mrb[0].mxu1 %vm4203_vm3, %v19846_v48  ;;  %v8475_v11 = vrot.slane %v17482_v21, 5  ;;  %v8480_v31 = vrot.slane %v17194_v39, 1  ;;  %v8389_v22 = vsel %vm6720_vm9, %v8388_v9, %v8387_v17  ;;  %v8474_v49 = vsel %vm6711_vm6, %v8370_v25, %v8473_v44 }
 0x486   : > { %v8464_v30 = vrot.slane %v19848_v0, %v19791_v26  ;;  %13145 = vmatpush3.bf16.msra.mxu1 %v13601_v41  ;;  %13148 = vmatprep.mubr.msk.bf16.mxu1 %vm14046_vm0, %v19816_v1  ;;  %v8482_v41 = vsel %vm6708_vm5, %v8382_v10, %v17186_v28  ;;  %v8391_v19 = vsel %vm6723_vm10, %v8390_v55, %v8389_v22  ;;  %v8484_v59 = vrot.slane %v17491_v43, 5 }
 0x487   : > { %13146 = vmatprep.subr.bf16.mxu1 %v19816_v1  ;;  %v8476_v36 = vsel %vm6714_vm7, %v8475_v11, %v8474_v49  ;;  %v8483_v51 = vsel %vm6711_vm6, %v8384_v63, %v8482_v41  ;;  %v17888_v23 = vsel %vm6726_vm11, %v8392_v5, %v8391_v19  ;;  %v8555_v53 = vrot.slane %v17170_v32, 1 }
 0x488   : > { %v8471_v38 = vrot.slane %v8464_v30, %v19791_v26  ;;  %v8477_v4 = vsel %vm6717_vm8, %v8374_v40, %v8476_v36  ;;  %v8394_v25 = vpack.c.b16 %v17888_v23, %v17859_v14  ;;  %v8485_v27 = vsel %vm6714_vm7, %v8484_v59, %v8483_v51  ;;  %v13607_v59 = vld [vmem:[%s19659_s1 + $0xb0] sm:$0xff]  }
 0x489   : > { %v8478_v10 = vsel %vm6720_vm9, %v8376_v7, %v8477_v4  ;;  %v8557_v63 = vrot.slane %v17174_v57, 7  ;;  %v8486_v18 = vsel %vm6717_vm8, %v8388_v9, %v8485_v27  ;;  %v8556_v32 = vsel %vm6708_vm5, %v17172_v24, %v8555_v53 }
 0x48a   : > { %v8472_v50 = vunpack.c.l.b16 %v8471_v38  ;;  %13147 = vmatpush3.bf16.msra.mxu1 %v13602_v46  ;;  %v8479_v48 = vsel %vm6723_vm10, %v8378_v45, %v8478_v10  ;;  %v8487_v0 = vsel %vm6720_vm9, %v8390_v55, %v8486_v18  ;;  %v8559_v30 = vrot.slane %v17482_v21, 6  ;;  %v13603_v45 = vld [vmem:[%s19659_s1 + $0x90] sm:$0xff]  }
 0x48b   : > { %13152 = vmatprep.subr.bf16.mxu1 %v19816_v1  ;;  %v17903_v40 = vsel %vm6726_vm11, %v8480_v31, %v8479_v48  ;;  %v8558_v7 = vsel %vm6711_vm6, %v8557_v63, %v8556_v32  ;;  %v8488_v57 = vsel %vm6723_vm10, %v8392_v5, %v8487_v0  ;;  %v8561_v46 = vrot.slane %v17178_v52, 5 }
 0x48c   : > { %v8489_v20 = vrot.slane %v8472_v50, 1  ;;  %v8560_v24 = vsel %vm6714_vm7, %v8559_v30, %v8558_v7  ;;  %v8563_v17 = vrot.slane %v17180_v61, 4  ;;  %v8569_v55 = vrot.slane %v17186_v28, 1 }
 0x48d   : > { %v8562_v5 = vsel %vm6717_vm8, %v8561_v46, %v8560_v24  ;;  %v8565_v52 = vrot.slane %v17182_v60, 3  ;;  %v8571_v44 = vrot.slane %v17190_v62, 7  ;;  %v8567_v31 = vrot.slane %v17194_v39, 2  ;;  %v13604_v39 = vld [vmem:[%s19659_s1 + $0x98] sm:$0xff]  }
 0x48e   : > { %v17914_v9 = vsel %vm6726_vm11, %v8489_v20, %v8488_v57  ;;  %v8564_v11 = vsel %vm6720_vm9, %v8563_v17, %v8562_v5  ;;  %v8570_v22 = vsel %vm6708_vm5, %v17188_v34, %v8569_v55  ;;  %v8573_v61 = vrot.slane %v17491_v43, 6 }
 0x48f   : > { %v8491_v21 = vpack.c.b16 %v17914_v9, %v17903_v40  ;;  %v19849_v28 = vpack.c.b16 %v17650_v37, %v17625_v13  ;;  %v8566_v38 = vsel %vm6723_vm10, %v8565_v52, %v8564_v11  ;;  %v8572_v60 = vsel %vm6711_vm6, %v8571_v44, %v8570_v22 }
 0x490   : > { %v8575_v62 = vrot.slane %v17768_v12, 5  ;;  %v8568_v34 = vsel %vm6726_vm11, %v8567_v31, %v8566_v38  ;;  %v8574_v43 = vsel %vm6714_vm7, %v8573_v61, %v8572_v60  ;;  %v8577_v13 = vrot.slane %v17770_v3, 4  ;;  %v13605_v3 = vld [vmem:[%s19659_s1 + $0xa0] sm:$0xff]  }
 0x491   : > { %13149 = vmatmul.mubr.msk.bf16.vlgmr.msra.gmra.mrb[0].mxu1 %vm4203_vm3, %v19849_v28  ;;  %v8579_v12 = vrot.slane %v17795_v47, 3  ;;  %v8581_v41 = vrot.slane %v8472_v50, 2  ;;  %v13606_v47 = vld [vmem:[%s19659_s1 + $0xa8] sm:$0xff]  }
 0x492   : > { %13153 = vmatpush3.bf16.msra.mxu1 %v13603_v45  ;;  %13156 = vmatprep.mubr.msk.bf16.mxu1 %vm14046_vm0, %v19816_v1  ;;  %v8576_v37 = vsel %vm6717_vm8, %v8575_v62, %v8574_v43 }
 0x493   : > { %13154 = vmatprep.subr.bf16.mxu1 %v19816_v1  ;;  %v8578_v49 = vsel %vm6720_vm9, %v8577_v13, %v8576_v37 }
 0x494   : > { %v8580_v19 = vsel %vm6723_vm10, %v8579_v12, %v8578_v49 }
 0x495   : > { %v8582_v36 = vsel %vm6726_vm11, %v8581_v41, %v8580_v19 }
 0x496   : > { %13155 = vmatpush3.bf16.msra.mxu1 %v13604_v39  ;;  %v8583_v51 = vpack.c.b16 %v8582_v36, %v8568_v34 }
 0x497   : > { %13160 = vmatprep.subr.bf16.mxu1 %v19816_v1 }
 0x49d   : > { %13157 = vmatmul.mubr.msk.bf16.vlgmr.msra.gmra.mrb[0].mxu1 %vm4203_vm3, %v7961_v29  ;;  %v13610_v29 = vld [vmem:[%s19659_s1 + $0xc8] sm:$0xff]  }
 0x49e   : > { %13161 = vmatpush3.bf16.msra.mxu1 %v13605_v3  ;;  %13164 = vmatprep.mubr.msk.bf16.mxu1 %vm14046_vm0, %v19816_v1 }
 0x49f   : > { %13162 = vmatprep.subr.bf16.mxu1 %v19816_v1 }
 0x4a2   : > { %13163 = vmatpush3.bf16.msra.mxu1 %v13606_v47 }
 0x4a3   : > { %13168 = vmatprep.subr.bf16.mxu1 %v19816_v1 }
 0x4a9   : > { %13165 = vmatmul.mubr.msk.bf16.vlgmr.msra.gmra.mrb[0].mxu1 %vm4203_vm3, %v8058_v16  ;;  %v13613_v16 = vld [vmem:[%s19659_s1 + $0xe0] sm:$0xff]  }
 0x4aa   : > { %13169 = vmatpush3.bf16.msra.mxu1 %v13607_v59  ;;  %13172 = vmatprep.mubr.msk.bf16.mxu1 %vm14046_vm0, %v19816_v1 }
 0x4ab   : > { %13170 = vmatprep.subr.bf16.mxu1 %v19816_v1 }
 0x4ae   : > { %13171 = vmatpush3.bf16.msra.mxu1 %v13608_v35 }
 0x4af   : > { %13176 = vmatprep.subr.bf16.mxu1 %v19816_v1 }
 0x4b5   : > { %13173 = vmatmul.mubr.msk.bf16.vlgmr.msra.gmra.mrb[0].mxu1 %vm4203_vm3, %v8150_v58  ;;  %v13616_v58 = vld [vmem:[%s19659_s1 + $0xf8] sm:$0xff]   ;;  %s19201_s1 = scalar_lea.hbm %s19264_s21, %s12752_s6 }
 0x4b6   : > { %13177 = vmatpush3.bf16.msra.mxu1 %v13609_v54  ;;  %13180 = vmatprep.mubr.msk.bf16.mxu1 %vm14046_vm0, %v19816_v1 }
 0x4b7   : > { %13178 = vmatprep.subr.bf16.mxu1 %v19816_v1 }
 0x4ba   : > { %13179 = vmatpush3.bf16.msra.mxu1 %v13610_v29 }
 0x4bb   : > { %13184 = vmatprep.subr.bf16.mxu1 %v19816_v1 }
 0x4c1   : > { %13181 = vmatmul.mubr.msk.bf16.vlgmr.msra.gmra.mrb[0].mxu1 %vm4203_vm3, %v8302_v15 }
 0x4c2   : > { %13185 = vmatpush3.bf16.msra.mxu1 %v13611_v56  ;;  %13188 = vmatprep.mubr.msk.bf16.mxu1 %vm14046_vm0, %v19816_v1 }
 0x4c3   : > { %13186 = vmatprep.subr.bf16.mxu1 %v19816_v1 }
 0x4c6   : > { %13187 = vmatpush3.bf16.msra.mxu1 %v13612_v8 }
 0x4c7   : > { %13192 = vmatprep.subr.bf16.mxu1 %v19816_v1 }
 0x4cd   : > { %13189 = vmatmul.mubr.msk.bf16.vlgmr.msra.gmra.mrb[0].mxu1 %vm4203_vm3, %v8394_v25 }
 0x4ce   : > { %13193 = vmatpush3.bf16.msra.mxu1 %v13613_v16  ;;  %13196 = vmatprep.mubr.msk.bf16.mxu1 %vm14046_vm0, %v19816_v1 }
 0x4cf   : > { %13194 = vmatprep.subr.bf16.mxu1 %v19816_v1 }
 0x4d2   : > { %13195 = vmatpush3.bf16.msra.mxu1 %v13614_v42 }
 0x4d3   : > { %13200 = vmatprep.subr.bf16.mxu1 %v19816_v1 }
 0x4d9   : > { %13197 = vmatmul.mubr.msk.bf16.vlgmr.msra.gmra.mrb[0].mxu1 %vm4203_vm3, %v8491_v21 }
 0x4da   : > { %13201 = vmatpush3.bf16.msra.mxu1 %v13615_v6  ;;  %13204 = vmatprep.mubr.msk.bf16.mxu1 %vm14046_vm0, %v19816_v1 }
 0x4db   : > { %13202 = vmatprep.subr.bf16.mxu1 %v19816_v1 }
 0x4de   : > { %13203 = vmatpush3.bf16.msra.mxu1 %v13616_v58 }
 0x4df   : > { %13208 = vmatprep.subr.bf16.mxu1 %v19816_v1 }
 0x4e5   : > { %13205 = vmatmul.mubr.msk.bf16.vlgmr.msra.gmra.mrb[0].mxu1 %vm4203_vm3, %v8583_v51 }
 0x4e6   : > { %13216 = vmatprep.mubr.msk.bf16.mxu1 %vm14046_vm0, %v19816_v1 }
 0x5b8   : > { %v8633_v2 = vpop.f32.mrb[0].mxu1 }
 0x5b9   : > { %v8644_v15 = vcombine.high %v8633_v2, %v8633_v2  ;;  %v8655_v14 = vadd.f32 %v12354_v33, %v8633_v2  ;;  %v13206_v23 = vpop.f32.mrb[1].mxu1  ;;  %v13617_v2 = vld [vmem:[%s19252_s9 + $0x20] sm:$0xff]  }
 0x5ba   : > { %v8636_v50 = vpop.f32.mrb[2].mxu1  ;;  %13209 = vmatpush3.bf16.msra.mxu1 %v13617_v2  ;;  %v13620_v23 = vld [vmem:[%s19252_s9 + $0x38] sm:$0xff]  }
 0x5bb   : > { %v8645_v4 = vcombine.high %v8636_v50, %v8636_v50  ;;  %v8657_v53 = vadd.f32 %v12354_v33, %v8636_v50  ;;  %v13207_v25 = vpop.f32.mrb[3].mxu1  ;;  %v8668_v10 = vsel %vm8667_vm12, %v8655_v14, 0.0  ;;  %v8656_v27 = vadd.f32 %v12354_v33, %v8644_v15  ;;  %v13618_v15 = vld [vmem:[%s19252_s9 + $0x28] sm:$0xff]   ;;  %13210 = vmatprep.subr.bf16.mxu1 %v19816_v1 }
 0x5bc   : > { %8669 = vadd.xlane.f32.xlu0 %v8668_v10 }
 0x5bd   : > { %v8671_v63 = vsel %vm8667_vm12, %v8656_v27, 0.0  ;;  %v8658_v48 = vadd.f32 %v12354_v33, %v8645_v4  ;;  %v8674_v18 = vsel %vm8667_vm12, %v8657_v53, 0.0 }
 0x5be   : > { %8672 = vadd.xlane.f32.xlu1 %v8671_v63  ;;  %13211 = vmatpush3.bf16.msra.mxu1 %v13618_v15 }
 0x5bf   : > { %v8677_v20 = vsel %vm8667_vm12, %v8658_v48, 0.0  ;;  %13212 = vmatprep.subr.bf16.mxu1 %v19816_v1 }
 0x5c0   : > { %8675 = vadd.xlane.f32.xlu0 %v8674_v18 }
 0x5c2   : > { %8678 = vadd.xlane.f32.xlu1 %v8677_v20 }
 0x649   : > { %v8670_v32 = vpop.xlane.xlu0 %8669 }
 0x64a   : > { %v8681_v40 = vsel %vm8680_vm13, %v8670_v32, 0.0 }
 0x64b   : > { %v8682_v0 = vrot.slane %v8681_v40, 4  ;;  %v8673_v7 = vpop.xlane.xlu1 %8672 }
 0x64c   : > { %v8688_v30 = vsel %vm8680_vm13, %v8673_v7, 0.0 }
 0x64d   : > { %v8683_v57 = vadd.f32 %v8682_v0, %v8681_v40  ;;  %v8689_v46 = vrot.slane %v8688_v30, 4  ;;  %v8676_v45 = vpop.xlane.xlu0 %8675 }
 0x64e   : > { %v8695_v9 = vsel %vm8680_vm13, %v8676_v45, 0.0 }
 0x64f   : > { %v8684_v24 = vrot.slane %v8683_v57, 2  ;;  %v8690_v17 = vadd.f32 %v8689_v46, %v8688_v30  ;;  %v8696_v55 = vrot.slane %v8695_v9, 4  ;;  %v8679_v21 = vpop.xlane.xlu1 %8678 }
 0x650   : > { %v8702_v5 = vsel %vm8680_vm13, %v8679_v21, 0.0 }
 0x651   : > { %v8685_v52 = vadd.f32 %v8684_v24, %v8683_v57  ;;  %v8691_v44 = vrot.slane %v8690_v17, 2  ;;  %v8697_v11 = vadd.f32 %v8696_v55, %v8695_v9  ;;  %v8703_v31 = vrot.slane %v8702_v5, 4 }
 0x653   : > { %v8686_v22 = vrot.slane %v8685_v52, 1  ;;  %v8692_v61 = vadd.f32 %v8691_v44, %v8690_v17  ;;  %v8698_v28 = vrot.slane %v8697_v11, 2  ;;  %v8704_v38 = vadd.f32 %v8703_v31, %v8702_v5 }
 0x655   : > { %v8693_v60 = vrot.slane %v8692_v61, 1  ;;  %v8699_v62 = vadd.f32 %v8698_v28, %v8697_v11  ;;  %v8705_v39 = vrot.slane %v8704_v38, 2  ;;  %v8687_v34 = vadd.f32 %v8686_v22, %v8685_v52 }
 0x657   : > { %v8694_v43 = vadd.f32 %v8693_v60, %v8692_v61  ;;  %v8700_v13 = vrot.slane %v8699_v62, 1  ;;  %v8706_v37 = vadd.f32 %v8705_v39, %v8704_v38 }
 0x659   : > { %v8709_v12 = vadd.f32 %v8694_v43, %v8687_v34  ;;  %v8701_v49 = vadd.f32 %v8700_v13, %v8699_v62  ;;  %v8707_v41 = vrot.slane %v8706_v37, 1  ;;  %v8659_v13 = vld [vmem:[%s19851_s7] sm:$0xf] }
 0x65b   : > { %v8710_v19 = vadd.f32 %v8709_v12, %v8701_v49  ;;  %v8708_v36 = vadd.f32 %v8707_v41, %v8706_v37  ;;  %v8660_v12 = vld [vmem:[%s19851_s7 + $0x4] sm:$0xf]  ;;  %v8661_v49 = vld [vmem:[%s19851_s7 + $0x8] sm:$0xf]  ;;  %v8662_v41 = vld [vmem:[%s19851_s7 + $0xc] sm:$0xf] }
 0x65d   : > { %v8711_v51 = vadd.f32 %v8710_v19, %v8708_v36  ;;  %v8663_v19 = vld [vmem:[%s19852_s8] sm:$0xf] }
 0x65f   : > { %v8712_v3 = vmul.f32 0.0009765625, %v8711_v51 }
 0x661   : > { %v18049_v47 = vsub.f32 %v8656_v27, %v8712_v3  ;;  %v18051_v59 = vsub.f32 %v8655_v14, %v8712_v3  ;;  %v18053_v35 = vsub.f32 %v8658_v48, %v8712_v3  ;;  %v18055_v54 = vsub.f32 %v8657_v53, %v8712_v3  ;;  %v13619_v14 = vld [vmem:[%s19252_s9 + $0x30] sm:$0xff]  }
 0x662   : > { %13213 = vmatpush3.bf16.msra.mxu1 %v13619_v14 }
 0x663   : > { %v8718_v29 = vmul.f32 %v18049_v47, %v18049_v47  ;;  %v8717_v56 = vmul.f32 %v18051_v59, %v18051_v59  ;;  %v8720_v42 = vmul.f32 %v18053_v35, %v18053_v35  ;;  %v8719_v6 = vmul.f32 %v18055_v54, %v18055_v54  ;;  %13214 = vmatprep.subr.bf16.mxu1 %v19816_v1 }
 0x665   : > { %v8724_v8 = vsel %vm8667_vm12, %v8718_v29, 0.0  ;;  %v8721_v16 = vsel %vm8667_vm12, %v8717_v56, 0.0  ;;  %v8730_v58 = vsel %vm8667_vm12, %v8720_v42, 0.0  ;;  %v8727_v33 = vsel %vm8667_vm12, %v8719_v6, 0.0  ;;  %v8664_v56 = vld [vmem:[%s19852_s8 + $0x4] sm:$0xf] }
 0x666   : > { %8725 = vadd.xlane.f32.xlu1 %v8724_v8  ;;  %8722 = vadd.xlane.f32.xlu0 %v8721_v16  ;;  %v8665_v8 = vld [vmem:[%s19852_s8 + $0x8] sm:$0xf]  ;;  %v8666_v16 = vld [vmem:[%s19852_s8 + $0xc] sm:$0xf]  ;;  %s647_s8 = sand.u32 1, %s14035_s25  }
 0x667   : > { %13215 = vmatpush3.bf16.msra.mxu1 %v13620_v23  ;;  %s648_s7 = scalar_lea.vmem [#allocation2], %s647_s8  ;;  %s11988_s23 = scalar_lea.sflag [#allocation3], %s647_s8 }
 0x668   : > { %13220 = vmatprep.subr.bf16.mxu1 %v19816_v1  ;;  %s12000_s4 = sshll.u32 %s648_s7, 4  ;;  %s19203_s4 = int_to_ptr.vmem [resolvable:$true] %s12000_s4 }
 0x669   : > { %s13981_s2 = scalar_lea.vmem %s19203_s4, 16  ;;  %p13988_p0 = scmp.lt.s32.totalorder %s19203_s4, %s13986_s28 }
 0x66a   : > { %8731 = vadd.xlane.f32.xlu1 %v8730_v58  ;;  %8728 = vadd.xlane.f32.xlu0 %v8727_v33  ;;  %p13982_p11 = scmp.ne.s32.totalorder %s19203_s4, %s13981_s2  ;;  %p13989_p1 = scmp.lt.s32.totalorder %s13987_s0, %s13981_s2 }
 0x66c   : > { %p13983_p12 = pnand %p13982_p11, %p14199_p5  ;;  %p13990_p2 = por %p13989_p1, %p13988_p0 }
 0x66e   : > { %p13984_p13 = pneg %p13983_p12 }
 0x670   : > { %p13991_p3 = pnand %p13990_p2, %p13984_p13 }
 0x6f3   : > { %v8726_v50 = vpop.xlane.xlu1 %8725  ;;  %v8723_v4 = vpop.xlane.xlu0 %8722 }
 0x6f4   : > { %v8740_v53 = vsel %vm8680_vm13, %v8726_v50, 0.0  ;;  %v8733_v25 = vsel %vm8680_vm13, %v8723_v4, 0.0 }
 0x6f5   : > { %v8741_v10 = vrot.slane %v8740_v53, 4  ;;  %v8734_v27 = vrot.slane %v8733_v25, 4 }
 0x6f7   : > { %v8742_v63 = vadd.f32 %v8741_v10, %v8740_v53  ;;  %v8735_v48 = vadd.f32 %v8734_v27, %v8733_v25  ;;  %v8732_v18 = vpop.xlane.xlu1 %8731  ;;  %v8729_v20 = vpop.xlane.xlu0 %8728 }
 0x6f8   : > { %v8754_v32 = vsel %vm8680_vm13, %v8732_v18, 0.0  ;;  %v8747_v40 = vsel %vm8680_vm13, %v8729_v20, 0.0 }
 0x6f9   : > { %v8743_v0 = vrot.slane %v8742_v63, 2  ;;  %v8736_v7 = vrot.slane %v8735_v48, 2  ;;  %v8755_v30 = vrot.slane %v8754_v32, 4  ;;  %v8748_v57 = vrot.slane %v8747_v40, 4 }
 0x6fb   : > { %v8744_v46 = vadd.f32 %v8743_v0, %v8742_v63  ;;  %v8737_v45 = vadd.f32 %v8736_v7, %v8735_v48  ;;  %v8756_v9 = vadd.f32 %v8755_v30, %v8754_v32  ;;  %v8749_v24 = vadd.f32 %v8748_v57, %v8747_v40 }
 0x6fd   : > { %v8745_v17 = vrot.slane %v8744_v46, 1  ;;  %v8738_v55 = vrot.slane %v8737_v45, 1  ;;  %v8757_v21 = vrot.slane %v8756_v9, 2  ;;  %v8750_v5 = vrot.slane %v8749_v24, 2 }
 0x6ff   : > { %v8746_v52 = vadd.f32 %v8745_v17, %v8744_v46  ;;  %v8739_v44 = vadd.f32 %v8738_v55, %v8737_v45  ;;  %v8758_v11 = vadd.f32 %v8757_v21, %v8756_v9  ;;  %v8751_v31 = vadd.f32 %v8750_v5, %v8749_v24 }
 0x701   : > { %v8759_v22 = vrot.slane %v8758_v11, 1  ;;  %v8752_v61 = vrot.slane %v8751_v31, 1  ;;  %v8761_v28 = vadd.f32 %v8746_v52, %v8739_v44 }
 0x703   : > { %v8753_v38 = vadd.f32 %v8752_v61, %v8751_v31  ;;  %v8760_v60 = vadd.f32 %v8759_v22, %v8758_v11 }
 0x705   : > { %v8762_v62 = vadd.f32 %v8761_v28, %v8753_v38 }
 0x707   : > { %v8763_v39 = vadd.f32 %v8762_v62, %v8760_v60 }
 0x709   : > { %v8764_v34 = vmul.f32 0.0009765625, %v8763_v39  ;;  %v13621_v39 = vld [vmem:[%s19252_s9] sm:$0xff]  }
 0x70b   : > { %v8765_v43 = vadd.f32 1e-05, %v8764_v34 }
 0x70d   : > { %13975 = vrsqrt.f32 %v8765_v43  ;;  %v13622_v43 = vld [vmem:[%s19252_s9 + $0x8] sm:$0xff]  }
 0x717   : > { %v13976_v37 = vpop.eup %13975 }
 0x718   : > { %v8767_v36 = vmul.f32 %v13976_v37, %v18051_v59  ;;  %v8768_v51 = vmul.f32 %v13976_v37, %v18049_v47  ;;  %v8769_v3 = vmul.f32 %v13976_v37, %v18055_v54  ;;  %v8770_v29 = vmul.f32 %v13976_v37, %v18053_v35 }
 0x71a   : > { %v8771_v42 = vmul.f32 %v8767_v36, %v8659_v13  ;;  %v8772_v59 = vmul.f32 %v8768_v51, %v8660_v12  ;;  %v8773_v6 = vmul.f32 %v8769_v3, %v8661_v49  ;;  %v8774_v47 = vmul.f32 %v8770_v29, %v8662_v41  ;;  %v13623_v13 = vld [vmem:[%s19252_s9 + $0x10] sm:$0xff]   ;;  %v13624_v12 = vld [vmem:[%s19252_s9 + $0x18] sm:$0xff]   ;;  %v13625_v41 = vld [vmem:[%s19252_s9 + $0x40] sm:$0xff]  }
 0x71b   : > { %v13626_v36 = vld [vmem:[%s19252_s9 + $0x48] sm:$0xff]   ;;  %v13627_v51 = vld [vmem:[%s19252_s9 + $0x50] sm:$0xff]   ;;  %v13628_v29 = vld [vmem:[%s19252_s9 + $0x58] sm:$0xff]  }
 0x71c   : > { %v8775_v58 = vadd.f32 %v8771_v42, %v8663_v19  ;;  %v8776_v54 = vadd.f32 %v8772_v59, %v8664_v56  ;;  %v8777_v33 = vadd.f32 %v8773_v6, %v8665_v8  ;;  %v8778_v35 = vadd.f32 %v8774_v47, %v8666_v16  ;;  %v13629_v8 = vld [vmem:[%s19252_s9 + $0x60] sm:$0xff]   ;;  %v13630_v42 = vld [vmem:[%s19252_s9 + $0x68] sm:$0xff]   ;;  %v13631_v59 = vld [vmem:[%s19252_s9 + $0x70] sm:$0xff]  }
 0x71d   : > { %v13632_v47 = vld [vmem:[%s19252_s9 + $0x78] sm:$0xff]  }
 0x71e   : > { %v8779_v2 = vmax.f32 %v8775_v58, 0.0  ;;  %v18117_v15 = vmax.f32 %v8776_v54, 0.0  ;;  %v18119_v14 = vmax.f32 %v8777_v33, 0.0  ;;  %v18121_v23 = vmax.f32 %v8778_v35, 0.0  ;;  %v13633_v54 = vld [vmem:[%s19252_s9 + $0x80] sm:$0xff]   ;;  %v13634_v35 = vld [vmem:[%s19252_s9 + $0x88] sm:$0xff]  }
 0x720   : > { %v8783_v50 = vpack.c.bf16 %v8779_v2, %v8779_v2  ;;  %v8784_v4 = vpack.c.bf16 %v18117_v15, %v18117_v15  ;;  %v8785_v53 = vpack.c.bf16 %v18119_v14, %v18119_v14  ;;  %v8786_v25 = vpack.c.bf16 %v18121_v23, %v18121_v23 }
 0x721   : > { %v12370_v37 = vpack.c.bf16 %v18117_v15, %v8779_v2  ;;  %v12397_v6 = vpack.c.bf16 %v18119_v14, %v18117_v15  ;;  %v13635_v2 = vld [vmem:[%s19252_s9 + $0x90] sm:$0xff]   ;;  %v13636_v15 = vld [vmem:[%s19252_s9 + $0x98] sm:$0xff]  }
 0x722   : > { %v8803_v10 = vrot.slane %v8783_v50, %v19791_v26  ;;  %v8825_v27 = vrot.slane %v8784_v4, %v19791_v26  ;;  %v9223_v63 = vrot.slane %v8785_v53, %v19791_v26  ;;  %v18133_v48 = vrot.slane %v8786_v25, %v19791_v26  ;;  %v13637_v4 = vld [vmem:[%s19252_s9 + $0xa0] sm:$0xff]   ;;  %v13638_v25 = vld [vmem:[%s19252_s9 + $0xa8] sm:$0xff]  }
 0x723   : > { %v8957_v49 = vrot.slane %v12370_v37, %v19791_v26  ;;  %v9141_v58 = vrot.slane %v12397_v6, %v19791_v26 }
 0x724   : > { %v8804_v18 = vcombine.high %v8803_v10, %v8803_v10  ;;  %v8811_v20 = vrot.slane %v8803_v10, %v19791_v26  ;;  %v8826_v32 = vcombine.high %v8825_v27, %v8825_v27  ;;  %v8833_v40 = vrot.slane %v8825_v27, %v19791_v26  ;;  %v13639_v10 = vld [vmem:[%s19252_s9 + $0xb0] sm:$0xff]   ;;  %v13640_v27 = vld [vmem:[%s19252_s9 + $0xb8] sm:$0xff]  }
 0x725   : > { %v9224_v0 = vcombine.high %v9223_v63, %v9223_v63  ;;  %v9231_v7 = vrot.slane %v9223_v63, %v19791_v26  ;;  %v9532_v45 = vcombine.high %v18133_v48, %v18133_v48  ;;  %v8964_v19 = vrot.slane %v8957_v49, %v19791_v26 }
 0x726   : > { %v8818_v30 = vrot.slane %v8804_v18, %v19791_v26  ;;  %v18140_v57 = vrot.slane %v8826_v32, %v19791_v26  ;;  %v8842_v9 = vshrl.u32 %v8811_v20, 16  ;;  %v8851_v17 = vshrl.u32 %v8833_v40, 16  ;;  %v13641_v18 = vld [vmem:[%s19252_s9 + $0xc0] sm:$0xff]   ;;  %v13642_v32 = vld [vmem:[%s19252_s9 + $0xc8] sm:$0xff]   ;;  %v13643_v40 = vld [vmem:[%s19252_s9 + $0xd0] sm:$0xff]  }
 0x727   : > { %v18143_v46 = vrot.slane %v9224_v0, %v19791_v26  ;;  %v9240_v21 = vshrl.u32 %v9231_v7, 16  ;;  %v18152_v44 = vrot.slane %v9532_v45, %v19791_v26  ;;  %v9148_v33 = vrot.slane %v9141_v58, %v19791_v26  ;;  %v13644_v7 = vld [vmem:[%s19252_s9 + $0xd8] sm:$0xff]  }
 0x728   : > { %v8847_v24 = vshll.u32 %v8818_v30, 16  ;;  %v8856_v55 = vshll.u32 %v18140_v57, 16  ;;  %v9041_v3 = vcombine.low %v8818_v30, %v18140_v57  ;;  %v12438_v0 = vpack.c.bf16 %v18121_v23, %v18119_v14  ;;  %v13646_v23 = vld [vmem:[%s19252_s9 + $0xe8] sm:$0xff]  }
 0x729   : > { %v9245_v5 = vshll.u32 %v18143_v46, 16  ;;  %v9349_v52 = vcombine.low %v18140_v57, %v18143_v46  ;;  %v9657_v60 = vcombine.low %v18143_v46, %v18152_v44  ;;  %v13645_v57 = vld [vmem:[%s19252_s9 + $0xe0] sm:$0xff]   ;;  %v9539_v45 = vrot.slane %v18133_v48, %v19791_v26 }
 0x72a   : > { %v8849_v31 = vsel %vm14260_vm15, %v8842_v9, %v8847_v24  ;;  %v18158_v22 = vsel %vm14260_vm15, %v8851_v17, %v8856_v55  ;;  %v9048_v56 = vrot.slane %v9041_v3, %v19791_v26  ;;  %v9449_v30 = vrot.slane %v12438_v0, %v19791_v26  ;;  %v13647_v17 = vld [vmem:[%s19252_s9 + $0xf0] sm:$0xff]  }
 0x72b   : > { %v8868_v61 = vcombine.low %v8849_v31, %v18158_v22  ;;  %v18163_v28 = vsel %vm14260_vm15, %v9240_v21, %v9245_v5  ;;  %v9356_v63 = vrot.slane %v9349_v52, %v19791_v26  ;;  %v9553_v14 = vshll.u32 %v18152_v44, 16  ;;  %v13648_v21 = vld [vmem:[%s19252_s9 + $0xf8] sm:$0xff]   ;;  %v13649_v52 = vld [vmem:[%s19252_s9 + $0x100] sm:$0xff]   ;;  %v13650_v31 = vld [vmem:[%s19252_s9 + $0x108] sm:$0xff]  }
 0x72c   : > { %v9257_v38 = vcombine.low %v18158_v22, %v18163_v28  ;;  %v9055_v16 = vrot.slane %v9048_v56, %v19791_v26  ;;  %v9456_v9 = vrot.slane %v9449_v30, %v19791_v26  ;;  %v9548_v24 = vshrl.u32 %v9539_v45, 16  ;;  %v13651_v22 = vld [vmem:[%s19252_s9 + $0x110] sm:$0xff]  }
 0x72d   : > { %v8875_v62 = vrot.slane %v8868_v61, %v19791_v26  ;;  %v9363_v20 = vrot.slane %v9356_v63, %v19791_v26  ;;  %v13652_v61 = vld [vmem:[%s19252_s9 + $0x118] sm:$0xff]   ;;  %v13664_v0 = vld [vmem:[%s19256_s13 + $0x104] ss:$16 sps:$4 sm:$0xff]   ;;  %v13668_v45 = vld [vmem:[%s19256_s13 + $0x120] ss:$16 sps:$4 sm:$0xff]  }
 0x72e   : > { %v9264_v50 = vrot.slane %v9257_v38, %v19791_v26  ;;  %v9555_v48 = vsel %vm14260_vm15, %v9548_v24, %v9553_v14  ;;  %v13670_v30 = vld [vmem:[%s19256_s13 + $0x124] ss:$16 sps:$4 sm:$0xff]   ;;  %v14049_v14 = vmov 0   ;;  %vm11985_vm15 = vcmask 40960  }
 0x72f   : > { %v8882_v34 = vrot.slane %v8875_v62, %v19791_v26  ;;  %v9565_v55 = vcombine.low %v18163_v28, %v9555_v48  ;;  %v9664_v28 = vrot.slane %v9657_v60, %v19791_v26  ;;  %v13653_v60 = vld [vmem:[%s19256_s13 + $0x80] ss:$16 sps:$4 sm:$0xff]   ;;  %9976 = vmatprep.mubr.bf16.mxu0 %v14049_v14  ;;  %v13676_v24 = vld [vmem:[%s19256_s13 + $0x164] ss:$16 sps:$4 sm:$0xff]   ;;  %v13682_v48 = vld [vmem:[%s19256_s13 + $0x8c] ss:$16 sps:$4 sm:$0xff]  }
 0x730   : > { %v9271_v53 = vrot.slane %v9264_v50, %v19791_v26 }
 0x731   : > { %13217 = vmatmul.mubr.msk.bf16.vlgmr.msra.gmra.mrb[4].mxu1 %vm1932_vm1, %v8882_v34  ;;  %v9572_v5 = vrot.slane %v9565_v55, %v19791_v26  ;;  %v9671_v38 = vrot.slane %v9664_v28, %v19791_v26  ;;  %v19854_v34 = vld [vmem:[#allocation39_spill] sm:$0xff]  ;;  %v13679_v55 = vld [vmem:[%s19256_s13 + $0x184] ss:$16 sps:$4 sm:$0xff]  }
 0x732   : > { %13221 = vmatpush3.bf16.msra.mxu1 %v13621_v39  ;;  %13228 = vmatprep.mubr.msk.bf16.mxu1 %vm14046_vm0, %v19816_v1  ;;  %v12471_v39 = vld [vmem:[%s19253_s10] ss:$0 sm:$0xff] }
 0x733   : > { %13222 = vmatprep.subr.bf16.mxu1 %v19816_v1  ;;  %v9579_v11 = vrot.slane %v9572_v5, %v19791_v26 }
 0x736   : > { %13223 = vmatpush3.bf16.msra.mxu1 %v13622_v43 }
 0x737   : > { %13224 = vmatprep.subr.bf16.mxu1 %v19816_v1 }
 0x73a   : > { %13225 = vmatpush3.bf16.msra.mxu1 %v13623_v13 }
 0x73b   : > { %13226 = vmatprep.subr.bf16.mxu1 %v19816_v1 }
 0x73e   : > { %13227 = vmatpush3.bf16.msra.mxu1 %v13624_v12 }
 0x73f   : > { %13232 = vmatprep.subr.bf16.mxu1 %v19816_v1 }
 0x741   : > { %13229 = vmatmul.mubr.msk.bf16.vlgmr.msra.gmra.mrb[4].mxu1 %vm1932_vm1, %v8964_v19  ;;  %v13658_v19 = vld [vmem:[%s19256_s13 + $0xa4] ss:$16 sps:$4 sm:$0xff]  }
 0x742   : > { %13233 = vmatpush3.bf16.msra.mxu1 %v13625_v41  ;;  %13240 = vmatprep.mubr.msk.bf16.mxu1 %vm14046_vm0, %v19816_v1  ;;  %v13655_v41 = vld [vmem:[%s19256_s13 + $0x84] ss:$16 sps:$4 sm:$0xff]  }
 0x743   : > { %13234 = vmatprep.subr.bf16.mxu1 %v19816_v1  ;;  %9944 = vmatprep.subr.bf16.mxu0 %v13655_v41 }
 0x744   : > { %9945 = vmatpush1.bf16.msra.mxu0 %v13653_v60  ;;  %v9761_v60 = vld [vmem:[%s19254_s11 + $0x2] sm:$0x3] }
 0x745   : > { %9946 = vmatprep.subr.bf16.mxu0 %v13658_v19 }
 0x746   : > { %13235 = vmatpush3.bf16.msra.mxu1 %v13626_v36  ;;  %v13656_v36 = vld [vmem:[%s19256_s13 + $0xa0] ss:$16 sps:$4 sm:$0xff]  }
 0x747   : > { %13236 = vmatprep.subr.bf16.mxu1 %v19816_v1 }
 0x748   : > { %9947 = vmatpush1.bf16.msra.mxu0 %v13656_v36  ;;  %v9763_v36 = vld [vmem:[%s19255_s12 + $0x2] sm:$0x3] }
 0x74a   : > { %13237 = vmatpush3.bf16.msra.mxu1 %v13627_v51 }
 0x74b   : > { %13238 = vmatprep.subr.bf16.mxu1 %v19816_v1 }
 0x74e   : > { %13239 = vmatpush3.bf16.msra.mxu1 %v13628_v29 }
 0x74f   : > { %13244 = vmatprep.subr.bf16.mxu1 %v19816_v1 }
 0x751   : > { %13241 = vmatmul.mubr.msk.bf16.vlgmr.msra.gmra.mrb[4].mxu1 %vm1932_vm1, %v9055_v16 }
 0x752   : > { %13245 = vmatpush3.bf16.msra.mxu1 %v13629_v8  ;;  %13252 = vmatprep.mubr.msk.bf16.mxu1 %vm14046_vm0, %v19816_v1 }
 0x753   : > { %13246 = vmatprep.subr.bf16.mxu1 %v19816_v1 }
 0x756   : > { %13247 = vmatpush3.bf16.msra.mxu1 %v13630_v42 }
 0x757   : > { %13248 = vmatprep.subr.bf16.mxu1 %v19816_v1 }
 0x75a   : > { %13249 = vmatpush3.bf16.msra.mxu1 %v13631_v59 }
 0x75b   : > { %13250 = vmatprep.subr.bf16.mxu1 %v19816_v1 }
 0x75e   : > { %13251 = vmatpush3.bf16.msra.mxu1 %v13632_v47 }
 0x75f   : > { %13256 = vmatprep.subr.bf16.mxu1 %v19816_v1 }
 0x761   : > { %13253 = vmatmul.mubr.msk.bf16.vlgmr.msra.gmra.mrb[4].mxu1 %vm1932_vm1, %v9148_v33 }
 0x762   : > { %13257 = vmatpush3.bf16.msra.mxu1 %v13633_v54  ;;  %13264 = vmatprep.mubr.msk.bf16.mxu1 %vm14046_vm0, %v19816_v1 }
 0x763   : > { %13258 = vmatprep.subr.bf16.mxu1 %v19816_v1 }
 0x766   : > { %13259 = vmatpush3.bf16.msra.mxu1 %v13634_v35 }
 0x767   : > { %13260 = vmatprep.subr.bf16.mxu1 %v19816_v1 }
 0x76a   : > { %13261 = vmatpush3.bf16.msra.mxu1 %v13635_v2 }
 0x76b   : > { %13262 = vmatprep.subr.bf16.mxu1 %v19816_v1 }
 0x76e   : > { %13263 = vmatpush3.bf16.msra.mxu1 %v13636_v15 }
 0x76f   : > { %13268 = vmatprep.subr.bf16.mxu1 %v19816_v1 }
 0x771   : > { %13265 = vmatmul.mubr.msk.bf16.vlgmr.msra.gmra.mrb[4].mxu1 %vm1932_vm1, %v9271_v53 }
 0x772   : > { %13269 = vmatpush3.bf16.msra.mxu1 %v13637_v4  ;;  %13276 = vmatprep.mubr.msk.bf16.mxu1 %vm14046_vm0, %v19816_v1 }
 0x773   : > { %13270 = vmatprep.subr.bf16.mxu1 %v19816_v1 }
 0x776   : > { %13271 = vmatpush3.bf16.msra.mxu1 %v13638_v25 }
 0x777   : > { %13272 = vmatprep.subr.bf16.mxu1 %v19816_v1 }
 0x77a   : > { %13273 = vmatpush3.bf16.msra.mxu1 %v13639_v10 }
 0x77b   : > { %13274 = vmatprep.subr.bf16.mxu1 %v19816_v1 }
 0x77e   : > { %13275 = vmatpush3.bf16.msra.mxu1 %v13640_v27 }
 0x77f   : > { %13280 = vmatprep.subr.bf16.mxu1 %v19816_v1 }
 0x781   : > { %13277 = vmatmul.mubr.msk.bf16.vlgmr.msra.gmra.mrb[4].mxu1 %vm1932_vm1, %v9363_v20  ;;  %v13659_v20 = vld [vmem:[%s19256_s13 + $0xc0] ss:$16 sps:$4 sm:$0xff]  }
 0x782   : > { %13281 = vmatpush3.bf16.msra.mxu1 %v13641_v18  ;;  %13288 = vmatprep.mubr.msk.bf16.mxu1 %vm14046_vm0, %v19816_v1 }
 0x783   : > { %13282 = vmatprep.subr.bf16.mxu1 %v19816_v1 }
 0x786   : > { %13283 = vmatpush3.bf16.msra.mxu1 %v13642_v32  ;;  %v13661_v32 = vld [vmem:[%s19256_s13 + $0xc4] ss:$16 sps:$4 sm:$0xff]  }
 0x787   : > { %13284 = vmatprep.subr.bf16.mxu1 %v19816_v1  ;;  %9948 = vmatprep.subr.bf16.mxu0 %v13661_v32 }
 0x788   : > { %9949 = vmatpush1.bf16.msra.mxu0 %v13659_v20  ;;  %v13703_v20 = vld [vmem:[%s19256_s13 + $0x4] ss:$16 sps:$4 sm:$0xff]  }
 0x78a   : > { %13285 = vmatpush3.bf16.msra.mxu1 %v13643_v40  ;;  %v13662_v40 = vld [vmem:[%s19256_s13 + $0x100] ss:$16 sps:$4 sm:$0xff]  }
 0x78b   : > { %13286 = vmatprep.subr.bf16.mxu1 %v19816_v1 }
 0x78e   : > { %13287 = vmatpush3.bf16.msra.mxu1 %v13644_v7  ;;  %v13667_v7 = vld [vmem:[%s19256_s13 + $0xe4] ss:$16 sps:$4 sm:$0xff]  }
 0x78f   : > { %13292 = vmatprep.subr.bf16.mxu1 %v19816_v1  ;;  %9950 = vmatprep.subr.bf16.mxu0 %v13667_v7  ;;  %v13704_v7 = vld [vmem:[%s19256_s13 + $0x20] ss:$16 sps:$4 sm:$0xff]  }
 0x791   : > { %13289 = vmatmul.mubr.msk.bf16.vlgmr.msra.gmra.mrb[4].mxu1 %vm1932_vm1, %v9456_v9  ;;  %v13673_v9 = vld [vmem:[%s19256_s13 + $0x144] ss:$16 sps:$4 sm:$0xff]  }
 0x792   : > { %13293 = vmatpush3.bf16.msra.mxu1 %v13645_v57  ;;  %13300 = vmatprep.mubr.msk.bf16.mxu1 %vm14046_vm0, %v19816_v1  ;;  %v13665_v57 = vld [vmem:[%s19256_s13 + $0xe0] ss:$16 sps:$4 sm:$0xff]  }
 0x793   : > { %13294 = vmatprep.subr.bf16.mxu1 %v19816_v1  ;;  %9951 = vmatpush1.bf16.msra.mxu0 %v13665_v57  ;;  %v13707_v57 = vld [vmem:[%s19256_s13 + $0x40] ss:$16 sps:$4 sm:$0xff]  }
 0x794   : > { %9985 = vmatprep.subr.bf16.mxu0 %v13682_v48  ;;  %v13718_v48 = vld [vmem:[%s19256_s13 + $0x2c] ss:$16 sps:$4 sm:$0xff]  }
 0x796   : > { %13295 = vmatpush3.bf16.msra.mxu1 %v13646_v23  ;;  %v13671_v23 = vld [vmem:[%s19256_s13 + $0x140] ss:$16 sps:$4 sm:$0xff]  }
 0x797   : > { %13296 = vmatprep.subr.bf16.mxu1 %v19816_v1 }
 0x79a   : > { %13297 = vmatpush3.bf16.msra.mxu1 %v13647_v17  ;;  %v13674_v17 = vld [vmem:[%s19256_s13 + $0x160] ss:$16 sps:$4 sm:$0xff]  }
 0x79b   : > { %13298 = vmatprep.subr.bf16.mxu1 %v19816_v1 }
 0x79e   : > { %13299 = vmatpush3.bf16.msra.mxu1 %v13648_v21 }
 0x79f   : > { %13304 = vmatprep.subr.bf16.mxu1 %v19816_v1 }
 0x7a1   : > { %13301 = vmatmul.mubr.msk.bf16.vlgmr.msra.gmra.mrb[4].mxu1 %vm1932_vm1, %v9579_v11 }
 0x7a2   : > { %13305 = vmatpush3.bf16.msra.mxu1 %v13649_v52  ;;  %13312 = vmatprep.mubr.msk.bf16.mxu1 %vm14046_vm0, %v19816_v1  ;;  %vm9764_vm0 = vcmask 517120  }
 0x7a3   : > { %13306 = vmatprep.subr.bf16.mxu1 %v19816_v1 }
 0x7a6   : > { %13307 = vmatpush3.bf16.msra.mxu1 %v13650_v31 }
 0x7a7   : > { %13308 = vmatprep.subr.bf16.mxu1 %v19816_v1 }
 0x7aa   : > { %13309 = vmatpush3.bf16.msra.mxu1 %v13651_v22 }
 0x7ab   : > { %13310 = vmatprep.subr.bf16.mxu1 %v19816_v1 }
 0x7ae   : > { %13311 = vmatpush3.bf16.msra.mxu1 %v13652_v61 }
 0x7af   : > { %10290 = vmatprep.subr.bf16.mxu1 %v13664_v0  ;;  %v13706_v0 = vld [vmem:[%s19256_s13 + $0x24] ss:$16 sps:$4 sm:$0xff]  }
 0x7b1   : > { %13313 = vmatmul.mubr.msk.bf16.vlgmr.msra.gmra.mrb[4].mxu1 %vm1932_vm1, %v9671_v38 }
 0x7b2   : > { %10291 = vmatpush1.bf16.msra.mxu1 %v13662_v40  ;;  %10322 = vmatprep.mubr.bf16.mxu1 %v14049_v14  ;;  %v13701_v40 = vld [vmem:[%s19256_s13] ss:$16 sps:$4 sm:$0xff]  }
 0x7b3   : > { %10292 = vmatprep.subr.bf16.mxu1 %v13670_v30  ;;  %v13709_v30 = vld [vmem:[%s19256_s13 + $0x44] ss:$16 sps:$4 sm:$0xff]  }
 0x7b6   : > { %10293 = vmatpush1.bf16.msra.mxu1 %v13668_v45  ;;  %v13712_v45 = vld [vmem:[%s19256_s13 + $0x64] ss:$16 sps:$4 sm:$0xff]  }
 0x7b7   : > { %10294 = vmatprep.subr.bf16.mxu1 %v13673_v9  ;;  %v13710_v9 = vld [vmem:[%s19256_s13 + $0x60] ss:$16 sps:$4 sm:$0xff]  }
 0x7ba   : > { %10295 = vmatpush1.bf16.msra.mxu1 %v13671_v23  ;;  %v13715_v23 = vld [vmem:[%s19256_s13 + $0xc] ss:$16 sps:$4 sm:$0xff]  }
 0x7bb   : > { %10296 = vmatprep.subr.bf16.mxu1 %v13676_v24  ;;  %v13713_v24 = vld [vmem:[%s19256_s13 + $0x8] ss:$16 sps:$4 sm:$0xff]  }
 0x7be   : > { %10297 = vmatpush1.bf16.msra.mxu1 %v13674_v17  ;;  %v13716_v17 = vld [vmem:[%s19256_s13 + $0x28] ss:$16 sps:$4 sm:$0xff]  }
 0x7bf   : > { %10478 = vmatprep.subr.bf16.mxu1 %v13679_v55  ;;  %v13721_v55 = vld [vmem:[%s19256_s13 + $0x4c] ss:$16 sps:$4 sm:$0xff]  }
 0x884   : > { %v9733_v62 = vpop.f32.mrb[4].mxu1 }
 0x885   : > { %v9747_v43 = vrot.slane %v9733_v62, %v19854_v34  ;;  %v13314_v13 = vpop.f32.mrb[5].mxu1 }
 0x886   : > { %v9736_v37 = vpop.f32.mrb[6].mxu1 }
 0x887   : > { %v9748_v1 = vcombine.high %v9747_v43, %v9747_v43  ;;  %v13315_v12 = vpop.f32.mrb[7].mxu1  ;;  %v9758_v49 = vadd.f32 %v12471_v39, %v9747_v43 }
 0x889   : > { %v9765_v46 = vsel %vm9764_vm0, %v9758_v49, 0.0  ;;  %v9759_v44 = vadd.f32 %v12471_v39, %v9748_v1 }
 0x88a   : > { %9766 = vadd.xlane.f32.xlu0 %v9765_v46 }
 0x88b   : > { %v9768_v26 = vsel %vm9764_vm0, %v9759_v44, 0.0 }
 0x88c   : > { %9769 = vadd.xlane.f32.xlu1 %v9768_v26  ;;  %v9760_v26 = vld [vmem:[%s19254_s11] sm:$0x3] }
 0x917   : > { %v9767_v51 = vpop.xlane.xlu0 %9766 }
 0x918   : > { %v9771_v3 = vsel %vm4265_vm4, %v9767_v51, 0.0  ;;  %v9762_v51 = vld [vmem:[%s19255_s12] sm:$0x3] }
 0x919   : > { %v9772_v29 = vrot.slane %v9771_v3, 4  ;;  %v9770_v56 = vpop.xlane.xlu1 %9769 }
 0x91a   : > { %v9778_v8 = vsel %vm4265_vm4, %v9770_v56, 0.0 }
 0x91b   : > { %v9773_v16 = vadd.f32 %v9772_v29, %v9771_v3  ;;  %v9779_v42 = vrot.slane %v9778_v8, 4 }
 0x91d   : > { %v9774_v59 = vrot.slane %v9773_v16, 2  ;;  %v9780_v6 = vadd.f32 %v9779_v42, %v9778_v8 }
 0x91f   : > { %v9775_v47 = vadd.f32 %v9774_v59, %v9773_v16  ;;  %v9781_v58 = vrot.slane %v9780_v6, 2  ;;  %v13677_v59 = vld [vmem:[%s19256_s13 + $0x180] ss:$16 sps:$4 sm:$0xff]  }
 0x921   : > { %v9776_v54 = vrot.slane %v9775_v47, 1  ;;  %v9782_v33 = vadd.f32 %v9781_v58, %v9780_v6  ;;  %v13685_v58 = vld [vmem:[%s19256_s13 + $0x1a4] ss:$16 sps:$4 sm:$0xff]  }
 0x923   : > { %v9783_v35 = vrot.slane %v9782_v33, 1  ;;  %v9777_v2 = vadd.f32 %v9776_v54, %v9775_v47  ;;  %v13680_v54 = vld [vmem:[%s19256_s13 + $0x88] ss:$16 sps:$4 sm:$0xff]  }
 0x925   : > { %v9784_v15 = vadd.f32 %v9783_v35, %v9782_v33  ;;  %v13688_v35 = vld [vmem:[%s19256_s13 + $0xac] ss:$16 sps:$4 sm:$0xff]  }
 0x927   : > { %v9785_v50 = vadd.f32 %v9784_v15, %v9777_v2  ;;  %v13683_v2 = vld [vmem:[%s19256_s13 + $0x1a0] ss:$16 sps:$4 sm:$0xff]   ;;  %v13691_v15 = vld [vmem:[%s19256_s13 + $0x1c4] ss:$16 sps:$4 sm:$0xff]  }
 0x929   : > { %v9786_v4 = vmul.f32 0.00390625, %v9785_v50  ;;  %v13686_v50 = vld [vmem:[%s19256_s13 + $0xa8] ss:$16 sps:$4 sm:$0xff]  }
 0x92b   : > { %v18380_v53 = vsub.f32 %v9759_v44, %v9786_v4  ;;  %v9787_v25 = vsub.f32 %v9758_v49, %v9786_v4  ;;  %v13694_v4 = vld [vmem:[%s19256_s13 + $0xcc] ss:$16 sps:$4 sm:$0xff]  }
 0x92d   : > { %v9790_v10 = vmul.f32 %v18380_v53, %v18380_v53  ;;  %v9789_v27 = vmul.f32 %v9787_v25, %v9787_v25 }
 0x92f   : > { %v9794_v63 = vsel %vm9764_vm0, %v9790_v10, 0.0  ;;  %v9791_v18 = vsel %vm9764_vm0, %v9789_v27, 0.0  ;;  %v13692_v10 = vld [vmem:[%s19256_s13 + $0xc8] ss:$16 sps:$4 sm:$0xff]   ;;  %v13700_v27 = vld [vmem:[%s19256_s13 + $0xec] ss:$16 sps:$4 sm:$0xff]  }
 0x930   : > { %9795 = vadd.xlane.f32.xlu1 %v9794_v63  ;;  %9792 = vadd.xlane.f32.xlu0 %v9791_v18  ;;  %v13695_v63 = vld [vmem:[%s19256_s13 + $0x1e0] ss:$16 sps:$4 sm:$0xff]   ;;  %v13698_v18 = vld [vmem:[%s19256_s13 + $0xe8] ss:$16 sps:$4 sm:$0xff]  }
 0x9bd   : > { %v9796_v21 = vpop.xlane.xlu1 %9795  ;;  %v9793_v5 = vpop.xlane.xlu0 %9792 }
 0x9be   : > { %v9804_v52 = vsel %vm4265_vm4, %v9796_v21, 0.0  ;;  %v9797_v11 = vsel %vm4265_vm4, %v9793_v5, 0.0  ;;  %v13719_v21 = vld [vmem:[%s19256_s13 + $0x48] ss:$16 sps:$4 sm:$0xff]   ;;  %v13724_v5 = vld [vmem:[%s19256_s13 + $0x6c] ss:$16 sps:$4 sm:$0xff]  }
 0x9bf   : > { %v9805_v31 = vrot.slane %v9804_v52, 4  ;;  %v9798_v22 = vrot.slane %v9797_v11, 4 }
 0x9c1   : > { %v9806_v61 = vadd.f32 %v9805_v31, %v9804_v52  ;;  %v9799_v28 = vadd.f32 %v9798_v22, %v9797_v11  ;;  %v13722_v52 = vld [vmem:[%s19256_s13 + $0x68] ss:$16 sps:$4 sm:$0xff]   ;;  %v13727_v11 = vld [vmem:[%s19256_s13 + $0x10c] ss:$16 sps:$4 sm:$0xff]  }
 0x9c2   : > { %v13725_v31 = vld [vmem:[%s19256_s13 + $0x108] ss:$16 sps:$4 sm:$0xff]   ;;  %v13730_v22 = vld [vmem:[%s19256_s13 + $0x12c] ss:$16 sps:$4 sm:$0xff]  }
 0x9c3   : > { %v9807_v38 = vrot.slane %v9806_v61, 2  ;;  %v9800_v62 = vrot.slane %v9799_v28, 2 }
 0x9c5   : > { %v9808_v39 = vadd.f32 %v9807_v38, %v9806_v61  ;;  %v9801_v34 = vadd.f32 %v9800_v62, %v9799_v28  ;;  %v13728_v61 = vld [vmem:[%s19256_s13 + $0x128] ss:$16 sps:$4 sm:$0xff]   ;;  %v13733_v28 = vld [vmem:[%s19256_s13 + $0x14c] ss:$16 sps:$4 sm:$0xff]  }
 0x9c6   : > { %v13731_v38 = vld [vmem:[%s19256_s13 + $0x148] ss:$16 sps:$4 sm:$0xff]   ;;  %v13736_v62 = vld [vmem:[%s19256_s13 + $0x16c] ss:$16 sps:$4 sm:$0xff]  }
 0x9c7   : > { %v9809_v43 = vrot.slane %v9808_v39, 1  ;;  %v9802_v13 = vrot.slane %v9801_v34, 1 }
 0x9c9   : > { %v9810_v37 = vadd.f32 %v9809_v43, %v9808_v39  ;;  %v9803_v1 = vadd.f32 %v9802_v13, %v9801_v34  ;;  %v13734_v39 = vld [vmem:[%s19256_s13 + $0x168] ss:$16 sps:$4 sm:$0xff]   ;;  %v13739_v34 = vld [vmem:[%s19256_s13 + $0x18c] ss:$16 sps:$4 sm:$0xff]  }
 0x9ca   : > { %v13737_v43 = vld [vmem:[%s19256_s13 + $0x188] ss:$16 sps:$4 sm:$0xff]   ;;  %v13742_v13 = vld [vmem:[%s19256_s13 + $0x1ac] ss:$16 sps:$4 sm:$0xff]  }
 0x9cb   : > { %v9811_v12 = vadd.f32 %v9810_v37, %v9803_v1  ;;  %v13740_v37 = vld [vmem:[%s19256_s13 + $0x1a8] ss:$16 sps:$4 sm:$0xff]   ;;  %v13745_v1 = vld [vmem:[%s19256_s13 + $0x1cc] ss:$16 sps:$4 sm:$0xff]  }
 0x9cd   : > { %v9812_v49 = vmul.f32 0.00390625, %v9811_v12  ;;  %v13743_v12 = vld [vmem:[%s19256_s13 + $0x1c8] ss:$16 sps:$4 sm:$0xff]  }
 0x9cf   : > { %v9813_v46 = vadd.f32 1e-05, %v9812_v49  ;;  %v13748_v49 = vld [vmem:[%s19256_s13 + $0x1ec] ss:$16 sps:$4 sm:$0xff]  }
 0x9d1   : > { %13977 = vrsqrt.f32 %v9813_v46 }
 0x9db   : > { %v13978_v44 = vpop.eup %13977 }
 0x9dc   : > { %v9815_v41 = vmul.f32 %v13978_v44, %v9787_v25  ;;  %v9816_v19 = vmul.f32 %v13978_v44, %v18380_v53  ;;  %v13689_v53 = vld [vmem:[%s19256_s13 + $0x1c0] ss:$16 sps:$4 sm:$0xff]   ;;  %v13697_v25 = vld [vmem:[%s19256_s13 + $0x1e4] ss:$16 sps:$4 sm:$0xff]  }
 0x9de   : > { %v9817_v3 = vmul.f32 %v9815_v41, %v9760_v26  ;;  %v9818_v29 = vmul.f32 %v9816_v19, %v9761_v60 }
 0x9e0   : > { %v9820_v56 = vadd.f32 %v9818_v29, %v9763_v36  ;;  %v9819_v8 = vadd.f32 %v9817_v3, %v9762_v51 }
 0x9e2   : > { %v9822_v16 = vmax.f32 %v9820_v56, 0.0  ;;  %v9821_v42 = vmax.f32 %v9819_v8, 0.0 }
 0x9e4   : > { %v18448_v6 = vpack.c.bf16 %v9822_v16, %v9822_v16  ;;  %v18450_v47 = vpack.c.bf16 %v9821_v42, %v9821_v42 }
 0x9e6   : > { %12556 = vmatmul.mubr.msk.bf16.vlgmr.msra.gmra.mrb[8].mxu1 %vm1932_vm1, %v18448_v6  ;;  %v9859_v33 = vshrl.u32 %v18450_v47, 16  ;;  %v10393_v32 = vshrl.u32 %v18448_v6, 16 }
 0x9e7   : > { %10479 = vmatpush1.bf16.msra.mxu1 %v13677_v59  ;;  %10510 = vmatprep.mubr.bf16.mxu1 %v14049_v14 }
 0x9e8   : > { %12504 = vmatmul.mubr.msk.bf16.vlgmr.msra.gmra.mrb[28].mxu0 %vm1932_vm1, %v9859_v33  ;;  %10480 = vmatprep.subr.bf16.mxu1 %v13685_v58 }
 0x9e9   : > { %9986 = vmatpush1.bf16.msra.mxu0 %v13680_v54  ;;  %10017 = vmatprep.mubr.bf16.mxu0 %v14049_v14 }
 0x9ea   : > { %9987 = vmatprep.subr.bf16.mxu0 %v13688_v35 }
 0x9eb   : > { %10481 = vmatpush1.bf16.msra.mxu1 %v13683_v2 }
 0x9ec   : > { %10482 = vmatprep.subr.bf16.mxu1 %v13691_v15 }
 0x9ed   : > { %9988 = vmatpush1.bf16.msra.mxu0 %v13686_v50 }
 0x9ee   : > { %9989 = vmatprep.subr.bf16.mxu0 %v13694_v4 }
 0x9ef   : > { %10483 = vmatpush1.bf16.msra.mxu1 %v13689_v53 }
 0x9f0   : > { %10484 = vmatprep.subr.bf16.mxu1 %v13697_v25 }
 0x9f1   : > { %9990 = vmatpush1.bf16.msra.mxu0 %v13692_v10 }
 0x9f2   : > { %9991 = vmatprep.subr.bf16.mxu0 %v13700_v27 }
 0x9f3   : > { %10485 = vmatpush1.bf16.msra.mxu1 %v13695_v63 }
 0x9f5   : > { %9992 = vmatpush1.bf16.msra.mxu0 %v13698_v18 }
 0x9f6   : > { %12590 = vmatmul.mubr.msk.bf16.vlgmr.msra.gmra.mrb[12].mxu1 %vm1932_vm1, %v10393_v32  ;;  %10108 = vmatprep.subr.bf16.mxu0 %v13703_v20 }
 0x9f8   : > { %12505 = vmatmul.mubr.msk.bf16.vlgmr.msra.gmra.mrb[32].mxu0 %vm1932_vm1, %v9859_v33 }
 0x9f9   : > { %10109 = vmatpush1.bf16.msra.mxu0 %v13701_v40  ;;  %10140 = vmatprep.mubr.bf16.mxu0 %v14049_v14 }
 0x9fa   : > { %10110 = vmatprep.subr.bf16.mxu0 %v13706_v0 }
 0x9fd   : > { %10111 = vmatpush1.bf16.msra.mxu0 %v13704_v7 }
 0x9fe   : > { %10112 = vmatprep.subr.bf16.mxu0 %v13709_v30 }
 0xa01   : > { %10113 = vmatpush1.bf16.msra.mxu0 %v13707_v57 }
 0xa02   : > { %10114 = vmatprep.subr.bf16.mxu0 %v13712_v45  ;;  %v19855_v45 = vld [vmem:[#allocation10_spill] sm:$0xff] }
 0xa05   : > { %10115 = vmatpush1.bf16.msra.mxu0 %v13710_v9  ;;  %v18612_v9 = vsub.s32 0, %v19855_v45 }
 0xa06   : > { %10149 = vmatprep.subr.bf16.mxu0 %v13715_v23  ;;  %v18615_v23 = vsub.s32 1, %v19855_v45 }
 0xa08   : > { %12522 = vmatmul.mubr.msk.bf16.vlgmr.msra.gmra.mrb[36].mxu0 %vm1932_vm1, %v18450_v47 }
 0xa09   : > { %10150 = vmatpush1.bf16.msra.mxu0 %v13713_v24  ;;  %10181 = vmatprep.mubr.bf16.mxu0 %v14049_v14  ;;  %v10564_v24 = vld [vmem:[%s19257_s14] sm:$0xf] }
 0xa0a   : > { %10151 = vmatprep.subr.bf16.mxu0 %v13718_v48  ;;  %v10569_v48 = vrot.slane %v10564_v24, %v18612_v9 }
 0xa0d   : > { %10152 = vmatpush1.bf16.msra.mxu0 %v13716_v17  ;;  %v10573_v17 = vrot.slane %v10564_v24, %v18615_v23 }
 0xa0e   : > { %10153 = vmatprep.subr.bf16.mxu0 %v13721_v55  ;;  %v18623_v55 = vsub.s32 2, %v19855_v45 }
 0xa11   : > { %10154 = vmatpush1.bf16.msra.mxu0 %v13719_v21  ;;  %v18626_v21 = vsub.s32 3, %v19855_v45  ;;  %v13808_v45 = vld [vmem:[%s19260_s17 + $0x12c] ss:$16 sps:$4 sm:$0xff]  }
 0xa12   : > { %10155 = vmatprep.subr.bf16.mxu0 %v13724_v5 }
 0xa15   : > { %10156 = vmatpush1.bf16.msra.mxu0 %v13722_v52 }
 0xa16   : > { %10331 = vmatprep.subr.bf16.mxu0 %v13727_v11  ;;  %v10577_v11 = vrot.slane %v10564_v24, %v18623_v55 }
 0xa18   : > { %12523 = vmatmul.mubr.msk.bf16.vlgmr.msra.gmra.mrb[40].mxu0 %vm1932_vm1, %v18450_v47 }
 0xa19   : > { %10332 = vmatpush1.bf16.msra.mxu0 %v13725_v31  ;;  %10363 = vmatprep.mubr.bf16.mxu0 %v14049_v14 }
 0xa1a   : > { %10333 = vmatprep.subr.bf16.mxu0 %v13730_v22  ;;  %v10581_v22 = vrot.slane %v10564_v24, %v18626_v21  ;;  %v13803_v24 = vld [vmem:[%s19260_s17 + $0x120] ss:$16 sps:$4 sm:$0xff]  }
 0xa1d   : > { %10334 = vmatpush1.bf16.msra.mxu0 %v13728_v61 }
 0xa1e   : > { %10335 = vmatprep.subr.bf16.mxu0 %v13733_v28 }
 0xa21   : > { %10336 = vmatpush1.bf16.msra.mxu0 %v13731_v38 }
 0xa22   : > { %10337 = vmatprep.subr.bf16.mxu0 %v13736_v62 }
 0xa25   : > { %10338 = vmatpush1.bf16.msra.mxu0 %v13734_v39 }
 0xa26   : > { %10519 = vmatprep.subr.bf16.mxu0 %v13739_v34 }
 0xa28   : > { %12557 = vmatmul.mubr.msk.bf16.vlgmr.msra.gmra.mrb[44].mxu0 %vm1932_vm1, %v18448_v6 }
 0xa29   : > { %10520 = vmatpush1.bf16.msra.mxu0 %v13737_v43  ;;  %10551 = vmatprep.mubr.bf16.mxu0 %v14049_v14  ;;  %v13746_v14 = vld [vmem:[%s19256_s13 + $0x1e8] ss:$16 sps:$4 sm:$0xff]  }
 0xa2a   : > { %10521 = vmatprep.subr.bf16.mxu0 %v13742_v13 }
 0xa2d   : > { %10522 = vmatpush1.bf16.msra.mxu0 %v13740_v37 }
 0xa2e   : > { %10523 = vmatprep.subr.bf16.mxu0 %v13745_v1 }
 0xa31   : > { %10524 = vmatpush1.bf16.msra.mxu0 %v13743_v12 }
 0xa32   : > { %10525 = vmatprep.subr.bf16.mxu0 %v13748_v49 }
 0xa35   : > { %10526 = vmatpush1.bf16.msra.mxu0 %v13746_v14 }
 0xa38   : > { %12591 = vmatmul.mubr.msk.bf16.vlgmr.msra.gmra.mrb[48].mxu0 %vm1932_vm1, %v10393_v32 }
 0xab9   : > { %v10324_v46 = vpop.f32.mrb[8].mxu1 }
 0xaba   : > { %v10326_v44 = vpop.f32.mrb[9].mxu1 }
 0xabb   : > { %v9978_v26 = vpop.f32.mrb[28].mxu0  ;;  %v10328_v60 = vpop.f32.mrb[10].mxu1 }
 0xabc   : > { %v9980_v41 = vpop.f32.mrb[29].mxu0  ;;  %v10329_v19 = vpop.f32.mrb[11].mxu1  ;;  %v13752_v60 = vld [vmem:[%s19260_s17 + $0x8] ss:$16 sps:$4 sm:$0xff]  }
 0xabd   : > { %v9982_v36 = vpop.f32.mrb[30].mxu0  ;;  %v13757_v19 = vld [vmem:[%s19260_s17 + $0x24] ss:$16 sps:$4 sm:$0xff]  }
 0xabe   : > { %v9983_v51 = vpop.f32.mrb[31].mxu0  ;;  %v13760_v36 = vld [vmem:[%s19260_s17 + $0x2c] ss:$16 sps:$4 sm:$0xff]  }
 0xabf   : > { %v13755_v51 = vld [vmem:[%s19260_s17 + $0x20] ss:$16 sps:$4 sm:$0xff]  }
 0xac9   : > { %v10512_v3 = vpop.f32.mrb[12].mxu1 }
 0xaca   : > { %v10514_v29 = vpop.f32.mrb[13].mxu1 }
 0xacb   : > { %v10019_v56 = vpop.f32.mrb[32].mxu0  ;;  %v10516_v8 = vpop.f32.mrb[14].mxu1 }
 0xacc   : > { %v10021_v16 = vpop.f32.mrb[33].mxu0  ;;  %v10517_v42 = vpop.f32.mrb[15].mxu1  ;;  %v13761_v8 = vld [vmem:[%s19260_s17 + $0x40] ss:$16 sps:$4 sm:$0xff]  }
 0xacd   : > { %v10023_v59 = vpop.f32.mrb[34].mxu0  ;;  %v13769_v42 = vld [vmem:[%s19260_s17 + $0x64] ss:$16 sps:$4 sm:$0xff]  }
 0xace   : > { %v10024_v47 = vpop.f32.mrb[35].mxu0  ;;  %v13772_v59 = vld [vmem:[%s19260_s17 + $0x6c] ss:$16 sps:$4 sm:$0xff]  }
 0xacf   : > { %v13767_v47 = vld [vmem:[%s19260_s17 + $0x60] ss:$16 sps:$4 sm:$0xff]  }
 0xadb   : > { %v10142_v58 = vpop.f32.mrb[36].mxu0 }
 0xadc   : > { %v10143_v6 = vadd.f32 %v10142_v58, %v9978_v26  ;;  %v10144_v54 = vpop.f32.mrb[37].mxu0  ;;  %v13751_v26 = vld [vmem:[%s19260_s17 + $0x4] ss:$16 sps:$4 sm:$0xff]   ;;  %v13770_v58 = vld [vmem:[%s19260_s17 + $0x68] ss:$16 sps:$4 sm:$0xff]  }
 0xadd   : > { %v10145_v33 = vadd.f32 %v10144_v54, %v9980_v41  ;;  %v10146_v35 = vpop.f32.mrb[38].mxu0  ;;  %v13754_v41 = vld [vmem:[%s19260_s17 + $0xc] ss:$16 sps:$4 sm:$0xff]   ;;  %11476 = vmatprep.subr.bf16.mxu1 %v13751_v26  ;;  %v13817_v26 = vld [vmem:[%s19260_s17 + $0x164] ss:$16 sps:$4 sm:$0xff]  }
 0xade   : > { %v10372_v2 = vadd.f32 %v10324_v46, %v10143_v6  ;;  %v10147_v15 = vpop.f32.mrb[39].mxu0  ;;  %11558 = vmatprep.subr.bf16.mxu0 %v13754_v41  ;;  %v13775_v6 = vld [vmem:[%s19260_s17 + $0x84] ss:$16 sps:$4 sm:$0xff]   ;;  %v13778_v54 = vld [vmem:[%s19260_s17 + $0x8c] ss:$16 sps:$4 sm:$0xff]  }
 0xadf   : > { %v10373_v50 = vadd.f32 %v10326_v44, %v10145_v33  ;;  %v13749_v44 = vld [vmem:[%s19260_s17] ss:$16 sps:$4 sm:$0xff]   ;;  %11559 = vmatpush1.bf16.msra.mxu0 %v13752_v60  ;;  %v13776_v35 = vld [vmem:[%s19260_s17 + $0x88] ss:$16 sps:$4 sm:$0xff]   ;;  %v13784_v15 = vld [vmem:[%s19260_s17 + $0xac] ss:$16 sps:$4 sm:$0xff]  }
 0xae0   : > { %v10560_v4 = vadd.f32 %v10512_v3, %v10372_v2  ;;  %11477 = vmatpush1.bf16.msra.mxu1 %v13749_v44  ;;  %v13758_v3 = vld [vmem:[%s19260_s17 + $0x28] ss:$16 sps:$4 sm:$0xff]   ;;  %11560 = vmatprep.subr.bf16.mxu0 %v13760_v36  ;;  %v13773_v33 = vld [vmem:[%s19260_s17 + $0x80] ss:$16 sps:$4 sm:$0xff]   ;;  %v13781_v2 = vld [vmem:[%s19260_s17 + $0xa4] ss:$16 sps:$4 sm:$0xff]  }
 0xae1   : > { %v10561_v53 = vadd.f32 %v10514_v29, %v10373_v50  ;;  %11478 = vmatprep.subr.bf16.mxu1 %v13757_v19  ;;  %v13763_v29 = vld [vmem:[%s19260_s17 + $0x44] ss:$16 sps:$4 sm:$0xff]   ;;  %v13779_v50 = vld [vmem:[%s19260_s17 + $0xa0] ss:$16 sps:$4 sm:$0xff]   ;;  %v13814_v44 = vld [vmem:[%s19260_s17 + $0x14c] ss:$16 sps:$4 sm:$0xff]  }
 0xae2   : > { %v18628_v5 = vadd.f32 %v10569_v48, %v10560_v4  ;;  %v13782_v4 = vld [vmem:[%s19260_s17 + $0xa8] ss:$16 sps:$4 sm:$0xff]   ;;  %v13820_v60 = vld [vmem:[%s19260_s17 + $0x16c] ss:$16 sps:$4 sm:$0xff]   ;;  %v13815_v41 = vld [vmem:[%s19260_s17 + $0x160] ss:$16 sps:$4 sm:$0xff]  }
 0xae3   : > { %v18630_v52 = vadd.f32 %v10573_v17, %v10561_v53  ;;  %11561 = vmatpush1.bf16.msra.mxu0 %v13758_v3  ;;  %v13787_v53 = vld [vmem:[%s19260_s17 + $0xc4] ss:$16 sps:$4 sm:$0xff]   ;;  %v13806_v48 = vld [vmem:[%s19260_s17 + $0x128] ss:$16 sps:$4 sm:$0xff]   ;;  %v13821_v3 = vld [vmem:[%s19260_s17 + $0x180] ss:$16 sps:$4 sm:$0xff]  }
 0xae4   : > { %v10591_v38 = vsel %vm10590_vm14, %v18628_v5, 0.0  ;;  %11479 = vmatpush1.bf16.msra.mxu1 %v13755_v51  ;;  %v13818_v19 = vld [vmem:[%s19260_s17 + $0x168] ss:$16 sps:$4 sm:$0xff]   ;;  %v13823_v36 = vld [vmem:[%s19260_s17 + $0x184] ss:$16 sps:$4 sm:$0xff]  }
 0xae5   : > { %v10592_v62 = vsel %vm10590_vm14, %v18630_v52, 0.0  ;;  %11480 = vmatprep.subr.bf16.mxu1 %v13763_v29  ;;  %v13826_v51 = vld [vmem:[%s19260_s17 + $0x18c] ss:$16 sps:$4 sm:$0xff]   ;;  %v13824_v29 = vld [vmem:[%s19260_s17 + $0x188] ss:$16 sps:$4 sm:$0xff]  }
 0xae6   : > { %v10593_v1 = vadd.f32 %v10592_v62, %v10591_v38 }
 0xae8   : > { %11481 = vmatpush1.bf16.msra.mxu1 %v13761_v8  ;;  %v13832_v8 = vld [vmem:[%s19260_s17 + $0x1ac] ss:$16 sps:$4 sm:$0xff]  }
 0xae9   : > { %11482 = vmatprep.subr.bf16.mxu1 %v13769_v42  ;;  %v13830_v42 = vld [vmem:[%s19260_s17 + $0x1a8] ss:$16 sps:$4 sm:$0xff]  }
 0xaeb   : > { %v10183_v25 = vpop.f32.mrb[40].mxu0 }
 0xaec   : > { %v10184_v10 = vadd.f32 %v10183_v25, %v10019_v56  ;;  %v10185_v27 = vpop.f32.mrb[41].mxu0  ;;  %v13766_v56 = vld [vmem:[%s19260_s17 + $0x4c] ss:$16 sps:$4 sm:$0xff]   ;;  %11483 = vmatpush1.bf16.msra.mxu1 %v13767_v47 }
 0xaed   : > { %v10186_v63 = vadd.f32 %v10185_v27, %v10021_v16  ;;  %v10187_v18 = vpop.f32.mrb[42].mxu0  ;;  %v13764_v16 = vld [vmem:[%s19260_s17 + $0x48] ss:$16 sps:$4 sm:$0xff]   ;;  %11562 = vmatprep.subr.bf16.mxu0 %v13766_v56  ;;  %11484 = vmatprep.subr.bf16.mxu1 %v13775_v6  ;;  %v13790_v25 = vld [vmem:[%s19260_s17 + $0xcc] ss:$16 sps:$4 sm:$0xff]  }
 0xaee   : > { %v10188_v20 = vpop.f32.mrb[43].mxu0  ;;  %11563 = vmatpush1.bf16.msra.mxu0 %v13764_v16  ;;  %v13788_v27 = vld [vmem:[%s19260_s17 + $0xc8] ss:$16 sps:$4 sm:$0xff]   ;;  %v13796_v18 = vld [vmem:[%s19260_s17 + $0xec] ss:$16 sps:$4 sm:$0xff]  }
 0xaef   : > { %11564 = vmatprep.subr.bf16.mxu0 %v13772_v59  ;;  %v13791_v20 = vld [vmem:[%s19260_s17 + $0xe0] ss:$16 sps:$4 sm:$0xff]   ;;  %v13829_v56 = vld [vmem:[%s19260_s17 + $0x1a4] ss:$16 sps:$4 sm:$0xff]   ;;  %v13838_v47 = vld [vmem:[%s19260_s17 + $0x1cc] ss:$16 sps:$4 sm:$0xff]  }
 0xaf0   : > { %11485 = vmatpush1.bf16.msra.mxu1 %v13773_v33  ;;  %v13827_v16 = vld [vmem:[%s19260_s17 + $0x1a0] ss:$16 sps:$4 sm:$0xff]   ;;  %v13835_v59 = vld [vmem:[%s19260_s17 + $0x1c4] ss:$16 sps:$4 sm:$0xff]   ;;  %v13836_v6 = vld [vmem:[%s19260_s17 + $0x1c8] ss:$16 sps:$4 sm:$0xff]  }
 0xaf1   : > { %11486 = vmatprep.subr.bf16.mxu1 %v13781_v2  ;;  %v13844_v33 = vld [vmem:[%s19260_s17 + $0x1ec] ss:$16 sps:$4 sm:$0xff]   ;;  %v13842_v2 = vld [vmem:[%s19260_s17 + $0x1e8] ss:$16 sps:$4 sm:$0xff]  }
 0xaf2   : > { %11565 = vmatpush1.bf16.msra.mxu0 %v13770_v58  ;;  %v13833_v58 = vld [vmem:[%s19260_s17 + $0x1c0] ss:$16 sps:$4 sm:$0xff]  }
 0xaf3   : > { %11566 = vmatprep.subr.bf16.mxu0 %v13778_v54  ;;  %v13841_v54 = vld [vmem:[%s19260_s17 + $0x1e4] ss:$16 sps:$4 sm:$0xff]  }
 0xaf4   : > { %11487 = vmatpush1.bf16.msra.mxu1 %v13779_v50  ;;  %v13850_v50 = vld [vmem:[%s19260_s17 + $0x20c] ss:$16 sps:$4 sm:$0xff]  }
 0xaf5   : > { %11488 = vmatprep.subr.bf16.mxu1 %v13787_v53 }
 0xaf6   : > { %11567 = vmatpush1.bf16.msra.mxu0 %v13776_v35  ;;  %v13839_v35 = vld [vmem:[%s19260_s17 + $0x1e0] ss:$16 sps:$4 sm:$0xff]  }
 0xaf7   : > { %11568 = vmatprep.subr.bf16.mxu0 %v13784_v15  ;;  %v13847_v15 = vld [vmem:[%s19260_s17 + $0x204] ss:$16 sps:$4 sm:$0xff]  }
 0xafa   : > { %11569 = vmatpush1.bf16.msra.mxu0 %v13782_v4 }
 0xafb   : > { %v10365_v32 = vpop.f32.mrb[44].mxu0  ;;  %11570 = vmatprep.subr.bf16.mxu0 %v13790_v25 }
 0xafc   : > { %v10374_v40 = vadd.f32 %v10365_v32, %v10184_v10  ;;  %v10367_v0 = vpop.f32.mrb[45].mxu0  ;;  %v13785_v10 = vld [vmem:[%s19260_s17 + $0xc0] ss:$16 sps:$4 sm:$0xff]   ;;  %v13794_v32 = vld [vmem:[%s19260_s17 + $0xe8] ss:$16 sps:$4 sm:$0xff]  }
 0xafd   : > { %v10375_v7 = vadd.f32 %v10367_v0, %v10186_v63  ;;  %v10369_v30 = vpop.f32.mrb[46].mxu0  ;;  %v13793_v63 = vld [vmem:[%s19260_s17 + $0xe4] ss:$16 sps:$4 sm:$0xff]   ;;  %11489 = vmatpush1.bf16.msra.mxu1 %v13785_v10  ;;  %v13802_v0 = vld [vmem:[%s19260_s17 + $0x10c] ss:$16 sps:$4 sm:$0xff]  }
 0xafe   : > { %v10370_v57 = vpop.f32.mrb[47].mxu0  ;;  %11571 = vmatpush1.bf16.msra.mxu0 %v13788_v27  ;;  %11490 = vmatprep.subr.bf16.mxu1 %v13793_v63  ;;  %v13800_v30 = vld [vmem:[%s19260_s17 + $0x108] ss:$16 sps:$4 sm:$0xff]   ;;  %v18871_v10 = vld [vmem:[%s19258_s15] sm:$0xf] }
 0xaff   : > { %11572 = vmatprep.subr.bf16.mxu0 %v13796_v18  ;;  %v13805_v57 = vld [vmem:[%s19260_s17 + $0x124] ss:$16 sps:$4 sm:$0xff]   ;;  %v18876_v27 = vld [vmem:[%s19259_s16] sm:$0xf]  ;;  %v10635_v63 = vrot.slane %v18871_v10, %v18615_v23  ;;  %v10631_v18 = vrot.slane %v18871_v10, %v18612_v9 }
 0xb01   : > { %11491 = vmatpush1.bf16.msra.mxu1 %v13791_v20  ;;  %v10643_v20 = vrot.slane %v18871_v10, %v18626_v21 }
 0xb02   : > { %11573 = vmatpush1.bf16.msra.mxu0 %v13794_v32 }
 0xb03   : > { %11574 = vmatprep.subr.bf16.mxu0 %v13802_v0  ;;  %v10657_v0 = vrot.slane %v18876_v27, %v18612_v9 }
 0xb06   : > { %11575 = vmatpush1.bf16.msra.mxu0 %v13800_v30 }
 0xb07   : > { %11576 = vmatprep.subr.bf16.mxu0 %v13808_v45  ;;  %v10669_v45 = vrot.slane %v18876_v27, %v18626_v21 }
 0xb0a   : > { %11577 = vmatpush1.bf16.msra.mxu0 %v13806_v48 }
 0xb0b   : > { %v10553_v31 = vpop.f32.mrb[48].mxu0  ;;  %11578 = vmatprep.subr.bf16.mxu0 %v13814_v44  ;;  %v13860_v44 = vld [vmem:[%s19260_s17 + $0x248] ss:$16 sps:$4 sm:$0xff]  }
 0xb0c   : > { %v10562_v61 = vadd.f32 %v10553_v31, %v10374_v40  ;;  %v10555_v28 = vpop.f32.mrb[49].mxu0  ;;  %v13799_v40 = vld [vmem:[%s19260_s17 + $0x104] ss:$16 sps:$4 sm:$0xff]  }
 0xb0d   : > { %v10563_v39 = vadd.f32 %v10555_v28, %v10375_v7  ;;  %v10557_v34 = vpop.f32.mrb[50].mxu0  ;;  %v13797_v7 = vld [vmem:[%s19260_s17 + $0x100] ss:$16 sps:$4 sm:$0xff]   ;;  %11492 = vmatprep.subr.bf16.mxu1 %v13799_v40  ;;  %v10661_v40 = vrot.slane %v18876_v27, %v18615_v23 }
 0xb0e   : > { %v18638_v43 = vadd.f32 %v10577_v11, %v10562_v61  ;;  %v10558_v13 = vpop.f32.mrb[51].mxu0  ;;  %11493 = vmatpush1.bf16.msra.mxu1 %v13797_v7 }
 0xb0f   : > { %v18640_v37 = vadd.f32 %v10581_v22, %v10563_v39  ;;  %11494 = vmatprep.subr.bf16.mxu1 %v13805_v57 }
 0xb10   : > { %v10594_v12 = vsel %vm10590_vm14, %v18638_v43, 0.0 }
 0xb11   : > { %v10595_v49 = vadd.f32 %v10594_v12, %v10593_v1  ;;  %v10596_v14 = vsel %vm10590_vm14, %v18640_v37, 0.0 }
 0xb12   : > { %11495 = vmatpush1.bf16.msra.mxu1 %v13803_v24 }
 0xb13   : > { %v10597_v46 = vadd.f32 %v10596_v14, %v10595_v49  ;;  %v13809_v49 = vld [vmem:[%s19260_s17 + $0x140] ss:$16 sps:$4 sm:$0xff]   ;;  %v13811_v14 = vld [vmem:[%s19260_s17 + $0x144] ss:$16 sps:$4 sm:$0xff]  }
 0xb14   : > { %11496 = vmatprep.subr.bf16.mxu1 %v13811_v14  ;;  %v13862_v14 = vld [vmem:[%s19260_s17 + $0x24c] ss:$16 sps:$4 sm:$0xff]  }
 0xb15   : > { %10598 = vadd.xlane.f32.xlu0 %v10597_v46  ;;  %v13812_v46 = vld [vmem:[%s19260_s17 + $0x148] ss:$16 sps:$4 sm:$0xff]  }
 0xb16   : > { %11497 = vmatpush1.bf16.msra.mxu1 %v13809_v49  ;;  %11579 = vmatpush1.bf16.msra.mxu0 %v13812_v46  ;;  %v13859_v49 = vld [vmem:[%s19260_s17 + $0x244] ss:$16 sps:$4 sm:$0xff]   ;;  %v13857_v46 = vld [vmem:[%s19260_s17 + $0x240] ss:$16 sps:$4 sm:$0xff]  }
 0xb17   : > { %11498 = vmatprep.subr.bf16.mxu1 %v13817_v26  ;;  %11580 = vmatprep.subr.bf16.mxu0 %v13820_v60  ;;  %v13865_v26 = vld [vmem:[%s19260_s17 + $0x264] ss:$16 sps:$4 sm:$0xff]   ;;  %v13868_v60 = vld [vmem:[%s19260_s17 + $0x26c] ss:$16 sps:$4 sm:$0xff]  }
 0xb1a   : > { %11499 = vmatpush1.bf16.msra.mxu1 %v13815_v41  ;;  %11581 = vmatpush1.bf16.msra.mxu0 %v13818_v19  ;;  %v13863_v41 = vld [vmem:[%s19260_s17 + $0x260] ss:$16 sps:$4 sm:$0xff]   ;;  %v13866_v19 = vld [vmem:[%s19260_s17 + $0x268] ss:$16 sps:$4 sm:$0xff]  }
 0xb1b   : > { %11500 = vmatprep.subr.bf16.mxu1 %v13823_v36  ;;  %11582 = vmatprep.subr.bf16.mxu0 %v13826_v51  ;;  %v13871_v36 = vld [vmem:[%s19260_s17 + $0x284] ss:$16 sps:$4 sm:$0xff]   ;;  %v13874_v51 = vld [vmem:[%s19260_s17 + $0x28c] ss:$16 sps:$4 sm:$0xff]  }
 0xb1e   : > { %11501 = vmatpush1.bf16.msra.mxu1 %v13821_v3  ;;  %11583 = vmatpush1.bf16.msra.mxu0 %v13824_v29  ;;  %v13869_v3 = vld [vmem:[%s19260_s17 + $0x280] ss:$16 sps:$4 sm:$0xff]   ;;  %v13872_v29 = vld [vmem:[%s19260_s17 + $0x288] ss:$16 sps:$4 sm:$0xff]  }
 0xb1f   : > { %11502 = vmatprep.subr.bf16.mxu1 %v13829_v56  ;;  %11584 = vmatprep.subr.bf16.mxu0 %v13832_v8  ;;  %v13877_v56 = vld [vmem:[%s19260_s17 + $0x2a4] ss:$16 sps:$4 sm:$0xff]   ;;  %v13880_v8 = vld [vmem:[%s19260_s17 + $0x2ac] ss:$16 sps:$4 sm:$0xff]  }
 0xb22   : > { %11503 = vmatpush1.bf16.msra.mxu1 %v13827_v16  ;;  %11585 = vmatpush1.bf16.msra.mxu0 %v13830_v42  ;;  %v13875_v16 = vld [vmem:[%s19260_s17 + $0x2a0] ss:$16 sps:$4 sm:$0xff]   ;;  %v13878_v42 = vld [vmem:[%s19260_s17 + $0x2a8] ss:$16 sps:$4 sm:$0xff]  }
 0xb23   : > { %11504 = vmatprep.subr.bf16.mxu1 %v13835_v59  ;;  %11586 = vmatprep.subr.bf16.mxu0 %v13838_v47  ;;  %v13883_v59 = vld [vmem:[%s19260_s17 + $0x2c4] ss:$16 sps:$4 sm:$0xff]   ;;  %v13886_v47 = vld [vmem:[%s19260_s17 + $0x2cc] ss:$16 sps:$4 sm:$0xff]  }
 0xb26   : > { %11505 = vmatpush1.bf16.msra.mxu1 %v13833_v58  ;;  %11587 = vmatpush1.bf16.msra.mxu0 %v13836_v6  ;;  %v13881_v58 = vld [vmem:[%s19260_s17 + $0x2c0] ss:$16 sps:$4 sm:$0xff]   ;;  %v13884_v6 = vld [vmem:[%s19260_s17 + $0x2c8] ss:$16 sps:$4 sm:$0xff]  }
 0xb27   : > { %11506 = vmatprep.subr.bf16.mxu1 %v13841_v54  ;;  %11588 = vmatprep.subr.bf16.mxu0 %v13844_v33  ;;  %v13889_v54 = vld [vmem:[%s19260_s17 + $0x2e4] ss:$16 sps:$4 sm:$0xff]   ;;  %v13892_v33 = vld [vmem:[%s19260_s17 + $0x2ec] ss:$16 sps:$4 sm:$0xff]  }
 0xb2a   : > { %11507 = vmatpush1.bf16.msra.mxu1 %v13839_v35  ;;  %11589 = vmatpush1.bf16.msra.mxu0 %v13842_v2  ;;  %v13887_v35 = vld [vmem:[%s19260_s17 + $0x2e0] ss:$16 sps:$4 sm:$0xff]   ;;  %v13890_v2 = vld [vmem:[%s19260_s17 + $0x2e8] ss:$16 sps:$4 sm:$0xff]  }
 0xb2b   : > { %11517 = vmatprep.subr.bf16.mxu1 %v13847_v15  ;;  %11599 = vmatprep.subr.bf16.mxu0 %v13850_v50  ;;  %v13895_v15 = vld [vmem:[%s19260_s17 + $0x304] ss:$16 sps:$4 sm:$0xff]   ;;  %v13898_v50 = vld [vmem:[%s19260_s17 + $0x30c] ss:$16 sps:$4 sm:$0xff]  }
 0xba2   : > { %v10599_v17 = vpop.xlane.xlu0 %10598 }
 0xba3   : > { %v10601_v11 = vmul.f32 0.001953125, %v10599_v17 }
 0xba5   : > { %v18767_v31 = vsub.f32 %v18628_v5, %v10601_v11  ;;  %v18770_v22 = vsub.f32 %v18630_v52, %v10601_v11  ;;  %v18773_v61 = vsub.f32 %v18638_v43, %v10601_v11  ;;  %v18776_v28 = vsub.f32 %v18640_v37, %v10601_v11 }
 0xba7   : > { %v10606_v38 = vmul.f32 %v18767_v31, %v18767_v31  ;;  %v10607_v62 = vmul.f32 %v18770_v22, %v18770_v22  ;;  %v10608_v39 = vmul.f32 %v18773_v61, %v18773_v61  ;;  %v10609_v5 = vmul.f32 %v18776_v28, %v18776_v28 }
 0xba9   : > { %v10610_v52 = vsel %vm10590_vm14, %v10606_v38, 0.0  ;;  %v10611_v34 = vsel %vm10590_vm14, %v10607_v62, 0.0  ;;  %v10613_v13 = vsel %vm10590_vm14, %v10608_v39, 0.0  ;;  %v10615_v1 = vsel %vm10590_vm14, %v10609_v5, 0.0 }
 0xbaa   : > { %v10612_v43 = vadd.f32 %v10611_v34, %v10610_v52 }
 0xbac   : > { %v10614_v37 = vadd.f32 %v10613_v13, %v10612_v43  ;;  %v13853_v43 = vld [vmem:[%s19260_s17 + $0x224] ss:$16 sps:$4 sm:$0xff]   ;;  %v13856_v13 = vld [vmem:[%s19260_s17 + $0x22c] ss:$16 sps:$4 sm:$0xff]  }
 0xbae   : > { %v10616_v12 = vadd.f32 %v10615_v1, %v10614_v37  ;;  %v13851_v1 = vld [vmem:[%s19260_s17 + $0x220] ss:$16 sps:$4 sm:$0xff]  }
 0xbb0   : > { %10617 = vadd.xlane.f32.xlu1 %v10616_v12  ;;  %v13854_v12 = vld [vmem:[%s19260_s17 + $0x228] ss:$16 sps:$4 sm:$0xff]  }
 0xc3d   : > { %v10618_v4 = vpop.xlane.xlu1 %10617 }
 0xc3e   : > { %v10619_v53 = vmul.f32 0.001953125, %v10618_v4  ;;  %v13893_v4 = vld [vmem:[%s19260_s17 + $0x300] ss:$16 sps:$4 sm:$0xff]  }
 0xc40   : > { %v10620_v25 = vadd.f32 1e-05, %v10619_v53  ;;  %v13896_v53 = vld [vmem:[%s19260_s17 + $0x308] ss:$16 sps:$4 sm:$0xff]  }
 0xc42   : > { %13979 = vrsqrt.f32 %v10620_v25  ;;  %v13901_v25 = vld [vmem:[%s19260_s17 + $0x324] ss:$16 sps:$4 sm:$0xff]  }
 0xc4c   : > { %v18884_v32 = vpop.eup %13979 }
 0xc4d   : > { %v10623_v7 = vmul.f32 %v18884_v32, %v18770_v22  ;;  %v10622_v30 = vmul.f32 %v18884_v32, %v18767_v31  ;;  %v10625_v57 = vmul.f32 %v18884_v32, %v18776_v28  ;;  %v13845_v31 = vld [vmem:[%s19260_s17 + $0x200] ss:$16 sps:$4 sm:$0xff]   ;;  %v13848_v22 = vld [vmem:[%s19260_s17 + $0x208] ss:$16 sps:$4 sm:$0xff]  }
 0xc4f   : > { %v10649_v24 = vmul.f32 %v10635_v63, %v10623_v7  ;;  %v10648_v48 = vmul.f32 %v10631_v18, %v10622_v30  ;;  %v10651_v17 = vmul.f32 %v10643_v20, %v10625_v57  ;;  %v13904_v63 = vld [vmem:[%s19260_s17 + $0x32c] ss:$16 sps:$4 sm:$0xff]   ;;  %v13899_v18 = vld [vmem:[%s19260_s17 + $0x320] ss:$16 sps:$4 sm:$0xff]   ;;  %v13902_v20 = vld [vmem:[%s19260_s17 + $0x328] ss:$16 sps:$4 sm:$0xff]  }
 0xc50   : > { %v13905_v7 = vld [vmem:[%s19260_s17 + $0x340] ss:$16 sps:$4 sm:$0xff]   ;;  %v13908_v30 = vld [vmem:[%s19260_s17 + $0x348] ss:$16 sps:$4 sm:$0xff]   ;;  %v13913_v57 = vld [vmem:[%s19260_s17 + $0x364] ss:$16 sps:$4 sm:$0xff]  }
 0xc51   : > { %v10675_v11 = vadd.f32 %v10661_v40, %v10649_v24  ;;  %v10674_v38 = vadd.f32 %v10657_v0, %v10648_v48  ;;  %v10677_v62 = vadd.f32 %v10669_v45, %v10651_v17  ;;  %v13907_v40 = vld [vmem:[%s19260_s17 + $0x344] ss:$16 sps:$4 sm:$0xff]   ;;  %v13910_v0 = vld [vmem:[%s19260_s17 + $0x34c] ss:$16 sps:$4 sm:$0xff]   ;;  %v13911_v24 = vld [vmem:[%s19260_s17 + $0x360] ss:$16 sps:$4 sm:$0xff]  }
 0xc52   : > { %v13916_v45 = vld [vmem:[%s19260_s17 + $0x36c] ss:$16 sps:$4 sm:$0xff]   ;;  %v13914_v48 = vld [vmem:[%s19260_s17 + $0x368] ss:$16 sps:$4 sm:$0xff]   ;;  %v13919_v17 = vld [vmem:[%s19260_s17 + $0x384] ss:$16 sps:$4 sm:$0xff]  }
 0xc53   : > { %v10679_v39 = vmax.f32 %v10675_v11, 0.0  ;;  %v10678_v5 = vmax.f32 %v10674_v38, 0.0  ;;  %v10681_v52 = vmax.f32 %v10677_v62, 0.0  ;;  %v13922_v11 = vld [vmem:[%s19260_s17 + $0x38c] ss:$16 sps:$4 sm:$0xff]  }
 0xc54   : > { %v13917_v38 = vld [vmem:[%s19260_s17 + $0x380] ss:$16 sps:$4 sm:$0xff]   ;;  %v13920_v62 = vld [vmem:[%s19260_s17 + $0x388] ss:$16 sps:$4 sm:$0xff]  }
 0xc55   : > { %v10683_v34 = vpack.c.bf16 %v10679_v39, %v10679_v39  ;;  %v10682_v28 = vpack.c.bf16 %v10678_v5, %v10678_v5  ;;  %v10685_v37 = vpack.c.bf16 %v10681_v52, %v10681_v52  ;;  %v13925_v39 = vld [vmem:[%s19260_s17 + $0x3a4] ss:$16 sps:$4 sm:$0xff]   ;;  %v13928_v5 = vld [vmem:[%s19260_s17 + $0x3ac] ss:$16 sps:$4 sm:$0xff]   ;;  %v10624_v52 = vmul.f32 %v18884_v32, %v18773_v61 }
 0xc56   : > { %v13934_v61 = vld [vmem:[%s19260_s17 + $0x3cc] ss:$16 sps:$4 sm:$0xff]   ;;  %v10665_v32 = vrot.slane %v18876_v27, %v18623_v55 }
 0xc57   : > { %11508 = vmatprep.mubr.bf16.mxu1 %v10683_v34  ;;  %11590 = vmatprep.mubr.bf16.mxu0 %v10683_v34  ;;  %v10639_v34 = vrot.slane %v18871_v10, %v18623_v55  ;;  %v13940_v27 = vld [vmem:[%s19260_s17 + $0x3ec] ss:$16 sps:$4 sm:$0xff]  }
 0xc58   : > { %11509 = vmatmul.mubr.bf16.vlgmr.msra.gmra.mrb[16].mxu1 %v10682_v28  ;;  %11591 = vmatmul.mubr.bf16.vlgmr.msra.gmra.mrb[52].mxu0 %v10682_v28  ;;  %v13931_v28 = vld [vmem:[%s19260_s17 + $0x3c4] ss:$16 sps:$4 sm:$0xff]  }
 0xc59   : > { %11518 = vmatpush1.bf16.msra.mxu1 %v13845_v31  ;;  %11600 = vmatpush1.bf16.msra.mxu0 %v13848_v22  ;;  %v13923_v31 = vld [vmem:[%s19260_s17 + $0x3a0] ss:$16 sps:$4 sm:$0xff]   ;;  %v13926_v22 = vld [vmem:[%s19260_s17 + $0x3a8] ss:$16 sps:$4 sm:$0xff]   ;;  %v10650_v10 = vmul.f32 %v10639_v34, %v10624_v52 }
 0xc5a   : > { %11549 = vmatprep.mubr.bf16.mxu1 %v10685_v37  ;;  %11631 = vmatprep.mubr.bf16.mxu0 %v10685_v37  ;;  %v13937_v37 = vld [vmem:[%s19260_s17 + $0x3e4] ss:$16 sps:$4 sm:$0xff]  }
 0xc5b   : > { %11519 = vmatprep.subr.bf16.mxu1 %v13853_v43  ;;  %11601 = vmatprep.subr.bf16.mxu0 %v13856_v13  ;;  %v13929_v43 = vld [vmem:[%s19260_s17 + $0x3c0] ss:$16 sps:$4 sm:$0xff]   ;;  %v13932_v13 = vld [vmem:[%s19260_s17 + $0x3c8] ss:$16 sps:$4 sm:$0xff]  }
 0xc5d   : > { %11520 = vmatpush1.bf16.msra.mxu1 %v13851_v1  ;;  %11602 = vmatpush1.bf16.msra.mxu0 %v13854_v12  ;;  %v10676_v1 = vadd.f32 %v10665_v32, %v10650_v10  ;;  %v13935_v12 = vld [vmem:[%s19260_s17 + $0x3e0] ss:$16 sps:$4 sm:$0xff]  }
 0xc5e   : > { %11521 = vmatprep.subr.bf16.mxu1 %v13859_v49  ;;  %11603 = vmatprep.subr.bf16.mxu0 %v13862_v14  ;;  %v13938_v49 = vld [vmem:[%s19260_s17 + $0x3e8] ss:$16 sps:$4 sm:$0xff]  }
 0xc5f   : > { %v10680_v14 = vmax.f32 %v10676_v1, 0.0  ;;  %v11712_v1 = vld [vmem:[%s19263_s20] sm:$0x1] }
 0xc61   : > { %11522 = vmatpush1.bf16.msra.mxu1 %v13857_v46  ;;  %11604 = vmatpush1.bf16.msra.mxu0 %v13860_v44  ;;  %v13941_v46 = vld [vmem:[%s19262_s19 + $0x40] sm:$0xff]  }
 0xc62   : > { %11523 = vmatprep.subr.bf16.mxu1 %v13865_v26  ;;  %11605 = vmatprep.subr.bf16.mxu0 %v13868_v60  ;;  %v13942_v44 = vld [vmem:[%s19262_s19 + $0xc0] sm:$0xff]  }
 0xc63   : > { %v13943_v26 = vld [vmem:[%s19262_s19] sm:$0xff]  }
 0xc64   : > { %v13944_v60 = vld [vmem:[%s19262_s19 + $0x80] sm:$0xff]  }
 0xc65   : > { %11524 = vmatpush1.bf16.msra.mxu1 %v13863_v41  ;;  %11606 = vmatpush1.bf16.msra.mxu0 %v13866_v19  ;;  %v10684_v41 = vpack.c.bf16 %v10680_v14, %v10680_v14  ;;  %v13945_v19 = vld [vmem:[%s19262_s19 + $0x48] sm:$0xff]  }
 0xc66   : > { %11525 = vmatprep.subr.bf16.mxu1 %v13871_v36  ;;  %11607 = vmatprep.subr.bf16.mxu0 %v13874_v51  ;;  %v13946_v36 = vld [vmem:[%s19262_s19 + $0xc8] sm:$0xff]  }
 0xc67   : > { %v13947_v51 = vld [vmem:[%s19262_s19 + $0x8] sm:$0xff]  }
 0xc69   : > { %11526 = vmatpush1.bf16.msra.mxu1 %v13869_v3  ;;  %11608 = vmatpush1.bf16.msra.mxu0 %v13872_v29  ;;  %v13948_v3 = vld [vmem:[%s19262_s19 + $0x88] sm:$0xff]   ;;  %v13949_v29 = vld [vmem:[%s19262_s19 + $0x50] sm:$0xff]  }
 0xc6a   : > { %11527 = vmatprep.subr.bf16.mxu1 %v13877_v56  ;;  %11609 = vmatprep.subr.bf16.mxu0 %v13880_v8  ;;  %v13950_v56 = vld [vmem:[%s19262_s19 + $0xd0] sm:$0xff]  }
 0xc6b   : > { %v13951_v8 = vld [vmem:[%s19262_s19 + $0x10] sm:$0xff]  }
 0xc6d   : > { %11528 = vmatpush1.bf16.msra.mxu1 %v13875_v16  ;;  %11610 = vmatpush1.bf16.msra.mxu0 %v13878_v42  ;;  %v13952_v16 = vld [vmem:[%s19262_s19 + $0x90] sm:$0xff]   ;;  %v13953_v42 = vld [vmem:[%s19262_s19 + $0x58] sm:$0xff]  }
 0xc6e   : > { %11529 = vmatprep.subr.bf16.mxu1 %v13883_v59  ;;  %11611 = vmatprep.subr.bf16.mxu0 %v13886_v47  ;;  %v13954_v59 = vld [vmem:[%s19262_s19 + $0xd8] sm:$0xff]  }
 0xc6f   : > { %v13955_v47 = vld [vmem:[%s19262_s19 + $0x18] sm:$0xff]  }
 0xc71   : > { %11530 = vmatpush1.bf16.msra.mxu1 %v13881_v58  ;;  %11612 = vmatpush1.bf16.msra.mxu0 %v13884_v6  ;;  %v13956_v58 = vld [vmem:[%s19262_s19 + $0x98] sm:$0xff]   ;;  %v13957_v6 = vld [vmem:[%s19262_s19 + $0x60] sm:$0xff]  }
 0xc72   : > { %11531 = vmatprep.subr.bf16.mxu1 %v13889_v54  ;;  %11613 = vmatprep.subr.bf16.mxu0 %v13892_v33  ;;  %v13958_v54 = vld [vmem:[%s19262_s19 + $0xe0] sm:$0xff]  }
 0xc73   : > { %v13959_v33 = vld [vmem:[%s19262_s19 + $0x20] sm:$0xff]  }
 0xc75   : > { %11532 = vmatpush1.bf16.msra.mxu1 %v13887_v35  ;;  %11614 = vmatpush1.bf16.msra.mxu0 %v13890_v2  ;;  %v13960_v35 = vld [vmem:[%s19262_s19 + $0xa0] sm:$0xff]   ;;  %v13961_v2 = vld [vmem:[%s19262_s19 + $0x68] sm:$0xff]  }
 0xc76   : > { %11533 = vmatprep.subr.bf16.mxu1 %v13895_v15  ;;  %11615 = vmatprep.subr.bf16.mxu0 %v13898_v50  ;;  %v13962_v15 = vld [vmem:[%s19262_s19 + $0xe8] sm:$0xff]  }
 0xc77   : > { %v13963_v50 = vld [vmem:[%s19262_s19 + $0x28] sm:$0xff]  }
 0xc79   : > { %11534 = vmatpush1.bf16.msra.mxu1 %v13893_v4  ;;  %11616 = vmatpush1.bf16.msra.mxu0 %v13896_v53  ;;  %v13964_v4 = vld [vmem:[%s19262_s19 + $0xa8] sm:$0xff]   ;;  %v13965_v53 = vld [vmem:[%s19262_s19 + $0x70] sm:$0xff]  }
 0xc7a   : > { %11535 = vmatprep.subr.bf16.mxu1 %v13901_v25  ;;  %11617 = vmatprep.subr.bf16.mxu0 %v13904_v63  ;;  %v13966_v25 = vld [vmem:[%s19262_s19 + $0xf0] sm:$0xff]  }
 0xc7b   : > { %v13967_v63 = vld [vmem:[%s19262_s19 + $0x30] sm:$0xff]  }
 0xc7d   : > { %11536 = vmatpush1.bf16.msra.mxu1 %v13899_v18  ;;  %11618 = vmatpush1.bf16.msra.mxu0 %v13902_v20  ;;  %v13968_v18 = vld [vmem:[%s19262_s19 + $0xb0] sm:$0xff]   ;;  %v13969_v20 = vld [vmem:[%s19262_s19 + $0x78] sm:$0xff]  }
 0xc7e   : > { %11537 = vmatprep.subr.bf16.mxu1 %v13907_v40  ;;  %11619 = vmatprep.subr.bf16.mxu0 %v13910_v0  ;;  %v13970_v40 = vld [vmem:[%s19262_s19 + $0xf8] sm:$0xff]  }
 0xc7f   : > { %v13971_v0 = vld [vmem:[%s19262_s19 + $0x38] sm:$0xff]  }
 0xc81   : > { %11538 = vmatpush1.bf16.msra.mxu1 %v13905_v7  ;;  %11620 = vmatpush1.bf16.msra.mxu0 %v13908_v30  ;;  %v13972_v7 = vld [vmem:[%s19262_s19 + $0xb8] sm:$0xff]   ;;  %v10814_v30 = vld [vmem:[%s19261_s18] sm:$0xf] }
 0xc82   : > { %11539 = vmatprep.subr.bf16.mxu1 %v13913_v57  ;;  %11621 = vmatprep.subr.bf16.mxu0 %v13916_v45  ;;  %v11459_v57 = vrot.slane %v10814_v30, %v18612_v9  ;;  %v11467_v45 = vrot.slane %v10814_v30, %v18623_v55 }
 0xc85   : > { %11540 = vmatpush1.bf16.msra.mxu1 %v13911_v24  ;;  %11622 = vmatpush1.bf16.msra.mxu0 %v13914_v48  ;;  %v11463_v24 = vrot.slane %v10814_v30, %v18615_v23  ;;  %v11471_v48 = vrot.slane %v10814_v30, %v18626_v21 }
 0xc86   : > { %11541 = vmatprep.subr.bf16.mxu1 %v13919_v17  ;;  %11623 = vmatprep.subr.bf16.mxu0 %v13922_v11 }
 0xc89   : > { %11542 = vmatpush1.bf16.msra.mxu1 %v13917_v38  ;;  %11624 = vmatpush1.bf16.msra.mxu0 %v13920_v62 }
 0xc8a   : > { %11543 = vmatprep.subr.bf16.mxu1 %v13925_v39  ;;  %11625 = vmatprep.subr.bf16.mxu0 %v13928_v5 }
 0xc8d   : > { %11544 = vmatpush1.bf16.msra.mxu1 %v13923_v31  ;;  %11626 = vmatpush1.bf16.msra.mxu0 %v13926_v22 }
 0xc8e   : > { %11545 = vmatprep.subr.bf16.mxu1 %v13931_v28  ;;  %11627 = vmatprep.subr.bf16.mxu0 %v13934_v61 }
 0xc91   : > { %11546 = vmatpush1.bf16.msra.mxu1 %v13929_v43  ;;  %11628 = vmatpush1.bf16.msra.mxu0 %v13932_v13 }
 0xc92   : > { %11547 = vmatprep.subr.bf16.mxu1 %v13937_v37  ;;  %11629 = vmatprep.subr.bf16.mxu0 %v13940_v27 }
 0xc95   : > { %11548 = vmatpush1.bf16.msra.mxu1 %v13935_v12  ;;  %11630 = vmatpush1.bf16.msra.mxu0 %v13938_v49 }
 0xc96   : > { %12892 = vmatprep.subr.bf16.mxu1 %v13941_v46  ;;  %12914 = vmatprep.subr.bf16.mxu0 %v13942_v44 }
 0xc98   : > { %11550 = vmatmul.mubr.bf16.vlgmr.msra.gmra.mrb[16].mxu1 %v10684_v41  ;;  %11632 = vmatmul.mubr.bf16.vlgmr.msra.gmra.mrb[52].mxu0 %v10684_v41 }
 0xc99   : > { %12893 = vmatpush3.bf16.msra.mxu1 %v13943_v26  ;;  %12915 = vmatpush3.bf16.msra.mxu0 %v13944_v60 }
 0xc9a   : > { %12894 = vmatprep.subr.bf16.mxu1 %v13945_v19  ;;  %12916 = vmatprep.subr.bf16.mxu0 %v13946_v36 }
 0xc9d   : > { %12895 = vmatpush3.bf16.msra.mxu1 %v13947_v51  ;;  %12917 = vmatpush3.bf16.msra.mxu0 %v13948_v3 }
 0xc9e   : > { %12896 = vmatprep.subr.bf16.mxu1 %v13949_v29  ;;  %12918 = vmatprep.subr.bf16.mxu0 %v13950_v56 }
 0xca1   : > { %12897 = vmatpush3.bf16.msra.mxu1 %v13951_v8  ;;  %12919 = vmatpush3.bf16.msra.mxu0 %v13952_v16 }
 0xca2   : > { %12898 = vmatprep.subr.bf16.mxu1 %v13953_v42  ;;  %12920 = vmatprep.subr.bf16.mxu0 %v13954_v59 }
 0xca5   : > { %12899 = vmatpush3.bf16.msra.mxu1 %v13955_v47  ;;  %12921 = vmatpush3.bf16.msra.mxu0 %v13956_v58 }
 0xca6   : > { %12900 = vmatprep.subr.bf16.mxu1 %v13957_v6  ;;  %12922 = vmatprep.subr.bf16.mxu0 %v13958_v54 }
 0xca9   : > { %12901 = vmatpush3.bf16.msra.mxu1 %v13959_v33  ;;  %12923 = vmatpush3.bf16.msra.mxu0 %v13960_v35 }
 0xcaa   : > { %12902 = vmatprep.subr.bf16.mxu1 %v13961_v2  ;;  %12924 = vmatprep.subr.bf16.mxu0 %v13962_v15 }
 0xcad   : > { %12903 = vmatpush3.bf16.msra.mxu1 %v13963_v50  ;;  %12925 = vmatpush3.bf16.msra.mxu0 %v13964_v4 }
 0xcae   : > { %12904 = vmatprep.subr.bf16.mxu1 %v13965_v53  ;;  %12926 = vmatprep.subr.bf16.mxu0 %v13966_v25 }
 0xcb1   : > { %12905 = vmatpush3.bf16.msra.mxu1 %v13967_v63  ;;  %12927 = vmatpush3.bf16.msra.mxu0 %v13968_v18 }
 0xcb2   : > { %12906 = vmatprep.subr.bf16.mxu1 %v13969_v20  ;;  %12928 = vmatprep.subr.bf16.mxu0 %v13970_v40 }
 0xcb5   : > { %12907 = vmatpush3.bf16.msra.mxu1 %v13971_v0  ;;  %12929 = vmatpush3.bf16.msra.mxu0 %v13972_v7 }
 0xd6b   : > { %v11551_v17 = vpop.f32.mrb[16].mxu1  ;;  %v11633_v11 = vpop.f32.mrb[52].mxu0 }
 0xd6c   : > { %v13316_v38 = vadd.f32 %v11551_v17, %v11459_v57  ;;  %v13318_v62 = vadd.f32 %v11633_v11, %v11467_v45  ;;  %v11553_v39 = vpop.f32.mrb[17].mxu1  ;;  %v11635_v5 = vpop.f32.mrb[53].mxu0 }
 0xd6d   : > { %v13317_v52 = vadd.f32 %v11553_v39, %v11463_v24  ;;  %v13319_v34 = vadd.f32 %v11635_v5, %v11471_v48  ;;  %v11555_v31 = vpop.f32.mrb[18].mxu1  ;;  %v11637_v22 = vpop.f32.mrb[54].mxu0 }
 0xd6e   : > { %v11640_v28 = vmax.f32 %v13316_v38, 0.0  ;;  %v11642_v61 = vmax.f32 %v13318_v62, 0.0  ;;  %v11556_v9 = vpop.f32.mrb[19].mxu1  ;;  %v11638_v10 = vpop.f32.mrb[55].mxu0 }
 0xd6f   : > { %v11641_v55 = vmax.f32 %v13317_v52, 0.0  ;;  %v11643_v32 = vmax.f32 %v13319_v34, 0.0 }
 0xd70   : > { %v11644_v21 = vpack.c.bf16 %v11640_v28, %v11640_v28  ;;  %v11646_v13 = vpack.c.bf16 %v11642_v61, %v11642_v61 }
 0xd71   : > { %v11645_v23 = vpack.c.bf16 %v11641_v55, %v11641_v55  ;;  %v11647_v43 = vpack.c.bf16 %v11643_v32, %v11643_v32 }
 0xd73   : > { %11937 = vmatprep.mubr.bf16.mxu1 %v11645_v23  ;;  %11977 = vmatprep.mubr.bf16.mxu0 %v11647_v43 }
 0xd74   : > { %11938 = vmatmul.mubr.bf16.vlgmr.msra.gmra.mrb[20].mxu1 %v11644_v21  ;;  %11978 = vmatmul.mubr.bf16.vlgmr.msra.gmra.mrb[56].mxu0 %v11646_v13 }
 0xe47   : > { %v12908_v37 = vpop.f32.mrb[20].mxu1  ;;  %v12930_v27 = vpop.f32.mrb[56].mxu0 }
 0xe48   : > { %v12909_v12 = vpop.f32.mrb[21].mxu1  ;;  %v12931_v49 = vpop.f32.mrb[57].mxu0 }
 0xe49   : > { %v12910_v14 = vadd.f32 %v12909_v12, %v12908_v37  ;;  %v12932_v46 = vadd.f32 %v12931_v49, %v12930_v27  ;;  %v12911_v44 = vpop.f32.mrb[22].mxu1  ;;  %v12933_v26 = vpop.f32.mrb[58].mxu0 }
 0xe4a   : > { %v12912_v60 = vpop.f32.mrb[23].mxu1  ;;  %v12934_v41 = vpop.f32.mrb[59].mxu0 }
 0xe4b   : > { %v11940_v19 = vadd.f32 %v12910_v14, %v11712_v1 }
 0xe4d   : > { %v11980_v36 = vadd.f32 %v12932_v46, %v11940_v19 }
 0xe4f   : > { %11986 = vst.msk [vmem:[%s648_s7] sm:$0x1] %vm11985_vm15, %v11980_v36 }
 0xe50   : > { %13994 = shalt.err (!%p13991_p3)
}
 0xe51   : > { %s13995_s8 = scalar_lea.hbm %s19201_s1, 16  ;;  %s13999_s7 = scalar_lea.hbm %s19264_s21, 32 }
 0xe52   : > { %p13996_p4 = scmp.ne.s32.totalorder %s19201_s1, %s13995_s8  ;;  %p14000_p9 = scmp.lt.u32.totalorder %s19201_s1, %s19264_s21 }
 0xe53   : > { %p14001_p10 = scmp.lt.u32.totalorder %s13999_s7, %s13995_s8  ;;  %p14003_p12 = scmp.lt.u32.totalorder %s13995_s8, %s19201_s1 }
 0xe54   : > { %p13997_p7 = pnand %p13996_p4, %p14199_p5 }
 0xe55   : > { %p14002_p11 = por %p14001_p10, %p14000_p9 }
 0xe56   : > { %p13998_p8 = pneg %p13997_p7 }
 0xe57   : > { %p14004_p13 = por %p14003_p12, %p14002_p11 }
 0xe59   : > { %p14005_p0 = pnand %p14004_p13, %p13998_p8 }
 0xe5b   : > { %14008 = shalt.err (!%p14005_p0)
}
 0xe5c   : > { %13505 = dma.vmem_to_hbm [thread:$0]  (%p14199_p5), %s19203_s4, 16, %s19201_s1, %s11988_s23  }
 0xe5d PF: > { %s19856_s2 = sld [smem:[#allocation5_spill]]  ;;  %p13511_p1 = scmp.ge.s32.totalorder %s14043_s27, 2 }
 0xe5f   : > { %p13508_p2 = pnand %p13511_p1, %p14203_p6 }
 0xe63   : > { %s12012_s28 = sand.u32 1, %s19856_s2  }
 0xe64   : > { %s12013_s0 = scalar_lea.sflag [#allocation3], %s12012_s28 }
 0xe65   : > { %14026 = dma.done.wait (!%p13508_p2), %s12013_s0, 16  }
 0xe66   : > { %14028 = vsyncadd (!%p13508_p2), %s12013_s0, 4294967280  ;;  %s19858_s27 = sld [smem:[#allocation7_spill]]  ;;  %s19859_s8 = sld [smem:[#allocation6_spill]] }
 0xe67   : > { %s19860_s26 = sld [smem:[#allocation8_spill]]  ;;  %s19861_s2 = smov %s14035_s25 }
 0xe6c   : > { %p31_p3 = scmp.ge.s32.totalorder %s19858_s27, 4   ;;  %s19862_s25 = smov %s19859_s8 }
 0xe6e   :  { %33 = sbr.rel (!%p31_p3) target bundleno = 13 (0xd), region = 168 }
 0xe75   :  { %12017 = vsyncpa [#allocation3], 1 }
 0xe76   :  { %12019 = vsyncpa [#allocation3 + $0x1], 1 }

</bundles_post_ra>
